<compile_context>
chip_gen: v7x
topology: tpu7x:2x2x1
jax: 0.10.0
libtpu: 0.0.40
codegen_flags: <defaults>
</compile_context>

<pallas_src>
import functools
import numpy as np
import jax
import jax.numpy as jnp
from jax.experimental import pallas as pl
from jax.experimental.pallas import tpu as pltpu

# ---------------- model config (small, consistent with the forward) ----------
D_MODEL = 32
N_HEADS = 4
D_HEAD = D_MODEL // N_HEADS
FFN = 64
VOCAB = 128            # multiple of 128 -> lane-dense logits stores
N_ENC = 2
N_DEC = 2
MAX_POS = 32
DEC_START = 2          # BART decoder_start_token_id (eos)
SCALE = 1.0 / float(np.sqrt(D_HEAD))
NEG_INF = -1e9

# synthetic "tokenizer": fixed token-id -> word mapping
BEFORE_TOK, AFTER_TOK, INTENT_TOK = 10, 11, 12

_N_DATA = 6   # x_enc, y_dec, enc_mask, dec_mask, cross_mask, labels_onehot


# ---------------- in-kernel building blocks (values only, 2-D ops) -----------
def _ln(x, g, b, eps=1e-5):
    mu = jnp.mean(x, axis=-1, keepdims=True)
    xc = x - mu
    var = jnp.mean(xc * xc, axis=-1, keepdims=True)
    return xc * jax.lax.rsqrt(var + eps) * g + b


def _softmax(s):
    s = s - jnp.max(s, axis=-1, keepdims=True)
    e = jnp.exp(s)
    return e * pl.reciprocal(jnp.sum(e, axis=-1, keepdims=True), approx=True)


def _mha(x_q, x_kv, p, l, mask):
    """Multi-head attention.  p holds (layer, head)-stacked weight refs."""
    acc = None
    for h in range(N_HEADS):
        q = jnp.dot(x_q, p['wq'][l, h],
                    preferred_element_type=jnp.float32) + p['bq'][l, h]
        k = jnp.dot(x_kv, p['wk'][l, h],
                    preferred_element_type=jnp.float32) + p['bk'][l, h]
        v = jnp.dot(x_kv, p['wv'][l, h],
                    preferred_element_type=jnp.float32) + p['bv'][l, h]
        # scores: (Mq, Mk) = q @ k^T  (contract last dims, no transpose op)
        s = jax.lax.dot_general(
            q, k, (((1,), (1,)), ((), ())),
            preferred_element_type=jnp.float32) * SCALE + mask
        a = _softmax(s)
        o = jnp.dot(a, v, preferred_element_type=jnp.float32)          # (Mq, Dh)
        c = jnp.dot(o, p['wo'][l, h], preferred_element_type=jnp.float32)
        acc = c if acc is None else acc + c
    return acc + p['bo'][l]


def _ffn(x, p, l):
    h = jnp.dot(x, p['fc1_w'][l], preferred_element_type=jnp.float32) + p['fc1_b'][l]
    h = jax.nn.gelu(h, approximate=True)
    return jnp.dot(h, p['fc2_w'][l], preferred_element_type=jnp.float32) + p['fc2_b'][l]


def _encoder_layer(x, p, l, mask):
    h = _mha(x, x, p['attn'], l, mask)
    x = _ln(x + h, p['attn_ln_g'][l], p['attn_ln_b'][l])
    h = _ffn(x, p, l)
    return _ln(x + h, p['final_ln_g'][l], p['final_ln_b'][l])


def _decoder_layer(y, enc_out, p, l, self_mask, cross_mask):
    h = _mha(y, y, p['self_attn'], l, self_mask)
    y = _ln(y + h, p['self_ln_g'][l], p['self_ln_b'][l])
    h = _mha(y, enc_out, p['cross_attn'], l, cross_mask)
    y = _ln(y + h, p['cross_ln_g'][l], p['cross_ln_b'][l])
    h = _ffn(y, p, l)
    return _ln(y + h, p['final_ln_g'][l], p['final_ln_b'][l])


# ---------------- the single fused Pallas kernel ------------------------------
def _bart_kernel(*refs, treedef, n_weights):
    x_ref, y_ref, enc_m_ref, dec_m_ref, cross_m_ref, lab_ref = refs[:_N_DATA]
    W = jax.tree_util.tree_unflatten(
        treedef, refs[_N_DATA:_N_DATA + n_weights])
    logits_ref = refs[_N_DATA + n_weights]
    loss_ref = refs[_N_DATA + n_weights + 1]

    enc_mask = enc_m_ref[...]
    dec_mask = dec_m_ref[...]
    cross_mask = cross_m_ref[...]

    # ----- encoder -----
    x = _ln(x_ref[...], W['enc_ln_emb_g'][...], W['enc_ln_emb_b'][...])
    for l in range(N_ENC):
        x = _encoder_layer(x, W['encoder_layers'], l, enc_mask)

    # ----- decoder -----
    y = _ln(y_ref[...], W['dec_ln_emb_g'][...], W['dec_ln_emb_b'][...])
    for l in range(N_DEC):
        y = _decoder_layer(y, x, W['decoder_layers'], l, dec_mask, cross_mask)

    # ----- tied LM head (lane-dense: VOCAB == 128) -----
    logits = (jnp.dot(y, W['lm_head_w'][...], preferred_element_type=jnp.float32)
              + W['lm_head_b'][...])
    logits_ref[...] = logits

    # ----- mean token cross-entropy (fused epilogue) -----
    m = jnp.max(logits, axis=-1, keepdims=True)
    lse = m + jnp.log(jnp.sum(jnp.exp(logits - m), axis=-1, keepdims=True))
    nll = -jnp.sum((logits - lse) * lab_ref[...], axis=-1, keepdims=True)   # (M, 1)
    loss_ref[...] = jnp.sum(nll, axis=0, keepdims=True) * (1.0 / nll.shape[0])


# ---------------- host-side mask construction (tiny, fused under jit) ---------
def _build_masks(attention_mask, B, S, Sd):
    bs = jnp.repeat(jnp.arange(B), S)      # batch id of each encoder token
    bd = jnp.repeat(jnp.arange(B), Sd)     # batch id of each decoder token
    key_ok = attention_mask.reshape(B * S) > 0

    same_ss = bs[:, None] == bs[None, :]
    enc_mask = jnp.where(same_ss & key_ok[None, :], 0.0, NEG_INF)

    pos_d = jnp.tile(jnp.arange(Sd), B)
    same_dd = bd[:, None] == bd[None, :]
    causal = pos_d[None, :] <= pos_d[:, None]
    dec_mask = jnp.where(same_dd & causal, 0.0, NEG_INF)

    same_ds = bd[:, None] == bs[None, :]
    cross_mask = jnp.where(same_ds & key_ok[None, :], 0.0, NEG_INF)

    return (enc_mask.astype(jnp.float32), dec_mask.astype(jnp.float32),
            cross_mask.astype(jnp.float32))


# ---------------- jitted forward: embeddings -> fused kernel -> logits/loss ---
@jax.jit
def bart_forward(params, input_ids, attention_mask, labels):
    B, S = input_ids.shape
    emb = params['embed_tokens']
    pos = params['embed_positions']

    x_enc = (emb[input_ids] + pos[:S][None]).reshape(B * S, D_MODEL)

    # teacher forcing with shifted labels (BART-style)
    dec_input = jnp.concatenate(
        [jnp.full((B, 1), DEC_START, labels.dtype), labels[:, :-1]], axis=1)
    Sd = dec_input.shape[1]
    y_dec = (emb[dec_input] + pos[:Sd][None]).reshape(B * Sd, D_MODEL)

    enc_mask, dec_mask, cross_mask = _build_masks(attention_mask, B, S, Sd)
    lab_1h = jax.nn.one_hot(labels.reshape(-1), VOCAB, dtype=jnp.float32)

    kweights = dict(
        enc_ln_emb_g=params['enc_ln_emb_g'], enc_ln_emb_b=params['enc_ln_emb_b'],
        dec_ln_emb_g=params['dec_ln_emb_g'], dec_ln_emb_b=params['dec_ln_emb_b'],
        encoder_layers=params['encoder_layers'],
        decoder_layers=params['decoder_layers'],
        lm_head_w=emb.T,                               # tied LM head
        lm_head_b=params['final_logits_bias'],
    )
    flat_w, treedef = jax.tree_util.tree_flatten(kweights)

    kernel = functools.partial(_bart_kernel, treedef=treedef,
                               n_weights=len(flat_w))
    logits_flat, loss = pl.pallas_call(
        kernel,
        out_shape=(jax.ShapeDtypeStruct((B * Sd, VOCAB), jnp.float32),
                   jax.ShapeDtypeStruct((1, 1), jnp.float32)),
        compiler_params=pltpu.CompilerParams(
            vmem_limit_bytes=32 * 1024 * 1024),
    )(x_enc.astype(jnp.float32), y_dec.astype(jnp.float32),
      enc_mask, dec_mask, cross_mask, lab_1h, *flat_w)

    logits = logits_flat.reshape(B, Sd, VOCAB)
    preds = jnp.argmax(logits[:, :6, :], axis=-1)      # first 6 decoder positions
    return logits, loss[0, 0], preds


# ---------------- Simple_EvRel_Bart.forward equivalent ------------------------
def _synthetic_decode(tok_id):
    # TODO(synk): BartTokenizerFast.decode (and file-logging prints / .cuda())
    # have no Pallas/JAX equivalent; a fixed token-id -> word map is used.
    return {BEFORE_TOK: 'before', AFTER_TOK: 'after',
            INTENT_TOK: 'intent'}.get(int(tok_id), 'other')


def simple_evrel_bart_forward(params, inp):
    src_toks1 = inp['bart_full_evrel_seq_out']
    src_attn1 = inp['bart_full_evrel_seq_out_lens']
    B, num_ev = 1, 1
    num_seq_eg, seq_len = src_toks1.shape
    src_toks = src_toks1.reshape(B * num_ev * num_seq_eg, seq_len)
    src_attn_mask = src_attn1.reshape(B * num_ev * num_seq_eg, seq_len)

    logits, loss, preds = bart_forward(params, src_toks, src_attn_mask,
                                       inp['bart_full_evrel_labs'])
    out = {'logits': logits, 'loss': loss}

    preds_np = np.asarray(preds)                        # (num_seq_eg, 6)

    batch_mdl_out_list = []
    for i in range(num_seq_eg):
        decoded_seq = [_synthetic_decode(t) for t in preds_np[i]]
        mdl_out_list = [[[-1, 0, 0, 0] for _ in range(3)] for _ in range(4)]
        for j, evrel_pred in enumerate(decoded_seq):
            if j > 3:
                break
            if 'before' in evrel_pred:
                col = 1
            elif 'after' in evrel_pred:
                col = 2
            elif 'intent' in evrel_pred:
                col = 3
            else:
                col = 0
            for r in range(3):
                mdl_out_list[j][r][col] = 1
        batch_mdl_out_list.append(mdl_out_list)

    out['mdl_out'] = jnp.asarray(batch_mdl_out_list, dtype=jnp.float32)
    out['gt_lst'] = inp['gt_lst']
    return out


# ---------------- deterministic parameter init --------------------------------
def init_params(key):
    keys = iter(jax.random.split(key, 512))

    def nrm(shape):
        return jax.random.normal(next(keys), shape, jnp.float32) * 0.02

    zeros = lambda s: jnp.zeros(s, jnp.float32)
    ones = lambda s: jnp.ones(s, jnp.float32)

    def attn_params():
        # per-head stacked projections: (H, D, Dh) / (H, Dh, D)
        return dict(
            wq=nrm((N_HEADS, D_MODEL, D_HEAD)), bq=zeros((N_HEADS, 1, D_HEAD)),
            wk=nrm((N_HEADS, D_MODEL, D_HEAD)), bk=zeros((N_HEADS, 1, D_HEAD)),
            wv=nrm((N_HEADS, D_MODEL, D_HEAD)), bv=zeros((N_HEADS, 1, D_HEAD)),
            wo=nrm((N_HEADS, D_HEAD, D_MODEL)), bo=zeros((1, D_MODEL)))

    def enc_layer():
        return dict(attn=attn_params(),
                    attn_ln_g=ones((1, D_MODEL)), attn_ln_b=zeros((1, D_MODEL)),
                    fc1_w=nrm((D_MODEL, FFN)), fc1_b=zeros((1, FFN)),
                    fc2_w=nrm((FFN, D_MODEL)), fc2_b=zeros((1, D_MODEL)),
                    final_ln_g=ones((1, D_MODEL)), final_ln_b=zeros((1, D_MODEL)))

    def dec_layer():
        return dict(self_attn=attn_params(),
                    self_ln_g=ones((1, D_MODEL)), self_ln_b=zeros((1, D_MODEL)),
                    cross_attn=attn_params(),
                    cross_ln_g=ones((1, D_MODEL)), cross_ln_b=zeros((1, D_MODEL)),
                    fc1_w=nrm((D_MODEL, FFN)), fc1_b=zeros((1, FFN)),
                    fc2_w=nrm((FFN, D_MODEL)), fc2_b=zeros((1, D_MODEL)),
                    final_ln_g=ones((1, D_MODEL)), final_ln_b=zeros((1, D_MODEL)))

    def stack(layers):
        # stack per-layer dicts along a new leading "layer" axis
        return jax.tree_util.tree_map(lambda *xs: jnp.stack(xs, axis=0), *layers)

    return dict(
        embed_tokens=nrm((VOCAB, D_MODEL)),
        embed_positions=nrm((MAX_POS, D_MODEL)),
        enc_ln_emb_g=ones((1, D_MODEL)), enc_ln_emb_b=zeros((1, D_MODEL)),
        dec_ln_emb_g=ones((1, D_MODEL)), dec_ln_emb_b=zeros((1, D_MODEL)),
        encoder_layers=stack([enc_layer() for _ in range(N_ENC)]),
        decoder_layers=stack([dec_layer() for _ in range(N_DEC)]),
        final_logits_bias=zeros((1, VOCAB)),
    )


# ---------------- main ---------------------------------------------------------
if __name__ == "__main__":
    key = jax.random.PRNGKey(0)
    kp, kt, kl = jax.random.split(key, 3)
    params = init_params(kp)

    num_seq_eg, seq_len = 2, 8
    src_toks = jax.random.randint(kt, (num_seq_eg, seq_len), 0, VOCAB,
                                  dtype=jnp.int32)
    src_attn = jnp.ones((num_seq_eg, seq_len), jnp.int32).at[:, 6:].set(0)
    labels = jax.random.randint(kl, (num_seq_eg, seq_len), 0, VOCAB,
                                dtype=jnp.int32)
    inp = {
        'bart_full_evrel_seq_out': src_toks,
        'bart_full_evrel_seq_out_lens': src_attn,
        'bart_full_evrel_labs': labels,
        'gt_lst': jnp.zeros((num_seq_eg, 4), jnp.int32),
    }

    out = simple_evrel_bart_forward(params, inp)
    jax.block_until_ready(out['logits'])
    jax.block_until_ready(out['loss'])
    jax.block_until_ready(out['mdl_out'])
    assert out['logits'].shape == (num_seq_eg, seq_len, VOCAB)
    assert out['mdl_out'].shape == (num_seq_eg, 4, 3, 4)
    assert bool(jnp.isfinite(out['loss']))
    print("KERNEL_OK")
</pallas_src>

<mosaic_0001>
module attributes {stable_mosaic.version = 11 : i64} {
  func.func @_bart_kernel(%arg0: memref<16x32xf32, #tpu.memory_space<vmem>>, %arg1: memref<16x32xf32, #tpu.memory_space<vmem>>, %arg2: memref<16x16xf32, #tpu.memory_space<vmem>>, %arg3: memref<16x16xf32, #tpu.memory_space<vmem>>, %arg4: memref<16x16xf32, #tpu.memory_space<vmem>>, %arg5: memref<16x128xf32, #tpu.memory_space<vmem>>, %arg6: memref<1x32xf32, #tpu.memory_space<vmem>>, %arg7: memref<1x32xf32, #tpu.memory_space<vmem>>, %arg8: memref<2x4x1x8xf32, #tpu.memory_space<vmem>>, %arg9: memref<2x1x32xf32, #tpu.memory_space<vmem>>, %arg10: memref<2x4x1x8xf32, #tpu.memory_space<vmem>>, %arg11: memref<2x4x1x8xf32, #tpu.memory_space<vmem>>, %arg12: memref<2x4x32x8xf32, #tpu.memory_space<vmem>>, %arg13: memref<2x4x8x32xf32, #tpu.memory_space<vmem>>, %arg14: memref<2x4x32x8xf32, #tpu.memory_space<vmem>>, %arg15: memref<2x4x32x8xf32, #tpu.memory_space<vmem>>, %arg16: memref<2x1x32xf32, #tpu.memory_space<vmem>>, %arg17: memref<2x1x32xf32, #tpu.memory_space<vmem>>, %arg18: memref<2x1x64xf32, #tpu.memory_space<vmem>>, %arg19: memref<2x32x64xf32, #tpu.memory_space<vmem>>, %arg20: memref<2x1x32xf32, #tpu.memory_space<vmem>>, %arg21: memref<2x64x32xf32, #tpu.memory_space<vmem>>, %arg22: memref<2x1x32xf32, #tpu.memory_space<vmem>>, %arg23: memref<2x1x32xf32, #tpu.memory_space<vmem>>, %arg24: memref<2x4x1x8xf32, #tpu.memory_space<vmem>>, %arg25: memref<2x1x32xf32, #tpu.memory_space<vmem>>, %arg26: memref<2x4x1x8xf32, #tpu.memory_space<vmem>>, %arg27: memref<2x4x1x8xf32, #tpu.memory_space<vmem>>, %arg28: memref<2x4x32x8xf32, #tpu.memory_space<vmem>>, %arg29: memref<2x4x8x32xf32, #tpu.memory_space<vmem>>, %arg30: memref<2x4x32x8xf32, #tpu.memory_space<vmem>>, %arg31: memref<2x4x32x8xf32, #tpu.memory_space<vmem>>, %arg32: memref<2x1x32xf32, #tpu.memory_space<vmem>>, %arg33: memref<2x1x32xf32, #tpu.memory_space<vmem>>, %arg34: memref<1x32xf32, #tpu.memory_space<vmem>>, %arg35: memref<1x32xf32, #tpu.memory_space<vmem>>, %arg36: memref<2x4x1x8xf32, #tpu.memory_space<vmem>>, %arg37: memref<2x1x32xf32, #tpu.memory_space<vmem>>, %arg38: memref<2x4x1x8xf32, #tpu.memory_space<vmem>>, %arg39: memref<2x4x1x8xf32, #tpu.memory_space<vmem>>, %arg40: memref<2x4x32x8xf32, #tpu.memory_space<vmem>>, %arg41: memref<2x4x8x32xf32, #tpu.memory_space<vmem>>, %arg42: memref<2x4x32x8xf32, #tpu.memory_space<vmem>>, %arg43: memref<2x4x32x8xf32, #tpu.memory_space<vmem>>, %arg44: memref<2x1x32xf32, #tpu.memory_space<vmem>>, %arg45: memref<2x1x32xf32, #tpu.memory_space<vmem>>, %arg46: memref<2x1x64xf32, #tpu.memory_space<vmem>>, %arg47: memref<2x32x64xf32, #tpu.memory_space<vmem>>, %arg48: memref<2x1x32xf32, #tpu.memory_space<vmem>>, %arg49: memref<2x64x32xf32, #tpu.memory_space<vmem>>, %arg50: memref<2x1x32xf32, #tpu.memory_space<vmem>>, %arg51: memref<2x1x32xf32, #tpu.memory_space<vmem>>, %arg52: memref<1x128xf32, #tpu.memory_space<vmem>>, %arg53: memref<32x128xf32, #tpu.memory_space<vmem>>, %arg54: memref<16x128xf32, #tpu.memory_space<vmem>>, %arg55: memref<1x1xf32, #tpu.memory_space<vmem>>) attributes {dimension_semantics = [], scalar_prefetch = 0 : i64, scratch_operands = 0 : i64, tpu.core_type = #tpu.core_type<tc>} {
    %c0 = arith.constant 0 : index
    %c0_0 = arith.constant 0 : index
    %0 = vector.load %arg2[%c0, %c0_0] : memref<16x16xf32, #tpu.memory_space<vmem>>, vector<16x16xf32>
    %c0_1 = arith.constant 0 : index
    %c0_2 = arith.constant 0 : index
    %1 = vector.load %arg3[%c0_1, %c0_2] : memref<16x16xf32, #tpu.memory_space<vmem>>, vector<16x16xf32>
    %c0_3 = arith.constant 0 : index
    %c0_4 = arith.constant 0 : index
    %2 = vector.load %arg4[%c0_3, %c0_4] : memref<16x16xf32, #tpu.memory_space<vmem>>, vector<16x16xf32>
    %c0_5 = arith.constant 0 : index
    %c0_6 = arith.constant 0 : index
    %3 = vector.load %arg0[%c0_5, %c0_6] : memref<16x32xf32, #tpu.memory_space<vmem>>, vector<16x32xf32>
    %c0_7 = arith.constant 0 : index
    %c0_8 = arith.constant 0 : index
    %4 = vector.load %arg35[%c0_7, %c0_8] : memref<1x32xf32, #tpu.memory_space<vmem>>, vector<1x32xf32>
    %c0_9 = arith.constant 0 : index
    %c0_10 = arith.constant 0 : index
    %5 = vector.load %arg34[%c0_9, %c0_10] : memref<1x32xf32, #tpu.memory_space<vmem>>, vector<1x32xf32>
    %cst = arith.constant dense<0.000000e+00> : vector<16xf32>
    %6 = vector.multi_reduction <add>, %3, %cst [1] : vector<16x32xf32> to vector<16xf32>
    %7 = vector.shape_cast %6 : vector<16xf32> to vector<16x1xf32>
    %cst_11 = arith.constant 3.200000e+01 : f32
    %8 = vector.broadcast %cst_11 : f32 to vector<16x1xf32>
    %9 = arith.divf %7, %8 : vector<16x1xf32>
    %10 = vector.broadcast %9 : vector<16x1xf32> to vector<16x32xf32>
    %11 = arith.subf %3, %10 : vector<16x32xf32>
    %12 = arith.mulf %11, %11 : vector<16x32xf32>
    %cst_12 = arith.constant dense<0.000000e+00> : vector<16xf32>
    %13 = vector.multi_reduction <add>, %12, %cst_12 [1] : vector<16x32xf32> to vector<16xf32>
    %14 = vector.shape_cast %13 : vector<16xf32> to vector<16x1xf32>
    %cst_13 = arith.constant 3.200000e+01 : f32
    %15 = vector.broadcast %cst_13 : f32 to vector<16x1xf32>
    %16 = arith.divf %14, %15 : vector<16x1xf32>
    %cst_14 = arith.constant 9.99999974E-6 : f32
    %17 = vector.broadcast %cst_14 : f32 to vector<16x1xf32>
    %18 = arith.addf %16, %17 : vector<16x1xf32>
    %19 = math.rsqrt %18 : vector<16x1xf32>
    %20 = vector.broadcast %19 : vector<16x1xf32> to vector<16x32xf32>
    %21 = arith.mulf %11, %20 : vector<16x32xf32>
    %22 = vector.broadcast %4 : vector<1x32xf32> to vector<16x32xf32>
    %23 = arith.mulf %21, %22 : vector<16x32xf32>
    %24 = vector.broadcast %5 : vector<1x32xf32> to vector<16x32xf32>
    %25 = arith.addf %23, %24 : vector<16x32xf32>
    %c0_15 = arith.constant 0 : index
    %c0_16 = arith.constant 0 : index
    %c0_17 = arith.constant 0 : index
    %c0_18 = arith.constant 0 : index
    %26 = vector.load %arg42[%c0_15, %c0_16, %c0_17, %c0_18] : memref<2x4x32x8xf32, #tpu.memory_space<vmem>>, vector<1x1x32x8xf32>
    %27 = vector.shape_cast %26 : vector<1x1x32x8xf32> to vector<32x8xf32>
    %cst_19 = arith.constant dense<0.000000e+00> : vector<16x8xf32>
    %28 = tpu.matmul %25, %27, %cst_19 {dimension_numbers = #tpu.dot_dimension_numbers<[1], [0], [0], [1], [0, 0, 1, 1], [], []>} : vector<16x32xf32>, vector<32x8xf32>, vector<16x8xf32> -> vector<16x8xf32>
    %c0_20 = arith.constant 0 : index
    %c0_21 = arith.constant 0 : index
    %c0_22 = arith.constant 0 : index
    %c0_23 = arith.constant 0 : index
    %29 = vector.load %arg38[%c0_20, %c0_21, %c0_22, %c0_23] : memref<2x4x1x8xf32, #tpu.memory_space<vmem>>, vector<1x1x1x8xf32>
    %30 = vector.shape_cast %29 : vector<1x1x1x8xf32> to vector<1x8xf32>
    %31 = vector.broadcast %30 : vector<1x8xf32> to vector<16x8xf32>
    %32 = arith.addf %28, %31 : vector<16x8xf32>
    %c0_24 = arith.constant 0 : index
    %c0_25 = arith.constant 0 : index
    %c0_26 = arith.constant 0 : index
    %c0_27 = arith.constant 0 : index
    %33 = vector.load %arg40[%c0_24, %c0_25, %c0_26, %c0_27] : memref<2x4x32x8xf32, #tpu.memory_space<vmem>>, vector<1x1x32x8xf32>
    %34 = vector.shape_cast %33 : vector<1x1x32x8xf32> to vector<32x8xf32>
    %cst_28 = arith.constant dense<0.000000e+00> : vector<16x8xf32>
    %35 = tpu.matmul %25, %34, %cst_28 {dimension_numbers = #tpu.dot_dimension_numbers<[1], [0], [0], [1], [0, 0, 1, 1], [], []>} : vector<16x32xf32>, vector<32x8xf32>, vector<16x8xf32> -> vector<16x8xf32>
    %c0_29 = arith.constant 0 : index
    %c0_30 = arith.constant 0 : index
    %c0_31 = arith.constant 0 : index
    %c0_32 = arith.constant 0 : index
    %36 = vector.load %arg36[%c0_29, %c0_30, %c0_31, %c0_32] : memref<2x4x1x8xf32, #tpu.memory_space<vmem>>, vector<1x1x1x8xf32>
    %37 = vector.shape_cast %36 : vector<1x1x1x8xf32> to vector<1x8xf32>
    %38 = vector.broadcast %37 : vector<1x8xf32> to vector<16x8xf32>
    %39 = arith.addf %35, %38 : vector<16x8xf32>
    %c0_33 = arith.constant 0 : index
    %c0_34 = arith.constant 0 : index
    %c0_35 = arith.constant 0 : index
    %c0_36 = arith.constant 0 : index
    %40 = vector.load %arg43[%c0_33, %c0_34, %c0_35, %c0_36] : memref<2x4x32x8xf32, #tpu.memory_space<vmem>>, vector<1x1x32x8xf32>
    %41 = vector.shape_cast %40 : vector<1x1x32x8xf32> to vector<32x8xf32>
    %cst_37 = arith.constant dense<0.000000e+00> : vector<16x8xf32>
    %42 = tpu.matmul %25, %41, %cst_37 {dimension_numbers = #tpu.dot_dimension_numbers<[1], [0], [0], [1], [0, 0, 1, 1], [], []>} : vector<16x32xf32>, vector<32x8xf32>, vector<16x8xf32> -> vector<16x8xf32>
    %c0_38 = arith.constant 0 : index
    %c0_39 = arith.constant 0 : index
    %c0_40 = arith.constant 0 : index
    %c0_41 = arith.constant 0 : index
    %43 = vector.load %arg39[%c0_38, %c0_39, %c0_40, %c0_41] : memref<2x4x1x8xf32, #tpu.memory_space<vmem>>, vector<1x1x1x8xf32>
    %44 = vector.shape_cast %43 : vector<1x1x1x8xf32> to vector<1x8xf32>
    %45 = vector.broadcast %44 : vector<1x8xf32> to vector<16x8xf32>
    %46 = arith.addf %42, %45 : vector<16x8xf32>
    %cst_42 = arith.constant dense<0.000000e+00> : vector<16x16xf32>
    %47 = tpu.matmul %32, %39, %cst_42 {dimension_numbers = #tpu.dot_dimension_numbers<[1], [1], [0], [0], [0, 0, 1, 0], [], []>} : vector<16x8xf32>, vector<16x8xf32>, vector<16x16xf32> -> vector<16x16xf32>
    %cst_43 = arith.constant 0.353553385 : f32
    %48 = vector.broadcast %cst_43 : f32 to vector<16x16xf32>
    %49 = arith.mulf %47, %48 : vector<16x16xf32>
    %50 = arith.addf %49, %0 : vector<16x16xf32>
    %cst_44 = arith.constant dense<0xFF800000> : vector<16xf32>
    %51 = vector.multi_reduction <maximumf>, %50, %cst_44 [1] : vector<16x16xf32> to vector<16xf32>
    %52 = vector.shape_cast %51 : vector<16xf32> to vector<16x1xf32>
    %53 = vector.broadcast %52 : vector<16x1xf32> to vector<16x16xf32>
    %54 = arith.subf %50, %53 : vector<16x16xf32>
    %55 = math.exp %54 : vector<16x16xf32>
    %cst_45 = arith.constant dense<0.000000e+00> : vector<16xf32>
    %56 = vector.multi_reduction <add>, %55, %cst_45 [1] : vector<16x16xf32> to vector<16xf32>
    %57 = vector.shape_cast %56 : vector<16xf32> to vector<16x1xf32>
    %58 = tpu.reciprocal %57 {approx = true} : vector<16x1xf32> -> vector<16x1xf32>
    %59 = vector.broadcast %58 : vector<16x1xf32> to vector<16x16xf32>
    %60 = arith.mulf %55, %59 : vector<16x16xf32>
    %cst_46 = arith.constant dense<0.000000e+00> : vector<16x8xf32>
    %61 = tpu.matmul %60, %46, %cst_46 {dimension_numbers = #tpu.dot_dimension_numbers<[1], [0], [0], [1], [0, 0, 1, 1], [], []>} : vector<16x16xf32>, vector<16x8xf32>, vector<16x8xf32> -> vector<16x8xf32>
    %c0_47 = arith.constant 0 : index
    %c0_48 = arith.constant 0 : index
    %c0_49 = arith.constant 0 : index
    %c0_50 = arith.constant 0 : index
    %62 = vector.load %arg41[%c0_47, %c0_48, %c0_49, %c0_50] : memref<2x4x8x32xf32, #tpu.memory_space<vmem>>, vector<1x1x8x32xf32>
    %63 = vector.shape_cast %62 : vector<1x1x8x32xf32> to vector<8x32xf32>
    %cst_51 = arith.constant dense<0.000000e+00> : vector<16x32xf32>
    %64 = tpu.matmul %61, %63, %cst_51 {dimension_numbers = #tpu.dot_dimension_numbers<[1], [0], [0], [1], [0, 0, 1, 1], [], []>} : vector<16x8xf32>, vector<8x32xf32>, vector<16x32xf32> -> vector<16x32xf32>
    %c0_52 = arith.constant 0 : index
    %c1 = arith.constant 1 : index
    %c0_53 = arith.constant 0 : index
    %c0_54 = arith.constant 0 : index
    %65 = vector.load %arg42[%c0_52, %c1, %c0_53, %c0_54] : memref<2x4x32x8xf32, #tpu.memory_space<vmem>>, vector<1x1x32x8xf32>
    %66 = vector.shape_cast %65 : vector<1x1x32x8xf32> to vector<32x8xf32>
    %cst_55 = arith.constant dense<0.000000e+00> : vector<16x8xf32>
    %67 = tpu.matmul %25, %66, %cst_55 {dimension_numbers = #tpu.dot_dimension_numbers<[1], [0], [0], [1], [0, 0, 1, 1], [], []>} : vector<16x32xf32>, vector<32x8xf32>, vector<16x8xf32> -> vector<16x8xf32>
    %c0_56 = arith.constant 0 : index
    %c1_57 = arith.constant 1 : index
    %c0_58 = arith.constant 0 : index
    %c0_59 = arith.constant 0 : index
    %68 = vector.load %arg38[%c0_56, %c1_57, %c0_58, %c0_59] : memref<2x4x1x8xf32, #tpu.memory_space<vmem>>, vector<1x1x1x8xf32>
    %69 = vector.shape_cast %68 : vector<1x1x1x8xf32> to vector<1x8xf32>
    %70 = vector.broadcast %69 : vector<1x8xf32> to vector<16x8xf32>
    %71 = arith.addf %67, %70 : vector<16x8xf32>
    %c0_60 = arith.constant 0 : index
    %c1_61 = arith.constant 1 : index
    %c0_62 = arith.constant 0 : index
    %c0_63 = arith.constant 0 : index
    %72 = vector.load %arg40[%c0_60, %c1_61, %c0_62, %c0_63] : memref<2x4x32x8xf32, #tpu.memory_space<vmem>>, vector<1x1x32x8xf32>
    %73 = vector.shape_cast %72 : vector<1x1x32x8xf32> to vector<32x8xf32>
    %cst_64 = arith.constant dense<0.000000e+00> : vector<16x8xf32>
    %74 = tpu.matmul %25, %73, %cst_64 {dimension_numbers = #tpu.dot_dimension_numbers<[1], [0], [0], [1], [0, 0, 1, 1], [], []>} : vector<16x32xf32>, vector<32x8xf32>, vector<16x8xf32> -> vector<16x8xf32>
    %c0_65 = arith.constant 0 : index
    %c1_66 = arith.constant 1 : index
    %c0_67 = arith.constant 0 : index
    %c0_68 = arith.constant 0 : index
    %75 = vector.load %arg36[%c0_65, %c1_66, %c0_67, %c0_68] : memref<2x4x1x8xf32, #tpu.memory_space<vmem>>, vector<1x1x1x8xf32>
    %76 = vector.shape_cast %75 : vector<1x1x1x8xf32> to vector<1x8xf32>
    %77 = vector.broadcast %76 : vector<1x8xf32> to vector<16x8xf32>
    %78 = arith.addf %74, %77 : vector<16x8xf32>
    %c0_69 = arith.constant 0 : index
    %c1_70 = arith.constant 1 : index
    %c0_71 = arith.constant 0 : index
    %c0_72 = arith.constant 0 : index
    %79 = vector.load %arg43[%c0_69, %c1_70, %c0_71, %c0_72] : memref<2x4x32x8xf32, #tpu.memory_space<vmem>>, vector<1x1x32x8xf32>
    %80 = vector.shape_cast %79 : vector<1x1x32x8xf32> to vector<32x8xf32>
    %cst_73 = arith.constant dense<0.000000e+00> : vector<16x8xf32>
    %81 = tpu.matmul %25, %80, %cst_73 {dimension_numbers = #tpu.dot_dimension_numbers<[1], [0], [0], [1], [0, 0, 1, 1], [], []>} : vector<16x32xf32>, vector<32x8xf32>, vector<16x8xf32> -> vector<16x8xf32>
    %c0_74 = arith.constant 0 : index
    %c1_75 = arith.constant 1 : index
    %c0_76 = arith.constant 0 : index
    %c0_77 = arith.constant 0 : index
    %82 = vector.load %arg39[%c0_74, %c1_75, %c0_76, %c0_77] : memref<2x4x1x8xf32, #tpu.memory_space<vmem>>, vector<1x1x1x8xf32>
    %83 = vector.shape_cast %82 : vector<1x1x1x8xf32> to vector<1x8xf32>
    %84 = vector.broadcast %83 : vector<1x8xf32> to vector<16x8xf32>
    %85 = arith.addf %81, %84 : vector<16x8xf32>
    %cst_78 = arith.constant dense<0.000000e+00> : vector<16x16xf32>
    %86 = tpu.matmul %71, %78, %cst_78 {dimension_numbers = #tpu.dot_dimension_numbers<[1], [1], [0], [0], [0, 0, 1, 0], [], []>} : vector<16x8xf32>, vector<16x8xf32>, vector<16x16xf32> -> vector<16x16xf32>
    %cst_79 = arith.constant 0.353553385 : f32
    %87 = vector.broadcast %cst_79 : f32 to vector<16x16xf32>
    %88 = arith.mulf %86, %87 : vector<16x16xf32>
    %89 = arith.addf %88, %0 : vector<16x16xf32>
    %cst_80 = arith.constant dense<0xFF800000> : vector<16xf32>
    %90 = vector.multi_reduction <maximumf>, %89, %cst_80 [1] : vector<16x16xf32> to vector<16xf32>
    %91 = vector.shape_cast %90 : vector<16xf32> to vector<16x1xf32>
    %92 = vector.broadcast %91 : vector<16x1xf32> to vector<16x16xf32>
    %93 = arith.subf %89, %92 : vector<16x16xf32>
    %94 = math.exp %93 : vector<16x16xf32>
    %cst_81 = arith.constant dense<0.000000e+00> : vector<16xf32>
    %95 = vector.multi_reduction <add>, %94, %cst_81 [1] : vector<16x16xf32> to vector<16xf32>
    %96 = vector.shape_cast %95 : vector<16xf32> to vector<16x1xf32>
    %97 = tpu.reciprocal %96 {approx = true} : vector<16x1xf32> -> vector<16x1xf32>
    %98 = vector.broadcast %97 : vector<16x1xf32> to vector<16x16xf32>
    %99 = arith.mulf %94, %98 : vector<16x16xf32>
    %cst_82 = arith.constant dense<0.000000e+00> : vector<16x8xf32>
    %100 = tpu.matmul %99, %85, %cst_82 {dimension_numbers = #tpu.dot_dimension_numbers<[1], [0], [0], [1], [0, 0, 1, 1], [], []>} : vector<16x16xf32>, vector<16x8xf32>, vector<16x8xf32> -> vector<16x8xf32>
    %c0_83 = arith.constant 0 : index
    %c1_84 = arith.constant 1 : index
    %c0_85 = arith.constant 0 : index
    %c0_86 = arith.constant 0 : index
    %101 = vector.load %arg41[%c0_83, %c1_84, %c0_85, %c0_86] : memref<2x4x8x32xf32, #tpu.memory_space<vmem>>, vector<1x1x8x32xf32>
    %102 = vector.shape_cast %101 : vector<1x1x8x32xf32> to vector<8x32xf32>
    %cst_87 = arith.constant dense<0.000000e+00> : vector<16x32xf32>
    %103 = tpu.matmul %100, %102, %cst_87 {dimension_numbers = #tpu.dot_dimension_numbers<[1], [0], [0], [1], [0, 0, 1, 1], [], []>} : vector<16x8xf32>, vector<8x32xf32>, vector<16x32xf32> -> vector<16x32xf32>
    %104 = arith.addf %64, %103 : vector<16x32xf32>
    %c0_88 = arith.constant 0 : index
    %c2 = arith.constant 2 : index
    %c0_89 = arith.constant 0 : index
    %c0_90 = arith.constant 0 : index
    %105 = vector.load %arg42[%c0_88, %c2, %c0_89, %c0_90] : memref<2x4x32x8xf32, #tpu.memory_space<vmem>>, vector<1x1x32x8xf32>
    %106 = vector.shape_cast %105 : vector<1x1x32x8xf32> to vector<32x8xf32>
    %cst_91 = arith.constant dense<0.000000e+00> : vector<16x8xf32>
    %107 = tpu.matmul %25, %106, %cst_91 {dimension_numbers = #tpu.dot_dimension_numbers<[1], [0], [0], [1], [0, 0, 1, 1], [], []>} : vector<16x32xf32>, vector<32x8xf32>, vector<16x8xf32> -> vector<16x8xf32>
    %c0_92 = arith.constant 0 : index
    %c2_93 = arith.constant 2 : index
    %c0_94 = arith.constant 0 : index
    %c0_95 = arith.constant 0 : index
    %108 = vector.load %arg38[%c0_92, %c2_93, %c0_94, %c0_95] : memref<2x4x1x8xf32, #tpu.memory_space<vmem>>, vector<1x1x1x8xf32>
    %109 = vector.shape_cast %108 : vector<1x1x1x8xf32> to vector<1x8xf32>
    %110 = vector.broadcast %109 : vector<1x8xf32> to vector<16x8xf32>
    %111 = arith.addf %107, %110 : vector<16x8xf32>
    %c0_96 = arith.constant 0 : index
    %c2_97 = arith.constant 2 : index
    %c0_98 = arith.constant 0 : index
    %c0_99 = arith.constant 0 : index
    %112 = vector.load %arg40[%c0_96, %c2_97, %c0_98, %c0_99] : memref<2x4x32x8xf32, #tpu.memory_space<vmem>>, vector<1x1x32x8xf32>
    %113 = vector.shape_cast %112 : vector<1x1x32x8xf32> to vector<32x8xf32>
    %cst_100 = arith.constant dense<0.000000e+00> : vector<16x8xf32>
    %114 = tpu.matmul %25, %113, %cst_100 {dimension_numbers = #tpu.dot_dimension_numbers<[1], [0], [0], [1], [0, 0, 1, 1], [], []>} : vector<16x32xf32>, vector<32x8xf32>, vector<16x8xf32> -> vector<16x8xf32>
    %c0_101 = arith.constant 0 : index
    %c2_102 = arith.constant 2 : index
    %c0_103 = arith.constant 0 : index
    %c0_104 = arith.constant 0 : index
    %115 = vector.load %arg36[%c0_101, %c2_102, %c0_103, %c0_104] : memref<2x4x1x8xf32, #tpu.memory_space<vmem>>, vector<1x1x1x8xf32>
    %116 = vector.shape_cast %115 : vector<1x1x1x8xf32> to vector<1x8xf32>
    %117 = vector.broadcast %116 : vector<1x8xf32> to vector<16x8xf32>
    %118 = arith.addf %114, %117 : vector<16x8xf32>
    %c0_105 = arith.constant 0 : index
    %c2_106 = arith.constant 2 : index
    %c0_107 = arith.constant 0 : index
    %c0_108 = arith.constant 0 : index
    %119 = vector.load %arg43[%c0_105, %c2_106, %c0_107, %c0_108] : memref<2x4x32x8xf32, #tpu.memory_space<vmem>>, vector<1x1x32x8xf32>
    %120 = vector.shape_cast %119 : vector<1x1x32x8xf32> to vector<32x8xf32>
    %cst_109 = arith.constant dense<0.000000e+00> : vector<16x8xf32>
    %121 = tpu.matmul %25, %120, %cst_109 {dimension_numbers = #tpu.dot_dimension_numbers<[1], [0], [0], [1], [0, 0, 1, 1], [], []>} : vector<16x32xf32>, vector<32x8xf32>, vector<16x8xf32> -> vector<16x8xf32>
    %c0_110 = arith.constant 0 : index
    %c2_111 = arith.constant 2 : index
    %c0_112 = arith.constant 0 : index
    %c0_113 = arith.constant 0 : index
    %122 = vector.load %arg39[%c0_110, %c2_111, %c0_112, %c0_113] : memref<2x4x1x8xf32, #tpu.memory_space<vmem>>, vector<1x1x1x8xf32>
    %123 = vector.shape_cast %122 : vector<1x1x1x8xf32> to vector<1x8xf32>
    %124 = vector.broadcast %123 : vector<1x8xf32> to vector<16x8xf32>
    %125 = arith.addf %121, %124 : vector<16x8xf32>
    %cst_114 = arith.constant dense<0.000000e+00> : vector<16x16xf32>
    %126 = tpu.matmul %111, %118, %cst_114 {dimension_numbers = #tpu.dot_dimension_numbers<[1], [1], [0], [0], [0, 0, 1, 0], [], []>} : vector<16x8xf32>, vector<16x8xf32>, vector<16x16xf32> -> vector<16x16xf32>
    %cst_115 = arith.constant 0.353553385 : f32
    %127 = vector.broadcast %cst_115 : f32 to vector<16x16xf32>
    %128 = arith.mulf %126, %127 : vector<16x16xf32>
    %129 = arith.addf %128, %0 : vector<16x16xf32>
    %cst_116 = arith.constant dense<0xFF800000> : vector<16xf32>
    %130 = vector.multi_reduction <maximumf>, %129, %cst_116 [1] : vector<16x16xf32> to vector<16xf32>
    %131 = vector.shape_cast %130 : vector<16xf32> to vector<16x1xf32>
    %132 = vector.broadcast %131 : vector<16x1xf32> to vector<16x16xf32>
    %133 = arith.subf %129, %132 : vector<16x16xf32>
    %134 = math.exp %133 : vector<16x16xf32>
    %cst_117 = arith.constant dense<0.000000e+00> : vector<16xf32>
    %135 = vector.multi_reduction <add>, %134, %cst_117 [1] : vector<16x16xf32> to vector<16xf32>
    %136 = vector.shape_cast %135 : vector<16xf32> to vector<16x1xf32>
    %137 = tpu.reciprocal %136 {approx = true} : vector<16x1xf32> -> vector<16x1xf32>
    %138 = vector.broadcast %137 : vector<16x1xf32> to vector<16x16xf32>
    %139 = arith.mulf %134, %138 : vector<16x16xf32>
    %cst_118 = arith.constant dense<0.000000e+00> : vector<16x8xf32>
    %140 = tpu.matmul %139, %125, %cst_118 {dimension_numbers = #tpu.dot_dimension_numbers<[1], [0], [0], [1], [0, 0, 1, 1], [], []>} : vector<16x16xf32>, vector<16x8xf32>, vector<16x8xf32> -> vector<16x8xf32>
    %c0_119 = arith.constant 0 : index
    %c2_120 = arith.constant 2 : index
    %c0_121 = arith.constant 0 : index
    %c0_122 = arith.constant 0 : index
    %141 = vector.load %arg41[%c0_119, %c2_120, %c0_121, %c0_122] : memref<2x4x8x32xf32, #tpu.memory_space<vmem>>, vector<1x1x8x32xf32>
    %142 = vector.shape_cast %141 : vector<1x1x8x32xf32> to vector<8x32xf32>
    %cst_123 = arith.constant dense<0.000000e+00> : vector<16x32xf32>
    %143 = tpu.matmul %140, %142, %cst_123 {dimension_numbers = #tpu.dot_dimension_numbers<[1], [0], [0], [1], [0, 0, 1, 1], [], []>} : vector<16x8xf32>, vector<8x32xf32>, vector<16x32xf32> -> vector<16x32xf32>
    %144 = arith.addf %104, %143 : vector<16x32xf32>
    %c0_124 = arith.constant 0 : index
    %c3 = arith.constant 3 : index
    %c0_125 = arith.constant 0 : index
    %c0_126 = arith.constant 0 : index
    %145 = vector.load %arg42[%c0_124, %c3, %c0_125, %c0_126] : memref<2x4x32x8xf32, #tpu.memory_space<vmem>>, vector<1x1x32x8xf32>
    %146 = vector.shape_cast %145 : vector<1x1x32x8xf32> to vector<32x8xf32>
    %cst_127 = arith.constant dense<0.000000e+00> : vector<16x8xf32>
    %147 = tpu.matmul %25, %146, %cst_127 {dimension_numbers = #tpu.dot_dimension_numbers<[1], [0], [0], [1], [0, 0, 1, 1], [], []>} : vector<16x32xf32>, vector<32x8xf32>, vector<16x8xf32> -> vector<16x8xf32>
    %c0_128 = arith.constant 0 : index
    %c3_129 = arith.constant 3 : index
    %c0_130 = arith.constant 0 : index
    %c0_131 = arith.constant 0 : index
    %148 = vector.load %arg38[%c0_128, %c3_129, %c0_130, %c0_131] : memref<2x4x1x8xf32, #tpu.memory_space<vmem>>, vector<1x1x1x8xf32>
    %149 = vector.shape_cast %148 : vector<1x1x1x8xf32> to vector<1x8xf32>
    %150 = vector.broadcast %149 : vector<1x8xf32> to vector<16x8xf32>
    %151 = arith.addf %147, %150 : vector<16x8xf32>
    %c0_132 = arith.constant 0 : index
    %c3_133 = arith.constant 3 : index
    %c0_134 = arith.constant 0 : index
    %c0_135 = arith.constant 0 : index
    %152 = vector.load %arg40[%c0_132, %c3_133, %c0_134, %c0_135] : memref<2x4x32x8xf32, #tpu.memory_space<vmem>>, vector<1x1x32x8xf32>
    %153 = vector.shape_cast %152 : vector<1x1x32x8xf32> to vector<32x8xf32>
    %cst_136 = arith.constant dense<0.000000e+00> : vector<16x8xf32>
    %154 = tpu.matmul %25, %153, %cst_136 {dimension_numbers = #tpu.dot_dimension_numbers<[1], [0], [0], [1], [0, 0, 1, 1], [], []>} : vector<16x32xf32>, vector<32x8xf32>, vector<16x8xf32> -> vector<16x8xf32>
    %c0_137 = arith.constant 0 : index
    %c3_138 = arith.constant 3 : index
    %c0_139 = arith.constant 0 : index
    %c0_140 = arith.constant 0 : index
    %155 = vector.load %arg36[%c0_137, %c3_138, %c0_139, %c0_140] : memref<2x4x1x8xf32, #tpu.memory_space<vmem>>, vector<1x1x1x8xf32>
    %156 = vector.shape_cast %155 : vector<1x1x1x8xf32> to vector<1x8xf32>
    %157 = vector.broadcast %156 : vector<1x8xf32> to vector<16x8xf32>
    %158 = arith.addf %154, %157 : vector<16x8xf32>
    %c0_141 = arith.constant 0 : index
    %c3_142 = arith.constant 3 : index
    %c0_143 = arith.constant 0 : index
    %c0_144 = arith.constant 0 : index
    %159 = vector.load %arg43[%c0_141, %c3_142, %c0_143, %c0_144] : memref<2x4x32x8xf32, #tpu.memory_space<vmem>>, vector<1x1x32x8xf32>
    %160 = vector.shape_cast %159 : vector<1x1x32x8xf32> to vector<32x8xf32>
    %cst_145 = arith.constant dense<0.000000e+00> : vector<16x8xf32>
    %161 = tpu.matmul %25, %160, %cst_145 {dimension_numbers = #tpu.dot_dimension_numbers<[1], [0], [0], [1], [0, 0, 1, 1], [], []>} : vector<16x32xf32>, vector<32x8xf32>, vector<16x8xf32> -> vector<16x8xf32>
    %c0_146 = arith.constant 0 : index
    %c3_147 = arith.constant 3 : index
    %c0_148 = arith.constant 0 : index
    %c0_149 = arith.constant 0 : index
    %162 = vector.load %arg39[%c0_146, %c3_147, %c0_148, %c0_149] : memref<2x4x1x8xf32, #tpu.memory_space<vmem>>, vector<1x1x1x8xf32>
    %163 = vector.shape_cast %162 : vector<1x1x1x8xf32> to vector<1x8xf32>
    %164 = vector.broadcast %163 : vector<1x8xf32> to vector<16x8xf32>
    %165 = arith.addf %161, %164 : vector<16x8xf32>
    %cst_150 = arith.constant dense<0.000000e+00> : vector<16x16xf32>
    %166 = tpu.matmul %151, %158, %cst_150 {dimension_numbers = #tpu.dot_dimension_numbers<[1], [1], [0], [0], [0, 0, 1, 0], [], []>} : vector<16x8xf32>, vector<16x8xf32>, vector<16x16xf32> -> vector<16x16xf32>
    %cst_151 = arith.constant 0.353553385 : f32
    %167 = vector.broadcast %cst_151 : f32 to vector<16x16xf32>
    %168 = arith.mulf %166, %167 : vector<16x16xf32>
    %169 = arith.addf %168, %0 : vector<16x16xf32>
    %cst_152 = arith.constant dense<0xFF800000> : vector<16xf32>
    %170 = vector.multi_reduction <maximumf>, %169, %cst_152 [1] : vector<16x16xf32> to vector<16xf32>
    %171 = vector.shape_cast %170 : vector<16xf32> to vector<16x1xf32>
    %172 = vector.broadcast %171 : vector<16x1xf32> to vector<16x16xf32>
    %173 = arith.subf %169, %172 : vector<16x16xf32>
    %174 = math.exp %173 : vector<16x16xf32>
    %cst_153 = arith.constant dense<0.000000e+00> : vector<16xf32>
    %175 = vector.multi_reduction <add>, %174, %cst_153 [1] : vector<16x16xf32> to vector<16xf32>
    %176 = vector.shape_cast %175 : vector<16xf32> to vector<16x1xf32>
    %177 = tpu.reciprocal %176 {approx = true} : vector<16x1xf32> -> vector<16x1xf32>
    %178 = vector.broadcast %177 : vector<16x1xf32> to vector<16x16xf32>
    %179 = arith.mulf %174, %178 : vector<16x16xf32>
    %cst_154 = arith.constant dense<0.000000e+00> : vector<16x8xf32>
    %180 = tpu.matmul %179, %165, %cst_154 {dimension_numbers = #tpu.dot_dimension_numbers<[1], [0], [0], [1], [0, 0, 1, 1], [], []>} : vector<16x16xf32>, vector<16x8xf32>, vector<16x8xf32> -> vector<16x8xf32>
    %c0_155 = arith.constant 0 : index
    %c3_156 = arith.constant 3 : index
    %c0_157 = arith.constant 0 : index
    %c0_158 = arith.constant 0 : index
    %181 = vector.load %arg41[%c0_155, %c3_156, %c0_157, %c0_158] : memref<2x4x8x32xf32, #tpu.memory_space<vmem>>, vector<1x1x8x32xf32>
    %182 = vector.shape_cast %181 : vector<1x1x8x32xf32> to vector<8x32xf32>
    %cst_159 = arith.constant dense<0.000000e+00> : vector<16x32xf32>
    %183 = tpu.matmul %180, %182, %cst_159 {dimension_numbers = #tpu.dot_dimension_numbers<[1], [0], [0], [1], [0, 0, 1, 1], [], []>} : vector<16x8xf32>, vector<8x32xf32>, vector<16x32xf32> -> vector<16x32xf32>
    %184 = arith.addf %144, %183 : vector<16x32xf32>
    %c0_160 = arith.constant 0 : index
    %c0_161 = arith.constant 0 : index
    %c0_162 = arith.constant 0 : index
    %185 = vector.load %arg37[%c0_160, %c0_161, %c0_162] : memref<2x1x32xf32, #tpu.memory_space<vmem>>, vector<1x1x32xf32>
    %186 = vector.shape_cast %185 : vector<1x1x32xf32> to vector<1x32xf32>
    %187 = vector.broadcast %186 : vector<1x32xf32> to vector<16x32xf32>
    %188 = arith.addf %184, %187 : vector<16x32xf32>
    %189 = arith.addf %25, %188 : vector<16x32xf32>
    %c0_163 = arith.constant 0 : index
    %c0_164 = arith.constant 0 : index
    %c0_165 = arith.constant 0 : index
    %190 = vector.load %arg45[%c0_163, %c0_164, %c0_165] : memref<2x1x32xf32, #tpu.memory_space<vmem>>, vector<1x1x32xf32>
    %191 = vector.shape_cast %190 : vector<1x1x32xf32> to vector<1x32xf32>
    %c0_166 = arith.constant 0 : index
    %c0_167 = arith.constant 0 : index
    %c0_168 = arith.constant 0 : index
    %192 = vector.load %arg44[%c0_166, %c0_167, %c0_168] : memref<2x1x32xf32, #tpu.memory_space<vmem>>, vector<1x1x32xf32>
    %193 = vector.shape_cast %192 : vector<1x1x32xf32> to vector<1x32xf32>
    %cst_169 = arith.constant dense<0.000000e+00> : vector<16xf32>
    %194 = vector.multi_reduction <add>, %189, %cst_169 [1] : vector<16x32xf32> to vector<16xf32>
    %195 = vector.shape_cast %194 : vector<16xf32> to vector<16x1xf32>
    %cst_170 = arith.constant 3.200000e+01 : f32
    %196 = vector.broadcast %cst_170 : f32 to vector<16x1xf32>
    %197 = arith.divf %195, %196 : vector<16x1xf32>
    %198 = vector.broadcast %197 : vector<16x1xf32> to vector<16x32xf32>
    %199 = arith.subf %189, %198 : vector<16x32xf32>
    %200 = arith.mulf %199, %199 : vector<16x32xf32>
    %cst_171 = arith.constant dense<0.000000e+00> : vector<16xf32>
    %201 = vector.multi_reduction <add>, %200, %cst_171 [1] : vector<16x32xf32> to vector<16xf32>
    %202 = vector.shape_cast %201 : vector<16xf32> to vector<16x1xf32>
    %cst_172 = arith.constant 3.200000e+01 : f32
    %203 = vector.broadcast %cst_172 : f32 to vector<16x1xf32>
    %204 = arith.divf %202, %203 : vector<16x1xf32>
    %cst_173 = arith.constant 9.99999974E-6 : f32
    %205 = vector.broadcast %cst_173 : f32 to vector<16x1xf32>
    %206 = arith.addf %204, %205 : vector<16x1xf32>
    %207 = math.rsqrt %206 : vector<16x1xf32>
    %208 = vector.broadcast %207 : vector<16x1xf32> to vector<16x32xf32>
    %209 = arith.mulf %199, %208 : vector<16x32xf32>
    %210 = vector.broadcast %191 : vector<1x32xf32> to vector<16x32xf32>
    %211 = arith.mulf %209, %210 : vector<16x32xf32>
    %212 = vector.broadcast %193 : vector<1x32xf32> to vector<16x32xf32>
    %213 = arith.addf %211, %212 : vector<16x32xf32>
    %c0_174 = arith.constant 0 : index
    %c0_175 = arith.constant 0 : index
    %c0_176 = arith.constant 0 : index
    %214 = vector.load %arg47[%c0_174, %c0_175, %c0_176] : memref<2x32x64xf32, #tpu.memory_space<vmem>>, vector<1x32x64xf32>
    %215 = vector.shape_cast %214 : vector<1x32x64xf32> to vector<32x64xf32>
    %cst_177 = arith.constant dense<0.000000e+00> : vector<16x64xf32>
    %216 = tpu.matmul %213, %215, %cst_177 {dimension_numbers = #tpu.dot_dimension_numbers<[1], [0], [0], [1], [0, 0, 1, 1], [], []>} : vector<16x32xf32>, vector<32x64xf32>, vector<16x64xf32> -> vector<16x64xf32>
    %c0_178 = arith.constant 0 : index
    %c0_179 = arith.constant 0 : index
    %c0_180 = arith.constant 0 : index
    %217 = vector.load %arg46[%c0_178, %c0_179, %c0_180] : memref<2x1x64xf32, #tpu.memory_space<vmem>>, vector<1x1x64xf32>
    %218 = vector.shape_cast %217 : vector<1x1x64xf32> to vector<1x64xf32>
    %219 = vector.broadcast %218 : vector<1x64xf32> to vector<16x64xf32>
    %220 = arith.addf %216, %219 : vector<16x64xf32>
    %221 = arith.mulf %220, %220 : vector<16x64xf32>
    %222 = arith.mulf %220, %221 : vector<16x64xf32>
    %cst_181 = arith.constant 4.471500e-02 : f32
    %223 = vector.broadcast %cst_181 : f32 to vector<16x64xf32>
    %224 = arith.mulf %223, %222 : vector<16x64xf32>
    %225 = arith.addf %220, %224 : vector<16x64xf32>
    %cst_182 = arith.constant 0.797884583 : f32
    %226 = vector.broadcast %cst_182 : f32 to vector<16x64xf32>
    %227 = arith.mulf %226, %225 : vector<16x64xf32>
    %228 = math.tanh %227 : vector<16x64xf32>
    %cst_183 = arith.constant 1.000000e+00 : f32
    %229 = vector.broadcast %cst_183 : f32 to vector<16x64xf32>
    %230 = arith.addf %229, %228 : vector<16x64xf32>
    %cst_184 = arith.constant 5.000000e-01 : f32
    %231 = vector.broadcast %cst_184 : f32 to vector<16x64xf32>
    %232 = arith.mulf %231, %230 : vector<16x64xf32>
    %233 = arith.mulf %220, %232 : vector<16x64xf32>
    %c0_185 = arith.constant 0 : index
    %c0_186 = arith.constant 0 : index
    %c0_187 = arith.constant 0 : index
    %234 = vector.load %arg49[%c0_185, %c0_186, %c0_187] : memref<2x64x32xf32, #tpu.memory_space<vmem>>, vector<1x64x32xf32>
    %235 = vector.shape_cast %234 : vector<1x64x32xf32> to vector<64x32xf32>
    %cst_188 = arith.constant dense<0.000000e+00> : vector<16x32xf32>
    %236 = tpu.matmul %233, %235, %cst_188 {dimension_numbers = #tpu.dot_dimension_numbers<[1], [0], [0], [1], [0, 0, 1, 1], [], []>} : vector<16x64xf32>, vector<64x32xf32>, vector<16x32xf32> -> vector<16x32xf32>
    %c0_189 = arith.constant 0 : index
    %c0_190 = arith.constant 0 : index
    %c0_191 = arith.constant 0 : index
    %237 = vector.load %arg48[%c0_189, %c0_190, %c0_191] : memref<2x1x32xf32, #tpu.memory_space<vmem>>, vector<1x1x32xf32>
    %238 = vector.shape_cast %237 : vector<1x1x32xf32> to vector<1x32xf32>
    %239 = vector.broadcast %238 : vector<1x32xf32> to vector<16x32xf32>
    %240 = arith.addf %236, %239 : vector<16x32xf32>
    %241 = arith.addf %213, %240 : vector<16x32xf32>
    %c0_192 = arith.constant 0 : index
    %c0_193 = arith.constant 0 : index
    %c0_194 = arith.constant 0 : index
    %242 = vector.load %arg51[%c0_192, %c0_193, %c0_194] : memref<2x1x32xf32, #tpu.memory_space<vmem>>, vector<1x1x32xf32>
    %243 = vector.shape_cast %242 : vector<1x1x32xf32> to vector<1x32xf32>
    %c0_195 = arith.constant 0 : index
    %c0_196 = arith.constant 0 : index
    %c0_197 = arith.constant 0 : index
    %244 = vector.load %arg50[%c0_195, %c0_196, %c0_197] : memref<2x1x32xf32, #tpu.memory_space<vmem>>, vector<1x1x32xf32>
    %245 = vector.shape_cast %244 : vector<1x1x32xf32> to vector<1x32xf32>
    %cst_198 = arith.constant dense<0.000000e+00> : vector<16xf32>
    %246 = vector.multi_reduction <add>, %241, %cst_198 [1] : vector<16x32xf32> to vector<16xf32>
    %247 = vector.shape_cast %246 : vector<16xf32> to vector<16x1xf32>
    %cst_199 = arith.constant 3.200000e+01 : f32
    %248 = vector.broadcast %cst_199 : f32 to vector<16x1xf32>
    %249 = arith.divf %247, %248 : vector<16x1xf32>
    %250 = vector.broadcast %249 : vector<16x1xf32> to vector<16x32xf32>
    %251 = arith.subf %241, %250 : vector<16x32xf32>
    %252 = arith.mulf %251, %251 : vector<16x32xf32>
    %cst_200 = arith.constant dense<0.000000e+00> : vector<16xf32>
    %253 = vector.multi_reduction <add>, %252, %cst_200 [1] : vector<16x32xf32> to vector<16xf32>
    %254 = vector.shape_cast %253 : vector<16xf32> to vector<16x1xf32>
    %cst_201 = arith.constant 3.200000e+01 : f32
    %255 = vector.broadcast %cst_201 : f32 to vector<16x1xf32>
    %256 = arith.divf %254, %255 : vector<16x1xf32>
    %cst_202 = arith.constant 9.99999974E-6 : f32
    %257 = vector.broadcast %cst_202 : f32 to vector<16x1xf32>
    %258 = arith.addf %256, %257 : vector<16x1xf32>
    %259 = math.rsqrt %258 : vector<16x1xf32>
    %260 = vector.broadcast %259 : vector<16x1xf32> to vector<16x32xf32>
    %261 = arith.mulf %251, %260 : vector<16x32xf32>
    %262 = vector.broadcast %243 : vector<1x32xf32> to vector<16x32xf32>
    %263 = arith.mulf %261, %262 : vector<16x32xf32>
    %264 = vector.broadcast %245 : vector<1x32xf32> to vector<16x32xf32>
    %265 = arith.addf %263, %264 : vector<16x32xf32>
    %c1_203 = arith.constant 1 : index
    %c0_204 = arith.constant 0 : index
    %c0_205 = arith.constant 0 : index
    %c0_206 = arith.constant 0 : index
    %266 = vector.load %arg42[%c1_203, %c0_204, %c0_205, %c0_206] : memref<2x4x32x8xf32, #tpu.memory_space<vmem>>, vector<1x1x32x8xf32>
    %267 = vector.shape_cast %266 : vector<1x1x32x8xf32> to vector<32x8xf32>
    %cst_207 = arith.constant dense<0.000000e+00> : vector<16x8xf32>
    %268 = tpu.matmul %265, %267, %cst_207 {dimension_numbers = #tpu.dot_dimension_numbers<[1], [0], [0], [1], [0, 0, 1, 1], [], []>} : vector<16x32xf32>, vector<32x8xf32>, vector<16x8xf32> -> vector<16x8xf32>
    %c1_208 = arith.constant 1 : index
    %c0_209 = arith.constant 0 : index
    %c0_210 = arith.constant 0 : index
    %c0_211 = arith.constant 0 : index
    %269 = vector.load %arg38[%c1_208, %c0_209, %c0_210, %c0_211] : memref<2x4x1x8xf32, #tpu.memory_space<vmem>>, vector<1x1x1x8xf32>
    %270 = vector.shape_cast %269 : vector<1x1x1x8xf32> to vector<1x8xf32>
    %271 = vector.broadcast %270 : vector<1x8xf32> to vector<16x8xf32>
    %272 = arith.addf %268, %271 : vector<16x8xf32>
    %c1_212 = arith.constant 1 : index
    %c0_213 = arith.constant 0 : index
    %c0_214 = arith.constant 0 : index
    %c0_215 = arith.constant 0 : index
    %273 = vector.load %arg40[%c1_212, %c0_213, %c0_214, %c0_215] : memref<2x4x32x8xf32, #tpu.memory_space<vmem>>, vector<1x1x32x8xf32>
    %274 = vector.shape_cast %273 : vector<1x1x32x8xf32> to vector<32x8xf32>
    %cst_216 = arith.constant dense<0.000000e+00> : vector<16x8xf32>
    %275 = tpu.matmul %265, %274, %cst_216 {dimension_numbers = #tpu.dot_dimension_numbers<[1], [0], [0], [1], [0, 0, 1, 1], [], []>} : vector<16x32xf32>, vector<32x8xf32>, vector<16x8xf32> -> vector<16x8xf32>
    %c1_217 = arith.constant 1 : index
    %c0_218 = arith.constant 0 : index
    %c0_219 = arith.constant 0 : index
    %c0_220 = arith.constant 0 : index
    %276 = vector.load %arg36[%c1_217, %c0_218, %c0_219, %c0_220] : memref<2x4x1x8xf32, #tpu.memory_space<vmem>>, vector<1x1x1x8xf32>
    %277 = vector.shape_cast %276 : vector<1x1x1x8xf32> to vector<1x8xf32>
    %278 = vector.broadcast %277 : vector<1x8xf32> to vector<16x8xf32>
    %279 = arith.addf %275, %278 : vector<16x8xf32>
    %c1_221 = arith.constant 1 : index
    %c0_222 = arith.constant 0 : index
    %c0_223 = arith.constant 0 : index
    %c0_224 = arith.constant 0 : index
    %280 = vector.load %arg43[%c1_221, %c0_222, %c0_223, %c0_224] : memref<2x4x32x8xf32, #tpu.memory_space<vmem>>, vector<1x1x32x8xf32>
    %281 = vector.shape_cast %280 : vector<1x1x32x8xf32> to vector<32x8xf32>
    %cst_225 = arith.constant dense<0.000000e+00> : vector<16x8xf32>
    %282 = tpu.matmul %265, %281, %cst_225 {dimension_numbers = #tpu.dot_dimension_numbers<[1], [0], [0], [1], [0, 0, 1, 1], [], []>} : vector<16x32xf32>, vector<32x8xf32>, vector<16x8xf32> -> vector<16x8xf32>
    %c1_226 = arith.constant 1 : index
    %c0_227 = arith.constant 0 : index
    %c0_228 = arith.constant 0 : index
    %c0_229 = arith.constant 0 : index
    %283 = vector.load %arg39[%c1_226, %c0_227, %c0_228, %c0_229] : memref<2x4x1x8xf32, #tpu.memory_space<vmem>>, vector<1x1x1x8xf32>
    %284 = vector.shape_cast %283 : vector<1x1x1x8xf32> to vector<1x8xf32>
    %285 = vector.broadcast %284 : vector<1x8xf32> to vector<16x8xf32>
    %286 = arith.addf %282, %285 : vector<16x8xf32>
    %cst_230 = arith.constant dense<0.000000e+00> : vector<16x16xf32>
    %287 = tpu.matmul %272, %279, %cst_230 {dimension_numbers = #tpu.dot_dimension_numbers<[1], [1], [0], [0], [0, 0, 1, 0], [], []>} : vector<16x8xf32>, vector<16x8xf32>, vector<16x16xf32> -> vector<16x16xf32>
    %cst_231 = arith.constant 0.353553385 : f32
    %288 = vector.broadcast %cst_231 : f32 to vector<16x16xf32>
    %289 = arith.mulf %287, %288 : vector<16x16xf32>
    %290 = arith.addf %289, %0 : vector<16x16xf32>
    %cst_232 = arith.constant dense<0xFF800000> : vector<16xf32>
    %291 = vector.multi_reduction <maximumf>, %290, %cst_232 [1] : vector<16x16xf32> to vector<16xf32>
    %292 = vector.shape_cast %291 : vector<16xf32> to vector<16x1xf32>
    %293 = vector.broadcast %292 : vector<16x1xf32> to vector<16x16xf32>
    %294 = arith.subf %290, %293 : vector<16x16xf32>
    %295 = math.exp %294 : vector<16x16xf32>
    %cst_233 = arith.constant dense<0.000000e+00> : vector<16xf32>
    %296 = vector.multi_reduction <add>, %295, %cst_233 [1] : vector<16x16xf32> to vector<16xf32>
    %297 = vector.shape_cast %296 : vector<16xf32> to vector<16x1xf32>
    %298 = tpu.reciprocal %297 {approx = true} : vector<16x1xf32> -> vector<16x1xf32>
    %299 = vector.broadcast %298 : vector<16x1xf32> to vector<16x16xf32>
    %300 = arith.mulf %295, %299 : vector<16x16xf32>
    %cst_234 = arith.constant dense<0.000000e+00> : vector<16x8xf32>
    %301 = tpu.matmul %300, %286, %cst_234 {dimension_numbers = #tpu.dot_dimension_numbers<[1], [0], [0], [1], [0, 0, 1, 1], [], []>} : vector<16x16xf32>, vector<16x8xf32>, vector<16x8xf32> -> vector<16x8xf32>
    %c1_235 = arith.constant 1 : index
    %c0_236 = arith.constant 0 : index
    %c0_237 = arith.constant 0 : index
    %c0_238 = arith.constant 0 : index
    %302 = vector.load %arg41[%c1_235, %c0_236, %c0_237, %c0_238] : memref<2x4x8x32xf32, #tpu.memory_space<vmem>>, vector<1x1x8x32xf32>
    %303 = vector.shape_cast %302 : vector<1x1x8x32xf32> to vector<8x32xf32>
    %cst_239 = arith.constant dense<0.000000e+00> : vector<16x32xf32>
    %304 = tpu.matmul %301, %303, %cst_239 {dimension_numbers = #tpu.dot_dimension_numbers<[1], [0], [0], [1], [0, 0, 1, 1], [], []>} : vector<16x8xf32>, vector<8x32xf32>, vector<16x32xf32> -> vector<16x32xf32>
    %c1_240 = arith.constant 1 : index
    %c1_241 = arith.constant 1 : index
    %c0_242 = arith.constant 0 : index
    %c0_243 = arith.constant 0 : index
    %305 = vector.load %arg42[%c1_240, %c1_241, %c0_242, %c0_243] : memref<2x4x32x8xf32, #tpu.memory_space<vmem>>, vector<1x1x32x8xf32>
    %306 = vector.shape_cast %305 : vector<1x1x32x8xf32> to vector<32x8xf32>
    %cst_244 = arith.constant dense<0.000000e+00> : vector<16x8xf32>
    %307 = tpu.matmul %265, %306, %cst_244 {dimension_numbers = #tpu.dot_dimension_numbers<[1], [0], [0], [1], [0, 0, 1, 1], [], []>} : vector<16x32xf32>, vector<32x8xf32>, vector<16x8xf32> -> vector<16x8xf32>
    %c1_245 = arith.constant 1 : index
    %c1_246 = arith.constant 1 : index
    %c0_247 = arith.constant 0 : index
    %c0_248 = arith.constant 0 : index
    %308 = vector.load %arg38[%c1_245, %c1_246, %c0_247, %c0_248] : memref<2x4x1x8xf32, #tpu.memory_space<vmem>>, vector<1x1x1x8xf32>
    %309 = vector.shape_cast %308 : vector<1x1x1x8xf32> to vector<1x8xf32>
    %310 = vector.broadcast %309 : vector<1x8xf32> to vector<16x8xf32>
    %311 = arith.addf %307, %310 : vector<16x8xf32>
    %c1_249 = arith.constant 1 : index
    %c1_250 = arith.constant 1 : index
    %c0_251 = arith.constant 0 : index
    %c0_252 = arith.constant 0 : index
    %312 = vector.load %arg40[%c1_249, %c1_250, %c0_251, %c0_252] : memref<2x4x32x8xf32, #tpu.memory_space<vmem>>, vector<1x1x32x8xf32>
    %313 = vector.shape_cast %312 : vector<1x1x32x8xf32> to vector<32x8xf32>
    %cst_253 = arith.constant dense<0.000000e+00> : vector<16x8xf32>
    %314 = tpu.matmul %265, %313, %cst_253 {dimension_numbers = #tpu.dot_dimension_numbers<[1], [0], [0], [1], [0, 0, 1, 1], [], []>} : vector<16x32xf32>, vector<32x8xf32>, vector<16x8xf32> -> vector<16x8xf32>
    %c1_254 = arith.constant 1 : index
    %c1_255 = arith.constant 1 : index
    %c0_256 = arith.constant 0 : index
    %c0_257 = arith.constant 0 : index
    %315 = vector.load %arg36[%c1_254, %c1_255, %c0_256, %c0_257] : memref<2x4x1x8xf32, #tpu.memory_space<vmem>>, vector<1x1x1x8xf32>
    %316 = vector.shape_cast %315 : vector<1x1x1x8xf32> to vector<1x8xf32>
    %317 = vector.broadcast %316 : vector<1x8xf32> to vector<16x8xf32>
    %318 = arith.addf %314, %317 : vector<16x8xf32>
    %c1_258 = arith.constant 1 : index
    %c1_259 = arith.constant 1 : index
    %c0_260 = arith.constant 0 : index
    %c0_261 = arith.constant 0 : index
    %319 = vector.load %arg43[%c1_258, %c1_259, %c0_260, %c0_261] : memref<2x4x32x8xf32, #tpu.memory_space<vmem>>, vector<1x1x32x8xf32>
    %320 = vector.shape_cast %319 : vector<1x1x32x8xf32> to vector<32x8xf32>
    %cst_262 = arith.constant dense<0.000000e+00> : vector<16x8xf32>
    %321 = tpu.matmul %265, %320, %cst_262 {dimension_numbers = #tpu.dot_dimension_numbers<[1], [0], [0], [1], [0, 0, 1, 1], [], []>} : vector<16x32xf32>, vector<32x8xf32>, vector<16x8xf32> -> vector<16x8xf32>
    %c1_263 = arith.constant 1 : index
    %c1_264 = arith.constant 1 : index
    %c0_265 = arith.constant 0 : index
    %c0_266 = arith.constant 0 : index
    %322 = vector.load %arg39[%c1_263, %c1_264, %c0_265, %c0_266] : memref<2x4x1x8xf32, #tpu.memory_space<vmem>>, vector<1x1x1x8xf32>
    %323 = vector.shape_cast %322 : vector<1x1x1x8xf32> to vector<1x8xf32>
    %324 = vector.broadcast %323 : vector<1x8xf32> to vector<16x8xf32>
    %325 = arith.addf %321, %324 : vector<16x8xf32>
    %cst_267 = arith.constant dense<0.000000e+00> : vector<16x16xf32>
    %326 = tpu.matmul %311, %318, %cst_267 {dimension_numbers = #tpu.dot_dimension_numbers<[1], [1], [0], [0], [0, 0, 1, 0], [], []>} : vector<16x8xf32>, vector<16x8xf32>, vector<16x16xf32> -> vector<16x16xf32>
    %cst_268 = arith.constant 0.353553385 : f32
    %327 = vector.broadcast %cst_268 : f32 to vector<16x16xf32>
    %328 = arith.mulf %326, %327 : vector<16x16xf32>
    %329 = arith.addf %328, %0 : vector<16x16xf32>
    %cst_269 = arith.constant dense<0xFF800000> : vector<16xf32>
    %330 = vector.multi_reduction <maximumf>, %329, %cst_269 [1] : vector<16x16xf32> to vector<16xf32>
    %331 = vector.shape_cast %330 : vector<16xf32> to vector<16x1xf32>
    %332 = vector.broadcast %331 : vector<16x1xf32> to vector<16x16xf32>
    %333 = arith.subf %329, %332 : vector<16x16xf32>
    %334 = math.exp %333 : vector<16x16xf32>
    %cst_270 = arith.constant dense<0.000000e+00> : vector<16xf32>
    %335 = vector.multi_reduction <add>, %334, %cst_270 [1] : vector<16x16xf32> to vector<16xf32>
    %336 = vector.shape_cast %335 : vector<16xf32> to vector<16x1xf32>
    %337 = tpu.reciprocal %336 {approx = true} : vector<16x1xf32> -> vector<16x1xf32>
    %338 = vector.broadcast %337 : vector<16x1xf32> to vector<16x16xf32>
    %339 = arith.mulf %334, %338 : vector<16x16xf32>
    %cst_271 = arith.constant dense<0.000000e+00> : vector<16x8xf32>
    %340 = tpu.matmul %339, %325, %cst_271 {dimension_numbers = #tpu.dot_dimension_numbers<[1], [0], [0], [1], [0, 0, 1, 1], [], []>} : vector<16x16xf32>, vector<16x8xf32>, vector<16x8xf32> -> vector<16x8xf32>
    %c1_272 = arith.constant 1 : index
    %c1_273 = arith.constant 1 : index
    %c0_274 = arith.constant 0 : index
    %c0_275 = arith.constant 0 : index
    %341 = vector.load %arg41[%c1_272, %c1_273, %c0_274, %c0_275] : memref<2x4x8x32xf32, #tpu.memory_space<vmem>>, vector<1x1x8x32xf32>
    %342 = vector.shape_cast %341 : vector<1x1x8x32xf32> to vector<8x32xf32>
    %cst_276 = arith.constant dense<0.000000e+00> : vector<16x32xf32>
    %343 = tpu.matmul %340, %342, %cst_276 {dimension_numbers = #tpu.dot_dimension_numbers<[1], [0], [0], [1], [0, 0, 1, 1], [], []>} : vector<16x8xf32>, vector<8x32xf32>, vector<16x32xf32> -> vector<16x32xf32>
    %344 = arith.addf %304, %343 : vector<16x32xf32>
    %c1_277 = arith.constant 1 : index
    %c2_278 = arith.constant 2 : index
    %c0_279 = arith.constant 0 : index
    %c0_280 = arith.constant 0 : index
    %345 = vector.load %arg42[%c1_277, %c2_278, %c0_279, %c0_280] : memref<2x4x32x8xf32, #tpu.memory_space<vmem>>, vector<1x1x32x8xf32>
    %346 = vector.shape_cast %345 : vector<1x1x32x8xf32> to vector<32x8xf32>
    %cst_281 = arith.constant dense<0.000000e+00> : vector<16x8xf32>
    %347 = tpu.matmul %265, %346, %cst_281 {dimension_numbers = #tpu.dot_dimension_numbers<[1], [0], [0], [1], [0, 0, 1, 1], [], []>} : vector<16x32xf32>, vector<32x8xf32>, vector<16x8xf32> -> vector<16x8xf32>
    %c1_282 = arith.constant 1 : index
    %c2_283 = arith.constant 2 : index
    %c0_284 = arith.constant 0 : index
    %c0_285 = arith.constant 0 : index
    %348 = vector.load %arg38[%c1_282, %c2_283, %c0_284, %c0_285] : memref<2x4x1x8xf32, #tpu.memory_space<vmem>>, vector<1x1x1x8xf32>
    %349 = vector.shape_cast %348 : vector<1x1x1x8xf32> to vector<1x8xf32>
    %350 = vector.broadcast %349 : vector<1x8xf32> to vector<16x8xf32>
    %351 = arith.addf %347, %350 : vector<16x8xf32>
    %c1_286 = arith.constant 1 : index
    %c2_287 = arith.constant 2 : index
    %c0_288 = arith.constant 0 : index
    %c0_289 = arith.constant 0 : index
    %352 = vector.load %arg40[%c1_286, %c2_287, %c0_288, %c0_289] : memref<2x4x32x8xf32, #tpu.memory_space<vmem>>, vector<1x1x32x8xf32>
    %353 = vector.shape_cast %352 : vector<1x1x32x8xf32> to vector<32x8xf32>
    %cst_290 = arith.constant dense<0.000000e+00> : vector<16x8xf32>
    %354 = tpu.matmul %265, %353, %cst_290 {dimension_numbers = #tpu.dot_dimension_numbers<[1], [0], [0], [1], [0, 0, 1, 1], [], []>} : vector<16x32xf32>, vector<32x8xf32>, vector<16x8xf32> -> vector<16x8xf32>
    %c1_291 = arith.constant 1 : index
    %c2_292 = arith.constant 2 : index
    %c0_293 = arith.constant 0 : index
    %c0_294 = arith.constant 0 : index
    %355 = vector.load %arg36[%c1_291, %c2_292, %c0_293, %c0_294] : memref<2x4x1x8xf32, #tpu.memory_space<vmem>>, vector<1x1x1x8xf32>
    %356 = vector.shape_cast %355 : vector<1x1x1x8xf32> to vector<1x8xf32>
    %357 = vector.broadcast %356 : vector<1x8xf32> to vector<16x8xf32>
    %358 = arith.addf %354, %357 : vector<16x8xf32>
    %c1_295 = arith.constant 1 : index
    %c2_296 = arith.constant 2 : index
    %c0_297 = arith.constant 0 : index
    %c0_298 = arith.constant 0 : index
    %359 = vector.load %arg43[%c1_295, %c2_296, %c0_297, %c0_298] : memref<2x4x32x8xf32, #tpu.memory_space<vmem>>, vector<1x1x32x8xf32>
    %360 = vector.shape_cast %359 : vector<1x1x32x8xf32> to vector<32x8xf32>
    %cst_299 = arith.constant dense<0.000000e+00> : vector<16x8xf32>
    %361 = tpu.matmul %265, %360, %cst_299 {dimension_numbers = #tpu.dot_dimension_numbers<[1], [0], [0], [1], [0, 0, 1, 1], [], []>} : vector<16x32xf32>, vector<32x8xf32>, vector<16x8xf32> -> vector<16x8xf32>
    %c1_300 = arith.constant 1 : index
    %c2_301 = arith.constant 2 : index
    %c0_302 = arith.constant 0 : index
    %c0_303 = arith.constant 0 : index
    %362 = vector.load %arg39[%c1_300, %c2_301, %c0_302, %c0_303] : memref<2x4x1x8xf32, #tpu.memory_space<vmem>>, vector<1x1x1x8xf32>
    %363 = vector.shape_cast %362 : vector<1x1x1x8xf32> to vector<1x8xf32>
    %364 = vector.broadcast %363 : vector<1x8xf32> to vector<16x8xf32>
    %365 = arith.addf %361, %364 : vector<16x8xf32>
    %cst_304 = arith.constant dense<0.000000e+00> : vector<16x16xf32>
    %366 = tpu.matmul %351, %358, %cst_304 {dimension_numbers = #tpu.dot_dimension_numbers<[1], [1], [0], [0], [0, 0, 1, 0], [], []>} : vector<16x8xf32>, vector<16x8xf32>, vector<16x16xf32> -> vector<16x16xf32>
    %cst_305 = arith.constant 0.353553385 : f32
    %367 = vector.broadcast %cst_305 : f32 to vector<16x16xf32>
    %368 = arith.mulf %366, %367 : vector<16x16xf32>
    %369 = arith.addf %368, %0 : vector<16x16xf32>
    %cst_306 = arith.constant dense<0xFF800000> : vector<16xf32>
    %370 = vector.multi_reduction <maximumf>, %369, %cst_306 [1] : vector<16x16xf32> to vector<16xf32>
    %371 = vector.shape_cast %370 : vector<16xf32> to vector<16x1xf32>
    %372 = vector.broadcast %371 : vector<16x1xf32> to vector<16x16xf32>
    %373 = arith.subf %369, %372 : vector<16x16xf32>
    %374 = math.exp %373 : vector<16x16xf32>
    %cst_307 = arith.constant dense<0.000000e+00> : vector<16xf32>
    %375 = vector.multi_reduction <add>, %374, %cst_307 [1] : vector<16x16xf32> to vector<16xf32>
    %376 = vector.shape_cast %375 : vector<16xf32> to vector<16x1xf32>
    %377 = tpu.reciprocal %376 {approx = true} : vector<16x1xf32> -> vector<16x1xf32>
    %378 = vector.broadcast %377 : vector<16x1xf32> to vector<16x16xf32>
    %379 = arith.mulf %374, %378 : vector<16x16xf32>
    %cst_308 = arith.constant dense<0.000000e+00> : vector<16x8xf32>
    %380 = tpu.matmul %379, %365, %cst_308 {dimension_numbers = #tpu.dot_dimension_numbers<[1], [0], [0], [1], [0, 0, 1, 1], [], []>} : vector<16x16xf32>, vector<16x8xf32>, vector<16x8xf32> -> vector<16x8xf32>
    %c1_309 = arith.constant 1 : index
    %c2_310 = arith.constant 2 : index
    %c0_311 = arith.constant 0 : index
    %c0_312 = arith.constant 0 : index
    %381 = vector.load %arg41[%c1_309, %c2_310, %c0_311, %c0_312] : memref<2x4x8x32xf32, #tpu.memory_space<vmem>>, vector<1x1x8x32xf32>
    %382 = vector.shape_cast %381 : vector<1x1x8x32xf32> to vector<8x32xf32>
    %cst_313 = arith.constant dense<0.000000e+00> : vector<16x32xf32>
    %383 = tpu.matmul %380, %382, %cst_313 {dimension_numbers = #tpu.dot_dimension_numbers<[1], [0], [0], [1], [0, 0, 1, 1], [], []>} : vector<16x8xf32>, vector<8x32xf32>, vector<16x32xf32> -> vector<16x32xf32>
    %384 = arith.addf %344, %383 : vector<16x32xf32>
    %c1_314 = arith.constant 1 : index
    %c3_315 = arith.constant 3 : index
    %c0_316 = arith.constant 0 : index
    %c0_317 = arith.constant 0 : index
    %385 = vector.load %arg42[%c1_314, %c3_315, %c0_316, %c0_317] : memref<2x4x32x8xf32, #tpu.memory_space<vmem>>, vector<1x1x32x8xf32>
    %386 = vector.shape_cast %385 : vector<1x1x32x8xf32> to vector<32x8xf32>
    %cst_318 = arith.constant dense<0.000000e+00> : vector<16x8xf32>
    %387 = tpu.matmul %265, %386, %cst_318 {dimension_numbers = #tpu.dot_dimension_numbers<[1], [0], [0], [1], [0, 0, 1, 1], [], []>} : vector<16x32xf32>, vector<32x8xf32>, vector<16x8xf32> -> vector<16x8xf32>
    %c1_319 = arith.constant 1 : index
    %c3_320 = arith.constant 3 : index
    %c0_321 = arith.constant 0 : index
    %c0_322 = arith.constant 0 : index
    %388 = vector.load %arg38[%c1_319, %c3_320, %c0_321, %c0_322] : memref<2x4x1x8xf32, #tpu.memory_space<vmem>>, vector<1x1x1x8xf32>
    %389 = vector.shape_cast %388 : vector<1x1x1x8xf32> to vector<1x8xf32>
    %390 = vector.broadcast %389 : vector<1x8xf32> to vector<16x8xf32>
    %391 = arith.addf %387, %390 : vector<16x8xf32>
    %c1_323 = arith.constant 1 : index
    %c3_324 = arith.constant 3 : index
    %c0_325 = arith.constant 0 : index
    %c0_326 = arith.constant 0 : index
    %392 = vector.load %arg40[%c1_323, %c3_324, %c0_325, %c0_326] : memref<2x4x32x8xf32, #tpu.memory_space<vmem>>, vector<1x1x32x8xf32>
    %393 = vector.shape_cast %392 : vector<1x1x32x8xf32> to vector<32x8xf32>
    %cst_327 = arith.constant dense<0.000000e+00> : vector<16x8xf32>
    %394 = tpu.matmul %265, %393, %cst_327 {dimension_numbers = #tpu.dot_dimension_numbers<[1], [0], [0], [1], [0, 0, 1, 1], [], []>} : vector<16x32xf32>, vector<32x8xf32>, vector<16x8xf32> -> vector<16x8xf32>
    %c1_328 = arith.constant 1 : index
    %c3_329 = arith.constant 3 : index
    %c0_330 = arith.constant 0 : index
    %c0_331 = arith.constant 0 : index
    %395 = vector.load %arg36[%c1_328, %c3_329, %c0_330, %c0_331] : memref<2x4x1x8xf32, #tpu.memory_space<vmem>>, vector<1x1x1x8xf32>
    %396 = vector.shape_cast %395 : vector<1x1x1x8xf32> to vector<1x8xf32>
    %397 = vector.broadcast %396 : vector<1x8xf32> to vector<16x8xf32>
    %398 = arith.addf %394, %397 : vector<16x8xf32>
    %c1_332 = arith.constant 1 : index
    %c3_333 = arith.constant 3 : index
    %c0_334 = arith.constant 0 : index
    %c0_335 = arith.constant 0 : index
    %399 = vector.load %arg43[%c1_332, %c3_333, %c0_334, %c0_335] : memref<2x4x32x8xf32, #tpu.memory_space<vmem>>, vector<1x1x32x8xf32>
    %400 = vector.shape_cast %399 : vector<1x1x32x8xf32> to vector<32x8xf32>
    %cst_336 = arith.constant dense<0.000000e+00> : vector<16x8xf32>
    %401 = tpu.matmul %265, %400, %cst_336 {dimension_numbers = #tpu.dot_dimension_numbers<[1], [0], [0], [1], [0, 0, 1, 1], [], []>} : vector<16x32xf32>, vector<32x8xf32>, vector<16x8xf32> -> vector<16x8xf32>
    %c1_337 = arith.constant 1 : index
    %c3_338 = arith.constant 3 : index
    %c0_339 = arith.constant 0 : index
    %c0_340 = arith.constant 0 : index
    %402 = vector.load %arg39[%c1_337, %c3_338, %c0_339, %c0_340] : memref<2x4x1x8xf32, #tpu.memory_space<vmem>>, vector<1x1x1x8xf32>
    %403 = vector.shape_cast %402 : vector<1x1x1x8xf32> to vector<1x8xf32>
    %404 = vector.broadcast %403 : vector<1x8xf32> to vector<16x8xf32>
    %405 = arith.addf %401, %404 : vector<16x8xf32>
    %cst_341 = arith.constant dense<0.000000e+00> : vector<16x16xf32>
    %406 = tpu.matmul %391, %398, %cst_341 {dimension_numbers = #tpu.dot_dimension_numbers<[1], [1], [0], [0], [0, 0, 1, 0], [], []>} : vector<16x8xf32>, vector<16x8xf32>, vector<16x16xf32> -> vector<16x16xf32>
    %cst_342 = arith.constant 0.353553385 : f32
    %407 = vector.broadcast %cst_342 : f32 to vector<16x16xf32>
    %408 = arith.mulf %406, %407 : vector<16x16xf32>
    %409 = arith.addf %408, %0 : vector<16x16xf32>
    %cst_343 = arith.constant dense<0xFF800000> : vector<16xf32>
    %410 = vector.multi_reduction <maximumf>, %409, %cst_343 [1] : vector<16x16xf32> to vector<16xf32>
    %411 = vector.shape_cast %410 : vector<16xf32> to vector<16x1xf32>
    %412 = vector.broadcast %411 : vector<16x1xf32> to vector<16x16xf32>
    %413 = arith.subf %409, %412 : vector<16x16xf32>
    %414 = math.exp %413 : vector<16x16xf32>
    %cst_344 = arith.constant dense<0.000000e+00> : vector<16xf32>
    %415 = vector.multi_reduction <add>, %414, %cst_344 [1] : vector<16x16xf32> to vector<16xf32>
    %416 = vector.shape_cast %415 : vector<16xf32> to vector<16x1xf32>
    %417 = tpu.reciprocal %416 {approx = true} : vector<16x1xf32> -> vector<16x1xf32>
    %418 = vector.broadcast %417 : vector<16x1xf32> to vector<16x16xf32>
    %419 = arith.mulf %414, %418 : vector<16x16xf32>
    %cst_345 = arith.constant dense<0.000000e+00> : vector<16x8xf32>
    %420 = tpu.matmul %419, %405, %cst_345 {dimension_numbers = #tpu.dot_dimension_numbers<[1], [0], [0], [1], [0, 0, 1, 1], [], []>} : vector<16x16xf32>, vector<16x8xf32>, vector<16x8xf32> -> vector<16x8xf32>
    %c1_346 = arith.constant 1 : index
    %c3_347 = arith.constant 3 : index
    %c0_348 = arith.constant 0 : index
    %c0_349 = arith.constant 0 : index
    %421 = vector.load %arg41[%c1_346, %c3_347, %c0_348, %c0_349] : memref<2x4x8x32xf32, #tpu.memory_space<vmem>>, vector<1x1x8x32xf32>
    %422 = vector.shape_cast %421 : vector<1x1x8x32xf32> to vector<8x32xf32>
    %cst_350 = arith.constant dense<0.000000e+00> : vector<16x32xf32>
    %423 = tpu.matmul %420, %422, %cst_350 {dimension_numbers = #tpu.dot_dimension_numbers<[1], [0], [0], [1], [0, 0, 1, 1], [], []>} : vector<16x8xf32>, vector<8x32xf32>, vector<16x32xf32> -> vector<16x32xf32>
    %424 = arith.addf %384, %423 : vector<16x32xf32>
    %c1_351 = arith.constant 1 : index
    %c0_352 = arith.constant 0 : index
    %c0_353 = arith.constant 0 : index
    %425 = vector.load %arg37[%c1_351, %c0_352, %c0_353] : memref<2x1x32xf32, #tpu.memory_space<vmem>>, vector<1x1x32xf32>
    %426 = vector.shape_cast %425 : vector<1x1x32xf32> to vector<1x32xf32>
    %427 = vector.broadcast %426 : vector<1x32xf32> to vector<16x32xf32>
    %428 = arith.addf %424, %427 : vector<16x32xf32>
    %429 = arith.addf %265, %428 : vector<16x32xf32>
    %c1_354 = arith.constant 1 : index
    %c0_355 = arith.constant 0 : index
    %c0_356 = arith.constant 0 : index
    %430 = vector.load %arg45[%c1_354, %c0_355, %c0_356] : memref<2x1x32xf32, #tpu.memory_space<vmem>>, vector<1x1x32xf32>
    %431 = vector.shape_cast %430 : vector<1x1x32xf32> to vector<1x32xf32>
    %c1_357 = arith.constant 1 : index
    %c0_358 = arith.constant 0 : index
    %c0_359 = arith.constant 0 : index
    %432 = vector.load %arg44[%c1_357, %c0_358, %c0_359] : memref<2x1x32xf32, #tpu.memory_space<vmem>>, vector<1x1x32xf32>
    %433 = vector.shape_cast %432 : vector<1x1x32xf32> to vector<1x32xf32>
    %cst_360 = arith.constant dense<0.000000e+00> : vector<16xf32>
    %434 = vector.multi_reduction <add>, %429, %cst_360 [1] : vector<16x32xf32> to vector<16xf32>
    %435 = vector.shape_cast %434 : vector<16xf32> to vector<16x1xf32>
    %cst_361 = arith.constant 3.200000e+01 : f32
    %436 = vector.broadcast %cst_361 : f32 to vector<16x1xf32>
    %437 = arith.divf %435, %436 : vector<16x1xf32>
    %438 = vector.broadcast %437 : vector<16x1xf32> to vector<16x32xf32>
    %439 = arith.subf %429, %438 : vector<16x32xf32>
    %440 = arith.mulf %439, %439 : vector<16x32xf32>
    %cst_362 = arith.constant dense<0.000000e+00> : vector<16xf32>
    %441 = vector.multi_reduction <add>, %440, %cst_362 [1] : vector<16x32xf32> to vector<16xf32>
    %442 = vector.shape_cast %441 : vector<16xf32> to vector<16x1xf32>
    %cst_363 = arith.constant 3.200000e+01 : f32
    %443 = vector.broadcast %cst_363 : f32 to vector<16x1xf32>
    %444 = arith.divf %442, %443 : vector<16x1xf32>
    %cst_364 = arith.constant 9.99999974E-6 : f32
    %445 = vector.broadcast %cst_364 : f32 to vector<16x1xf32>
    %446 = arith.addf %444, %445 : vector<16x1xf32>
    %447 = math.rsqrt %446 : vector<16x1xf32>
    %448 = vector.broadcast %447 : vector<16x1xf32> to vector<16x32xf32>
    %449 = arith.mulf %439, %448 : vector<16x32xf32>
    %450 = vector.broadcast %431 : vector<1x32xf32> to vector<16x32xf32>
    %451 = arith.mulf %449, %450 : vector<16x32xf32>
    %452 = vector.broadcast %433 : vector<1x32xf32> to vector<16x32xf32>
    %453 = arith.addf %451, %452 : vector<16x32xf32>
    %c1_365 = arith.constant 1 : index
    %c0_366 = arith.constant 0 : index
    %c0_367 = arith.constant 0 : index
    %454 = vector.load %arg47[%c1_365, %c0_366, %c0_367] : memref<2x32x64xf32, #tpu.memory_space<vmem>>, vector<1x32x64xf32>
    %455 = vector.shape_cast %454 : vector<1x32x64xf32> to vector<32x64xf32>
    %cst_368 = arith.constant dense<0.000000e+00> : vector<16x64xf32>
    %456 = tpu.matmul %453, %455, %cst_368 {dimension_numbers = #tpu.dot_dimension_numbers<[1], [0], [0], [1], [0, 0, 1, 1], [], []>} : vector<16x32xf32>, vector<32x64xf32>, vector<16x64xf32> -> vector<16x64xf32>
    %c1_369 = arith.constant 1 : index
    %c0_370 = arith.constant 0 : index
    %c0_371 = arith.constant 0 : index
    %457 = vector.load %arg46[%c1_369, %c0_370, %c0_371] : memref<2x1x64xf32, #tpu.memory_space<vmem>>, vector<1x1x64xf32>
    %458 = vector.shape_cast %457 : vector<1x1x64xf32> to vector<1x64xf32>
    %459 = vector.broadcast %458 : vector<1x64xf32> to vector<16x64xf32>
    %460 = arith.addf %456, %459 : vector<16x64xf32>
    %461 = arith.mulf %460, %460 : vector<16x64xf32>
    %462 = arith.mulf %460, %461 : vector<16x64xf32>
    %cst_372 = arith.constant 4.471500e-02 : f32
    %463 = vector.broadcast %cst_372 : f32 to vector<16x64xf32>
    %464 = arith.mulf %463, %462 : vector<16x64xf32>
    %465 = arith.addf %460, %464 : vector<16x64xf32>
    %cst_373 = arith.constant 0.797884583 : f32
    %466 = vector.broadcast %cst_373 : f32 to vector<16x64xf32>
    %467 = arith.mulf %466, %465 : vector<16x64xf32>
    %468 = math.tanh %467 : vector<16x64xf32>
    %cst_374 = arith.constant 1.000000e+00 : f32
    %469 = vector.broadcast %cst_374 : f32 to vector<16x64xf32>
    %470 = arith.addf %469, %468 : vector<16x64xf32>
    %cst_375 = arith.constant 5.000000e-01 : f32
    %471 = vector.broadcast %cst_375 : f32 to vector<16x64xf32>
    %472 = arith.mulf %471, %470 : vector<16x64xf32>
    %473 = arith.mulf %460, %472 : vector<16x64xf32>
    %c1_376 = arith.constant 1 : index
    %c0_377 = arith.constant 0 : index
    %c0_378 = arith.constant 0 : index
    %474 = vector.load %arg49[%c1_376, %c0_377, %c0_378] : memref<2x64x32xf32, #tpu.memory_space<vmem>>, vector<1x64x32xf32>
    %475 = vector.shape_cast %474 : vector<1x64x32xf32> to vector<64x32xf32>
    %cst_379 = arith.constant dense<0.000000e+00> : vector<16x32xf32>
    %476 = tpu.matmul %473, %475, %cst_379 {dimension_numbers = #tpu.dot_dimension_numbers<[1], [0], [0], [1], [0, 0, 1, 1], [], []>} : vector<16x64xf32>, vector<64x32xf32>, vector<16x32xf32> -> vector<16x32xf32>
    %c1_380 = arith.constant 1 : index
    %c0_381 = arith.constant 0 : index
    %c0_382 = arith.constant 0 : index
    %477 = vector.load %arg48[%c1_380, %c0_381, %c0_382] : memref<2x1x32xf32, #tpu.memory_space<vmem>>, vector<1x1x32xf32>
    %478 = vector.shape_cast %477 : vector<1x1x32xf32> to vector<1x32xf32>
    %479 = vector.broadcast %478 : vector<1x32xf32> to vector<16x32xf32>
    %480 = arith.addf %476, %479 : vector<16x32xf32>
    %481 = arith.addf %453, %480 : vector<16x32xf32>
    %c1_383 = arith.constant 1 : index
    %c0_384 = arith.constant 0 : index
    %c0_385 = arith.constant 0 : index
    %482 = vector.load %arg51[%c1_383, %c0_384, %c0_385] : memref<2x1x32xf32, #tpu.memory_space<vmem>>, vector<1x1x32xf32>
    %483 = vector.shape_cast %482 : vector<1x1x32xf32> to vector<1x32xf32>
    %c1_386 = arith.constant 1 : index
    %c0_387 = arith.constant 0 : index
    %c0_388 = arith.constant 0 : index
    %484 = vector.load %arg50[%c1_386, %c0_387, %c0_388] : memref<2x1x32xf32, #tpu.memory_space<vmem>>, vector<1x1x32xf32>
    %485 = vector.shape_cast %484 : vector<1x1x32xf32> to vector<1x32xf32>
    %cst_389 = arith.constant dense<0.000000e+00> : vector<16xf32>
    %486 = vector.multi_reduction <add>, %481, %cst_389 [1] : vector<16x32xf32> to vector<16xf32>
    %487 = vector.shape_cast %486 : vector<16xf32> to vector<16x1xf32>
    %cst_390 = arith.constant 3.200000e+01 : f32
    %488 = vector.broadcast %cst_390 : f32 to vector<16x1xf32>
    %489 = arith.divf %487, %488 : vector<16x1xf32>
    %490 = vector.broadcast %489 : vector<16x1xf32> to vector<16x32xf32>
    %491 = arith.subf %481, %490 : vector<16x32xf32>
    %492 = arith.mulf %491, %491 : vector<16x32xf32>
    %cst_391 = arith.constant dense<0.000000e+00> : vector<16xf32>
    %493 = vector.multi_reduction <add>, %492, %cst_391 [1] : vector<16x32xf32> to vector<16xf32>
    %494 = vector.shape_cast %493 : vector<16xf32> to vector<16x1xf32>
    %cst_392 = arith.constant 3.200000e+01 : f32
    %495 = vector.broadcast %cst_392 : f32 to vector<16x1xf32>
    %496 = arith.divf %494, %495 : vector<16x1xf32>
    %cst_393 = arith.constant 9.99999974E-6 : f32
    %497 = vector.broadcast %cst_393 : f32 to vector<16x1xf32>
    %498 = arith.addf %496, %497 : vector<16x1xf32>
    %499 = math.rsqrt %498 : vector<16x1xf32>
    %500 = vector.broadcast %499 : vector<16x1xf32> to vector<16x32xf32>
    %501 = arith.mulf %491, %500 : vector<16x32xf32>
    %502 = vector.broadcast %483 : vector<1x32xf32> to vector<16x32xf32>
    %503 = arith.mulf %501, %502 : vector<16x32xf32>
    %504 = vector.broadcast %485 : vector<1x32xf32> to vector<16x32xf32>
    %505 = arith.addf %503, %504 : vector<16x32xf32>
    %c0_394 = arith.constant 0 : index
    %c0_395 = arith.constant 0 : index
    %506 = vector.load %arg1[%c0_394, %c0_395] : memref<16x32xf32, #tpu.memory_space<vmem>>, vector<16x32xf32>
    %c0_396 = arith.constant 0 : index
    %c0_397 = arith.constant 0 : index
    %507 = vector.load %arg7[%c0_396, %c0_397] : memref<1x32xf32, #tpu.memory_space<vmem>>, vector<1x32xf32>
    %c0_398 = arith.constant 0 : index
    %c0_399 = arith.constant 0 : index
    %508 = vector.load %arg6[%c0_398, %c0_399] : memref<1x32xf32, #tpu.memory_space<vmem>>, vector<1x32xf32>
    %cst_400 = arith.constant dense<0.000000e+00> : vector<16xf32>
    %509 = vector.multi_reduction <add>, %506, %cst_400 [1] : vector<16x32xf32> to vector<16xf32>
    %510 = vector.shape_cast %509 : vector<16xf32> to vector<16x1xf32>
    %cst_401 = arith.constant 3.200000e+01 : f32
    %511 = vector.broadcast %cst_401 : f32 to vector<16x1xf32>
    %512 = arith.divf %510, %511 : vector<16x1xf32>
    %513 = vector.broadcast %512 : vector<16x1xf32> to vector<16x32xf32>
    %514 = arith.subf %506, %513 : vector<16x32xf32>
    %515 = arith.mulf %514, %514 : vector<16x32xf32>
    %cst_402 = arith.constant dense<0.000000e+00> : vector<16xf32>
    %516 = vector.multi_reduction <add>, %515, %cst_402 [1] : vector<16x32xf32> to vector<16xf32>
    %517 = vector.shape_cast %516 : vector<16xf32> to vector<16x1xf32>
    %cst_403 = arith.constant 3.200000e+01 : f32
    %518 = vector.broadcast %cst_403 : f32 to vector<16x1xf32>
    %519 = arith.divf %517, %518 : vector<16x1xf32>
    %cst_404 = arith.constant 9.99999974E-6 : f32
    %520 = vector.broadcast %cst_404 : f32 to vector<16x1xf32>
    %521 = arith.addf %519, %520 : vector<16x1xf32>
    %522 = math.rsqrt %521 : vector<16x1xf32>
    %523 = vector.broadcast %522 : vector<16x1xf32> to vector<16x32xf32>
    %524 = arith.mulf %514, %523 : vector<16x32xf32>
    %525 = vector.broadcast %507 : vector<1x32xf32> to vector<16x32xf32>
    %526 = arith.mulf %524, %525 : vector<16x32xf32>
    %527 = vector.broadcast %508 : vector<1x32xf32> to vector<16x32xf32>
    %528 = arith.addf %526, %527 : vector<16x32xf32>
    %c0_405 = arith.constant 0 : index
    %c0_406 = arith.constant 0 : index
    %c0_407 = arith.constant 0 : index
    %c0_408 = arith.constant 0 : index
    %529 = vector.load %arg30[%c0_405, %c0_406, %c0_407, %c0_408] : memref<2x4x32x8xf32, #tpu.memory_space<vmem>>, vector<1x1x32x8xf32>
    %530 = vector.shape_cast %529 : vector<1x1x32x8xf32> to vector<32x8xf32>
    %cst_409 = arith.constant dense<0.000000e+00> : vector<16x8xf32>
    %531 = tpu.matmul %528, %530, %cst_409 {dimension_numbers = #tpu.dot_dimension_numbers<[1], [0], [0], [1], [0, 0, 1, 1], [], []>} : vector<16x32xf32>, vector<32x8xf32>, vector<16x8xf32> -> vector<16x8xf32>
    %c0_410 = arith.constant 0 : index
    %c0_411 = arith.constant 0 : index
    %c0_412 = arith.constant 0 : index
    %c0_413 = arith.constant 0 : index
    %532 = vector.load %arg26[%c0_410, %c0_411, %c0_412, %c0_413] : memref<2x4x1x8xf32, #tpu.memory_space<vmem>>, vector<1x1x1x8xf32>
    %533 = vector.shape_cast %532 : vector<1x1x1x8xf32> to vector<1x8xf32>
    %534 = vector.broadcast %533 : vector<1x8xf32> to vector<16x8xf32>
    %535 = arith.addf %531, %534 : vector<16x8xf32>
    %c0_414 = arith.constant 0 : index
    %c0_415 = arith.constant 0 : index
    %c0_416 = arith.constant 0 : index
    %c0_417 = arith.constant 0 : index
    %536 = vector.load %arg28[%c0_414, %c0_415, %c0_416, %c0_417] : memref<2x4x32x8xf32, #tpu.memory_space<vmem>>, vector<1x1x32x8xf32>
    %537 = vector.shape_cast %536 : vector<1x1x32x8xf32> to vector<32x8xf32>
    %cst_418 = arith.constant dense<0.000000e+00> : vector<16x8xf32>
    %538 = tpu.matmul %528, %537, %cst_418 {dimension_numbers = #tpu.dot_dimension_numbers<[1], [0], [0], [1], [0, 0, 1, 1], [], []>} : vector<16x32xf32>, vector<32x8xf32>, vector<16x8xf32> -> vector<16x8xf32>
    %c0_419 = arith.constant 0 : index
    %c0_420 = arith.constant 0 : index
    %c0_421 = arith.constant 0 : index
    %c0_422 = arith.constant 0 : index
    %539 = vector.load %arg24[%c0_419, %c0_420, %c0_421, %c0_422] : memref<2x4x1x8xf32, #tpu.memory_space<vmem>>, vector<1x1x1x8xf32>
    %540 = vector.shape_cast %539 : vector<1x1x1x8xf32> to vector<1x8xf32>
    %541 = vector.broadcast %540 : vector<1x8xf32> to vector<16x8xf32>
    %542 = arith.addf %538, %541 : vector<16x8xf32>
    %c0_423 = arith.constant 0 : index
    %c0_424 = arith.constant 0 : index
    %c0_425 = arith.constant 0 : index
    %c0_426 = arith.constant 0 : index
    %543 = vector.load %arg31[%c0_423, %c0_424, %c0_425, %c0_426] : memref<2x4x32x8xf32, #tpu.memory_space<vmem>>, vector<1x1x32x8xf32>
    %544 = vector.shape_cast %543 : vector<1x1x32x8xf32> to vector<32x8xf32>
    %cst_427 = arith.constant dense<0.000000e+00> : vector<16x8xf32>
    %545 = tpu.matmul %528, %544, %cst_427 {dimension_numbers = #tpu.dot_dimension_numbers<[1], [0], [0], [1], [0, 0, 1, 1], [], []>} : vector<16x32xf32>, vector<32x8xf32>, vector<16x8xf32> -> vector<16x8xf32>
    %c0_428 = arith.constant 0 : index
    %c0_429 = arith.constant 0 : index
    %c0_430 = arith.constant 0 : index
    %c0_431 = arith.constant 0 : index
    %546 = vector.load %arg27[%c0_428, %c0_429, %c0_430, %c0_431] : memref<2x4x1x8xf32, #tpu.memory_space<vmem>>, vector<1x1x1x8xf32>
    %547 = vector.shape_cast %546 : vector<1x1x1x8xf32> to vector<1x8xf32>
    %548 = vector.broadcast %547 : vector<1x8xf32> to vector<16x8xf32>
    %549 = arith.addf %545, %548 : vector<16x8xf32>
    %cst_432 = arith.constant dense<0.000000e+00> : vector<16x16xf32>
    %550 = tpu.matmul %535, %542, %cst_432 {dimension_numbers = #tpu.dot_dimension_numbers<[1], [1], [0], [0], [0, 0, 1, 0], [], []>} : vector<16x8xf32>, vector<16x8xf32>, vector<16x16xf32> -> vector<16x16xf32>
    %cst_433 = arith.constant 0.353553385 : f32
    %551 = vector.broadcast %cst_433 : f32 to vector<16x16xf32>
    %552 = arith.mulf %550, %551 : vector<16x16xf32>
    %553 = arith.addf %552, %1 : vector<16x16xf32>
    %cst_434 = arith.constant dense<0xFF800000> : vector<16xf32>
    %554 = vector.multi_reduction <maximumf>, %553, %cst_434 [1] : vector<16x16xf32> to vector<16xf32>
    %555 = vector.shape_cast %554 : vector<16xf32> to vector<16x1xf32>
    %556 = vector.broadcast %555 : vector<16x1xf32> to vector<16x16xf32>
    %557 = arith.subf %553, %556 : vector<16x16xf32>
    %558 = math.exp %557 : vector<16x16xf32>
    %cst_435 = arith.constant dense<0.000000e+00> : vector<16xf32>
    %559 = vector.multi_reduction <add>, %558, %cst_435 [1] : vector<16x16xf32> to vector<16xf32>
    %560 = vector.shape_cast %559 : vector<16xf32> to vector<16x1xf32>
    %561 = tpu.reciprocal %560 {approx = true} : vector<16x1xf32> -> vector<16x1xf32>
    %562 = vector.broadcast %561 : vector<16x1xf32> to vector<16x16xf32>
    %563 = arith.mulf %558, %562 : vector<16x16xf32>
    %cst_436 = arith.constant dense<0.000000e+00> : vector<16x8xf32>
    %564 = tpu.matmul %563, %549, %cst_436 {dimension_numbers = #tpu.dot_dimension_numbers<[1], [0], [0], [1], [0, 0, 1, 1], [], []>} : vector<16x16xf32>, vector<16x8xf32>, vector<16x8xf32> -> vector<16x8xf32>
    %c0_437 = arith.constant 0 : index
    %c0_438 = arith.constant 0 : index
    %c0_439 = arith.constant 0 : index
    %c0_440 = arith.constant 0 : index
    %565 = vector.load %arg29[%c0_437, %c0_438, %c0_439, %c0_440] : memref<2x4x8x32xf32, #tpu.memory_space<vmem>>, vector<1x1x8x32xf32>
    %566 = vector.shape_cast %565 : vector<1x1x8x32xf32> to vector<8x32xf32>
    %cst_441 = arith.constant dense<0.000000e+00> : vector<16x32xf32>
    %567 = tpu.matmul %564, %566, %cst_441 {dimension_numbers = #tpu.dot_dimension_numbers<[1], [0], [0], [1], [0, 0, 1, 1], [], []>} : vector<16x8xf32>, vector<8x32xf32>, vector<16x32xf32> -> vector<16x32xf32>
    %c0_442 = arith.constant 0 : index
    %c1_443 = arith.constant 1 : index
    %c0_444 = arith.constant 0 : index
    %c0_445 = arith.constant 0 : index
    %568 = vector.load %arg30[%c0_442, %c1_443, %c0_444, %c0_445] : memref<2x4x32x8xf32, #tpu.memory_space<vmem>>, vector<1x1x32x8xf32>
    %569 = vector.shape_cast %568 : vector<1x1x32x8xf32> to vector<32x8xf32>
    %cst_446 = arith.constant dense<0.000000e+00> : vector<16x8xf32>
    %570 = tpu.matmul %528, %569, %cst_446 {dimension_numbers = #tpu.dot_dimension_numbers<[1], [0], [0], [1], [0, 0, 1, 1], [], []>} : vector<16x32xf32>, vector<32x8xf32>, vector<16x8xf32> -> vector<16x8xf32>
    %c0_447 = arith.constant 0 : index
    %c1_448 = arith.constant 1 : index
    %c0_449 = arith.constant 0 : index
    %c0_450 = arith.constant 0 : index
    %571 = vector.load %arg26[%c0_447, %c1_448, %c0_449, %c0_450] : memref<2x4x1x8xf32, #tpu.memory_space<vmem>>, vector<1x1x1x8xf32>
    %572 = vector.shape_cast %571 : vector<1x1x1x8xf32> to vector<1x8xf32>
    %573 = vector.broadcast %572 : vector<1x8xf32> to vector<16x8xf32>
    %574 = arith.addf %570, %573 : vector<16x8xf32>
    %c0_451 = arith.constant 0 : index
    %c1_452 = arith.constant 1 : index
    %c0_453 = arith.constant 0 : index
    %c0_454 = arith.constant 0 : index
    %575 = vector.load %arg28[%c0_451, %c1_452, %c0_453, %c0_454] : memref<2x4x32x8xf32, #tpu.memory_space<vmem>>, vector<1x1x32x8xf32>
    %576 = vector.shape_cast %575 : vector<1x1x32x8xf32> to vector<32x8xf32>
    %cst_455 = arith.constant dense<0.000000e+00> : vector<16x8xf32>
    %577 = tpu.matmul %528, %576, %cst_455 {dimension_numbers = #tpu.dot_dimension_numbers<[1], [0], [0], [1], [0, 0, 1, 1], [], []>} : vector<16x32xf32>, vector<32x8xf32>, vector<16x8xf32> -> vector<16x8xf32>
    %c0_456 = arith.constant 0 : index
    %c1_457 = arith.constant 1 : index
    %c0_458 = arith.constant 0 : index
    %c0_459 = arith.constant 0 : index
    %578 = vector.load %arg24[%c0_456, %c1_457, %c0_458, %c0_459] : memref<2x4x1x8xf32, #tpu.memory_space<vmem>>, vector<1x1x1x8xf32>
    %579 = vector.shape_cast %578 : vector<1x1x1x8xf32> to vector<1x8xf32>
    %580 = vector.broadcast %579 : vector<1x8xf32> to vector<16x8xf32>
    %581 = arith.addf %577, %580 : vector<16x8xf32>
    %c0_460 = arith.constant 0 : index
    %c1_461 = arith.constant 1 : index
    %c0_462 = arith.constant 0 : index
    %c0_463 = arith.constant 0 : index
    %582 = vector.load %arg31[%c0_460, %c1_461, %c0_462, %c0_463] : memref<2x4x32x8xf32, #tpu.memory_space<vmem>>, vector<1x1x32x8xf32>
    %583 = vector.shape_cast %582 : vector<1x1x32x8xf32> to vector<32x8xf32>
    %cst_464 = arith.constant dense<0.000000e+00> : vector<16x8xf32>
    %584 = tpu.matmul %528, %583, %cst_464 {dimension_numbers = #tpu.dot_dimension_numbers<[1], [0], [0], [1], [0, 0, 1, 1], [], []>} : vector<16x32xf32>, vector<32x8xf32>, vector<16x8xf32> -> vector<16x8xf32>
    %c0_465 = arith.constant 0 : index
    %c1_466 = arith.constant 1 : index
    %c0_467 = arith.constant 0 : index
    %c0_468 = arith.constant 0 : index
    %585 = vector.load %arg27[%c0_465, %c1_466, %c0_467, %c0_468] : memref<2x4x1x8xf32, #tpu.memory_space<vmem>>, vector<1x1x1x8xf32>
    %586 = vector.shape_cast %585 : vector<1x1x1x8xf32> to vector<1x8xf32>
    %587 = vector.broadcast %586 : vector<1x8xf32> to vector<16x8xf32>
    %588 = arith.addf %584, %587 : vector<16x8xf32>
    %cst_469 = arith.constant dense<0.000000e+00> : vector<16x16xf32>
    %589 = tpu.matmul %574, %581, %cst_469 {dimension_numbers = #tpu.dot_dimension_numbers<[1], [1], [0], [0], [0, 0, 1, 0], [], []>} : vector<16x8xf32>, vector<16x8xf32>, vector<16x16xf32> -> vector<16x16xf32>
    %cst_470 = arith.constant 0.353553385 : f32
    %590 = vector.broadcast %cst_470 : f32 to vector<16x16xf32>
    %591 = arith.mulf %589, %590 : vector<16x16xf32>
    %592 = arith.addf %591, %1 : vector<16x16xf32>
    %cst_471 = arith.constant dense<0xFF800000> : vector<16xf32>
    %593 = vector.multi_reduction <maximumf>, %592, %cst_471 [1] : vector<16x16xf32> to vector<16xf32>
    %594 = vector.shape_cast %593 : vector<16xf32> to vector<16x1xf32>
    %595 = vector.broadcast %594 : vector<16x1xf32> to vector<16x16xf32>
    %596 = arith.subf %592, %595 : vector<16x16xf32>
    %597 = math.exp %596 : vector<16x16xf32>
    %cst_472 = arith.constant dense<0.000000e+00> : vector<16xf32>
    %598 = vector.multi_reduction <add>, %597, %cst_472 [1] : vector<16x16xf32> to vector<16xf32>
    %599 = vector.shape_cast %598 : vector<16xf32> to vector<16x1xf32>
    %600 = tpu.reciprocal %599 {approx = true} : vector<16x1xf32> -> vector<16x1xf32>
    %601 = vector.broadcast %600 : vector<16x1xf32> to vector<16x16xf32>
    %602 = arith.mulf %597, %601 : vector<16x16xf32>
    %cst_473 = arith.constant dense<0.000000e+00> : vector<16x8xf32>
    %603 = tpu.matmul %602, %588, %cst_473 {dimension_numbers = #tpu.dot_dimension_numbers<[1], [0], [0], [1], [0, 0, 1, 1], [], []>} : vector<16x16xf32>, vector<16x8xf32>, vector<16x8xf32> -> vector<16x8xf32>
    %c0_474 = arith.constant 0 : index
    %c1_475 = arith.constant 1 : index
    %c0_476 = arith.constant 0 : index
    %c0_477 = arith.constant 0 : index
    %604 = vector.load %arg29[%c0_474, %c1_475, %c0_476, %c0_477] : memref<2x4x8x32xf32, #tpu.memory_space<vmem>>, vector<1x1x8x32xf32>
    %605 = vector.shape_cast %604 : vector<1x1x8x32xf32> to vector<8x32xf32>
    %cst_478 = arith.constant dense<0.000000e+00> : vector<16x32xf32>
    %606 = tpu.matmul %603, %605, %cst_478 {dimension_numbers = #tpu.dot_dimension_numbers<[1], [0], [0], [1], [0, 0, 1, 1], [], []>} : vector<16x8xf32>, vector<8x32xf32>, vector<16x32xf32> -> vector<16x32xf32>
    %607 = arith.addf %567, %606 : vector<16x32xf32>
    %c0_479 = arith.constant 0 : index
    %c2_480 = arith.constant 2 : index
    %c0_481 = arith.constant 0 : index
    %c0_482 = arith.constant 0 : index
    %608 = vector.load %arg30[%c0_479, %c2_480, %c0_481, %c0_482] : memref<2x4x32x8xf32, #tpu.memory_space<vmem>>, vector<1x1x32x8xf32>
    %609 = vector.shape_cast %608 : vector<1x1x32x8xf32> to vector<32x8xf32>
    %cst_483 = arith.constant dense<0.000000e+00> : vector<16x8xf32>
    %610 = tpu.matmul %528, %609, %cst_483 {dimension_numbers = #tpu.dot_dimension_numbers<[1], [0], [0], [1], [0, 0, 1, 1], [], []>} : vector<16x32xf32>, vector<32x8xf32>, vector<16x8xf32> -> vector<16x8xf32>
    %c0_484 = arith.constant 0 : index
    %c2_485 = arith.constant 2 : index
    %c0_486 = arith.constant 0 : index
    %c0_487 = arith.constant 0 : index
    %611 = vector.load %arg26[%c0_484, %c2_485, %c0_486, %c0_487] : memref<2x4x1x8xf32, #tpu.memory_space<vmem>>, vector<1x1x1x8xf32>
    %612 = vector.shape_cast %611 : vector<1x1x1x8xf32> to vector<1x8xf32>
    %613 = vector.broadcast %612 : vector<1x8xf32> to vector<16x8xf32>
    %614 = arith.addf %610, %613 : vector<16x8xf32>
    %c0_488 = arith.constant 0 : index
    %c2_489 = arith.constant 2 : index
    %c0_490 = arith.constant 0 : index
    %c0_491 = arith.constant 0 : index
    %615 = vector.load %arg28[%c0_488, %c2_489, %c0_490, %c0_491] : memref<2x4x32x8xf32, #tpu.memory_space<vmem>>, vector<1x1x32x8xf32>
    %616 = vector.shape_cast %615 : vector<1x1x32x8xf32> to vector<32x8xf32>
    %cst_492 = arith.constant dense<0.000000e+00> : vector<16x8xf32>
    %617 = tpu.matmul %528, %616, %cst_492 {dimension_numbers = #tpu.dot_dimension_numbers<[1], [0], [0], [1], [0, 0, 1, 1], [], []>} : vector<16x32xf32>, vector<32x8xf32>, vector<16x8xf32> -> vector<16x8xf32>
    %c0_493 = arith.constant 0 : index
    %c2_494 = arith.constant 2 : index
    %c0_495 = arith.constant 0 : index
    %c0_496 = arith.constant 0 : index
    %618 = vector.load %arg24[%c0_493, %c2_494, %c0_495, %c0_496] : memref<2x4x1x8xf32, #tpu.memory_space<vmem>>, vector<1x1x1x8xf32>
    %619 = vector.shape_cast %618 : vector<1x1x1x8xf32> to vector<1x8xf32>
    %620 = vector.broadcast %619 : vector<1x8xf32> to vector<16x8xf32>
    %621 = arith.addf %617, %620 : vector<16x8xf32>
    %c0_497 = arith.constant 0 : index
    %c2_498 = arith.constant 2 : index
    %c0_499 = arith.constant 0 : index
    %c0_500 = arith.constant 0 : index
    %622 = vector.load %arg31[%c0_497, %c2_498, %c0_499, %c0_500] : memref<2x4x32x8xf32, #tpu.memory_space<vmem>>, vector<1x1x32x8xf32>
    %623 = vector.shape_cast %622 : vector<1x1x32x8xf32> to vector<32x8xf32>
    %cst_501 = arith.constant dense<0.000000e+00> : vector<16x8xf32>
    %624 = tpu.matmul %528, %623, %cst_501 {dimension_numbers = #tpu.dot_dimension_numbers<[1], [0], [0], [1], [0, 0, 1, 1], [], []>} : vector<16x32xf32>, vector<32x8xf32>, vector<16x8xf32> -> vector<16x8xf32>
    %c0_502 = arith.constant 0 : index
    %c2_503 = arith.constant 2 : index
    %c0_504 = arith.constant 0 : index
    %c0_505 = arith.constant 0 : index
    %625 = vector.load %arg27[%c0_502, %c2_503, %c0_504, %c0_505] : memref<2x4x1x8xf32, #tpu.memory_space<vmem>>, vector<1x1x1x8xf32>
    %626 = vector.shape_cast %625 : vector<1x1x1x8xf32> to vector<1x8xf32>
    %627 = vector.broadcast %626 : vector<1x8xf32> to vector<16x8xf32>
    %628 = arith.addf %624, %627 : vector<16x8xf32>
    %cst_506 = arith.constant dense<0.000000e+00> : vector<16x16xf32>
    %629 = tpu.matmul %614, %621, %cst_506 {dimension_numbers = #tpu.dot_dimension_numbers<[1], [1], [0], [0], [0, 0, 1, 0], [], []>} : vector<16x8xf32>, vector<16x8xf32>, vector<16x16xf32> -> vector<16x16xf32>
    %cst_507 = arith.constant 0.353553385 : f32
    %630 = vector.broadcast %cst_507 : f32 to vector<16x16xf32>
    %631 = arith.mulf %629, %630 : vector<16x16xf32>
    %632 = arith.addf %631, %1 : vector<16x16xf32>
    %cst_508 = arith.constant dense<0xFF800000> : vector<16xf32>
    %633 = vector.multi_reduction <maximumf>, %632, %cst_508 [1] : vector<16x16xf32> to vector<16xf32>
    %634 = vector.shape_cast %633 : vector<16xf32> to vector<16x1xf32>
    %635 = vector.broadcast %634 : vector<16x1xf32> to vector<16x16xf32>
    %636 = arith.subf %632, %635 : vector<16x16xf32>
    %637 = math.exp %636 : vector<16x16xf32>
    %cst_509 = arith.constant dense<0.000000e+00> : vector<16xf32>
    %638 = vector.multi_reduction <add>, %637, %cst_509 [1] : vector<16x16xf32> to vector<16xf32>
    %639 = vector.shape_cast %638 : vector<16xf32> to vector<16x1xf32>
    %640 = tpu.reciprocal %639 {approx = true} : vector<16x1xf32> -> vector<16x1xf32>
    %641 = vector.broadcast %640 : vector<16x1xf32> to vector<16x16xf32>
    %642 = arith.mulf %637, %641 : vector<16x16xf32>
    %cst_510 = arith.constant dense<0.000000e+00> : vector<16x8xf32>
    %643 = tpu.matmul %642, %628, %cst_510 {dimension_numbers = #tpu.dot_dimension_numbers<[1], [0], [0], [1], [0, 0, 1, 1], [], []>} : vector<16x16xf32>, vector<16x8xf32>, vector<16x8xf32> -> vector<16x8xf32>
    %c0_511 = arith.constant 0 : index
    %c2_512 = arith.constant 2 : index
    %c0_513 = arith.constant 0 : index
    %c0_514 = arith.constant 0 : index
    %644 = vector.load %arg29[%c0_511, %c2_512, %c0_513, %c0_514] : memref<2x4x8x32xf32, #tpu.memory_space<vmem>>, vector<1x1x8x32xf32>
    %645 = vector.shape_cast %644 : vector<1x1x8x32xf32> to vector<8x32xf32>
    %cst_515 = arith.constant dense<0.000000e+00> : vector<16x32xf32>
    %646 = tpu.matmul %643, %645, %cst_515 {dimension_numbers = #tpu.dot_dimension_numbers<[1], [0], [0], [1], [0, 0, 1, 1], [], []>} : vector<16x8xf32>, vector<8x32xf32>, vector<16x32xf32> -> vector<16x32xf32>
    %647 = arith.addf %607, %646 : vector<16x32xf32>
    %c0_516 = arith.constant 0 : index
    %c3_517 = arith.constant 3 : index
    %c0_518 = arith.constant 0 : index
    %c0_519 = arith.constant 0 : index
    %648 = vector.load %arg30[%c0_516, %c3_517, %c0_518, %c0_519] : memref<2x4x32x8xf32, #tpu.memory_space<vmem>>, vector<1x1x32x8xf32>
    %649 = vector.shape_cast %648 : vector<1x1x32x8xf32> to vector<32x8xf32>
    %cst_520 = arith.constant dense<0.000000e+00> : vector<16x8xf32>
    %650 = tpu.matmul %528, %649, %cst_520 {dimension_numbers = #tpu.dot_dimension_numbers<[1], [0], [0], [1], [0, 0, 1, 1], [], []>} : vector<16x32xf32>, vector<32x8xf32>, vector<16x8xf32> -> vector<16x8xf32>
    %c0_521 = arith.constant 0 : index
    %c3_522 = arith.constant 3 : index
    %c0_523 = arith.constant 0 : index
    %c0_524 = arith.constant 0 : index
    %651 = vector.load %arg26[%c0_521, %c3_522, %c0_523, %c0_524] : memref<2x4x1x8xf32, #tpu.memory_space<vmem>>, vector<1x1x1x8xf32>
    %652 = vector.shape_cast %651 : vector<1x1x1x8xf32> to vector<1x8xf32>
    %653 = vector.broadcast %652 : vector<1x8xf32> to vector<16x8xf32>
    %654 = arith.addf %650, %653 : vector<16x8xf32>
    %c0_525 = arith.constant 0 : index
    %c3_526 = arith.constant 3 : index
    %c0_527 = arith.constant 0 : index
    %c0_528 = arith.constant 0 : index
    %655 = vector.load %arg28[%c0_525, %c3_526, %c0_527, %c0_528] : memref<2x4x32x8xf32, #tpu.memory_space<vmem>>, vector<1x1x32x8xf32>
    %656 = vector.shape_cast %655 : vector<1x1x32x8xf32> to vector<32x8xf32>
    %cst_529 = arith.constant dense<0.000000e+00> : vector<16x8xf32>
    %657 = tpu.matmul %528, %656, %cst_529 {dimension_numbers = #tpu.dot_dimension_numbers<[1], [0], [0], [1], [0, 0, 1, 1], [], []>} : vector<16x32xf32>, vector<32x8xf32>, vector<16x8xf32> -> vector<16x8xf32>
    %c0_530 = arith.constant 0 : index
    %c3_531 = arith.constant 3 : index
    %c0_532 = arith.constant 0 : index
    %c0_533 = arith.constant 0 : index
    %658 = vector.load %arg24[%c0_530, %c3_531, %c0_532, %c0_533] : memref<2x4x1x8xf32, #tpu.memory_space<vmem>>, vector<1x1x1x8xf32>
    %659 = vector.shape_cast %658 : vector<1x1x1x8xf32> to vector<1x8xf32>
    %660 = vector.broadcast %659 : vector<1x8xf32> to vector<16x8xf32>
    %661 = arith.addf %657, %660 : vector<16x8xf32>
    %c0_534 = arith.constant 0 : index
    %c3_535 = arith.constant 3 : index
    %c0_536 = arith.constant 0 : index
    %c0_537 = arith.constant 0 : index
    %662 = vector.load %arg31[%c0_534, %c3_535, %c0_536, %c0_537] : memref<2x4x32x8xf32, #tpu.memory_space<vmem>>, vector<1x1x32x8xf32>
    %663 = vector.shape_cast %662 : vector<1x1x32x8xf32> to vector<32x8xf32>
    %cst_538 = arith.constant dense<0.000000e+00> : vector<16x8xf32>
    %664 = tpu.matmul %528, %663, %cst_538 {dimension_numbers = #tpu.dot_dimension_numbers<[1], [0], [0], [1], [0, 0, 1, 1], [], []>} : vector<16x32xf32>, vector<32x8xf32>, vector<16x8xf32> -> vector<16x8xf32>
    %c0_539 = arith.constant 0 : index
    %c3_540 = arith.constant 3 : index
    %c0_541 = arith.constant 0 : index
    %c0_542 = arith.constant 0 : index
    %665 = vector.load %arg27[%c0_539, %c3_540, %c0_541, %c0_542] : memref<2x4x1x8xf32, #tpu.memory_space<vmem>>, vector<1x1x1x8xf32>
    %666 = vector.shape_cast %665 : vector<1x1x1x8xf32> to vector<1x8xf32>
    %667 = vector.broadcast %666 : vector<1x8xf32> to vector<16x8xf32>
    %668 = arith.addf %664, %667 : vector<16x8xf32>
    %cst_543 = arith.constant dense<0.000000e+00> : vector<16x16xf32>
    %669 = tpu.matmul %654, %661, %cst_543 {dimension_numbers = #tpu.dot_dimension_numbers<[1], [1], [0], [0], [0, 0, 1, 0], [], []>} : vector<16x8xf32>, vector<16x8xf32>, vector<16x16xf32> -> vector<16x16xf32>
    %cst_544 = arith.constant 0.353553385 : f32
    %670 = vector.broadcast %cst_544 : f32 to vector<16x16xf32>
    %671 = arith.mulf %669, %670 : vector<16x16xf32>
    %672 = arith.addf %671, %1 : vector<16x16xf32>
    %cst_545 = arith.constant dense<0xFF800000> : vector<16xf32>
    %673 = vector.multi_reduction <maximumf>, %672, %cst_545 [1] : vector<16x16xf32> to vector<16xf32>
    %674 = vector.shape_cast %673 : vector<16xf32> to vector<16x1xf32>
    %675 = vector.broadcast %674 : vector<16x1xf32> to vector<16x16xf32>
    %676 = arith.subf %672, %675 : vector<16x16xf32>
    %677 = math.exp %676 : vector<16x16xf32>
    %cst_546 = arith.constant dense<0.000000e+00> : vector<16xf32>
    %678 = vector.multi_reduction <add>, %677, %cst_546 [1] : vector<16x16xf32> to vector<16xf32>
    %679 = vector.shape_cast %678 : vector<16xf32> to vector<16x1xf32>
    %680 = tpu.reciprocal %679 {approx = true} : vector<16x1xf32> -> vector<16x1xf32>
    %681 = vector.broadcast %680 : vector<16x1xf32> to vector<16x16xf32>
    %682 = arith.mulf %677, %681 : vector<16x16xf32>
    %cst_547 = arith.constant dense<0.000000e+00> : vector<16x8xf32>
    %683 = tpu.matmul %682, %668, %cst_547 {dimension_numbers = #tpu.dot_dimension_numbers<[1], [0], [0], [1], [0, 0, 1, 1], [], []>} : vector<16x16xf32>, vector<16x8xf32>, vector<16x8xf32> -> vector<16x8xf32>
    %c0_548 = arith.constant 0 : index
    %c3_549 = arith.constant 3 : index
    %c0_550 = arith.constant 0 : index
    %c0_551 = arith.constant 0 : index
    %684 = vector.load %arg29[%c0_548, %c3_549, %c0_550, %c0_551] : memref<2x4x8x32xf32, #tpu.memory_space<vmem>>, vector<1x1x8x32xf32>
    %685 = vector.shape_cast %684 : vector<1x1x8x32xf32> to vector<8x32xf32>
    %cst_552 = arith.constant dense<0.000000e+00> : vector<16x32xf32>
    %686 = tpu.matmul %683, %685, %cst_552 {dimension_numbers = #tpu.dot_dimension_numbers<[1], [0], [0], [1], [0, 0, 1, 1], [], []>} : vector<16x8xf32>, vector<8x32xf32>, vector<16x32xf32> -> vector<16x32xf32>
    %687 = arith.addf %647, %686 : vector<16x32xf32>
    %c0_553 = arith.constant 0 : index
    %c0_554 = arith.constant 0 : index
    %c0_555 = arith.constant 0 : index
    %688 = vector.load %arg25[%c0_553, %c0_554, %c0_555] : memref<2x1x32xf32, #tpu.memory_space<vmem>>, vector<1x1x32xf32>
    %689 = vector.shape_cast %688 : vector<1x1x32xf32> to vector<1x32xf32>
    %690 = vector.broadcast %689 : vector<1x32xf32> to vector<16x32xf32>
    %691 = arith.addf %687, %690 : vector<16x32xf32>
    %692 = arith.addf %528, %691 : vector<16x32xf32>
    %c0_556 = arith.constant 0 : index
    %c0_557 = arith.constant 0 : index
    %c0_558 = arith.constant 0 : index
    %693 = vector.load %arg33[%c0_556, %c0_557, %c0_558] : memref<2x1x32xf32, #tpu.memory_space<vmem>>, vector<1x1x32xf32>
    %694 = vector.shape_cast %693 : vector<1x1x32xf32> to vector<1x32xf32>
    %c0_559 = arith.constant 0 : index
    %c0_560 = arith.constant 0 : index
    %c0_561 = arith.constant 0 : index
    %695 = vector.load %arg32[%c0_559, %c0_560, %c0_561] : memref<2x1x32xf32, #tpu.memory_space<vmem>>, vector<1x1x32xf32>
    %696 = vector.shape_cast %695 : vector<1x1x32xf32> to vector<1x32xf32>
    %cst_562 = arith.constant dense<0.000000e+00> : vector<16xf32>
    %697 = vector.multi_reduction <add>, %692, %cst_562 [1] : vector<16x32xf32> to vector<16xf32>
    %698 = vector.shape_cast %697 : vector<16xf32> to vector<16x1xf32>
    %cst_563 = arith.constant 3.200000e+01 : f32
    %699 = vector.broadcast %cst_563 : f32 to vector<16x1xf32>
    %700 = arith.divf %698, %699 : vector<16x1xf32>
    %701 = vector.broadcast %700 : vector<16x1xf32> to vector<16x32xf32>
    %702 = arith.subf %692, %701 : vector<16x32xf32>
    %703 = arith.mulf %702, %702 : vector<16x32xf32>
    %cst_564 = arith.constant dense<0.000000e+00> : vector<16xf32>
    %704 = vector.multi_reduction <add>, %703, %cst_564 [1] : vector<16x32xf32> to vector<16xf32>
    %705 = vector.shape_cast %704 : vector<16xf32> to vector<16x1xf32>
    %cst_565 = arith.constant 3.200000e+01 : f32
    %706 = vector.broadcast %cst_565 : f32 to vector<16x1xf32>
    %707 = arith.divf %705, %706 : vector<16x1xf32>
    %cst_566 = arith.constant 9.99999974E-6 : f32
    %708 = vector.broadcast %cst_566 : f32 to vector<16x1xf32>
    %709 = arith.addf %707, %708 : vector<16x1xf32>
    %710 = math.rsqrt %709 : vector<16x1xf32>
    %711 = vector.broadcast %710 : vector<16x1xf32> to vector<16x32xf32>
    %712 = arith.mulf %702, %711 : vector<16x32xf32>
    %713 = vector.broadcast %694 : vector<1x32xf32> to vector<16x32xf32>
    %714 = arith.mulf %712, %713 : vector<16x32xf32>
    %715 = vector.broadcast %696 : vector<1x32xf32> to vector<16x32xf32>
    %716 = arith.addf %714, %715 : vector<16x32xf32>
    %c0_567 = arith.constant 0 : index
    %c0_568 = arith.constant 0 : index
    %c0_569 = arith.constant 0 : index
    %c0_570 = arith.constant 0 : index
    %717 = vector.load %arg14[%c0_567, %c0_568, %c0_569, %c0_570] : memref<2x4x32x8xf32, #tpu.memory_space<vmem>>, vector<1x1x32x8xf32>
    %718 = vector.shape_cast %717 : vector<1x1x32x8xf32> to vector<32x8xf32>
    %cst_571 = arith.constant dense<0.000000e+00> : vector<16x8xf32>
    %719 = tpu.matmul %716, %718, %cst_571 {dimension_numbers = #tpu.dot_dimension_numbers<[1], [0], [0], [1], [0, 0, 1, 1], [], []>} : vector<16x32xf32>, vector<32x8xf32>, vector<16x8xf32> -> vector<16x8xf32>
    %c0_572 = arith.constant 0 : index
    %c0_573 = arith.constant 0 : index
    %c0_574 = arith.constant 0 : index
    %c0_575 = arith.constant 0 : index
    %720 = vector.load %arg10[%c0_572, %c0_573, %c0_574, %c0_575] : memref<2x4x1x8xf32, #tpu.memory_space<vmem>>, vector<1x1x1x8xf32>
    %721 = vector.shape_cast %720 : vector<1x1x1x8xf32> to vector<1x8xf32>
    %722 = vector.broadcast %721 : vector<1x8xf32> to vector<16x8xf32>
    %723 = arith.addf %719, %722 : vector<16x8xf32>
    %c0_576 = arith.constant 0 : index
    %c0_577 = arith.constant 0 : index
    %c0_578 = arith.constant 0 : index
    %c0_579 = arith.constant 0 : index
    %724 = vector.load %arg12[%c0_576, %c0_577, %c0_578, %c0_579] : memref<2x4x32x8xf32, #tpu.memory_space<vmem>>, vector<1x1x32x8xf32>
    %725 = vector.shape_cast %724 : vector<1x1x32x8xf32> to vector<32x8xf32>
    %cst_580 = arith.constant dense<0.000000e+00> : vector<16x8xf32>
    %726 = tpu.matmul %505, %725, %cst_580 {dimension_numbers = #tpu.dot_dimension_numbers<[1], [0], [0], [1], [0, 0, 1, 1], [], []>} : vector<16x32xf32>, vector<32x8xf32>, vector<16x8xf32> -> vector<16x8xf32>
    %c0_581 = arith.constant 0 : index
    %c0_582 = arith.constant 0 : index
    %c0_583 = arith.constant 0 : index
    %c0_584 = arith.constant 0 : index
    %727 = vector.load %arg8[%c0_581, %c0_582, %c0_583, %c0_584] : memref<2x4x1x8xf32, #tpu.memory_space<vmem>>, vector<1x1x1x8xf32>
    %728 = vector.shape_cast %727 : vector<1x1x1x8xf32> to vector<1x8xf32>
    %729 = vector.broadcast %728 : vector<1x8xf32> to vector<16x8xf32>
    %730 = arith.addf %726, %729 : vector<16x8xf32>
    %c0_585 = arith.constant 0 : index
    %c0_586 = arith.constant 0 : index
    %c0_587 = arith.constant 0 : index
    %c0_588 = arith.constant 0 : index
    %731 = vector.load %arg15[%c0_585, %c0_586, %c0_587, %c0_588] : memref<2x4x32x8xf32, #tpu.memory_space<vmem>>, vector<1x1x32x8xf32>
    %732 = vector.shape_cast %731 : vector<1x1x32x8xf32> to vector<32x8xf32>
    %cst_589 = arith.constant dense<0.000000e+00> : vector<16x8xf32>
    %733 = tpu.matmul %505, %732, %cst_589 {dimension_numbers = #tpu.dot_dimension_numbers<[1], [0], [0], [1], [0, 0, 1, 1], [], []>} : vector<16x32xf32>, vector<32x8xf32>, vector<16x8xf32> -> vector<16x8xf32>
    %c0_590 = arith.constant 0 : index
    %c0_591 = arith.constant 0 : index
    %c0_592 = arith.constant 0 : index
    %c0_593 = arith.constant 0 : index
    %734 = vector.load %arg11[%c0_590, %c0_591, %c0_592, %c0_593] : memref<2x4x1x8xf32, #tpu.memory_space<vmem>>, vector<1x1x1x8xf32>
    %735 = vector.shape_cast %734 : vector<1x1x1x8xf32> to vector<1x8xf32>
    %736 = vector.broadcast %735 : vector<1x8xf32> to vector<16x8xf32>
    %737 = arith.addf %733, %736 : vector<16x8xf32>
    %cst_594 = arith.constant dense<0.000000e+00> : vector<16x16xf32>
    %738 = tpu.matmul %723, %730, %cst_594 {dimension_numbers = #tpu.dot_dimension_numbers<[1], [1], [0], [0], [0, 0, 1, 0], [], []>} : vector<16x8xf32>, vector<16x8xf32>, vector<16x16xf32> -> vector<16x16xf32>
    %cst_595 = arith.constant 0.353553385 : f32
    %739 = vector.broadcast %cst_595 : f32 to vector<16x16xf32>
    %740 = arith.mulf %738, %739 : vector<16x16xf32>
    %741 = arith.addf %740, %2 : vector<16x16xf32>
    %cst_596 = arith.constant dense<0xFF800000> : vector<16xf32>
    %742 = vector.multi_reduction <maximumf>, %741, %cst_596 [1] : vector<16x16xf32> to vector<16xf32>
    %743 = vector.shape_cast %742 : vector<16xf32> to vector<16x1xf32>
    %744 = vector.broadcast %743 : vector<16x1xf32> to vector<16x16xf32>
    %745 = arith.subf %741, %744 : vector<16x16xf32>
    %746 = math.exp %745 : vector<16x16xf32>
    %cst_597 = arith.constant dense<0.000000e+00> : vector<16xf32>
    %747 = vector.multi_reduction <add>, %746, %cst_597 [1] : vector<16x16xf32> to vector<16xf32>
    %748 = vector.shape_cast %747 : vector<16xf32> to vector<16x1xf32>
    %749 = tpu.reciprocal %748 {approx = true} : vector<16x1xf32> -> vector<16x1xf32>
    %750 = vector.broadcast %749 : vector<16x1xf32> to vector<16x16xf32>
    %751 = arith.mulf %746, %750 : vector<16x16xf32>
    %cst_598 = arith.constant dense<0.000000e+00> : vector<16x8xf32>
    %752 = tpu.matmul %751, %737, %cst_598 {dimension_numbers = #tpu.dot_dimension_numbers<[1], [0], [0], [1], [0, 0, 1, 1], [], []>} : vector<16x16xf32>, vector<16x8xf32>, vector<16x8xf32> -> vector<16x8xf32>
    %c0_599 = arith.constant 0 : index
    %c0_600 = arith.constant 0 : index
    %c0_601 = arith.constant 0 : index
    %c0_602 = arith.constant 0 : index
    %753 = vector.load %arg13[%c0_599, %c0_600, %c0_601, %c0_602] : memref<2x4x8x32xf32, #tpu.memory_space<vmem>>, vector<1x1x8x32xf32>
    %754 = vector.shape_cast %753 : vector<1x1x8x32xf32> to vector<8x32xf32>
    %cst_603 = arith.constant dense<0.000000e+00> : vector<16x32xf32>
    %755 = tpu.matmul %752, %754, %cst_603 {dimension_numbers = #tpu.dot_dimension_numbers<[1], [0], [0], [1], [0, 0, 1, 1], [], []>} : vector<16x8xf32>, vector<8x32xf32>, vector<16x32xf32> -> vector<16x32xf32>
    %c0_604 = arith.constant 0 : index
    %c1_605 = arith.constant 1 : index
    %c0_606 = arith.constant 0 : index
    %c0_607 = arith.constant 0 : index
    %756 = vector.load %arg14[%c0_604, %c1_605, %c0_606, %c0_607] : memref<2x4x32x8xf32, #tpu.memory_space<vmem>>, vector<1x1x32x8xf32>
    %757 = vector.shape_cast %756 : vector<1x1x32x8xf32> to vector<32x8xf32>
    %cst_608 = arith.constant dense<0.000000e+00> : vector<16x8xf32>
    %758 = tpu.matmul %716, %757, %cst_608 {dimension_numbers = #tpu.dot_dimension_numbers<[1], [0], [0], [1], [0, 0, 1, 1], [], []>} : vector<16x32xf32>, vector<32x8xf32>, vector<16x8xf32> -> vector<16x8xf32>
    %c0_609 = arith.constant 0 : index
    %c1_610 = arith.constant 1 : index
    %c0_611 = arith.constant 0 : index
    %c0_612 = arith.constant 0 : index
    %759 = vector.load %arg10[%c0_609, %c1_610, %c0_611, %c0_612] : memref<2x4x1x8xf32, #tpu.memory_space<vmem>>, vector<1x1x1x8xf32>
    %760 = vector.shape_cast %759 : vector<1x1x1x8xf32> to vector<1x8xf32>
    %761 = vector.broadcast %760 : vector<1x8xf32> to vector<16x8xf32>
    %762 = arith.addf %758, %761 : vector<16x8xf32>
    %c0_613 = arith.constant 0 : index
    %c1_614 = arith.constant 1 : index
    %c0_615 = arith.constant 0 : index
    %c0_616 = arith.constant 0 : index
    %763 = vector.load %arg12[%c0_613, %c1_614, %c0_615, %c0_616] : memref<2x4x32x8xf32, #tpu.memory_space<vmem>>, vector<1x1x32x8xf32>
    %764 = vector.shape_cast %763 : vector<1x1x32x8xf32> to vector<32x8xf32>
    %cst_617 = arith.constant dense<0.000000e+00> : vector<16x8xf32>
    %765 = tpu.matmul %505, %764, %cst_617 {dimension_numbers = #tpu.dot_dimension_numbers<[1], [0], [0], [1], [0, 0, 1, 1], [], []>} : vector<16x32xf32>, vector<32x8xf32>, vector<16x8xf32> -> vector<16x8xf32>
    %c0_618 = arith.constant 0 : index
    %c1_619 = arith.constant 1 : index
    %c0_620 = arith.constant 0 : index
    %c0_621 = arith.constant 0 : index
    %766 = vector.load %arg8[%c0_618, %c1_619, %c0_620, %c0_621] : memref<2x4x1x8xf32, #tpu.memory_space<vmem>>, vector<1x1x1x8xf32>
    %767 = vector.shape_cast %766 : vector<1x1x1x8xf32> to vector<1x8xf32>
    %768 = vector.broadcast %767 : vector<1x8xf32> to vector<16x8xf32>
    %769 = arith.addf %765, %768 : vector<16x8xf32>
    %c0_622 = arith.constant 0 : index
    %c1_623 = arith.constant 1 : index
    %c0_624 = arith.constant 0 : index
    %c0_625 = arith.constant 0 : index
    %770 = vector.load %arg15[%c0_622, %c1_623, %c0_624, %c0_625] : memref<2x4x32x8xf32, #tpu.memory_space<vmem>>, vector<1x1x32x8xf32>
    %771 = vector.shape_cast %770 : vector<1x1x32x8xf32> to vector<32x8xf32>
    %cst_626 = arith.constant dense<0.000000e+00> : vector<16x8xf32>
    %772 = tpu.matmul %505, %771, %cst_626 {dimension_numbers = #tpu.dot_dimension_numbers<[1], [0], [0], [1], [0, 0, 1, 1], [], []>} : vector<16x32xf32>, vector<32x8xf32>, vector<16x8xf32> -> vector<16x8xf32>
    %c0_627 = arith.constant 0 : index
    %c1_628 = arith.constant 1 : index
    %c0_629 = arith.constant 0 : index
    %c0_630 = arith.constant 0 : index
    %773 = vector.load %arg11[%c0_627, %c1_628, %c0_629, %c0_630] : memref<2x4x1x8xf32, #tpu.memory_space<vmem>>, vector<1x1x1x8xf32>
    %774 = vector.shape_cast %773 : vector<1x1x1x8xf32> to vector<1x8xf32>
    %775 = vector.broadcast %774 : vector<1x8xf32> to vector<16x8xf32>
    %776 = arith.addf %772, %775 : vector<16x8xf32>
    %cst_631 = arith.constant dense<0.000000e+00> : vector<16x16xf32>
    %777 = tpu.matmul %762, %769, %cst_631 {dimension_numbers = #tpu.dot_dimension_numbers<[1], [1], [0], [0], [0, 0, 1, 0], [], []>} : vector<16x8xf32>, vector<16x8xf32>, vector<16x16xf32> -> vector<16x16xf32>
    %cst_632 = arith.constant 0.353553385 : f32
    %778 = vector.broadcast %cst_632 : f32 to vector<16x16xf32>
    %779 = arith.mulf %777, %778 : vector<16x16xf32>
    %780 = arith.addf %779, %2 : vector<16x16xf32>
    %cst_633 = arith.constant dense<0xFF800000> : vector<16xf32>
    %781 = vector.multi_reduction <maximumf>, %780, %cst_633 [1] : vector<16x16xf32> to vector<16xf32>
    %782 = vector.shape_cast %781 : vector<16xf32> to vector<16x1xf32>
    %783 = vector.broadcast %782 : vector<16x1xf32> to vector<16x16xf32>
    %784 = arith.subf %780, %783 : vector<16x16xf32>
    %785 = math.exp %784 : vector<16x16xf32>
    %cst_634 = arith.constant dense<0.000000e+00> : vector<16xf32>
    %786 = vector.multi_reduction <add>, %785, %cst_634 [1] : vector<16x16xf32> to vector<16xf32>
    %787 = vector.shape_cast %786 : vector<16xf32> to vector<16x1xf32>
    %788 = tpu.reciprocal %787 {approx = true} : vector<16x1xf32> -> vector<16x1xf32>
    %789 = vector.broadcast %788 : vector<16x1xf32> to vector<16x16xf32>
    %790 = arith.mulf %785, %789 : vector<16x16xf32>
    %cst_635 = arith.constant dense<0.000000e+00> : vector<16x8xf32>
    %791 = tpu.matmul %790, %776, %cst_635 {dimension_numbers = #tpu.dot_dimension_numbers<[1], [0], [0], [1], [0, 0, 1, 1], [], []>} : vector<16x16xf32>, vector<16x8xf32>, vector<16x8xf32> -> vector<16x8xf32>
    %c0_636 = arith.constant 0 : index
    %c1_637 = arith.constant 1 : index
    %c0_638 = arith.constant 0 : index
    %c0_639 = arith.constant 0 : index
    %792 = vector.load %arg13[%c0_636, %c1_637, %c0_638, %c0_639] : memref<2x4x8x32xf32, #tpu.memory_space<vmem>>, vector<1x1x8x32xf32>
    %793 = vector.shape_cast %792 : vector<1x1x8x32xf32> to vector<8x32xf32>
    %cst_640 = arith.constant dense<0.000000e+00> : vector<16x32xf32>
    %794 = tpu.matmul %791, %793, %cst_640 {dimension_numbers = #tpu.dot_dimension_numbers<[1], [0], [0], [1], [0, 0, 1, 1], [], []>} : vector<16x8xf32>, vector<8x32xf32>, vector<16x32xf32> -> vector<16x32xf32>
    %795 = arith.addf %755, %794 : vector<16x32xf32>
    %c0_641 = arith.constant 0 : index
    %c2_642 = arith.constant 2 : index
    %c0_643 = arith.constant 0 : index
    %c0_644 = arith.constant 0 : index
    %796 = vector.load %arg14[%c0_641, %c2_642, %c0_643, %c0_644] : memref<2x4x32x8xf32, #tpu.memory_space<vmem>>, vector<1x1x32x8xf32>
    %797 = vector.shape_cast %796 : vector<1x1x32x8xf32> to vector<32x8xf32>
    %cst_645 = arith.constant dense<0.000000e+00> : vector<16x8xf32>
    %798 = tpu.matmul %716, %797, %cst_645 {dimension_numbers = #tpu.dot_dimension_numbers<[1], [0], [0], [1], [0, 0, 1, 1], [], []>} : vector<16x32xf32>, vector<32x8xf32>, vector<16x8xf32> -> vector<16x8xf32>
    %c0_646 = arith.constant 0 : index
    %c2_647 = arith.constant 2 : index
    %c0_648 = arith.constant 0 : index
    %c0_649 = arith.constant 0 : index
    %799 = vector.load %arg10[%c0_646, %c2_647, %c0_648, %c0_649] : memref<2x4x1x8xf32, #tpu.memory_space<vmem>>, vector<1x1x1x8xf32>
    %800 = vector.shape_cast %799 : vector<1x1x1x8xf32> to vector<1x8xf32>
    %801 = vector.broadcast %800 : vector<1x8xf32> to vector<16x8xf32>
    %802 = arith.addf %798, %801 : vector<16x8xf32>
    %c0_650 = arith.constant 0 : index
    %c2_651 = arith.constant 2 : index
    %c0_652 = arith.constant 0 : index
    %c0_653 = arith.constant 0 : index
    %803 = vector.load %arg12[%c0_650, %c2_651, %c0_652, %c0_653] : memref<2x4x32x8xf32, #tpu.memory_space<vmem>>, vector<1x1x32x8xf32>
    %804 = vector.shape_cast %803 : vector<1x1x32x8xf32> to vector<32x8xf32>
    %cst_654 = arith.constant dense<0.000000e+00> : vector<16x8xf32>
    %805 = tpu.matmul %505, %804, %cst_654 {dimension_numbers = #tpu.dot_dimension_numbers<[1], [0], [0], [1], [0, 0, 1, 1], [], []>} : vector<16x32xf32>, vector<32x8xf32>, vector<16x8xf32> -> vector<16x8xf32>
    %c0_655 = arith.constant 0 : index
    %c2_656 = arith.constant 2 : index
    %c0_657 = arith.constant 0 : index
    %c0_658 = arith.constant 0 : index
    %806 = vector.load %arg8[%c0_655, %c2_656, %c0_657, %c0_658] : memref<2x4x1x8xf32, #tpu.memory_space<vmem>>, vector<1x1x1x8xf32>
    %807 = vector.shape_cast %806 : vector<1x1x1x8xf32> to vector<1x8xf32>
    %808 = vector.broadcast %807 : vector<1x8xf32> to vector<16x8xf32>
    %809 = arith.addf %805, %808 : vector<16x8xf32>
    %c0_659 = arith.constant 0 : index
    %c2_660 = arith.constant 2 : index
    %c0_661 = arith.constant 0 : index
    %c0_662 = arith.constant 0 : index
    %810 = vector.load %arg15[%c0_659, %c2_660, %c0_661, %c0_662] : memref<2x4x32x8xf32, #tpu.memory_space<vmem>>, vector<1x1x32x8xf32>
    %811 = vector.shape_cast %810 : vector<1x1x32x8xf32> to vector<32x8xf32>
    %cst_663 = arith.constant dense<0.000000e+00> : vector<16x8xf32>
    %812 = tpu.matmul %505, %811, %cst_663 {dimension_numbers = #tpu.dot_dimension_numbers<[1], [0], [0], [1], [0, 0, 1, 1], [], []>} : vector<16x32xf32>, vector<32x8xf32>, vector<16x8xf32> -> vector<16x8xf32>
    %c0_664 = arith.constant 0 : index
    %c2_665 = arith.constant 2 : index
    %c0_666 = arith.constant 0 : index
    %c0_667 = arith.constant 0 : index
    %813 = vector.load %arg11[%c0_664, %c2_665, %c0_666, %c0_667] : memref<2x4x1x8xf32, #tpu.memory_space<vmem>>, vector<1x1x1x8xf32>
    %814 = vector.shape_cast %813 : vector<1x1x1x8xf32> to vector<1x8xf32>
    %815 = vector.broadcast %814 : vector<1x8xf32> to vector<16x8xf32>
    %816 = arith.addf %812, %815 : vector<16x8xf32>
    %cst_668 = arith.constant dense<0.000000e+00> : vector<16x16xf32>
    %817 = tpu.matmul %802, %809, %cst_668 {dimension_numbers = #tpu.dot_dimension_numbers<[1], [1], [0], [0], [0, 0, 1, 0], [], []>} : vector<16x8xf32>, vector<16x8xf32>, vector<16x16xf32> -> vector<16x16xf32>
    %cst_669 = arith.constant 0.353553385 : f32
    %818 = vector.broadcast %cst_669 : f32 to vector<16x16xf32>
    %819 = arith.mulf %817, %818 : vector<16x16xf32>
    %820 = arith.addf %819, %2 : vector<16x16xf32>
    %cst_670 = arith.constant dense<0xFF800000> : vector<16xf32>
    %821 = vector.multi_reduction <maximumf>, %820, %cst_670 [1] : vector<16x16xf32> to vector<16xf32>
    %822 = vector.shape_cast %821 : vector<16xf32> to vector<16x1xf32>
    %823 = vector.broadcast %822 : vector<16x1xf32> to vector<16x16xf32>
    %824 = arith.subf %820, %823 : vector<16x16xf32>
    %825 = math.exp %824 : vector<16x16xf32>
    %cst_671 = arith.constant dense<0.000000e+00> : vector<16xf32>
    %826 = vector.multi_reduction <add>, %825, %cst_671 [1] : vector<16x16xf32> to vector<16xf32>
    %827 = vector.shape_cast %826 : vector<16xf32> to vector<16x1xf32>
    %828 = tpu.reciprocal %827 {approx = true} : vector<16x1xf32> -> vector<16x1xf32>
    %829 = vector.broadcast %828 : vector<16x1xf32> to vector<16x16xf32>
    %830 = arith.mulf %825, %829 : vector<16x16xf32>
    %cst_672 = arith.constant dense<0.000000e+00> : vector<16x8xf32>
    %831 = tpu.matmul %830, %816, %cst_672 {dimension_numbers = #tpu.dot_dimension_numbers<[1], [0], [0], [1], [0, 0, 1, 1], [], []>} : vector<16x16xf32>, vector<16x8xf32>, vector<16x8xf32> -> vector<16x8xf32>
    %c0_673 = arith.constant 0 : index
    %c2_674 = arith.constant 2 : index
    %c0_675 = arith.constant 0 : index
    %c0_676 = arith.constant 0 : index
    %832 = vector.load %arg13[%c0_673, %c2_674, %c0_675, %c0_676] : memref<2x4x8x32xf32, #tpu.memory_space<vmem>>, vector<1x1x8x32xf32>
    %833 = vector.shape_cast %832 : vector<1x1x8x32xf32> to vector<8x32xf32>
    %cst_677 = arith.constant dense<0.000000e+00> : vector<16x32xf32>
    %834 = tpu.matmul %831, %833, %cst_677 {dimension_numbers = #tpu.dot_dimension_numbers<[1], [0], [0], [1], [0, 0, 1, 1], [], []>} : vector<16x8xf32>, vector<8x32xf32>, vector<16x32xf32> -> vector<16x32xf32>
    %835 = arith.addf %795, %834 : vector<16x32xf32>
    %c0_678 = arith.constant 0 : index
    %c3_679 = arith.constant 3 : index
    %c0_680 = arith.constant 0 : index
    %c0_681 = arith.constant 0 : index
    %836 = vector.load %arg14[%c0_678, %c3_679, %c0_680, %c0_681] : memref<2x4x32x8xf32, #tpu.memory_space<vmem>>, vector<1x1x32x8xf32>
    %837 = vector.shape_cast %836 : vector<1x1x32x8xf32> to vector<32x8xf32>
    %cst_682 = arith.constant dense<0.000000e+00> : vector<16x8xf32>
    %838 = tpu.matmul %716, %837, %cst_682 {dimension_numbers = #tpu.dot_dimension_numbers<[1], [0], [0], [1], [0, 0, 1, 1], [], []>} : vector<16x32xf32>, vector<32x8xf32>, vector<16x8xf32> -> vector<16x8xf32>
    %c0_683 = arith.constant 0 : index
    %c3_684 = arith.constant 3 : index
    %c0_685 = arith.constant 0 : index
    %c0_686 = arith.constant 0 : index
    %839 = vector.load %arg10[%c0_683, %c3_684, %c0_685, %c0_686] : memref<2x4x1x8xf32, #tpu.memory_space<vmem>>, vector<1x1x1x8xf32>
    %840 = vector.shape_cast %839 : vector<1x1x1x8xf32> to vector<1x8xf32>
    %841 = vector.broadcast %840 : vector<1x8xf32> to vector<16x8xf32>
    %842 = arith.addf %838, %841 : vector<16x8xf32>
    %c0_687 = arith.constant 0 : index
    %c3_688 = arith.constant 3 : index
    %c0_689 = arith.constant 0 : index
    %c0_690 = arith.constant 0 : index
    %843 = vector.load %arg12[%c0_687, %c3_688, %c0_689, %c0_690] : memref<2x4x32x8xf32, #tpu.memory_space<vmem>>, vector<1x1x32x8xf32>
    %844 = vector.shape_cast %843 : vector<1x1x32x8xf32> to vector<32x8xf32>
    %cst_691 = arith.constant dense<0.000000e+00> : vector<16x8xf32>
    %845 = tpu.matmul %505, %844, %cst_691 {dimension_numbers = #tpu.dot_dimension_numbers<[1], [0], [0], [1], [0, 0, 1, 1], [], []>} : vector<16x32xf32>, vector<32x8xf32>, vector<16x8xf32> -> vector<16x8xf32>
    %c0_692 = arith.constant 0 : index
    %c3_693 = arith.constant 3 : index
    %c0_694 = arith.constant 0 : index
    %c0_695 = arith.constant 0 : index
    %846 = vector.load %arg8[%c0_692, %c3_693, %c0_694, %c0_695] : memref<2x4x1x8xf32, #tpu.memory_space<vmem>>, vector<1x1x1x8xf32>
    %847 = vector.shape_cast %846 : vector<1x1x1x8xf32> to vector<1x8xf32>
    %848 = vector.broadcast %847 : vector<1x8xf32> to vector<16x8xf32>
    %849 = arith.addf %845, %848 : vector<16x8xf32>
    %c0_696 = arith.constant 0 : index
    %c3_697 = arith.constant 3 : index
    %c0_698 = arith.constant 0 : index
    %c0_699 = arith.constant 0 : index
    %850 = vector.load %arg15[%c0_696, %c3_697, %c0_698, %c0_699] : memref<2x4x32x8xf32, #tpu.memory_space<vmem>>, vector<1x1x32x8xf32>
    %851 = vector.shape_cast %850 : vector<1x1x32x8xf32> to vector<32x8xf32>
    %cst_700 = arith.constant dense<0.000000e+00> : vector<16x8xf32>
    %852 = tpu.matmul %505, %851, %cst_700 {dimension_numbers = #tpu.dot_dimension_numbers<[1], [0], [0], [1], [0, 0, 1, 1], [], []>} : vector<16x32xf32>, vector<32x8xf32>, vector<16x8xf32> -> vector<16x8xf32>
    %c0_701 = arith.constant 0 : index
    %c3_702 = arith.constant 3 : index
    %c0_703 = arith.constant 0 : index
    %c0_704 = arith.constant 0 : index
    %853 = vector.load %arg11[%c0_701, %c3_702, %c0_703, %c0_704] : memref<2x4x1x8xf32, #tpu.memory_space<vmem>>, vector<1x1x1x8xf32>
    %854 = vector.shape_cast %853 : vector<1x1x1x8xf32> to vector<1x8xf32>
    %855 = vector.broadcast %854 : vector<1x8xf32> to vector<16x8xf32>
    %856 = arith.addf %852, %855 : vector<16x8xf32>
    %cst_705 = arith.constant dense<0.000000e+00> : vector<16x16xf32>
    %857 = tpu.matmul %842, %849, %cst_705 {dimension_numbers = #tpu.dot_dimension_numbers<[1], [1], [0], [0], [0, 0, 1, 0], [], []>} : vector<16x8xf32>, vector<16x8xf32>, vector<16x16xf32> -> vector<16x16xf32>
    %cst_706 = arith.constant 0.353553385 : f32
    %858 = vector.broadcast %cst_706 : f32 to vector<16x16xf32>
    %859 = arith.mulf %857, %858 : vector<16x16xf32>
    %860 = arith.addf %859, %2 : vector<16x16xf32>
    %cst_707 = arith.constant dense<0xFF800000> : vector<16xf32>
    %861 = vector.multi_reduction <maximumf>, %860, %cst_707 [1] : vector<16x16xf32> to vector<16xf32>
    %862 = vector.shape_cast %861 : vector<16xf32> to vector<16x1xf32>
    %863 = vector.broadcast %862 : vector<16x1xf32> to vector<16x16xf32>
    %864 = arith.subf %860, %863 : vector<16x16xf32>
    %865 = math.exp %864 : vector<16x16xf32>
    %cst_708 = arith.constant dense<0.000000e+00> : vector<16xf32>
    %866 = vector.multi_reduction <add>, %865, %cst_708 [1] : vector<16x16xf32> to vector<16xf32>
    %867 = vector.shape_cast %866 : vector<16xf32> to vector<16x1xf32>
    %868 = tpu.reciprocal %867 {approx = true} : vector<16x1xf32> -> vector<16x1xf32>
    %869 = vector.broadcast %868 : vector<16x1xf32> to vector<16x16xf32>
    %870 = arith.mulf %865, %869 : vector<16x16xf32>
    %cst_709 = arith.constant dense<0.000000e+00> : vector<16x8xf32>
    %871 = tpu.matmul %870, %856, %cst_709 {dimension_numbers = #tpu.dot_dimension_numbers<[1], [0], [0], [1], [0, 0, 1, 1], [], []>} : vector<16x16xf32>, vector<16x8xf32>, vector<16x8xf32> -> vector<16x8xf32>
    %c0_710 = arith.constant 0 : index
    %c3_711 = arith.constant 3 : index
    %c0_712 = arith.constant 0 : index
    %c0_713 = arith.constant 0 : index
    %872 = vector.load %arg13[%c0_710, %c3_711, %c0_712, %c0_713] : memref<2x4x8x32xf32, #tpu.memory_space<vmem>>, vector<1x1x8x32xf32>
    %873 = vector.shape_cast %872 : vector<1x1x8x32xf32> to vector<8x32xf32>
    %cst_714 = arith.constant dense<0.000000e+00> : vector<16x32xf32>
    %874 = tpu.matmul %871, %873, %cst_714 {dimension_numbers = #tpu.dot_dimension_numbers<[1], [0], [0], [1], [0, 0, 1, 1], [], []>} : vector<16x8xf32>, vector<8x32xf32>, vector<16x32xf32> -> vector<16x32xf32>
    %875 = arith.addf %835, %874 : vector<16x32xf32>
    %c0_715 = arith.constant 0 : index
    %c0_716 = arith.constant 0 : index
    %c0_717 = arith.constant 0 : index
    %876 = vector.load %arg9[%c0_715, %c0_716, %c0_717] : memref<2x1x32xf32, #tpu.memory_space<vmem>>, vector<1x1x32xf32>
    %877 = vector.shape_cast %876 : vector<1x1x32xf32> to vector<1x32xf32>
    %878 = vector.broadcast %877 : vector<1x32xf32> to vector<16x32xf32>
    %879 = arith.addf %875, %878 : vector<16x32xf32>
    %880 = arith.addf %716, %879 : vector<16x32xf32>
    %c0_718 = arith.constant 0 : index
    %c0_719 = arith.constant 0 : index
    %c0_720 = arith.constant 0 : index
    %881 = vector.load %arg17[%c0_718, %c0_719, %c0_720] : memref<2x1x32xf32, #tpu.memory_space<vmem>>, vector<1x1x32xf32>
    %882 = vector.shape_cast %881 : vector<1x1x32xf32> to vector<1x32xf32>
    %c0_721 = arith.constant 0 : index
    %c0_722 = arith.constant 0 : index
    %c0_723 = arith.constant 0 : index
    %883 = vector.load %arg16[%c0_721, %c0_722, %c0_723] : memref<2x1x32xf32, #tpu.memory_space<vmem>>, vector<1x1x32xf32>
    %884 = vector.shape_cast %883 : vector<1x1x32xf32> to vector<1x32xf32>
    %cst_724 = arith.constant dense<0.000000e+00> : vector<16xf32>
    %885 = vector.multi_reduction <add>, %880, %cst_724 [1] : vector<16x32xf32> to vector<16xf32>
    %886 = vector.shape_cast %885 : vector<16xf32> to vector<16x1xf32>
    %cst_725 = arith.constant 3.200000e+01 : f32
    %887 = vector.broadcast %cst_725 : f32 to vector<16x1xf32>
    %888 = arith.divf %886, %887 : vector<16x1xf32>
    %889 = vector.broadcast %888 : vector<16x1xf32> to vector<16x32xf32>
    %890 = arith.subf %880, %889 : vector<16x32xf32>
    %891 = arith.mulf %890, %890 : vector<16x32xf32>
    %cst_726 = arith.constant dense<0.000000e+00> : vector<16xf32>
    %892 = vector.multi_reduction <add>, %891, %cst_726 [1] : vector<16x32xf32> to vector<16xf32>
    %893 = vector.shape_cast %892 : vector<16xf32> to vector<16x1xf32>
    %cst_727 = arith.constant 3.200000e+01 : f32
    %894 = vector.broadcast %cst_727 : f32 to vector<16x1xf32>
    %895 = arith.divf %893, %894 : vector<16x1xf32>
    %cst_728 = arith.constant 9.99999974E-6 : f32
    %896 = vector.broadcast %cst_728 : f32 to vector<16x1xf32>
    %897 = arith.addf %895, %896 : vector<16x1xf32>
    %898 = math.rsqrt %897 : vector<16x1xf32>
    %899 = vector.broadcast %898 : vector<16x1xf32> to vector<16x32xf32>
    %900 = arith.mulf %890, %899 : vector<16x32xf32>
    %901 = vector.broadcast %882 : vector<1x32xf32> to vector<16x32xf32>
    %902 = arith.mulf %900, %901 : vector<16x32xf32>
    %903 = vector.broadcast %884 : vector<1x32xf32> to vector<16x32xf32>
    %904 = arith.addf %902, %903 : vector<16x32xf32>
    %c0_729 = arith.constant 0 : index
    %c0_730 = arith.constant 0 : index
    %c0_731 = arith.constant 0 : index
    %905 = vector.load %arg19[%c0_729, %c0_730, %c0_731] : memref<2x32x64xf32, #tpu.memory_space<vmem>>, vector<1x32x64xf32>
    %906 = vector.shape_cast %905 : vector<1x32x64xf32> to vector<32x64xf32>
    %cst_732 = arith.constant dense<0.000000e+00> : vector<16x64xf32>
    %907 = tpu.matmul %904, %906, %cst_732 {dimension_numbers = #tpu.dot_dimension_numbers<[1], [0], [0], [1], [0, 0, 1, 1], [], []>} : vector<16x32xf32>, vector<32x64xf32>, vector<16x64xf32> -> vector<16x64xf32>
    %c0_733 = arith.constant 0 : index
    %c0_734 = arith.constant 0 : index
    %c0_735 = arith.constant 0 : index
    %908 = vector.load %arg18[%c0_733, %c0_734, %c0_735] : memref<2x1x64xf32, #tpu.memory_space<vmem>>, vector<1x1x64xf32>
    %909 = vector.shape_cast %908 : vector<1x1x64xf32> to vector<1x64xf32>
    %910 = vector.broadcast %909 : vector<1x64xf32> to vector<16x64xf32>
    %911 = arith.addf %907, %910 : vector<16x64xf32>
    %912 = arith.mulf %911, %911 : vector<16x64xf32>
    %913 = arith.mulf %911, %912 : vector<16x64xf32>
    %cst_736 = arith.constant 4.471500e-02 : f32
    %914 = vector.broadcast %cst_736 : f32 to vector<16x64xf32>
    %915 = arith.mulf %914, %913 : vector<16x64xf32>
    %916 = arith.addf %911, %915 : vector<16x64xf32>
    %cst_737 = arith.constant 0.797884583 : f32
    %917 = vector.broadcast %cst_737 : f32 to vector<16x64xf32>
    %918 = arith.mulf %917, %916 : vector<16x64xf32>
    %919 = math.tanh %918 : vector<16x64xf32>
    %cst_738 = arith.constant 1.000000e+00 : f32
    %920 = vector.broadcast %cst_738 : f32 to vector<16x64xf32>
    %921 = arith.addf %920, %919 : vector<16x64xf32>
    %cst_739 = arith.constant 5.000000e-01 : f32
    %922 = vector.broadcast %cst_739 : f32 to vector<16x64xf32>
    %923 = arith.mulf %922, %921 : vector<16x64xf32>
    %924 = arith.mulf %911, %923 : vector<16x64xf32>
    %c0_740 = arith.constant 0 : index
    %c0_741 = arith.constant 0 : index
    %c0_742 = arith.constant 0 : index
    %925 = vector.load %arg21[%c0_740, %c0_741, %c0_742] : memref<2x64x32xf32, #tpu.memory_space<vmem>>, vector<1x64x32xf32>
    %926 = vector.shape_cast %925 : vector<1x64x32xf32> to vector<64x32xf32>
    %cst_743 = arith.constant dense<0.000000e+00> : vector<16x32xf32>
    %927 = tpu.matmul %924, %926, %cst_743 {dimension_numbers = #tpu.dot_dimension_numbers<[1], [0], [0], [1], [0, 0, 1, 1], [], []>} : vector<16x64xf32>, vector<64x32xf32>, vector<16x32xf32> -> vector<16x32xf32>
    %c0_744 = arith.constant 0 : index
    %c0_745 = arith.constant 0 : index
    %c0_746 = arith.constant 0 : index
    %928 = vector.load %arg20[%c0_744, %c0_745, %c0_746] : memref<2x1x32xf32, #tpu.memory_space<vmem>>, vector<1x1x32xf32>
    %929 = vector.shape_cast %928 : vector<1x1x32xf32> to vector<1x32xf32>
    %930 = vector.broadcast %929 : vector<1x32xf32> to vector<16x32xf32>
    %931 = arith.addf %927, %930 : vector<16x32xf32>
    %932 = arith.addf %904, %931 : vector<16x32xf32>
    %c0_747 = arith.constant 0 : index
    %c0_748 = arith.constant 0 : index
    %c0_749 = arith.constant 0 : index
    %933 = vector.load %arg23[%c0_747, %c0_748, %c0_749] : memref<2x1x32xf32, #tpu.memory_space<vmem>>, vector<1x1x32xf32>
    %934 = vector.shape_cast %933 : vector<1x1x32xf32> to vector<1x32xf32>
    %c0_750 = arith.constant 0 : index
    %c0_751 = arith.constant 0 : index
    %c0_752 = arith.constant 0 : index
    %935 = vector.load %arg22[%c0_750, %c0_751, %c0_752] : memref<2x1x32xf32, #tpu.memory_space<vmem>>, vector<1x1x32xf32>
    %936 = vector.shape_cast %935 : vector<1x1x32xf32> to vector<1x32xf32>
    %cst_753 = arith.constant dense<0.000000e+00> : vector<16xf32>
    %937 = vector.multi_reduction <add>, %932, %cst_753 [1] : vector<16x32xf32> to vector<16xf32>
    %938 = vector.shape_cast %937 : vector<16xf32> to vector<16x1xf32>
    %cst_754 = arith.constant 3.200000e+01 : f32
    %939 = vector.broadcast %cst_754 : f32 to vector<16x1xf32>
    %940 = arith.divf %938, %939 : vector<16x1xf32>
    %941 = vector.broadcast %940 : vector<16x1xf32> to vector<16x32xf32>
    %942 = arith.subf %932, %941 : vector<16x32xf32>
    %943 = arith.mulf %942, %942 : vector<16x32xf32>
    %cst_755 = arith.constant dense<0.000000e+00> : vector<16xf32>
    %944 = vector.multi_reduction <add>, %943, %cst_755 [1] : vector<16x32xf32> to vector<16xf32>
    %945 = vector.shape_cast %944 : vector<16xf32> to vector<16x1xf32>
    %cst_756 = arith.constant 3.200000e+01 : f32
    %946 = vector.broadcast %cst_756 : f32 to vector<16x1xf32>
    %947 = arith.divf %945, %946 : vector<16x1xf32>
    %cst_757 = arith.constant 9.99999974E-6 : f32
    %948 = vector.broadcast %cst_757 : f32 to vector<16x1xf32>
    %949 = arith.addf %947, %948 : vector<16x1xf32>
    %950 = math.rsqrt %949 : vector<16x1xf32>
    %951 = vector.broadcast %950 : vector<16x1xf32> to vector<16x32xf32>
    %952 = arith.mulf %942, %951 : vector<16x32xf32>
    %953 = vector.broadcast %934 : vector<1x32xf32> to vector<16x32xf32>
    %954 = arith.mulf %952, %953 : vector<16x32xf32>
    %955 = vector.broadcast %936 : vector<1x32xf32> to vector<16x32xf32>
    %956 = arith.addf %954, %955 : vector<16x32xf32>
    %c1_758 = arith.constant 1 : index
    %c0_759 = arith.constant 0 : index
    %c0_760 = arith.constant 0 : index
    %c0_761 = arith.constant 0 : index
    %957 = vector.load %arg30[%c1_758, %c0_759, %c0_760, %c0_761] : memref<2x4x32x8xf32, #tpu.memory_space<vmem>>, vector<1x1x32x8xf32>
    %958 = vector.shape_cast %957 : vector<1x1x32x8xf32> to vector<32x8xf32>
    %cst_762 = arith.constant dense<0.000000e+00> : vector<16x8xf32>
    %959 = tpu.matmul %956, %958, %cst_762 {dimension_numbers = #tpu.dot_dimension_numbers<[1], [0], [0], [1], [0, 0, 1, 1], [], []>} : vector<16x32xf32>, vector<32x8xf32>, vector<16x8xf32> -> vector<16x8xf32>
    %c1_763 = arith.constant 1 : index
    %c0_764 = arith.constant 0 : index
    %c0_765 = arith.constant 0 : index
    %c0_766 = arith.constant 0 : index
    %960 = vector.load %arg26[%c1_763, %c0_764, %c0_765, %c0_766] : memref<2x4x1x8xf32, #tpu.memory_space<vmem>>, vector<1x1x1x8xf32>
    %961 = vector.shape_cast %960 : vector<1x1x1x8xf32> to vector<1x8xf32>
    %962 = vector.broadcast %961 : vector<1x8xf32> to vector<16x8xf32>
    %963 = arith.addf %959, %962 : vector<16x8xf32>
    %c1_767 = arith.constant 1 : index
    %c0_768 = arith.constant 0 : index
    %c0_769 = arith.constant 0 : index
    %c0_770 = arith.constant 0 : index
    %964 = vector.load %arg28[%c1_767, %c0_768, %c0_769, %c0_770] : memref<2x4x32x8xf32, #tpu.memory_space<vmem>>, vector<1x1x32x8xf32>
    %965 = vector.shape_cast %964 : vector<1x1x32x8xf32> to vector<32x8xf32>
    %cst_771 = arith.constant dense<0.000000e+00> : vector<16x8xf32>
    %966 = tpu.matmul %956, %965, %cst_771 {dimension_numbers = #tpu.dot_dimension_numbers<[1], [0], [0], [1], [0, 0, 1, 1], [], []>} : vector<16x32xf32>, vector<32x8xf32>, vector<16x8xf32> -> vector<16x8xf32>
    %c1_772 = arith.constant 1 : index
    %c0_773 = arith.constant 0 : index
    %c0_774 = arith.constant 0 : index
    %c0_775 = arith.constant 0 : index
    %967 = vector.load %arg24[%c1_772, %c0_773, %c0_774, %c0_775] : memref<2x4x1x8xf32, #tpu.memory_space<vmem>>, vector<1x1x1x8xf32>
    %968 = vector.shape_cast %967 : vector<1x1x1x8xf32> to vector<1x8xf32>
    %969 = vector.broadcast %968 : vector<1x8xf32> to vector<16x8xf32>
    %970 = arith.addf %966, %969 : vector<16x8xf32>
    %c1_776 = arith.constant 1 : index
    %c0_777 = arith.constant 0 : index
    %c0_778 = arith.constant 0 : index
    %c0_779 = arith.constant 0 : index
    %971 = vector.load %arg31[%c1_776, %c0_777, %c0_778, %c0_779] : memref<2x4x32x8xf32, #tpu.memory_space<vmem>>, vector<1x1x32x8xf32>
    %972 = vector.shape_cast %971 : vector<1x1x32x8xf32> to vector<32x8xf32>
    %cst_780 = arith.constant dense<0.000000e+00> : vector<16x8xf32>
    %973 = tpu.matmul %956, %972, %cst_780 {dimension_numbers = #tpu.dot_dimension_numbers<[1], [0], [0], [1], [0, 0, 1, 1], [], []>} : vector<16x32xf32>, vector<32x8xf32>, vector<16x8xf32> -> vector<16x8xf32>
    %c1_781 = arith.constant 1 : index
    %c0_782 = arith.constant 0 : index
    %c0_783 = arith.constant 0 : index
    %c0_784 = arith.constant 0 : index
    %974 = vector.load %arg27[%c1_781, %c0_782, %c0_783, %c0_784] : memref<2x4x1x8xf32, #tpu.memory_space<vmem>>, vector<1x1x1x8xf32>
    %975 = vector.shape_cast %974 : vector<1x1x1x8xf32> to vector<1x8xf32>
    %976 = vector.broadcast %975 : vector<1x8xf32> to vector<16x8xf32>
    %977 = arith.addf %973, %976 : vector<16x8xf32>
    %cst_785 = arith.constant dense<0.000000e+00> : vector<16x16xf32>
    %978 = tpu.matmul %963, %970, %cst_785 {dimension_numbers = #tpu.dot_dimension_numbers<[1], [1], [0], [0], [0, 0, 1, 0], [], []>} : vector<16x8xf32>, vector<16x8xf32>, vector<16x16xf32> -> vector<16x16xf32>
    %cst_786 = arith.constant 0.353553385 : f32
    %979 = vector.broadcast %cst_786 : f32 to vector<16x16xf32>
    %980 = arith.mulf %978, %979 : vector<16x16xf32>
    %981 = arith.addf %980, %1 : vector<16x16xf32>
    %cst_787 = arith.constant dense<0xFF800000> : vector<16xf32>
    %982 = vector.multi_reduction <maximumf>, %981, %cst_787 [1] : vector<16x16xf32> to vector<16xf32>
    %983 = vector.shape_cast %982 : vector<16xf32> to vector<16x1xf32>
    %984 = vector.broadcast %983 : vector<16x1xf32> to vector<16x16xf32>
    %985 = arith.subf %981, %984 : vector<16x16xf32>
    %986 = math.exp %985 : vector<16x16xf32>
    %cst_788 = arith.constant dense<0.000000e+00> : vector<16xf32>
    %987 = vector.multi_reduction <add>, %986, %cst_788 [1] : vector<16x16xf32> to vector<16xf32>
    %988 = vector.shape_cast %987 : vector<16xf32> to vector<16x1xf32>
    %989 = tpu.reciprocal %988 {approx = true} : vector<16x1xf32> -> vector<16x1xf32>
    %990 = vector.broadcast %989 : vector<16x1xf32> to vector<16x16xf32>
    %991 = arith.mulf %986, %990 : vector<16x16xf32>
    %cst_789 = arith.constant dense<0.000000e+00> : vector<16x8xf32>
    %992 = tpu.matmul %991, %977, %cst_789 {dimension_numbers = #tpu.dot_dimension_numbers<[1], [0], [0], [1], [0, 0, 1, 1], [], []>} : vector<16x16xf32>, vector<16x8xf32>, vector<16x8xf32> -> vector<16x8xf32>
    %c1_790 = arith.constant 1 : index
    %c0_791 = arith.constant 0 : index
    %c0_792 = arith.constant 0 : index
    %c0_793 = arith.constant 0 : index
    %993 = vector.load %arg29[%c1_790, %c0_791, %c0_792, %c0_793] : memref<2x4x8x32xf32, #tpu.memory_space<vmem>>, vector<1x1x8x32xf32>
    %994 = vector.shape_cast %993 : vector<1x1x8x32xf32> to vector<8x32xf32>
    %cst_794 = arith.constant dense<0.000000e+00> : vector<16x32xf32>
    %995 = tpu.matmul %992, %994, %cst_794 {dimension_numbers = #tpu.dot_dimension_numbers<[1], [0], [0], [1], [0, 0, 1, 1], [], []>} : vector<16x8xf32>, vector<8x32xf32>, vector<16x32xf32> -> vector<16x32xf32>
    %c1_795 = arith.constant 1 : index
    %c1_796 = arith.constant 1 : index
    %c0_797 = arith.constant 0 : index
    %c0_798 = arith.constant 0 : index
    %996 = vector.load %arg30[%c1_795, %c1_796, %c0_797, %c0_798] : memref<2x4x32x8xf32, #tpu.memory_space<vmem>>, vector<1x1x32x8xf32>
    %997 = vector.shape_cast %996 : vector<1x1x32x8xf32> to vector<32x8xf32>
    %cst_799 = arith.constant dense<0.000000e+00> : vector<16x8xf32>
    %998 = tpu.matmul %956, %997, %cst_799 {dimension_numbers = #tpu.dot_dimension_numbers<[1], [0], [0], [1], [0, 0, 1, 1], [], []>} : vector<16x32xf32>, vector<32x8xf32>, vector<16x8xf32> -> vector<16x8xf32>
    %c1_800 = arith.constant 1 : index
    %c1_801 = arith.constant 1 : index
    %c0_802 = arith.constant 0 : index
    %c0_803 = arith.constant 0 : index
    %999 = vector.load %arg26[%c1_800, %c1_801, %c0_802, %c0_803] : memref<2x4x1x8xf32, #tpu.memory_space<vmem>>, vector<1x1x1x8xf32>
    %1000 = vector.shape_cast %999 : vector<1x1x1x8xf32> to vector<1x8xf32>
    %1001 = vector.broadcast %1000 : vector<1x8xf32> to vector<16x8xf32>
    %1002 = arith.addf %998, %1001 : vector<16x8xf32>
    %c1_804 = arith.constant 1 : index
    %c1_805 = arith.constant 1 : index
    %c0_806 = arith.constant 0 : index
    %c0_807 = arith.constant 0 : index
    %1003 = vector.load %arg28[%c1_804, %c1_805, %c0_806, %c0_807] : memref<2x4x32x8xf32, #tpu.memory_space<vmem>>, vector<1x1x32x8xf32>
    %1004 = vector.shape_cast %1003 : vector<1x1x32x8xf32> to vector<32x8xf32>
    %cst_808 = arith.constant dense<0.000000e+00> : vector<16x8xf32>
    %1005 = tpu.matmul %956, %1004, %cst_808 {dimension_numbers = #tpu.dot_dimension_numbers<[1], [0], [0], [1], [0, 0, 1, 1], [], []>} : vector<16x32xf32>, vector<32x8xf32>, vector<16x8xf32> -> vector<16x8xf32>
    %c1_809 = arith.constant 1 : index
    %c1_810 = arith.constant 1 : index
    %c0_811 = arith.constant 0 : index
    %c0_812 = arith.constant 0 : index
    %1006 = vector.load %arg24[%c1_809, %c1_810, %c0_811, %c0_812] : memref<2x4x1x8xf32, #tpu.memory_space<vmem>>, vector<1x1x1x8xf32>
    %1007 = vector.shape_cast %1006 : vector<1x1x1x8xf32> to vector<1x8xf32>
    %1008 = vector.broadcast %1007 : vector<1x8xf32> to vector<16x8xf32>
    %1009 = arith.addf %1005, %1008 : vector<16x8xf32>
    %c1_813 = arith.constant 1 : index
    %c1_814 = arith.constant 1 : index
    %c0_815 = arith.constant 0 : index
    %c0_816 = arith.constant 0 : index
    %1010 = vector.load %arg31[%c1_813, %c1_814, %c0_815, %c0_816] : memref<2x4x32x8xf32, #tpu.memory_space<vmem>>, vector<1x1x32x8xf32>
    %1011 = vector.shape_cast %1010 : vector<1x1x32x8xf32> to vector<32x8xf32>
    %cst_817 = arith.constant dense<0.000000e+00> : vector<16x8xf32>
    %1012 = tpu.matmul %956, %1011, %cst_817 {dimension_numbers = #tpu.dot_dimension_numbers<[1], [0], [0], [1], [0, 0, 1, 1], [], []>} : vector<16x32xf32>, vector<32x8xf32>, vector<16x8xf32> -> vector<16x8xf32>
    %c1_818 = arith.constant 1 : index
    %c1_819 = arith.constant 1 : index
    %c0_820 = arith.constant 0 : index
    %c0_821 = arith.constant 0 : index
    %1013 = vector.load %arg27[%c1_818, %c1_819, %c0_820, %c0_821] : memref<2x4x1x8xf32, #tpu.memory_space<vmem>>, vector<1x1x1x8xf32>
    %1014 = vector.shape_cast %1013 : vector<1x1x1x8xf32> to vector<1x8xf32>
    %1015 = vector.broadcast %1014 : vector<1x8xf32> to vector<16x8xf32>
    %1016 = arith.addf %1012, %1015 : vector<16x8xf32>
    %cst_822 = arith.constant dense<0.000000e+00> : vector<16x16xf32>
    %1017 = tpu.matmul %1002, %1009, %cst_822 {dimension_numbers = #tpu.dot_dimension_numbers<[1], [1], [0], [0], [0, 0, 1, 0], [], []>} : vector<16x8xf32>, vector<16x8xf32>, vector<16x16xf32> -> vector<16x16xf32>
    %cst_823 = arith.constant 0.353553385 : f32
    %1018 = vector.broadcast %cst_823 : f32 to vector<16x16xf32>
    %1019 = arith.mulf %1017, %1018 : vector<16x16xf32>
    %1020 = arith.addf %1019, %1 : vector<16x16xf32>
    %cst_824 = arith.constant dense<0xFF800000> : vector<16xf32>
    %1021 = vector.multi_reduction <maximumf>, %1020, %cst_824 [1] : vector<16x16xf32> to vector<16xf32>
    %1022 = vector.shape_cast %1021 : vector<16xf32> to vector<16x1xf32>
    %1023 = vector.broadcast %1022 : vector<16x1xf32> to vector<16x16xf32>
    %1024 = arith.subf %1020, %1023 : vector<16x16xf32>
    %1025 = math.exp %1024 : vector<16x16xf32>
    %cst_825 = arith.constant dense<0.000000e+00> : vector<16xf32>
    %1026 = vector.multi_reduction <add>, %1025, %cst_825 [1] : vector<16x16xf32> to vector<16xf32>
    %1027 = vector.shape_cast %1026 : vector<16xf32> to vector<16x1xf32>
    %1028 = tpu.reciprocal %1027 {approx = true} : vector<16x1xf32> -> vector<16x1xf32>
    %1029 = vector.broadcast %1028 : vector<16x1xf32> to vector<16x16xf32>
    %1030 = arith.mulf %1025, %1029 : vector<16x16xf32>
    %cst_826 = arith.constant dense<0.000000e+00> : vector<16x8xf32>
    %1031 = tpu.matmul %1030, %1016, %cst_826 {dimension_numbers = #tpu.dot_dimension_numbers<[1], [0], [0], [1], [0, 0, 1, 1], [], []>} : vector<16x16xf32>, vector<16x8xf32>, vector<16x8xf32> -> vector<16x8xf32>
    %c1_827 = arith.constant 1 : index
    %c1_828 = arith.constant 1 : index
    %c0_829 = arith.constant 0 : index
    %c0_830 = arith.constant 0 : index
    %1032 = vector.load %arg29[%c1_827, %c1_828, %c0_829, %c0_830] : memref<2x4x8x32xf32, #tpu.memory_space<vmem>>, vector<1x1x8x32xf32>
    %1033 = vector.shape_cast %1032 : vector<1x1x8x32xf32> to vector<8x32xf32>
    %cst_831 = arith.constant dense<0.000000e+00> : vector<16x32xf32>
    %1034 = tpu.matmul %1031, %1033, %cst_831 {dimension_numbers = #tpu.dot_dimension_numbers<[1], [0], [0], [1], [0, 0, 1, 1], [], []>} : vector<16x8xf32>, vector<8x32xf32>, vector<16x32xf32> -> vector<16x32xf32>
    %1035 = arith.addf %995, %1034 : vector<16x32xf32>
    %c1_832 = arith.constant 1 : index
    %c2_833 = arith.constant 2 : index
    %c0_834 = arith.constant 0 : index
    %c0_835 = arith.constant 0 : index
    %1036 = vector.load %arg30[%c1_832, %c2_833, %c0_834, %c0_835] : memref<2x4x32x8xf32, #tpu.memory_space<vmem>>, vector<1x1x32x8xf32>
    %1037 = vector.shape_cast %1036 : vector<1x1x32x8xf32> to vector<32x8xf32>
    %cst_836 = arith.constant dense<0.000000e+00> : vector<16x8xf32>
    %1038 = tpu.matmul %956, %1037, %cst_836 {dimension_numbers = #tpu.dot_dimension_numbers<[1], [0], [0], [1], [0, 0, 1, 1], [], []>} : vector<16x32xf32>, vector<32x8xf32>, vector<16x8xf32> -> vector<16x8xf32>
    %c1_837 = arith.constant 1 : index
    %c2_838 = arith.constant 2 : index
    %c0_839 = arith.constant 0 : index
    %c0_840 = arith.constant 0 : index
    %1039 = vector.load %arg26[%c1_837, %c2_838, %c0_839, %c0_840] : memref<2x4x1x8xf32, #tpu.memory_space<vmem>>, vector<1x1x1x8xf32>
    %1040 = vector.shape_cast %1039 : vector<1x1x1x8xf32> to vector<1x8xf32>
    %1041 = vector.broadcast %1040 : vector<1x8xf32> to vector<16x8xf32>
    %1042 = arith.addf %1038, %1041 : vector<16x8xf32>
    %c1_841 = arith.constant 1 : index
    %c2_842 = arith.constant 2 : index
    %c0_843 = arith.constant 0 : index
    %c0_844 = arith.constant 0 : index
    %1043 = vector.load %arg28[%c1_841, %c2_842, %c0_843, %c0_844] : memref<2x4x32x8xf32, #tpu.memory_space<vmem>>, vector<1x1x32x8xf32>
    %1044 = vector.shape_cast %1043 : vector<1x1x32x8xf32> to vector<32x8xf32>
    %cst_845 = arith.constant dense<0.000000e+00> : vector<16x8xf32>
    %1045 = tpu.matmul %956, %1044, %cst_845 {dimension_numbers = #tpu.dot_dimension_numbers<[1], [0], [0], [1], [0, 0, 1, 1], [], []>} : vector<16x32xf32>, vector<32x8xf32>, vector<16x8xf32> -> vector<16x8xf32>
    %c1_846 = arith.constant 1 : index
    %c2_847 = arith.constant 2 : index
    %c0_848 = arith.constant 0 : index
    %c0_849 = arith.constant 0 : index
    %1046 = vector.load %arg24[%c1_846, %c2_847, %c0_848, %c0_849] : memref<2x4x1x8xf32, #tpu.memory_space<vmem>>, vector<1x1x1x8xf32>
    %1047 = vector.shape_cast %1046 : vector<1x1x1x8xf32> to vector<1x8xf32>
    %1048 = vector.broadcast %1047 : vector<1x8xf32> to vector<16x8xf32>
    %1049 = arith.addf %1045, %1048 : vector<16x8xf32>
    %c1_850 = arith.constant 1 : index
    %c2_851 = arith.constant 2 : index
    %c0_852 = arith.constant 0 : index
    %c0_853 = arith.constant 0 : index
    %1050 = vector.load %arg31[%c1_850, %c2_851, %c0_852, %c0_853] : memref<2x4x32x8xf32, #tpu.memory_space<vmem>>, vector<1x1x32x8xf32>
    %1051 = vector.shape_cast %1050 : vector<1x1x32x8xf32> to vector<32x8xf32>
    %cst_854 = arith.constant dense<0.000000e+00> : vector<16x8xf32>
    %1052 = tpu.matmul %956, %1051, %cst_854 {dimension_numbers = #tpu.dot_dimension_numbers<[1], [0], [0], [1], [0, 0, 1, 1], [], []>} : vector<16x32xf32>, vector<32x8xf32>, vector<16x8xf32> -> vector<16x8xf32>
    %c1_855 = arith.constant 1 : index
    %c2_856 = arith.constant 2 : index
    %c0_857 = arith.constant 0 : index
    %c0_858 = arith.constant 0 : index
    %1053 = vector.load %arg27[%c1_855, %c2_856, %c0_857, %c0_858] : memref<2x4x1x8xf32, #tpu.memory_space<vmem>>, vector<1x1x1x8xf32>
    %1054 = vector.shape_cast %1053 : vector<1x1x1x8xf32> to vector<1x8xf32>
    %1055 = vector.broadcast %1054 : vector<1x8xf32> to vector<16x8xf32>
    %1056 = arith.addf %1052, %1055 : vector<16x8xf32>
    %cst_859 = arith.constant dense<0.000000e+00> : vector<16x16xf32>
    %1057 = tpu.matmul %1042, %1049, %cst_859 {dimension_numbers = #tpu.dot_dimension_numbers<[1], [1], [0], [0], [0, 0, 1, 0], [], []>} : vector<16x8xf32>, vector<16x8xf32>, vector<16x16xf32> -> vector<16x16xf32>
    %cst_860 = arith.constant 0.353553385 : f32
    %1058 = vector.broadcast %cst_860 : f32 to vector<16x16xf32>
    %1059 = arith.mulf %1057, %1058 : vector<16x16xf32>
    %1060 = arith.addf %1059, %1 : vector<16x16xf32>
    %cst_861 = arith.constant dense<0xFF800000> : vector<16xf32>
    %1061 = vector.multi_reduction <maximumf>, %1060, %cst_861 [1] : vector<16x16xf32> to vector<16xf32>
    %1062 = vector.shape_cast %1061 : vector<16xf32> to vector<16x1xf32>
    %1063 = vector.broadcast %1062 : vector<16x1xf32> to vector<16x16xf32>
    %1064 = arith.subf %1060, %1063 : vector<16x16xf32>
    %1065 = math.exp %1064 : vector<16x16xf32>
    %cst_862 = arith.constant dense<0.000000e+00> : vector<16xf32>
    %1066 = vector.multi_reduction <add>, %1065, %cst_862 [1] : vector<16x16xf32> to vector<16xf32>
    %1067 = vector.shape_cast %1066 : vector<16xf32> to vector<16x1xf32>
    %1068 = tpu.reciprocal %1067 {approx = true} : vector<16x1xf32> -> vector<16x1xf32>
    %1069 = vector.broadcast %1068 : vector<16x1xf32> to vector<16x16xf32>
    %1070 = arith.mulf %1065, %1069 : vector<16x16xf32>
    %cst_863 = arith.constant dense<0.000000e+00> : vector<16x8xf32>
    %1071 = tpu.matmul %1070, %1056, %cst_863 {dimension_numbers = #tpu.dot_dimension_numbers<[1], [0], [0], [1], [0, 0, 1, 1], [], []>} : vector<16x16xf32>, vector<16x8xf32>, vector<16x8xf32> -> vector<16x8xf32>
    %c1_864 = arith.constant 1 : index
    %c2_865 = arith.constant 2 : index
    %c0_866 = arith.constant 0 : index
    %c0_867 = arith.constant 0 : index
    %1072 = vector.load %arg29[%c1_864, %c2_865, %c0_866, %c0_867] : memref<2x4x8x32xf32, #tpu.memory_space<vmem>>, vector<1x1x8x32xf32>
    %1073 = vector.shape_cast %1072 : vector<1x1x8x32xf32> to vector<8x32xf32>
    %cst_868 = arith.constant dense<0.000000e+00> : vector<16x32xf32>
    %1074 = tpu.matmul %1071, %1073, %cst_868 {dimension_numbers = #tpu.dot_dimension_numbers<[1], [0], [0], [1], [0, 0, 1, 1], [], []>} : vector<16x8xf32>, vector<8x32xf32>, vector<16x32xf32> -> vector<16x32xf32>
    %1075 = arith.addf %1035, %1074 : vector<16x32xf32>
    %c1_869 = arith.constant 1 : index
    %c3_870 = arith.constant 3 : index
    %c0_871 = arith.constant 0 : index
    %c0_872 = arith.constant 0 : index
    %1076 = vector.load %arg30[%c1_869, %c3_870, %c0_871, %c0_872] : memref<2x4x32x8xf32, #tpu.memory_space<vmem>>, vector<1x1x32x8xf32>
    %1077 = vector.shape_cast %1076 : vector<1x1x32x8xf32> to vector<32x8xf32>
    %cst_873 = arith.constant dense<0.000000e+00> : vector<16x8xf32>
    %1078 = tpu.matmul %956, %1077, %cst_873 {dimension_numbers = #tpu.dot_dimension_numbers<[1], [0], [0], [1], [0, 0, 1, 1], [], []>} : vector<16x32xf32>, vector<32x8xf32>, vector<16x8xf32> -> vector<16x8xf32>
    %c1_874 = arith.constant 1 : index
    %c3_875 = arith.constant 3 : index
    %c0_876 = arith.constant 0 : index
    %c0_877 = arith.constant 0 : index
    %1079 = vector.load %arg26[%c1_874, %c3_875, %c0_876, %c0_877] : memref<2x4x1x8xf32, #tpu.memory_space<vmem>>, vector<1x1x1x8xf32>
    %1080 = vector.shape_cast %1079 : vector<1x1x1x8xf32> to vector<1x8xf32>
    %1081 = vector.broadcast %1080 : vector<1x8xf32> to vector<16x8xf32>
    %1082 = arith.addf %1078, %1081 : vector<16x8xf32>
    %c1_878 = arith.constant 1 : index
    %c3_879 = arith.constant 3 : index
    %c0_880 = arith.constant 0 : index
    %c0_881 = arith.constant 0 : index
    %1083 = vector.load %arg28[%c1_878, %c3_879, %c0_880, %c0_881] : memref<2x4x32x8xf32, #tpu.memory_space<vmem>>, vector<1x1x32x8xf32>
    %1084 = vector.shape_cast %1083 : vector<1x1x32x8xf32> to vector<32x8xf32>
    %cst_882 = arith.constant dense<0.000000e+00> : vector<16x8xf32>
    %1085 = tpu.matmul %956, %1084, %cst_882 {dimension_numbers = #tpu.dot_dimension_numbers<[1], [0], [0], [1], [0, 0, 1, 1], [], []>} : vector<16x32xf32>, vector<32x8xf32>, vector<16x8xf32> -> vector<16x8xf32>
    %c1_883 = arith.constant 1 : index
    %c3_884 = arith.constant 3 : index
    %c0_885 = arith.constant 0 : index
    %c0_886 = arith.constant 0 : index
    %1086 = vector.load %arg24[%c1_883, %c3_884, %c0_885, %c0_886] : memref<2x4x1x8xf32, #tpu.memory_space<vmem>>, vector<1x1x1x8xf32>
    %1087 = vector.shape_cast %1086 : vector<1x1x1x8xf32> to vector<1x8xf32>
    %1088 = vector.broadcast %1087 : vector<1x8xf32> to vector<16x8xf32>
    %1089 = arith.addf %1085, %1088 : vector<16x8xf32>
    %c1_887 = arith.constant 1 : index
    %c3_888 = arith.constant 3 : index
    %c0_889 = arith.constant 0 : index
    %c0_890 = arith.constant 0 : index
    %1090 = vector.load %arg31[%c1_887, %c3_888, %c0_889, %c0_890] : memref<2x4x32x8xf32, #tpu.memory_space<vmem>>, vector<1x1x32x8xf32>
    %1091 = vector.shape_cast %1090 : vector<1x1x32x8xf32> to vector<32x8xf32>
    %cst_891 = arith.constant dense<0.000000e+00> : vector<16x8xf32>
    %1092 = tpu.matmul %956, %1091, %cst_891 {dimension_numbers = #tpu.dot_dimension_numbers<[1], [0], [0], [1], [0, 0, 1, 1], [], []>} : vector<16x32xf32>, vector<32x8xf32>, vector<16x8xf32> -> vector<16x8xf32>
    %c1_892 = arith.constant 1 : index
    %c3_893 = arith.constant 3 : index
    %c0_894 = arith.constant 0 : index
    %c0_895 = arith.constant 0 : index
    %1093 = vector.load %arg27[%c1_892, %c3_893, %c0_894, %c0_895] : memref<2x4x1x8xf32, #tpu.memory_space<vmem>>, vector<1x1x1x8xf32>
    %1094 = vector.shape_cast %1093 : vector<1x1x1x8xf32> to vector<1x8xf32>
    %1095 = vector.broadcast %1094 : vector<1x8xf32> to vector<16x8xf32>
    %1096 = arith.addf %1092, %1095 : vector<16x8xf32>
    %cst_896 = arith.constant dense<0.000000e+00> : vector<16x16xf32>
    %1097 = tpu.matmul %1082, %1089, %cst_896 {dimension_numbers = #tpu.dot_dimension_numbers<[1], [1], [0], [0], [0, 0, 1, 0], [], []>} : vector<16x8xf32>, vector<16x8xf32>, vector<16x16xf32> -> vector<16x16xf32>
    %cst_897 = arith.constant 0.353553385 : f32
    %1098 = vector.broadcast %cst_897 : f32 to vector<16x16xf32>
    %1099 = arith.mulf %1097, %1098 : vector<16x16xf32>
    %1100 = arith.addf %1099, %1 : vector<16x16xf32>
    %cst_898 = arith.constant dense<0xFF800000> : vector<16xf32>
    %1101 = vector.multi_reduction <maximumf>, %1100, %cst_898 [1] : vector<16x16xf32> to vector<16xf32>
    %1102 = vector.shape_cast %1101 : vector<16xf32> to vector<16x1xf32>
    %1103 = vector.broadcast %1102 : vector<16x1xf32> to vector<16x16xf32>
    %1104 = arith.subf %1100, %1103 : vector<16x16xf32>
    %1105 = math.exp %1104 : vector<16x16xf32>
    %cst_899 = arith.constant dense<0.000000e+00> : vector<16xf32>
    %1106 = vector.multi_reduction <add>, %1105, %cst_899 [1] : vector<16x16xf32> to vector<16xf32>
    %1107 = vector.shape_cast %1106 : vector<16xf32> to vector<16x1xf32>
    %1108 = tpu.reciprocal %1107 {approx = true} : vector<16x1xf32> -> vector<16x1xf32>
    %1109 = vector.broadcast %1108 : vector<16x1xf32> to vector<16x16xf32>
    %1110 = arith.mulf %1105, %1109 : vector<16x16xf32>
    %cst_900 = arith.constant dense<0.000000e+00> : vector<16x8xf32>
    %1111 = tpu.matmul %1110, %1096, %cst_900 {dimension_numbers = #tpu.dot_dimension_numbers<[1], [0], [0], [1], [0, 0, 1, 1], [], []>} : vector<16x16xf32>, vector<16x8xf32>, vector<16x8xf32> -> vector<16x8xf32>
    %c1_901 = arith.constant 1 : index
    %c3_902 = arith.constant 3 : index
    %c0_903 = arith.constant 0 : index
    %c0_904 = arith.constant 0 : index
    %1112 = vector.load %arg29[%c1_901, %c3_902, %c0_903, %c0_904] : memref<2x4x8x32xf32, #tpu.memory_space<vmem>>, vector<1x1x8x32xf32>
    %1113 = vector.shape_cast %1112 : vector<1x1x8x32xf32> to vector<8x32xf32>
    %cst_905 = arith.constant dense<0.000000e+00> : vector<16x32xf32>
    %1114 = tpu.matmul %1111, %1113, %cst_905 {dimension_numbers = #tpu.dot_dimension_numbers<[1], [0], [0], [1], [0, 0, 1, 1], [], []>} : vector<16x8xf32>, vector<8x32xf32>, vector<16x32xf32> -> vector<16x32xf32>
    %1115 = arith.addf %1075, %1114 : vector<16x32xf32>
    %c1_906 = arith.constant 1 : index
    %c0_907 = arith.constant 0 : index
    %c0_908 = arith.constant 0 : index
    %1116 = vector.load %arg25[%c1_906, %c0_907, %c0_908] : memref<2x1x32xf32, #tpu.memory_space<vmem>>, vector<1x1x32xf32>
    %1117 = vector.shape_cast %1116 : vector<1x1x32xf32> to vector<1x32xf32>
    %1118 = vector.broadcast %1117 : vector<1x32xf32> to vector<16x32xf32>
    %1119 = arith.addf %1115, %1118 : vector<16x32xf32>
    %1120 = arith.addf %956, %1119 : vector<16x32xf32>
    %c1_909 = arith.constant 1 : index
    %c0_910 = arith.constant 0 : index
    %c0_911 = arith.constant 0 : index
    %1121 = vector.load %arg33[%c1_909, %c0_910, %c0_911] : memref<2x1x32xf32, #tpu.memory_space<vmem>>, vector<1x1x32xf32>
    %1122 = vector.shape_cast %1121 : vector<1x1x32xf32> to vector<1x32xf32>
    %c1_912 = arith.constant 1 : index
    %c0_913 = arith.constant 0 : index
    %c0_914 = arith.constant 0 : index
    %1123 = vector.load %arg32[%c1_912, %c0_913, %c0_914] : memref<2x1x32xf32, #tpu.memory_space<vmem>>, vector<1x1x32xf32>
    %1124 = vector.shape_cast %1123 : vector<1x1x32xf32> to vector<1x32xf32>
    %cst_915 = arith.constant dense<0.000000e+00> : vector<16xf32>
    %1125 = vector.multi_reduction <add>, %1120, %cst_915 [1] : vector<16x32xf32> to vector<16xf32>
    %1126 = vector.shape_cast %1125 : vector<16xf32> to vector<16x1xf32>
    %cst_916 = arith.constant 3.200000e+01 : f32
    %1127 = vector.broadcast %cst_916 : f32 to vector<16x1xf32>
    %1128 = arith.divf %1126, %1127 : vector<16x1xf32>
    %1129 = vector.broadcast %1128 : vector<16x1xf32> to vector<16x32xf32>
    %1130 = arith.subf %1120, %1129 : vector<16x32xf32>
    %1131 = arith.mulf %1130, %1130 : vector<16x32xf32>
    %cst_917 = arith.constant dense<0.000000e+00> : vector<16xf32>
    %1132 = vector.multi_reduction <add>, %1131, %cst_917 [1] : vector<16x32xf32> to vector<16xf32>
    %1133 = vector.shape_cast %1132 : vector<16xf32> to vector<16x1xf32>
    %cst_918 = arith.constant 3.200000e+01 : f32
    %1134 = vector.broadcast %cst_918 : f32 to vector<16x1xf32>
    %1135 = arith.divf %1133, %1134 : vector<16x1xf32>
    %cst_919 = arith.constant 9.99999974E-6 : f32
    %1136 = vector.broadcast %cst_919 : f32 to vector<16x1xf32>
    %1137 = arith.addf %1135, %1136 : vector<16x1xf32>
    %1138 = math.rsqrt %1137 : vector<16x1xf32>
    %1139 = vector.broadcast %1138 : vector<16x1xf32> to vector<16x32xf32>
    %1140 = arith.mulf %1130, %1139 : vector<16x32xf32>
    %1141 = vector.broadcast %1122 : vector<1x32xf32> to vector<16x32xf32>
    %1142 = arith.mulf %1140, %1141 : vector<16x32xf32>
    %1143 = vector.broadcast %1124 : vector<1x32xf32> to vector<16x32xf32>
    %1144 = arith.addf %1142, %1143 : vector<16x32xf32>
    %c1_920 = arith.constant 1 : index
    %c0_921 = arith.constant 0 : index
    %c0_922 = arith.constant 0 : index
    %c0_923 = arith.constant 0 : index
    %1145 = vector.load %arg14[%c1_920, %c0_921, %c0_922, %c0_923] : memref<2x4x32x8xf32, #tpu.memory_space<vmem>>, vector<1x1x32x8xf32>
    %1146 = vector.shape_cast %1145 : vector<1x1x32x8xf32> to vector<32x8xf32>
    %cst_924 = arith.constant dense<0.000000e+00> : vector<16x8xf32>
    %1147 = tpu.matmul %1144, %1146, %cst_924 {dimension_numbers = #tpu.dot_dimension_numbers<[1], [0], [0], [1], [0, 0, 1, 1], [], []>} : vector<16x32xf32>, vector<32x8xf32>, vector<16x8xf32> -> vector<16x8xf32>
    %c1_925 = arith.constant 1 : index
    %c0_926 = arith.constant 0 : index
    %c0_927 = arith.constant 0 : index
    %c0_928 = arith.constant 0 : index
    %1148 = vector.load %arg10[%c1_925, %c0_926, %c0_927, %c0_928] : memref<2x4x1x8xf32, #tpu.memory_space<vmem>>, vector<1x1x1x8xf32>
    %1149 = vector.shape_cast %1148 : vector<1x1x1x8xf32> to vector<1x8xf32>
    %1150 = vector.broadcast %1149 : vector<1x8xf32> to vector<16x8xf32>
    %1151 = arith.addf %1147, %1150 : vector<16x8xf32>
    %c1_929 = arith.constant 1 : index
    %c0_930 = arith.constant 0 : index
    %c0_931 = arith.constant 0 : index
    %c0_932 = arith.constant 0 : index
    %1152 = vector.load %arg12[%c1_929, %c0_930, %c0_931, %c0_932] : memref<2x4x32x8xf32, #tpu.memory_space<vmem>>, vector<1x1x32x8xf32>
    %1153 = vector.shape_cast %1152 : vector<1x1x32x8xf32> to vector<32x8xf32>
    %cst_933 = arith.constant dense<0.000000e+00> : vector<16x8xf32>
    %1154 = tpu.matmul %505, %1153, %cst_933 {dimension_numbers = #tpu.dot_dimension_numbers<[1], [0], [0], [1], [0, 0, 1, 1], [], []>} : vector<16x32xf32>, vector<32x8xf32>, vector<16x8xf32> -> vector<16x8xf32>
    %c1_934 = arith.constant 1 : index
    %c0_935 = arith.constant 0 : index
    %c0_936 = arith.constant 0 : index
    %c0_937 = arith.constant 0 : index
    %1155 = vector.load %arg8[%c1_934, %c0_935, %c0_936, %c0_937] : memref<2x4x1x8xf32, #tpu.memory_space<vmem>>, vector<1x1x1x8xf32>
    %1156 = vector.shape_cast %1155 : vector<1x1x1x8xf32> to vector<1x8xf32>
    %1157 = vector.broadcast %1156 : vector<1x8xf32> to vector<16x8xf32>
    %1158 = arith.addf %1154, %1157 : vector<16x8xf32>
    %c1_938 = arith.constant 1 : index
    %c0_939 = arith.constant 0 : index
    %c0_940 = arith.constant 0 : index
    %c0_941 = arith.constant 0 : index
    %1159 = vector.load %arg15[%c1_938, %c0_939, %c0_940, %c0_941] : memref<2x4x32x8xf32, #tpu.memory_space<vmem>>, vector<1x1x32x8xf32>
    %1160 = vector.shape_cast %1159 : vector<1x1x32x8xf32> to vector<32x8xf32>
    %cst_942 = arith.constant dense<0.000000e+00> : vector<16x8xf32>
    %1161 = tpu.matmul %505, %1160, %cst_942 {dimension_numbers = #tpu.dot_dimension_numbers<[1], [0], [0], [1], [0, 0, 1, 1], [], []>} : vector<16x32xf32>, vector<32x8xf32>, vector<16x8xf32> -> vector<16x8xf32>
    %c1_943 = arith.constant 1 : index
    %c0_944 = arith.constant 0 : index
    %c0_945 = arith.constant 0 : index
    %c0_946 = arith.constant 0 : index
    %1162 = vector.load %arg11[%c1_943, %c0_944, %c0_945, %c0_946] : memref<2x4x1x8xf32, #tpu.memory_space<vmem>>, vector<1x1x1x8xf32>
    %1163 = vector.shape_cast %1162 : vector<1x1x1x8xf32> to vector<1x8xf32>
    %1164 = vector.broadcast %1163 : vector<1x8xf32> to vector<16x8xf32>
    %1165 = arith.addf %1161, %1164 : vector<16x8xf32>
    %cst_947 = arith.constant dense<0.000000e+00> : vector<16x16xf32>
    %1166 = tpu.matmul %1151, %1158, %cst_947 {dimension_numbers = #tpu.dot_dimension_numbers<[1], [1], [0], [0], [0, 0, 1, 0], [], []>} : vector<16x8xf32>, vector<16x8xf32>, vector<16x16xf32> -> vector<16x16xf32>
    %cst_948 = arith.constant 0.353553385 : f32
    %1167 = vector.broadcast %cst_948 : f32 to vector<16x16xf32>
    %1168 = arith.mulf %1166, %1167 : vector<16x16xf32>
    %1169 = arith.addf %1168, %2 : vector<16x16xf32>
    %cst_949 = arith.constant dense<0xFF800000> : vector<16xf32>
    %1170 = vector.multi_reduction <maximumf>, %1169, %cst_949 [1] : vector<16x16xf32> to vector<16xf32>
    %1171 = vector.shape_cast %1170 : vector<16xf32> to vector<16x1xf32>
    %1172 = vector.broadcast %1171 : vector<16x1xf32> to vector<16x16xf32>
    %1173 = arith.subf %1169, %1172 : vector<16x16xf32>
    %1174 = math.exp %1173 : vector<16x16xf32>
    %cst_950 = arith.constant dense<0.000000e+00> : vector<16xf32>
    %1175 = vector.multi_reduction <add>, %1174, %cst_950 [1] : vector<16x16xf32> to vector<16xf32>
    %1176 = vector.shape_cast %1175 : vector<16xf32> to vector<16x1xf32>
    %1177 = tpu.reciprocal %1176 {approx = true} : vector<16x1xf32> -> vector<16x1xf32>
    %1178 = vector.broadcast %1177 : vector<16x1xf32> to vector<16x16xf32>
    %1179 = arith.mulf %1174, %1178 : vector<16x16xf32>
    %cst_951 = arith.constant dense<0.000000e+00> : vector<16x8xf32>
    %1180 = tpu.matmul %1179, %1165, %cst_951 {dimension_numbers = #tpu.dot_dimension_numbers<[1], [0], [0], [1], [0, 0, 1, 1], [], []>} : vector<16x16xf32>, vector<16x8xf32>, vector<16x8xf32> -> vector<16x8xf32>
    %c1_952 = arith.constant 1 : index
    %c0_953 = arith.constant 0 : index
    %c0_954 = arith.constant 0 : index
    %c0_955 = arith.constant 0 : index
    %1181 = vector.load %arg13[%c1_952, %c0_953, %c0_954, %c0_955] : memref<2x4x8x32xf32, #tpu.memory_space<vmem>>, vector<1x1x8x32xf32>
    %1182 = vector.shape_cast %1181 : vector<1x1x8x32xf32> to vector<8x32xf32>
    %cst_956 = arith.constant dense<0.000000e+00> : vector<16x32xf32>
    %1183 = tpu.matmul %1180, %1182, %cst_956 {dimension_numbers = #tpu.dot_dimension_numbers<[1], [0], [0], [1], [0, 0, 1, 1], [], []>} : vector<16x8xf32>, vector<8x32xf32>, vector<16x32xf32> -> vector<16x32xf32>
    %c1_957 = arith.constant 1 : index
    %c1_958 = arith.constant 1 : index
    %c0_959 = arith.constant 0 : index
    %c0_960 = arith.constant 0 : index
    %1184 = vector.load %arg14[%c1_957, %c1_958, %c0_959, %c0_960] : memref<2x4x32x8xf32, #tpu.memory_space<vmem>>, vector<1x1x32x8xf32>
    %1185 = vector.shape_cast %1184 : vector<1x1x32x8xf32> to vector<32x8xf32>
    %cst_961 = arith.constant dense<0.000000e+00> : vector<16x8xf32>
    %1186 = tpu.matmul %1144, %1185, %cst_961 {dimension_numbers = #tpu.dot_dimension_numbers<[1], [0], [0], [1], [0, 0, 1, 1], [], []>} : vector<16x32xf32>, vector<32x8xf32>, vector<16x8xf32> -> vector<16x8xf32>
    %c1_962 = arith.constant 1 : index
    %c1_963 = arith.constant 1 : index
    %c0_964 = arith.constant 0 : index
    %c0_965 = arith.constant 0 : index
    %1187 = vector.load %arg10[%c1_962, %c1_963, %c0_964, %c0_965] : memref<2x4x1x8xf32, #tpu.memory_space<vmem>>, vector<1x1x1x8xf32>
    %1188 = vector.shape_cast %1187 : vector<1x1x1x8xf32> to vector<1x8xf32>
    %1189 = vector.broadcast %1188 : vector<1x8xf32> to vector<16x8xf32>
    %1190 = arith.addf %1186, %1189 : vector<16x8xf32>
    %c1_966 = arith.constant 1 : index
    %c1_967 = arith.constant 1 : index
    %c0_968 = arith.constant 0 : index
    %c0_969 = arith.constant 0 : index
    %1191 = vector.load %arg12[%c1_966, %c1_967, %c0_968, %c0_969] : memref<2x4x32x8xf32, #tpu.memory_space<vmem>>, vector<1x1x32x8xf32>
    %1192 = vector.shape_cast %1191 : vector<1x1x32x8xf32> to vector<32x8xf32>
    %cst_970 = arith.constant dense<0.000000e+00> : vector<16x8xf32>
    %1193 = tpu.matmul %505, %1192, %cst_970 {dimension_numbers = #tpu.dot_dimension_numbers<[1], [0], [0], [1], [0, 0, 1, 1], [], []>} : vector<16x32xf32>, vector<32x8xf32>, vector<16x8xf32> -> vector<16x8xf32>
    %c1_971 = arith.constant 1 : index
    %c1_972 = arith.constant 1 : index
    %c0_973 = arith.constant 0 : index
    %c0_974 = arith.constant 0 : index
    %1194 = vector.load %arg8[%c1_971, %c1_972, %c0_973, %c0_974] : memref<2x4x1x8xf32, #tpu.memory_space<vmem>>, vector<1x1x1x8xf32>
    %1195 = vector.shape_cast %1194 : vector<1x1x1x8xf32> to vector<1x8xf32>
    %1196 = vector.broadcast %1195 : vector<1x8xf32> to vector<16x8xf32>
    %1197 = arith.addf %1193, %1196 : vector<16x8xf32>
    %c1_975 = arith.constant 1 : index
    %c1_976 = arith.constant 1 : index
    %c0_977 = arith.constant 0 : index
    %c0_978 = arith.constant 0 : index
    %1198 = vector.load %arg15[%c1_975, %c1_976, %c0_977, %c0_978] : memref<2x4x32x8xf32, #tpu.memory_space<vmem>>, vector<1x1x32x8xf32>
    %1199 = vector.shape_cast %1198 : vector<1x1x32x8xf32> to vector<32x8xf32>
    %cst_979 = arith.constant dense<0.000000e+00> : vector<16x8xf32>
    %1200 = tpu.matmul %505, %1199, %cst_979 {dimension_numbers = #tpu.dot_dimension_numbers<[1], [0], [0], [1], [0, 0, 1, 1], [], []>} : vector<16x32xf32>, vector<32x8xf32>, vector<16x8xf32> -> vector<16x8xf32>
    %c1_980 = arith.constant 1 : index
    %c1_981 = arith.constant 1 : index
    %c0_982 = arith.constant 0 : index
    %c0_983 = arith.constant 0 : index
    %1201 = vector.load %arg11[%c1_980, %c1_981, %c0_982, %c0_983] : memref<2x4x1x8xf32, #tpu.memory_space<vmem>>, vector<1x1x1x8xf32>
    %1202 = vector.shape_cast %1201 : vector<1x1x1x8xf32> to vector<1x8xf32>
    %1203 = vector.broadcast %1202 : vector<1x8xf32> to vector<16x8xf32>
    %1204 = arith.addf %1200, %1203 : vector<16x8xf32>
    %cst_984 = arith.constant dense<0.000000e+00> : vector<16x16xf32>
    %1205 = tpu.matmul %1190, %1197, %cst_984 {dimension_numbers = #tpu.dot_dimension_numbers<[1], [1], [0], [0], [0, 0, 1, 0], [], []>} : vector<16x8xf32>, vector<16x8xf32>, vector<16x16xf32> -> vector<16x16xf32>
    %cst_985 = arith.constant 0.353553385 : f32
    %1206 = vector.broadcast %cst_985 : f32 to vector<16x16xf32>
    %1207 = arith.mulf %1205, %1206 : vector<16x16xf32>
    %1208 = arith.addf %1207, %2 : vector<16x16xf32>
    %cst_986 = arith.constant dense<0xFF800000> : vector<16xf32>
    %1209 = vector.multi_reduction <maximumf>, %1208, %cst_986 [1] : vector<16x16xf32> to vector<16xf32>
    %1210 = vector.shape_cast %1209 : vector<16xf32> to vector<16x1xf32>
    %1211 = vector.broadcast %1210 : vector<16x1xf32> to vector<16x16xf32>
    %1212 = arith.subf %1208, %1211 : vector<16x16xf32>
    %1213 = math.exp %1212 : vector<16x16xf32>
    %cst_987 = arith.constant dense<0.000000e+00> : vector<16xf32>
    %1214 = vector.multi_reduction <add>, %1213, %cst_987 [1] : vector<16x16xf32> to vector<16xf32>
    %1215 = vector.shape_cast %1214 : vector<16xf32> to vector<16x1xf32>
    %1216 = tpu.reciprocal %1215 {approx = true} : vector<16x1xf32> -> vector<16x1xf32>
    %1217 = vector.broadcast %1216 : vector<16x1xf32> to vector<16x16xf32>
    %1218 = arith.mulf %1213, %1217 : vector<16x16xf32>
    %cst_988 = arith.constant dense<0.000000e+00> : vector<16x8xf32>
    %1219 = tpu.matmul %1218, %1204, %cst_988 {dimension_numbers = #tpu.dot_dimension_numbers<[1], [0], [0], [1], [0, 0, 1, 1], [], []>} : vector<16x16xf32>, vector<16x8xf32>, vector<16x8xf32> -> vector<16x8xf32>
    %c1_989 = arith.constant 1 : index
    %c1_990 = arith.constant 1 : index
    %c0_991 = arith.constant 0 : index
    %c0_992 = arith.constant 0 : index
    %1220 = vector.load %arg13[%c1_989, %c1_990, %c0_991, %c0_992] : memref<2x4x8x32xf32, #tpu.memory_space<vmem>>, vector<1x1x8x32xf32>
    %1221 = vector.shape_cast %1220 : vector<1x1x8x32xf32> to vector<8x32xf32>
    %cst_993 = arith.constant dense<0.000000e+00> : vector<16x32xf32>
    %1222 = tpu.matmul %1219, %1221, %cst_993 {dimension_numbers = #tpu.dot_dimension_numbers<[1], [0], [0], [1], [0, 0, 1, 1], [], []>} : vector<16x8xf32>, vector<8x32xf32>, vector<16x32xf32> -> vector<16x32xf32>
    %1223 = arith.addf %1183, %1222 : vector<16x32xf32>
    %c1_994 = arith.constant 1 : index
    %c2_995 = arith.constant 2 : index
    %c0_996 = arith.constant 0 : index
    %c0_997 = arith.constant 0 : index
    %1224 = vector.load %arg14[%c1_994, %c2_995, %c0_996, %c0_997] : memref<2x4x32x8xf32, #tpu.memory_space<vmem>>, vector<1x1x32x8xf32>
    %1225 = vector.shape_cast %1224 : vector<1x1x32x8xf32> to vector<32x8xf32>
    %cst_998 = arith.constant dense<0.000000e+00> : vector<16x8xf32>
    %1226 = tpu.matmul %1144, %1225, %cst_998 {dimension_numbers = #tpu.dot_dimension_numbers<[1], [0], [0], [1], [0, 0, 1, 1], [], []>} : vector<16x32xf32>, vector<32x8xf32>, vector<16x8xf32> -> vector<16x8xf32>
    %c1_999 = arith.constant 1 : index
    %c2_1000 = arith.constant 2 : index
    %c0_1001 = arith.constant 0 : index
    %c0_1002 = arith.constant 0 : index
    %1227 = vector.load %arg10[%c1_999, %c2_1000, %c0_1001, %c0_1002] : memref<2x4x1x8xf32, #tpu.memory_space<vmem>>, vector<1x1x1x8xf32>
    %1228 = vector.shape_cast %1227 : vector<1x1x1x8xf32> to vector<1x8xf32>
    %1229 = vector.broadcast %1228 : vector<1x8xf32> to vector<16x8xf32>
    %1230 = arith.addf %1226, %1229 : vector<16x8xf32>
    %c1_1003 = arith.constant 1 : index
    %c2_1004 = arith.constant 2 : index
    %c0_1005 = arith.constant 0 : index
    %c0_1006 = arith.constant 0 : index
    %1231 = vector.load %arg12[%c1_1003, %c2_1004, %c0_1005, %c0_1006] : memref<2x4x32x8xf32, #tpu.memory_space<vmem>>, vector<1x1x32x8xf32>
    %1232 = vector.shape_cast %1231 : vector<1x1x32x8xf32> to vector<32x8xf32>
    %cst_1007 = arith.constant dense<0.000000e+00> : vector<16x8xf32>
    %1233 = tpu.matmul %505, %1232, %cst_1007 {dimension_numbers = #tpu.dot_dimension_numbers<[1], [0], [0], [1], [0, 0, 1, 1], [], []>} : vector<16x32xf32>, vector<32x8xf32>, vector<16x8xf32> -> vector<16x8xf32>
    %c1_1008 = arith.constant 1 : index
    %c2_1009 = arith.constant 2 : index
    %c0_1010 = arith.constant 0 : index
    %c0_1011 = arith.constant 0 : index
    %1234 = vector.load %arg8[%c1_1008, %c2_1009, %c0_1010, %c0_1011] : memref<2x4x1x8xf32, #tpu.memory_space<vmem>>, vector<1x1x1x8xf32>
    %1235 = vector.shape_cast %1234 : vector<1x1x1x8xf32> to vector<1x8xf32>
    %1236 = vector.broadcast %1235 : vector<1x8xf32> to vector<16x8xf32>
    %1237 = arith.addf %1233, %1236 : vector<16x8xf32>
    %c1_1012 = arith.constant 1 : index
    %c2_1013 = arith.constant 2 : index
    %c0_1014 = arith.constant 0 : index
    %c0_1015 = arith.constant 0 : index
    %1238 = vector.load %arg15[%c1_1012, %c2_1013, %c0_1014, %c0_1015] : memref<2x4x32x8xf32, #tpu.memory_space<vmem>>, vector<1x1x32x8xf32>
    %1239 = vector.shape_cast %1238 : vector<1x1x32x8xf32> to vector<32x8xf32>
    %cst_1016 = arith.constant dense<0.000000e+00> : vector<16x8xf32>
    %1240 = tpu.matmul %505, %1239, %cst_1016 {dimension_numbers = #tpu.dot_dimension_numbers<[1], [0], [0], [1], [0, 0, 1, 1], [], []>} : vector<16x32xf32>, vector<32x8xf32>, vector<16x8xf32> -> vector<16x8xf32>
    %c1_1017 = arith.constant 1 : index
    %c2_1018 = arith.constant 2 : index
    %c0_1019 = arith.constant 0 : index
    %c0_1020 = arith.constant 0 : index
    %1241 = vector.load %arg11[%c1_1017, %c2_1018, %c0_1019, %c0_1020] : memref<2x4x1x8xf32, #tpu.memory_space<vmem>>, vector<1x1x1x8xf32>
    %1242 = vector.shape_cast %1241 : vector<1x1x1x8xf32> to vector<1x8xf32>
    %1243 = vector.broadcast %1242 : vector<1x8xf32> to vector<16x8xf32>
    %1244 = arith.addf %1240, %1243 : vector<16x8xf32>
    %cst_1021 = arith.constant dense<0.000000e+00> : vector<16x16xf32>
    %1245 = tpu.matmul %1230, %1237, %cst_1021 {dimension_numbers = #tpu.dot_dimension_numbers<[1], [1], [0], [0], [0, 0, 1, 0], [], []>} : vector<16x8xf32>, vector<16x8xf32>, vector<16x16xf32> -> vector<16x16xf32>
    %cst_1022 = arith.constant 0.353553385 : f32
    %1246 = vector.broadcast %cst_1022 : f32 to vector<16x16xf32>
    %1247 = arith.mulf %1245, %1246 : vector<16x16xf32>
    %1248 = arith.addf %1247, %2 : vector<16x16xf32>
    %cst_1023 = arith.constant dense<0xFF800000> : vector<16xf32>
    %1249 = vector.multi_reduction <maximumf>, %1248, %cst_1023 [1] : vector<16x16xf32> to vector<16xf32>
    %1250 = vector.shape_cast %1249 : vector<16xf32> to vector<16x1xf32>
    %1251 = vector.broadcast %1250 : vector<16x1xf32> to vector<16x16xf32>
    %1252 = arith.subf %1248, %1251 : vector<16x16xf32>
    %1253 = math.exp %1252 : vector<16x16xf32>
    %cst_1024 = arith.constant dense<0.000000e+00> : vector<16xf32>
    %1254 = vector.multi_reduction <add>, %1253, %cst_1024 [1] : vector<16x16xf32> to vector<16xf32>
    %1255 = vector.shape_cast %1254 : vector<16xf32> to vector<16x1xf32>
    %1256 = tpu.reciprocal %1255 {approx = true} : vector<16x1xf32> -> vector<16x1xf32>
    %1257 = vector.broadcast %1256 : vector<16x1xf32> to vector<16x16xf32>
    %1258 = arith.mulf %1253, %1257 : vector<16x16xf32>
    %cst_1025 = arith.constant dense<0.000000e+00> : vector<16x8xf32>
    %1259 = tpu.matmul %1258, %1244, %cst_1025 {dimension_numbers = #tpu.dot_dimension_numbers<[1], [0], [0], [1], [0, 0, 1, 1], [], []>} : vector<16x16xf32>, vector<16x8xf32>, vector<16x8xf32> -> vector<16x8xf32>
    %c1_1026 = arith.constant 1 : index
    %c2_1027 = arith.constant 2 : index
    %c0_1028 = arith.constant 0 : index
    %c0_1029 = arith.constant 0 : index
    %1260 = vector.load %arg13[%c1_1026, %c2_1027, %c0_1028, %c0_1029] : memref<2x4x8x32xf32, #tpu.memory_space<vmem>>, vector<1x1x8x32xf32>
    %1261 = vector.shape_cast %1260 : vector<1x1x8x32xf32> to vector<8x32xf32>
    %cst_1030 = arith.constant dense<0.000000e+00> : vector<16x32xf32>
    %1262 = tpu.matmul %1259, %1261, %cst_1030 {dimension_numbers = #tpu.dot_dimension_numbers<[1], [0], [0], [1], [0, 0, 1, 1], [], []>} : vector<16x8xf32>, vector<8x32xf32>, vector<16x32xf32> -> vector<16x32xf32>
    %1263 = arith.addf %1223, %1262 : vector<16x32xf32>
    %c1_1031 = arith.constant 1 : index
    %c3_1032 = arith.constant 3 : index
    %c0_1033 = arith.constant 0 : index
    %c0_1034 = arith.constant 0 : index
    %1264 = vector.load %arg14[%c1_1031, %c3_1032, %c0_1033, %c0_1034] : memref<2x4x32x8xf32, #tpu.memory_space<vmem>>, vector<1x1x32x8xf32>
    %1265 = vector.shape_cast %1264 : vector<1x1x32x8xf32> to vector<32x8xf32>
    %cst_1035 = arith.constant dense<0.000000e+00> : vector<16x8xf32>
    %1266 = tpu.matmul %1144, %1265, %cst_1035 {dimension_numbers = #tpu.dot_dimension_numbers<[1], [0], [0], [1], [0, 0, 1, 1], [], []>} : vector<16x32xf32>, vector<32x8xf32>, vector<16x8xf32> -> vector<16x8xf32>
    %c1_1036 = arith.constant 1 : index
    %c3_1037 = arith.constant 3 : index
    %c0_1038 = arith.constant 0 : index
    %c0_1039 = arith.constant 0 : index
    %1267 = vector.load %arg10[%c1_1036, %c3_1037, %c0_1038, %c0_1039] : memref<2x4x1x8xf32, #tpu.memory_space<vmem>>, vector<1x1x1x8xf32>
    %1268 = vector.shape_cast %1267 : vector<1x1x1x8xf32> to vector<1x8xf32>
    %1269 = vector.broadcast %1268 : vector<1x8xf32> to vector<16x8xf32>
    %1270 = arith.addf %1266, %1269 : vector<16x8xf32>
    %c1_1040 = arith.constant 1 : index
    %c3_1041 = arith.constant 3 : index
    %c0_1042 = arith.constant 0 : index
    %c0_1043 = arith.constant 0 : index
    %1271 = vector.load %arg12[%c1_1040, %c3_1041, %c0_1042, %c0_1043] : memref<2x4x32x8xf32, #tpu.memory_space<vmem>>, vector<1x1x32x8xf32>
    %1272 = vector.shape_cast %1271 : vector<1x1x32x8xf32> to vector<32x8xf32>
    %cst_1044 = arith.constant dense<0.000000e+00> : vector<16x8xf32>
    %1273 = tpu.matmul %505, %1272, %cst_1044 {dimension_numbers = #tpu.dot_dimension_numbers<[1], [0], [0], [1], [0, 0, 1, 1], [], []>} : vector<16x32xf32>, vector<32x8xf32>, vector<16x8xf32> -> vector<16x8xf32>
    %c1_1045 = arith.constant 1 : index
    %c3_1046 = arith.constant 3 : index
    %c0_1047 = arith.constant 0 : index
    %c0_1048 = arith.constant 0 : index
    %1274 = vector.load %arg8[%c1_1045, %c3_1046, %c0_1047, %c0_1048] : memref<2x4x1x8xf32, #tpu.memory_space<vmem>>, vector<1x1x1x8xf32>
    %1275 = vector.shape_cast %1274 : vector<1x1x1x8xf32> to vector<1x8xf32>
    %1276 = vector.broadcast %1275 : vector<1x8xf32> to vector<16x8xf32>
    %1277 = arith.addf %1273, %1276 : vector<16x8xf32>
    %c1_1049 = arith.constant 1 : index
    %c3_1050 = arith.constant 3 : index
    %c0_1051 = arith.constant 0 : index
    %c0_1052 = arith.constant 0 : index
    %1278 = vector.load %arg15[%c1_1049, %c3_1050, %c0_1051, %c0_1052] : memref<2x4x32x8xf32, #tpu.memory_space<vmem>>, vector<1x1x32x8xf32>
    %1279 = vector.shape_cast %1278 : vector<1x1x32x8xf32> to vector<32x8xf32>
    %cst_1053 = arith.constant dense<0.000000e+00> : vector<16x8xf32>
    %1280 = tpu.matmul %505, %1279, %cst_1053 {dimension_numbers = #tpu.dot_dimension_numbers<[1], [0], [0], [1], [0, 0, 1, 1], [], []>} : vector<16x32xf32>, vector<32x8xf32>, vector<16x8xf32> -> vector<16x8xf32>
    %c1_1054 = arith.constant 1 : index
    %c3_1055 = arith.constant 3 : index
    %c0_1056 = arith.constant 0 : index
    %c0_1057 = arith.constant 0 : index
    %1281 = vector.load %arg11[%c1_1054, %c3_1055, %c0_1056, %c0_1057] : memref<2x4x1x8xf32, #tpu.memory_space<vmem>>, vector<1x1x1x8xf32>
    %1282 = vector.shape_cast %1281 : vector<1x1x1x8xf32> to vector<1x8xf32>
    %1283 = vector.broadcast %1282 : vector<1x8xf32> to vector<16x8xf32>
    %1284 = arith.addf %1280, %1283 : vector<16x8xf32>
    %cst_1058 = arith.constant dense<0.000000e+00> : vector<16x16xf32>
    %1285 = tpu.matmul %1270, %1277, %cst_1058 {dimension_numbers = #tpu.dot_dimension_numbers<[1], [1], [0], [0], [0, 0, 1, 0], [], []>} : vector<16x8xf32>, vector<16x8xf32>, vector<16x16xf32> -> vector<16x16xf32>
    %cst_1059 = arith.constant 0.353553385 : f32
    %1286 = vector.broadcast %cst_1059 : f32 to vector<16x16xf32>
    %1287 = arith.mulf %1285, %1286 : vector<16x16xf32>
    %1288 = arith.addf %1287, %2 : vector<16x16xf32>
    %cst_1060 = arith.constant dense<0xFF800000> : vector<16xf32>
    %1289 = vector.multi_reduction <maximumf>, %1288, %cst_1060 [1] : vector<16x16xf32> to vector<16xf32>
    %1290 = vector.shape_cast %1289 : vector<16xf32> to vector<16x1xf32>
    %1291 = vector.broadcast %1290 : vector<16x1xf32> to vector<16x16xf32>
    %1292 = arith.subf %1288, %1291 : vector<16x16xf32>
    %1293 = math.exp %1292 : vector<16x16xf32>
    %cst_1061 = arith.constant dense<0.000000e+00> : vector<16xf32>
    %1294 = vector.multi_reduction <add>, %1293, %cst_1061 [1] : vector<16x16xf32> to vector<16xf32>
    %1295 = vector.shape_cast %1294 : vector<16xf32> to vector<16x1xf32>
    %1296 = tpu.reciprocal %1295 {approx = true} : vector<16x1xf32> -> vector<16x1xf32>
    %1297 = vector.broadcast %1296 : vector<16x1xf32> to vector<16x16xf32>
    %1298 = arith.mulf %1293, %1297 : vector<16x16xf32>
    %cst_1062 = arith.constant dense<0.000000e+00> : vector<16x8xf32>
    %1299 = tpu.matmul %1298, %1284, %cst_1062 {dimension_numbers = #tpu.dot_dimension_numbers<[1], [0], [0], [1], [0, 0, 1, 1], [], []>} : vector<16x16xf32>, vector<16x8xf32>, vector<16x8xf32> -> vector<16x8xf32>
    %c1_1063 = arith.constant 1 : index
    %c3_1064 = arith.constant 3 : index
    %c0_1065 = arith.constant 0 : index
    %c0_1066 = arith.constant 0 : index
    %1300 = vector.load %arg13[%c1_1063, %c3_1064, %c0_1065, %c0_1066] : memref<2x4x8x32xf32, #tpu.memory_space<vmem>>, vector<1x1x8x32xf32>
    %1301 = vector.shape_cast %1300 : vector<1x1x8x32xf32> to vector<8x32xf32>
    %cst_1067 = arith.constant dense<0.000000e+00> : vector<16x32xf32>
    %1302 = tpu.matmul %1299, %1301, %cst_1067 {dimension_numbers = #tpu.dot_dimension_numbers<[1], [0], [0], [1], [0, 0, 1, 1], [], []>} : vector<16x8xf32>, vector<8x32xf32>, vector<16x32xf32> -> vector<16x32xf32>
    %1303 = arith.addf %1263, %1302 : vector<16x32xf32>
    %c1_1068 = arith.constant 1 : index
    %c0_1069 = arith.constant 0 : index
    %c0_1070 = arith.constant 0 : index
    %1304 = vector.load %arg9[%c1_1068, %c0_1069, %c0_1070] : memref<2x1x32xf32, #tpu.memory_space<vmem>>, vector<1x1x32xf32>
    %1305 = vector.shape_cast %1304 : vector<1x1x32xf32> to vector<1x32xf32>
    %1306 = vector.broadcast %1305 : vector<1x32xf32> to vector<16x32xf32>
    %1307 = arith.addf %1303, %1306 : vector<16x32xf32>
    %1308 = arith.addf %1144, %1307 : vector<16x32xf32>
    %c1_1071 = arith.constant 1 : index
    %c0_1072 = arith.constant 0 : index
    %c0_1073 = arith.constant 0 : index
    %1309 = vector.load %arg17[%c1_1071, %c0_1072, %c0_1073] : memref<2x1x32xf32, #tpu.memory_space<vmem>>, vector<1x1x32xf32>
    %1310 = vector.shape_cast %1309 : vector<1x1x32xf32> to vector<1x32xf32>
    %c1_1074 = arith.constant 1 : index
    %c0_1075 = arith.constant 0 : index
    %c0_1076 = arith.constant 0 : index
    %1311 = vector.load %arg16[%c1_1074, %c0_1075, %c0_1076] : memref<2x1x32xf32, #tpu.memory_space<vmem>>, vector<1x1x32xf32>
    %1312 = vector.shape_cast %1311 : vector<1x1x32xf32> to vector<1x32xf32>
    %cst_1077 = arith.constant dense<0.000000e+00> : vector<16xf32>
    %1313 = vector.multi_reduction <add>, %1308, %cst_1077 [1] : vector<16x32xf32> to vector<16xf32>
    %1314 = vector.shape_cast %1313 : vector<16xf32> to vector<16x1xf32>
    %cst_1078 = arith.constant 3.200000e+01 : f32
    %1315 = vector.broadcast %cst_1078 : f32 to vector<16x1xf32>
    %1316 = arith.divf %1314, %1315 : vector<16x1xf32>
    %1317 = vector.broadcast %1316 : vector<16x1xf32> to vector<16x32xf32>
    %1318 = arith.subf %1308, %1317 : vector<16x32xf32>
    %1319 = arith.mulf %1318, %1318 : vector<16x32xf32>
    %cst_1079 = arith.constant dense<0.000000e+00> : vector<16xf32>
    %1320 = vector.multi_reduction <add>, %1319, %cst_1079 [1] : vector<16x32xf32> to vector<16xf32>
    %1321 = vector.shape_cast %1320 : vector<16xf32> to vector<16x1xf32>
    %cst_1080 = arith.constant 3.200000e+01 : f32
    %1322 = vector.broadcast %cst_1080 : f32 to vector<16x1xf32>
    %1323 = arith.divf %1321, %1322 : vector<16x1xf32>
    %cst_1081 = arith.constant 9.99999974E-6 : f32
    %1324 = vector.broadcast %cst_1081 : f32 to vector<16x1xf32>
    %1325 = arith.addf %1323, %1324 : vector<16x1xf32>
    %1326 = math.rsqrt %1325 : vector<16x1xf32>
    %1327 = vector.broadcast %1326 : vector<16x1xf32> to vector<16x32xf32>
    %1328 = arith.mulf %1318, %1327 : vector<16x32xf32>
    %1329 = vector.broadcast %1310 : vector<1x32xf32> to vector<16x32xf32>
    %1330 = arith.mulf %1328, %1329 : vector<16x32xf32>
    %1331 = vector.broadcast %1312 : vector<1x32xf32> to vector<16x32xf32>
    %1332 = arith.addf %1330, %1331 : vector<16x32xf32>
    %c1_1082 = arith.constant 1 : index
    %c0_1083 = arith.constant 0 : index
    %c0_1084 = arith.constant 0 : index
    %1333 = vector.load %arg19[%c1_1082, %c0_1083, %c0_1084] : memref<2x32x64xf32, #tpu.memory_space<vmem>>, vector<1x32x64xf32>
    %1334 = vector.shape_cast %1333 : vector<1x32x64xf32> to vector<32x64xf32>
    %cst_1085 = arith.constant dense<0.000000e+00> : vector<16x64xf32>
    %1335 = tpu.matmul %1332, %1334, %cst_1085 {dimension_numbers = #tpu.dot_dimension_numbers<[1], [0], [0], [1], [0, 0, 1, 1], [], []>} : vector<16x32xf32>, vector<32x64xf32>, vector<16x64xf32> -> vector<16x64xf32>
    %c1_1086 = arith.constant 1 : index
    %c0_1087 = arith.constant 0 : index
    %c0_1088 = arith.constant 0 : index
    %1336 = vector.load %arg18[%c1_1086, %c0_1087, %c0_1088] : memref<2x1x64xf32, #tpu.memory_space<vmem>>, vector<1x1x64xf32>
    %1337 = vector.shape_cast %1336 : vector<1x1x64xf32> to vector<1x64xf32>
    %1338 = vector.broadcast %1337 : vector<1x64xf32> to vector<16x64xf32>
    %1339 = arith.addf %1335, %1338 : vector<16x64xf32>
    %1340 = arith.mulf %1339, %1339 : vector<16x64xf32>
    %1341 = arith.mulf %1339, %1340 : vector<16x64xf32>
    %cst_1089 = arith.constant 4.471500e-02 : f32
    %1342 = vector.broadcast %cst_1089 : f32 to vector<16x64xf32>
    %1343 = arith.mulf %1342, %1341 : vector<16x64xf32>
    %1344 = arith.addf %1339, %1343 : vector<16x64xf32>
    %cst_1090 = arith.constant 0.797884583 : f32
    %1345 = vector.broadcast %cst_1090 : f32 to vector<16x64xf32>
    %1346 = arith.mulf %1345, %1344 : vector<16x64xf32>
    %1347 = math.tanh %1346 : vector<16x64xf32>
    %cst_1091 = arith.constant 1.000000e+00 : f32
    %1348 = vector.broadcast %cst_1091 : f32 to vector<16x64xf32>
    %1349 = arith.addf %1348, %1347 : vector<16x64xf32>
    %cst_1092 = arith.constant 5.000000e-01 : f32
    %1350 = vector.broadcast %cst_1092 : f32 to vector<16x64xf32>
    %1351 = arith.mulf %1350, %1349 : vector<16x64xf32>
    %1352 = arith.mulf %1339, %1351 : vector<16x64xf32>
    %c1_1093 = arith.constant 1 : index
    %c0_1094 = arith.constant 0 : index
    %c0_1095 = arith.constant 0 : index
    %1353 = vector.load %arg21[%c1_1093, %c0_1094, %c0_1095] : memref<2x64x32xf32, #tpu.memory_space<vmem>>, vector<1x64x32xf32>
    %1354 = vector.shape_cast %1353 : vector<1x64x32xf32> to vector<64x32xf32>
    %cst_1096 = arith.constant dense<0.000000e+00> : vector<16x32xf32>
    %1355 = tpu.matmul %1352, %1354, %cst_1096 {dimension_numbers = #tpu.dot_dimension_numbers<[1], [0], [0], [1], [0, 0, 1, 1], [], []>} : vector<16x64xf32>, vector<64x32xf32>, vector<16x32xf32> -> vector<16x32xf32>
    %c1_1097 = arith.constant 1 : index
    %c0_1098 = arith.constant 0 : index
    %c0_1099 = arith.constant 0 : index
    %1356 = vector.load %arg20[%c1_1097, %c0_1098, %c0_1099] : memref<2x1x32xf32, #tpu.memory_space<vmem>>, vector<1x1x32xf32>
    %1357 = vector.shape_cast %1356 : vector<1x1x32xf32> to vector<1x32xf32>
    %1358 = vector.broadcast %1357 : vector<1x32xf32> to vector<16x32xf32>
    %1359 = arith.addf %1355, %1358 : vector<16x32xf32>
    %1360 = arith.addf %1332, %1359 : vector<16x32xf32>
    %c1_1100 = arith.constant 1 : index
    %c0_1101 = arith.constant 0 : index
    %c0_1102 = arith.constant 0 : index
    %1361 = vector.load %arg23[%c1_1100, %c0_1101, %c0_1102] : memref<2x1x32xf32, #tpu.memory_space<vmem>>, vector<1x1x32xf32>
    %1362 = vector.shape_cast %1361 : vector<1x1x32xf32> to vector<1x32xf32>
    %c1_1103 = arith.constant 1 : index
    %c0_1104 = arith.constant 0 : index
    %c0_1105 = arith.constant 0 : index
    %1363 = vector.load %arg22[%c1_1103, %c0_1104, %c0_1105] : memref<2x1x32xf32, #tpu.memory_space<vmem>>, vector<1x1x32xf32>
    %1364 = vector.shape_cast %1363 : vector<1x1x32xf32> to vector<1x32xf32>
    %cst_1106 = arith.constant dense<0.000000e+00> : vector<16xf32>
    %1365 = vector.multi_reduction <add>, %1360, %cst_1106 [1] : vector<16x32xf32> to vector<16xf32>
    %1366 = vector.shape_cast %1365 : vector<16xf32> to vector<16x1xf32>
    %cst_1107 = arith.constant 3.200000e+01 : f32
    %1367 = vector.broadcast %cst_1107 : f32 to vector<16x1xf32>
    %1368 = arith.divf %1366, %1367 : vector<16x1xf32>
    %1369 = vector.broadcast %1368 : vector<16x1xf32> to vector<16x32xf32>
    %1370 = arith.subf %1360, %1369 : vector<16x32xf32>
    %1371 = arith.mulf %1370, %1370 : vector<16x32xf32>
    %cst_1108 = arith.constant dense<0.000000e+00> : vector<16xf32>
    %1372 = vector.multi_reduction <add>, %1371, %cst_1108 [1] : vector<16x32xf32> to vector<16xf32>
    %1373 = vector.shape_cast %1372 : vector<16xf32> to vector<16x1xf32>
    %cst_1109 = arith.constant 3.200000e+01 : f32
    %1374 = vector.broadcast %cst_1109 : f32 to vector<16x1xf32>
    %1375 = arith.divf %1373, %1374 : vector<16x1xf32>
    %cst_1110 = arith.constant 9.99999974E-6 : f32
    %1376 = vector.broadcast %cst_1110 : f32 to vector<16x1xf32>
    %1377 = arith.addf %1375, %1376 : vector<16x1xf32>
    %1378 = math.rsqrt %1377 : vector<16x1xf32>
    %1379 = vector.broadcast %1378 : vector<16x1xf32> to vector<16x32xf32>
    %1380 = arith.mulf %1370, %1379 : vector<16x32xf32>
    %1381 = vector.broadcast %1362 : vector<1x32xf32> to vector<16x32xf32>
    %1382 = arith.mulf %1380, %1381 : vector<16x32xf32>
    %1383 = vector.broadcast %1364 : vector<1x32xf32> to vector<16x32xf32>
    %1384 = arith.addf %1382, %1383 : vector<16x32xf32>
    %c0_1111 = arith.constant 0 : index
    %c0_1112 = arith.constant 0 : index
    %1385 = vector.load %arg53[%c0_1111, %c0_1112] : memref<32x128xf32, #tpu.memory_space<vmem>>, vector<32x128xf32>
    %cst_1113 = arith.constant dense<0.000000e+00> : vector<16x128xf32>
    %1386 = tpu.matmul %1384, %1385, %cst_1113 {dimension_numbers = #tpu.dot_dimension_numbers<[1], [0], [0], [1], [0, 0, 1, 1], [], []>} : vector<16x32xf32>, vector<32x128xf32>, vector<16x128xf32> -> vector<16x128xf32>
    %c0_1114 = arith.constant 0 : index
    %c0_1115 = arith.constant 0 : index
    %1387 = vector.load %arg52[%c0_1114, %c0_1115] : memref<1x128xf32, #tpu.memory_space<vmem>>, vector<1x128xf32>
    %1388 = vector.broadcast %1387 : vector<1x128xf32> to vector<16x128xf32>
    %1389 = arith.addf %1386, %1388 : vector<16x128xf32>
    %c0_1116 = arith.constant 0 : index
    %c0_1117 = arith.constant 0 : index
    %1390 = vector.load %arg54[%c0_1116, %c0_1117] : memref<16x128xf32, #tpu.memory_space<vmem>>, vector<16x128xf32>
    tpu.vector_store %arg54[%c0_1116, %c0_1117], %1389 {strides = array<i32>} : memref<16x128xf32, #tpu.memory_space<vmem>>, vector<16x128xf32>,
    %cst_1118 = arith.constant dense<0xFF800000> : vector<16xf32>
    %1391 = vector.multi_reduction <maximumf>, %1389, %cst_1118 [1] : vector<16x128xf32> to vector<16xf32>
    %1392 = vector.shape_cast %1391 : vector<16xf32> to vector<16x1xf32>
    %1393 = vector.broadcast %1392 : vector<16x1xf32> to vector<16x128xf32>
    %1394 = arith.subf %1389, %1393 : vector<16x128xf32>
    %1395 = math.exp %1394 : vector<16x128xf32>
    %cst_1119 = arith.constant dense<0.000000e+00> : vector<16xf32>
    %1396 = vector.multi_reduction <add>, %1395, %cst_1119 [1] : vector<16x128xf32> to vector<16xf32>
    %1397 = vector.shape_cast %1396 : vector<16xf32> to vector<16x1xf32>
    %1398 = math.log %1397 : vector<16x1xf32>
    %1399 = arith.addf %1392, %1398 : vector<16x1xf32>
    %1400 = vector.broadcast %1399 : vector<16x1xf32> to vector<16x128xf32>
    %1401 = arith.subf %1389, %1400 : vector<16x128xf32>
    %c0_1120 = arith.constant 0 : index
    %c0_1121 = arith.constant 0 : index
    %1402 = vector.load %arg5[%c0_1120, %c0_1121] : memref<16x128xf32, #tpu.memory_space<vmem>>, vector<16x128xf32>
    %1403 = arith.mulf %1401, %1402 : vector<16x128xf32>
    %cst_1122 = arith.constant dense<0.000000e+00> : vector<16xf32>
    %1404 = vector.multi_reduction <add>, %1403, %cst_1122 [1] : vector<16x128xf32> to vector<16xf32>
    %1405 = vector.shape_cast %1404 : vector<16xf32> to vector<16x1xf32>
    %cst_1123 = arith.constant 0.000000e+00 : f32
    %1406 = vector.broadcast %cst_1123 : f32 to vector<16x1xf32>
    %1407 = arith.subf %1406, %1405 : vector<16x1xf32>
    %cst_1124 = arith.constant dense<0.000000e+00> : vector<1xf32>
    %1408 = vector.multi_reduction <add>, %1407, %cst_1124 [0] : vector<16x1xf32> to vector<1xf32>
    %1409 = vector.shape_cast %1408 : vector<1xf32> to vector<1x1xf32>
    %cst_1125 = arith.constant 6.250000e-02 : f32
    %1410 = vector.broadcast %cst_1125 : f32 to vector<1x1xf32>
    %1411 = arith.mulf %1409, %1410 : vector<1x1xf32>
    %c0_1126 = arith.constant 0 : index
    %c0_1127 = arith.constant 0 : index
    %1412 = vector.load %arg55[%c0_1126, %c0_1127] : memref<1x1xf32, #tpu.memory_space<vmem>>, vector<1x1xf32>
    tpu.vector_store %arg55[%c0_1126, %c0_1127], %1411 {strides = array<i32>} : memref<1x1xf32, #tpu.memory_space<vmem>>, vector<1x1xf32>,
    return
  }
}

</mosaic_0001>

<bundles_post_ra>
// kernel: eq.1
= control target key start
LH: loop header
LB: loop body
LE: loop exit
PB: predicated region body
PF: predicated region fallthrough
CT: control target
= control target key end

     0   :  { %vm7_vm0 = vcmask 64512   ;;  %vm13_vm1 = vcmask 130112   ;;  %s39_s0 = inlined_call_operand.vmem [shape: s32[2,8], index: 0, kind: input, shape index: {}]   ;;  %s40_s1 = inlined_call_operand.vmem [shape: s32[16], index: 1, kind: output, shape index: {}]  }
   0x1   :  { %v4_v0 = vld [vmem:[%s39_s0] sm:$0x3]  ;;  %s22_s0 = smov 8  }
   0x2   :  { %5 = vst [vmem:[#allocation1] sm:$0x3] %v4_v0 }
   0x9   :  { %v10_v1 = vld [vmem:[#allocation1 + $0x1] sm:$0x1]   ;;  %v6_v2 = vld [vmem:[#allocation1] sm:$0x1]  }
   0xa   :  { %11 = vrot.lane.b32.xlu0 %v10_v1, %s22_s0  ;;  %8 = vst.msk [vmem:[#allocation0] sm:$0x1] %vm7_vm0, %v6_v2  }
  0x7c   :  { %v12_v3 = vpop.permute.xlu0 %11  }
  0x7d   :  { %14 = vst.msk [vmem:[#allocation0] sm:$0x1] %vm13_vm1, %v12_v3  }
  0x84   :  { %v18_v4 = vld [vmem:[#allocation0] sm:$0x1] }
  0x85   :  { %20 = vst [vmem:[%s40_s1] sm:$0x1] %v18_v4 }

// kernel: bart_forward.1
= control target key start
LH: loop header
LB: loop body
LE: loop exit
PB: predicated region body
PF: predicated region fallthrough
CT: control target
= control target key end

     0   :  { %s19219_s6 = smov 1   ;;  %s19220_s10 = smov 2   ;;  %s20920_s0 = inlined_call_operand.smem [shape: u32[56], index: -1, kind: input, shape index: {}] }
   0x1   :  { %s19283_s5 = sld [smem:[%s20920_s0]]   ;;  %s19221_s14 = smov 3  }
   0x2   :  { %s19288_s9 = sld [smem:[%s20920_s0 + %s19219_s6]]   ;;  %s19222_s18 = smov 4  }
   0x3   :  { %s19293_s13 = sld [smem:[%s20920_s0 + %s19220_s10]]   ;;  %s19223_s22 = smov 5  }
   0x4   :  { %s19298_s17 = sld [smem:[%s20920_s0 + %s19221_s14]]   ;;  %s19224_s26 = smov 6  }
   0x5   :  { %s19303_s21 = sld [smem:[%s20920_s0 + %s19222_s18]]   ;;  %s19225_s30 = smov 7  }
   0x6   :  { %s19308_s25 = sld [smem:[%s20920_s0 + %s19223_s22]]   ;;  %s19226_s4 = smov 8  }
   0x7   :  { %s19313_s29 = sld [smem:[%s20920_s0 + %s19224_s26]]   ;;  %s19227_s10 = smov 9  }
   0x8   :  { %20958 = sst [smem:[#allocation5_spill]] %s19288_s9  ;;  %s19228_s15 = smov 10  }
   0x9   :  { %s19318_s3 = sld [smem:[%s20920_s0 + %s19225_s30]]   ;;  %s19229_s20 = smov 11  }
   0xa   :  { %20959 = sst [smem:[#allocation6_spill]] %s19298_s17  ;;  %s19230_s26 = smov 12  }
   0xb   :  { %20960 = sst [smem:[#allocation7_spill]] %s19303_s21  ;;  %s19231_s1 = smov 13  }
   0xc   :  { %20961 = sst [smem:[#allocation8_spill]] %s19308_s25  ;;  %s19232_s7 = smov 14  }
   0xd   :  { %20962 = sst [smem:[#allocation9_spill]] %s19313_s29  ;;  %s19234_s22 = smov 16  }
   0xe   :  { %s19323_s8 = sld [smem:[%s20920_s0 + %s19226_s4]]   ;;  %s19235_s28 = smov 17  }
   0xf   :  { %20963 = sst [smem:[#allocation10_spill]] %s19318_s3 }
  0x10   :  { %s19328_s14 = sld [smem:[%s20920_s0 + %s19227_s10]]  }
  0x11   :  { %s19333_s19 = sld [smem:[%s20920_s0 + %s19228_s15]]   ;;  %s19233_s15 = smov 15  }
  0x12   :  { %s19338_s24 = sld [smem:[%s20920_s0 + %s19229_s20]]  }
  0x13   :  { %s19343_s30 = sld [smem:[%s20920_s0 + %s19230_s26]]  }
  0x14   :  { %20964 = sst [smem:[#allocation11_spill]] %s19323_s8 }
  0x15   :  { %s19348_s6 = sld [smem:[%s20920_s0 + %s19231_s1]]  }
  0x16   :  { %20965 = sst [smem:[#allocation12_spill]] %s19328_s14 }
  0x17   :  { %20966 = sst [smem:[#allocation13_spill]] %s19333_s19 }
  0x18   :  { %20967 = sst [smem:[#allocation14_spill]] %s19338_s24 }
  0x19   :  { %20968 = sst [smem:[#allocation15_spill]] %s19343_s30 }
  0x1a   :  { %s19353_s12 = sld [smem:[%s20920_s0 + %s19232_s7]]   ;;  %s19236_s7 = smov 18  }
  0x1b   :  { %20969 = sst [smem:[#allocation16_spill]] %s19348_s6 }
  0x1c   :  { %s19358_s20 = sld [smem:[%s20920_s0 + %s19233_s15]]   ;;  %s19237_s15 = smov 19  }
  0x1d   :  { %s19363_s27 = sld [smem:[%s20920_s0 + %s19234_s22]]   ;;  %s19238_s22 = smov 20  }
  0x1e   :  { %s19368_s4 = sld [smem:[%s20920_s0 + %s19235_s28]]   ;;  %s19239_s28 = smov 21  }
  0x1f   :  { %s19373_s25 = sld [smem:[%s20920_s0 + %s19236_s7]]   ;;  %s19240_s7 = smov 22  }
  0x20   :  { %20970 = sst [smem:[#allocation17_spill]] %s19353_s12 }
  0x21   :  { %s19378_s14 = sld [smem:[%s20920_s0 + %s19237_s15]]   ;;  %s19241_s15 = smov 23  }
  0x22   :  { %20971 = sst [smem:[#allocation18_spill]] %s19358_s20 }
  0x23   :  { %20972 = sst [smem:[#allocation19_spill]] %s19363_s27 }
  0x24   :  { %20973 = sst [smem:[#allocation20_spill]] %s19368_s4 }
  0x25   :  { %20974 = sst [smem:[#allocation21_spill]] %s19373_s25 }
  0x26   :  { %s19383_s27 = sld [smem:[%s20920_s0 + %s19238_s22]]   ;;  %s19242_s22 = smov 24  }
  0x27   :  { %20975 = sst [smem:[#allocation22_spill]] %s19378_s14 }
  0x28   :  { %s19388_s4 = sld [smem:[%s20920_s0 + %s19239_s28]]   ;;  %s19243_s28 = smov 25  }
  0x29   :  { %s19393_s25 = sld [smem:[%s20920_s0 + %s19240_s7]]   ;;  %s19244_s7 = smov 26  }
  0x2a   :  { %s19398_s14 = sld [smem:[%s20920_s0 + %s19241_s15]]   ;;  %s19245_s15 = smov 27  }
  0x2c   :  { %20976 = sst [smem:[#allocation23_spill]] %s19383_s27 }
  0x2d   :  { %s19403_s27 = sld [smem:[%s20920_s0 + %s19242_s22]]   ;;  %s19246_s22 = smov 28  }
  0x2e   :  { %20977 = sst [smem:[#allocation24_spill]] %s19388_s4 }
  0x2f   :  { %20978 = sst [smem:[#allocation25_spill]] %s19393_s25 }
  0x30   :  { %20979 = sst [smem:[#allocation26_spill]] %s19398_s14 }
  0x31   :  { %s19408_s4 = sld [smem:[%s20920_s0 + %s19243_s28]]   ;;  %s19247_s28 = smov 29  }
  0x32   :  { %s19413_s25 = sld [smem:[%s20920_s0 + %s19244_s7]]   ;;  %s19248_s7 = smov 30  }
  0x33   :  { %20980 = sst [smem:[#allocation27_spill]] %s19403_s27 }
  0x34   :  { %s19418_s14 = sld [smem:[%s20920_s0 + %s19245_s15]]   ;;  %s19249_s15 = smov 31  }
  0x35   :  { %s19423_s6 = sld [smem:[%s20920_s0 + %s19246_s22]]   ;;  %s19250_s22 = smov 32  }
  0x36   :  { %s19428_s21 = sld [smem:[%s20920_s0 + %s19247_s28]]   ;;  %s19251_s28 = smov 33  }
  0x37   :  { %20981 = sst [smem:[#allocation28_spill]] %s19408_s4 }
  0x38   :  { %20982 = sst [smem:[#allocation29_spill]] %s19413_s25 }
  0x39   :  { %s19433_s24 = sld [smem:[%s20920_s0 + %s19248_s7]]   ;;  %s19252_s7 = smov 34  }
  0x3a   :  { %20983 = sst [smem:[#allocation30_spill]] %s19418_s14 }
  0x3b   :  { %20984 = sst [smem:[#allocation31_spill]] %s19423_s6 }
  0x3c   :  { %20985 = sst [smem:[#allocation32_spill]] %s19428_s21 }
  0x3d   :  { %s19438_s19 = sld [smem:[%s20920_s0 + %s19249_s15]]   ;;  %s19253_s15 = smov 35  }
  0x3e   :  { %s19443_s8 = sld [smem:[%s20920_s0 + %s19250_s22]]   ;;  %s19254_s22 = smov 36  }
  0x3f   :  { %20986 = sst [smem:[#allocation33_spill]] %s19433_s24 }
  0x40   :  { %s19448_s20 = sld [smem:[%s20920_s0 + %s19251_s28]]   ;;  %s19255_s28 = smov 37  }
  0x41   :  { %s19453_s12 = sld [smem:[%s20920_s0 + %s19252_s7]]   ;;  %s19256_s7 = smov 38  }
  0x42   :  { %s19458_s30 = sld [smem:[%s20920_s0 + %s19253_s15]]   ;;  %s19257_s15 = smov 39  }
  0x43   :  { %20987 = sst [smem:[#allocation34_spill]] %s19438_s19 }
  0x44   :  { %20988 = sst [smem:[#allocation35_spill]] %s19443_s8 }
  0x45   :  { %s19463_s8 = sld [smem:[%s20920_s0 + %s19254_s22]]   ;;  %s19258_s22 = smov 40  }
  0x46   :  { %20989 = sst [smem:[#allocation36_spill]] %s19448_s20 }
  0x47   :  { %s19468_s20 = sld [smem:[%s20920_s0 + %s19255_s28]]   ;;  %s19259_s28 = smov 41  }
  0x48   :  { %s19473_s4 = sld [smem:[%s20920_s0 + %s19256_s7]]   ;;  %s19260_s7 = smov 42  }
  0x49   :  { %s19478_s21 = sld [smem:[%s20920_s0 + %s19257_s15]]   ;;  %s19261_s15 = smov 43  }
  0x4a   :  { %s19483_s14 = sld [smem:[%s20920_s0 + %s19258_s22]]   ;;  %s19262_s22 = smov 44  }
  0x4b   :  { %s19488_s17 = sld [smem:[%s20920_s0 + %s19259_s28]]   ;;  %s19263_s28 = smov 45  }
  0x4c   :  { %s19493_s27 = sld [smem:[%s20920_s0 + %s19260_s7]]   ;;  %s19264_s7 = smov 46  }
  0x4d   :  { %s19498_s25 = sld [smem:[%s20920_s0 + %s19261_s15]]   ;;  %s19265_s15 = smov 47  }
  0x4e   :  { %s19503_s19 = sld [smem:[%s20920_s0 + %s19262_s22]]   ;;  %s19266_s22 = smov 48  }
  0x4f   :  { %s19508_s6 = sld [smem:[%s20920_s0 + %s19263_s28]]   ;;  %s19267_s28 = smov 49  }
  0x50   :  { %s19513_s29 = sld [smem:[%s20920_s0 + %s19264_s7]]   ;;  %s19268_s7 = smov 50  }
  0x51   :  { %s19518_s3 = sld [smem:[%s20920_s0 + %s19265_s15]]   ;;  %s19269_s15 = smov 51  }
  0x52   :  { %s19523_s24 = sld [smem:[%s20920_s0 + %s19266_s22]]   ;;  %s19270_s22 = smov 52  }
  0x53   :  { %s19528_s9 = sld [smem:[%s20920_s0 + %s19267_s28]]   ;;  %s19271_s28 = smov 53  }
  0x54   :  { %20990 = sst [smem:[#allocation37_spill]] %s19503_s19 }
  0x55   :  { %s19538_s19 = sld [smem:[%s20920_s0 + %s19269_s15]]   ;;  %s19273_s15 = smov 55  }
  0x56   :  { %20991 = sst [smem:[#allocation38_spill]] %s19513_s29 }
  0x57   :  { %s19533_s29 = sld [smem:[%s20920_s0 + %s19268_s7]]   ;;  %s19272_s7 = smov 54  }
  0x58   :  { %20992 = sst [smem:[#allocation39_spill]] %s19523_s24 }
  0x59   :  { %20993 = sst [smem:[#allocation40_spill]] %s19528_s9 }
  0x5a   :  { %s19543_s24 = sld [smem:[%s20920_s0 + %s19270_s22]]  }
  0x5b   :  { %20995 = sst [smem:[#allocation42_spill]] %s19538_s19 }
  0x5c   :  { %s19548_s9 = sld [smem:[%s20920_s0 + %s19271_s28]]  }
  0x5d   :  { %20994 = sst [smem:[#allocation41_spill]] %s19533_s29 }
  0x5e   :  { %s19553_s29 = sld [smem:[%s20920_s0 + %s19272_s7]]  }
  0x5f   :  { %s19558_s19 = sld [smem:[%s20920_s0 + %s19273_s15]]  }
  0x65   :  { %20996 = sst [smem:[#allocation43_spill]] %s19558_s19 }
  0x66   :  { %v232_v0 = vld [vmem:[%s19283_s5] sm:$0xff]  ;;  %vm236_vm0 = vcmask 261120   ;;  %v233_v1 = vld [vmem:[%s19283_s5 + $0x8] sm:$0xff] }
  0x67   :  { %117 = vsyncpa [#allocation3], 0  ;;  %v237_v2 = vsel %vm236_vm0, %v232_v0, 0.0  ;;  %v240_v3 = vsel %vm236_vm0, %v233_v1, 0.0  ;;  %v280_v14 = vld [vmem:[%s19493_s27] sm:$0xff]  ;;  %v281_v15 = vld [vmem:[%s19493_s27 + $0x8] sm:$0xff] }
  0x68   :  { %238 = vadd.xlane.f32.xlu0 %v237_v2  ;;  %v17913_v16 = vpack.c.bf16 %v281_v15, %v280_v14  ;;  %v372_v17 = vld [vmem:[%s19483_s14] sm:$0xff]  ;;  %v373_v18 = vld [vmem:[%s19483_s14 + $0x8] sm:$0xff]  ;;  %v282_v20 = vld [vmem:[%s19493_s27 + $0x10] sm:$0xff]  ;;  %vm544_vm1 = vcmask 64512   ;;  %vm636_vm3 = vcmask 130048   ;;  %s20999_s0 = sld [smem:[#allocation37_spill]] }
  0x69   :  { %v17921_v19 = vpack.c.bf16 %v373_v18, %v372_v17  ;;  %v283_v21 = vld [vmem:[%s19493_s27 + $0x18] sm:$0xff]  ;;  %v374_v23 = vld [vmem:[%s19483_s14 + $0x10] sm:$0xff]  ;;  %v458_v26 = vld [vmem:[%s19498_s25] sm:$0xff]  ;;  %s21000_s5 = sld [smem:[#allocation40_spill]]  ;;  %vm2629_vm4 = vcmask 523264   ;;  %s21003_s22 = sld [smem:[#allocation42_spill]] }
  0x6a   :  { %17914 = vmatprep.subr.bf16.mxu0 %v17913_v16  ;;  %v17917_v22 = vpack.c.bf16 %v283_v21, %v282_v20  ;;  %v375_v24 = vld [vmem:[%s19483_s14 + $0x18] sm:$0xff]  ;;  %v459_v27 = vld [vmem:[%s19498_s25 + $0x8] sm:$0xff]  ;;  %v14926_v36 = vld [vmem:[%s19458_s30] ss:$0 sm:$0xff]  ;;  %s21001_s30 = sld [smem:[#allocation38_spill]]  ;;  %s21004_s23 = sld [smem:[#allocation41_spill]] }
  0x6b   :  { %17916 = vmatpush3.bf16.msra.mxu0 %v17913_v16  ;;  %17922 = vmatprep.subr.bf16.mxu1 %v17921_v19  ;;  %v17925_v25 = vpack.c.bf16 %v375_v24, %v374_v23  ;;  %v17929_v28 = vpack.c.bf16 %v459_v27, %v458_v26  ;;  %v14927_v38 = vld [vmem:[%s19453_s12] ss:$0 sm:$0xff]  ;;  %v460_v43 = vld [vmem:[%s19498_s25 + $0x10] sm:$0xff]  ;;  %v461_v44 = vld [vmem:[%s19498_s25 + $0x18] sm:$0xff]  ;;  %s21002_s12 = sld [smem:[#allocation39_spill]]  ;;  %s21016_s26 = sld [smem:[#allocation28_spill]] }
  0x6c   :  { %241 = vadd.xlane.f32.xlu0 %v240_v3  ;;  %17924 = vmatpush3.bf16.msra.mxu1 %v17921_v19  ;;  %v17933_v47 = vpack.c.bf16 %v461_v44, %v460_v43  ;;  %v14951_v48 = vld [vmem:[%s19483_s14 + $0x20] sm:$0xff]  ;;  %v14952_v49 = vld [vmem:[%s19483_s14 + $0x28] sm:$0xff]  ;;  %v14953_v51 = vld [vmem:[%s19483_s14 + $0x30] sm:$0xff]  ;;  %s21017_s28 = sld [smem:[#allocation15_spill]]  ;;  %s21018_s1 = sld [smem:[#allocation17_spill]]  ;;  %vm14851_vm5 = vcmask 0  }
  0x6d   :  { %17918 = vmatprep.subr.bf16.mxu0 %v17917_v22  ;;  %17926 = vmatprep.subr.bf16.mxu1 %v17925_v25  ;;  %v17955_v50 = vpack.c.bf16 %v14952_v49, %v14951_v48  ;;  %v14954_v52 = vld [vmem:[%s19483_s14 + $0x38] sm:$0xff]  ;;  %v14931_v54 = vld [vmem:[%s19463_s8] ss:$0 sm:$0xff]  ;;  %vm19608_vm2 = vmpackc.low %vm544_vm1, %vm544_vm1  ;;  %s21019_s2 = sld [smem:[#allocation18_spill]]  ;;  %s21020_s7 = sld [smem:[#allocation36_spill]] }
  0x6e   :  { %v17959_v53 = vpack.c.bf16 %v14954_v52, %v14953_v51  ;;  %v14928_v55 = vld [vmem:[%s19473_s4] ss:$0 sm:$0xff]  ;;  %v19625_v15 = vld [vmem:[%s19293_s13 + $0x8] sm:$0xff]  ;;  %v14961_v51 = vld [vmem:[%s19498_s25 + $0x30] sm:$0xff]  ;;  %s21021_s10 = sld [smem:[#allocation35_spill]]  ;;  %s21023_s15 = sld [smem:[#allocation13_spill]] }
  0x6f   :  { %17920 = vmatpush3.bf16.msra.mxu0 %v17917_v22  ;;  %v19628_v18 = vld [vmem:[%s19293_s13] sm:$0xff]  ;;  %v14960_v49 = vld [vmem:[%s19498_s25 + $0x28] sm:$0xff]  ;;  %v14962_v52 = vld [vmem:[%s19498_s25 + $0x38] sm:$0xff]  ;;  %s21022_s11 = sld [smem:[#allocation11_spill]]  ;;  %s21024_s16 = sld [smem:[#allocation14_spill]] }
  0x70   :  { %17928 = vmatpush3.bf16.msra.mxu1 %v17925_v25  ;;  %17930 = vmatprep.subr.bf16.mxu0 %v17929_v28  ;;  %v14959_v48 = vld [vmem:[%s19498_s25 + $0x20] sm:$0xff]  ;;  %s21025_s18 = sld [smem:[#allocation7_spill]]  ;;  %s21035_s19 = sld [smem:[#allocation25_spill]] }
  0xf5   :  { %v239_v4 = vpop.xlane.xlu0 %238 }
  0xf6   :  { %v244_v5 = vmul.f32 0.03125, %v239_v4 }
  0xf8   :  { %v246_v6 = vsub.f32 %v232_v0, %v244_v5 }
  0xf9   :  { %v242_v7 = vpop.xlane.xlu0 %241 }
  0xfa   :  { %v245_v8 = vmul.f32 0.03125, %v242_v7  ;;  %v248_v9 = vmul.f32 %v246_v6, %v246_v6 }
  0xfc   :  { %v247_v10 = vsub.f32 %v233_v1, %v245_v8  ;;  %v250_v11 = vsel %vm236_vm0, %v248_v9, 0.0  ;;  %v14934_v1 = vld [vmem:[%s19478_s21] ss:$0 sm:$0xff]  ;;  %v14956_v8 = vld [vmem:[%s19463_s8 + $0x1] ss:$0 sm:$0xff] }
  0xfd   :  { %251 = vadd.xlane.f32.xlu1 %v250_v11 }
  0xfe   :  { %v249_v12 = vmul.f32 %v247_v10, %v247_v10 }
 0x100   :  { %v253_v13 = vsel %vm236_vm0, %v249_v12, 0.0 }
 0x101   :  { %254 = vadd.xlane.f32.xlu1 %v253_v13 }
 0x18a   :  { %v252_v29 = vpop.xlane.xlu1 %251 }
 0x18b   :  { %v256_v30 = vmul.f32 0.03125, %v252_v29 }
 0x18d   :  { %v258_v31 = vadd.f32 1e-05, %v256_v30 }
 0x18e   :  { %v255_v32 = vpop.xlane.xlu1 %254 }
 0x18f   :  { %18925 = vrsqrt.f32 %v258_v31  ;;  %v257_v33 = vmul.f32 0.03125, %v255_v32 }
 0x191   :  { %v259_v34 = vadd.f32 1e-05, %v257_v33 }
 0x193   :  { %18927 = vrsqrt.f32 %v259_v34  ;;  %v14943_v34 = vld [vmem:[%s19493_s27 + $0x20] sm:$0xff] }
 0x199   :  { %v18926_v35 = vpop.eup %18925 }
 0x19a   :  { %v262_v37 = vmul.f32 %v18926_v35, %v246_v6  ;;  %v14944_v35 = vld [vmem:[%s19493_s27 + $0x28] sm:$0xff] }
 0x19c   :  { %v270_v39 = vmul.f32 %v14926_v36, %v262_v37 }
 0x19d   :  { %v18928_v40 = vpop.eup %18927 }
 0x19e   :  { %v19578_v41 = vadd.f32 %v14927_v38, %v270_v39  ;;  %v263_v42 = vmul.f32 %v18928_v40, %v247_v10  ;;  %v14945_v40 = vld [vmem:[%s19493_s27 + $0x30] sm:$0xff] }
 0x1a0   :  { %v271_v45 = vmul.f32 %v14926_v36, %v263_v42  ;;  %16542 = vmatprep.mubr.msk.f32.mxu0 %vm236_vm0, %v19578_v41  ;;  %16553 = vmatprep.mubr.msk.f32.mxu1 %vm236_vm0, %v19578_v41  ;;  %v17947_v36 = vpack.c.bf16 %v14944_v35, %v14943_v34  ;;  %v14946_v42 = vld [vmem:[%s19493_s27 + $0x38] sm:$0xff] }
 0x1a2   :  { %v19586_v46 = vadd.f32 %v14927_v38, %v271_v45 }
 0x1a4   :  { %16543 = vmatmul.mubr.msk.f32.vlgmr.msra.gmra.mrb[0].mxu0 %vm236_vm0, %v19586_v46  ;;  %16554 = vmatmul.mubr.msk.f32.vlgmr.msra.gmra.mrb[0].mxu1 %vm236_vm0, %v19586_v46 }
 0x1a5   :  { %17932 = vmatpush3.bf16.msra.mxu0 %v17929_v28  ;;  %16564 = vmatprep.mubr.msk.f32.mxu0 %vm236_vm0, %v19578_v41 }
 0x1a6   :  { %17934 = vmatprep.subr.bf16.mxu0 %v17933_v47 }
 0x1a9   :  { %17936 = vmatpush3.bf16.msra.mxu0 %v17933_v47  ;;  %v17951_v47 = vpack.c.bf16 %v14946_v42, %v14945_v40  ;;  %v14996_v40 = vld [vmem:[%s19498_s25 + $0x50] sm:$0xff]  ;;  %v14997_v42 = vld [vmem:[%s19498_s25 + $0x58] sm:$0xff] }
 0x1aa   :  { %17956 = vmatprep.subr.bf16.mxu0 %v17955_v50 }
 0x1ac   :  { %16565 = vmatmul.mubr.msk.f32.vlgmr.msra.gmra.mrb[2].mxu0 %vm236_vm0, %v19586_v46 }
 0x1ad   :  { %17958 = vmatpush3.bf16.msra.mxu0 %v17955_v50  ;;  %16600 = vmatprep.mubr.msk.f32.mxu0 %vm236_vm0, %v19578_v41  ;;  %v17963_v50 = vpack.c.bf16 %v14960_v49, %v14959_v48 }
 0x1ae   :  { %17960 = vmatprep.subr.bf16.mxu0 %v17959_v53 }
 0x1b1   :  { %17962 = vmatpush3.bf16.msra.mxu0 %v17959_v53  ;;  %v17967_v53 = vpack.c.bf16 %v14962_v52, %v14961_v51  ;;  %v14983_v51 = vld [vmem:[%s19473_s4 + $0x2] ss:$0 sm:$0xff]  ;;  %v14988_v52 = vld [vmem:[%s19483_s14 + $0x50] sm:$0xff] }
 0x1b4   :  { %16601 = vmatmul.mubr.msk.f32.vlgmr.msra.gmra.mrb[4].mxu0 %vm236_vm0, %v19586_v46 }
 0x277   :  { %v16544_v56 = vpop.f32.mrb[0].mxu0  ;;  %v16555_v57 = vpop.f32.mrb[0].mxu1 }
 0x278   :  { %v455_v58 = vadd.f32 %v16555_v57, %v14931_v54  ;;  %v363_v59 = vpop.f32.mrb[1].mxu0  ;;  %v449_v60 = vpop.f32.mrb[1].mxu1  ;;  %v369_v6 = vadd.f32 %v16544_v56, %v14928_v55  ;;  %v14948_v56 = vld [vmem:[%s19473_s4 + $0x1] ss:$0 sm:$0xff] }
 0x279   :  { %v364_v61 = vadd.f32 %v14928_v55, %v363_v59  ;;  %v450_v62 = vadd.f32 %v14931_v54, %v449_v60 }
 0x27b   :  { %v17937_v0 = vpack.c.bf16 %v455_v58, %v450_v62  ;;  %16571 = vmatprep.mubr.msk.f32.mxu1 %vm544_vm1, %v364_v61  ;;  %v14964_v61 = vld [vmem:[%s19478_s21 + $0x1] ss:$0 sm:$0xff] }
 0x27d   :  { %17939 = vmatprep.subr.msk.bf16.mxu1 %vm19608_vm2, %v17937_v0 }
 0x27e   :  { %17942 = vmatpush3.bf16.xpose.msk.msra.mxu1 %vm19608_vm2, %v17937_v0 }
 0x27f   :  { %v16566_v2 = vpop.f32.mrb[2].mxu0 }
 0x280   :  { %v541_v3 = vadd.f32 %v16566_v2, %v14934_v1  ;;  %v535_v4 = vpop.f32.mrb[3].mxu0 }
 0x281   :  { %v536_v5 = vadd.f32 %v14934_v1, %v535_v4 }
 0x283   :  { %v17943_v7 = vpack.c.bf16 %v541_v3, %v536_v5 }
 0x285   :  { %17944 = vmatprep.subr.bf16.mxu1 %v17943_v7  ;;  %16572 = vmatmul.mubr.msk.f32.vlgmr.msra.gmra.mrb[2].mxu1 %vm544_vm1, %v369_v6 }
 0x286   :  { %17946 = vmatpush3.bf16.msra.mxu1 %v17943_v7 }
 0x287   :  { %v16602_v9 = vpop.f32.mrb[4].mxu0  ;;  %17948 = vmatprep.subr.bf16.mxu1 %v17947_v36 }
 0x288   :  { %v914_v10 = vadd.f32 %v16602_v9, %v14956_v8  ;;  %v908_v11 = vpop.f32.mrb[5].mxu0 }
 0x289   :  { %v909_v12 = vadd.f32 %v14956_v8, %v908_v11 }
 0x28b   :  { %v17971_v13 = vpack.c.bf16 %v914_v10, %v909_v12 }
 0x28d   :  { %17973 = vmatprep.subr.msk.bf16.mxu0 %vm19608_vm2, %v17971_v13 }
 0x28e   :  { %17976 = vmatpush3.bf16.xpose.msk.msra.mxu0 %vm19608_vm2, %v17971_v13 }
 0x358   :  { %v16573_v14 = vpop.f32.mrb[2].mxu1 }
 0x359   :  { %v633_v16 = vmul.f32 0.35355338, %v16573_v14  ;;  %v623_v17 = vpop.f32.mrb[3].mxu1 }
 0x35a   :  { %v632_v19 = vmul.f32 0.35355338, %v623_v17 }
 0x35b   :  { %v635_v20 = vadd.f32 %v633_v16, %v19625_v15 }
 0x35c   :  { %v634_v21 = vadd.f32 %v632_v19, %v19628_v18 }
 0x35d   :  { %v640_v22 = vsel %vm636_vm3, %v635_v20, -inf }
 0x35e   :  { %641 = vmax.xlane.f32.xlu1 %v640_v22  ;;  %v637_v23 = vsel %vm636_vm3, %v634_v21, -inf }
 0x35f   :  { %638 = vmax.xlane.f32.xlu0 %v637_v23 }
 0x3eb   :  { %v642_v24 = vpop.xlane.xlu1 %641 }
 0x3ec   :  { %v644_v25 = vsub.f32 %v635_v20, %v642_v24  ;;  %v639_v26 = vpop.xlane.xlu0 %638  ;;  %v14978_v24 = vld [vmem:[%s19493_s27 + $0x40] sm:$0xff] }
 0x3ed   :  { %v643_v27 = vsub.f32 %v634_v21, %v639_v26 }
 0x3ee   :  { %v647_v28 = vmul.f32 1.442695, %v644_v25  ;;  %v14979_v25 = vld [vmem:[%s19493_s27 + $0x48] sm:$0xff] }
 0x3ef   :  { %v645_v29 = vmul.f32 1.442695, %v643_v27  ;;  %v17981_v26 = vpack.c.bf16 %v14979_v25, %v14978_v24  ;;  %v14973_v27 = vld [vmem:[%s19488_s17 + $0x8] sm:$0xff] }
 0x3f0   :  { %18929 = vpow2.f32 %v647_v28  ;;  %16628 = vmatprep.subr.mxu0 %v14973_v27 }
 0x3f1   :  { %18931 = vpow2.f32 %v645_v29 }
 0x3fa   :  { %v18930_v30 = vpop.eup %18929 }
 0x3fb   :  { %v18932_v31 = vpop.eup %18931  ;;  %v652_v32 = vsel %vm636_vm3, %v18930_v30, 0.0 }
 0x3fc   :  { %653 = vadd.xlane.f32.xlu1 %v652_v32  ;;  %v649_v33 = vsel %vm636_vm3, %v18932_v31, 0.0  ;;  %v14981_v32 = vld [vmem:[%s19493_s27 + $0x58] sm:$0xff] }
 0x3fd   :  { %650 = vadd.xlane.f32.xlu0 %v649_v33 }
 0x489   :  { %v654_v37 = vpop.xlane.xlu1 %653 }
 0x48a   :  { %18933 = vrcp.f32 %v654_v37  ;;  %v651_v38 = vpop.xlane.xlu0 %650  ;;  %v14994_v37 = vld [vmem:[%s19498_s25 + $0x40] sm:$0xff] }
 0x48b   :  { %18935 = vrcp.f32 %v651_v38  ;;  %v14995_v38 = vld [vmem:[%s19498_s25 + $0x48] sm:$0xff] }
 0x494   :  { %v18934_v39 = vpop.eup %18933 }
 0x495   :  { %v18936_v43 = vpop.eup %18935  ;;  %v658_v45 = vmul.f32 %v18934_v39, %v18930_v30  ;;  %v17997_v39 = vpack.c.bf16 %v14995_v38, %v14994_v37 }
 0x496   :  { %v657_v44 = vmul.f32 %v18936_v43, %v18932_v31  ;;  %v14980_v31 = vld [vmem:[%s19493_s27 + $0x50] sm:$0xff]  ;;  %v18001_v43 = vpack.c.bf16 %v14997_v42, %v14996_v40  ;;  %v15027_v42 = vld [vmem:[%s19498_s25 + $0x60] sm:$0xff] }
 0x498   :  { %16578 = vmatprep.mubr.msk.f32.mxu1 %vm636_vm3, %v657_v44  ;;  %v740_v44 = vld [vmem:[%s19488_s17] sm:$0xff] }
 0x499   :  { %16579 = vmatmul.mubr.msk.f32.vlgmr.msra.gmra.mrb[4].mxu1 %vm636_vm3, %v658_v45  ;;  %v14986_v45 = vld [vmem:[%s19483_s14 + $0x40] sm:$0xff] }
 0x49a   :  { %17950 = vmatpush3.bf16.msra.mxu1 %v17947_v36  ;;  %16589 = vmatprep.mubr.msk.f32.mxu1 %vm236_vm0, %v19578_v41  ;;  %v17985_v36 = vpack.c.bf16 %v14981_v32, %v14980_v31  ;;  %v15008_v31 = vld [vmem:[%s19488_s17 + $0x10] sm:$0xff] }
 0x49b   :  { %17952 = vmatprep.subr.bf16.mxu1 %v17951_v47 }
 0x49e   :  { %17954 = vmatpush3.bf16.msra.mxu1 %v17951_v47  ;;  %v14987_v47 = vld [vmem:[%s19483_s14 + $0x48] sm:$0xff] }
 0x49f   :  { %17964 = vmatprep.subr.bf16.mxu1 %v17963_v50 }
 0x4a1   :  { %16590 = vmatmul.mubr.msk.f32.vlgmr.msra.gmra.mrb[6].mxu1 %vm236_vm0, %v19586_v46 }
 0x4a2   :  { %17966 = vmatpush3.bf16.msra.mxu1 %v17963_v50  ;;  %16611 = vmatprep.mubr.msk.f32.mxu1 %vm236_vm0, %v19578_v41  ;;  %v17989_v50 = vpack.c.bf16 %v14987_v47, %v14986_v45  ;;  %v15029_v45 = vld [vmem:[%s19498_s25 + $0x70] sm:$0xff]  ;;  %v15030_v47 = vld [vmem:[%s19498_s25 + $0x78] sm:$0xff] }
 0x4a3   :  { %17968 = vmatprep.subr.bf16.mxu1 %v17967_v53 }
 0x4a6   :  { %17970 = vmatpush3.bf16.msra.mxu1 %v17967_v53  ;;  %v14989_v53 = vld [vmem:[%s19483_s14 + $0x58] sm:$0xff] }
 0x4a9   :  { %16612 = vmatmul.mubr.msk.f32.vlgmr.msra.gmra.mrb[8].mxu1 %vm236_vm0, %v19586_v46 }
 0x56c   :  { %v19654_v54 = vpop.f32.mrb[4].mxu1 }
 0x56d   :  { %v19656_v55 = vpop.f32.mrb[5].mxu1 }
 0x574   :  { %v16591_v57 = vpop.f32.mrb[6].mxu1 }
 0x575   :  { %v820_v58 = vpop.f32.mrb[7].mxu1  ;;  %v826_v60 = vadd.f32 %v16591_v57, %v14948_v56 }
 0x576   :  { %v821_v59 = vadd.f32 %v14948_v56, %v820_v58 }
 0x578   :  { %16618 = vmatprep.mubr.msk.f32.mxu0 %vm544_vm1, %v821_v59  ;;  %v17993_v59 = vpack.c.bf16 %v14989_v53, %v14988_v52  ;;  %v15021_v52 = vld [vmem:[%s19483_s14 + $0x70] sm:$0xff]  ;;  %v15022_v53 = vld [vmem:[%s19483_s14 + $0x78] sm:$0xff] }
 0x579   :  { %16619 = vmatmul.mubr.msk.f32.vlgmr.msra.gmra.mrb[6].mxu0 %vm544_vm1, %v826_v60  ;;  %v14999_v60 = vld [vmem:[%s19478_s21 + $0x2] ss:$0 sm:$0xff] }
 0x57a   :  { %16629 = vmatpush3.msra.mxu0 %v14973_v27 }
 0x57b   :  { %16633 = vmatprep.subr.mxu0 %v740_v44 }
 0x57c   :  { %v16613_v62 = vpop.f32.mrb[8].mxu1 }
 0x57d   :  { %v1002_v0 = vadd.f32 %v16613_v62, %v14964_v61  ;;  %v996_v1 = vpop.f32.mrb[9].mxu1 }
 0x57e   :  { %v997_v2 = vadd.f32 %v14964_v61, %v996_v1 }
 0x580   :  { %v17977_v3 = vpack.c.bf16 %v1002_v0, %v997_v2 }
 0x582   :  { %17978 = vmatprep.subr.bf16.mxu1 %v17977_v3 }
 0x583   :  { %17980 = vmatpush3.bf16.msra.mxu1 %v17977_v3 }
 0x584   :  { %17982 = vmatprep.subr.bf16.mxu1 %v17981_v26 }
 0x64c   :  { %v16620_v4 = vpop.f32.mrb[6].mxu0 }
 0x64d   :  { %v1093_v5 = vmul.f32 0.35355338, %v16620_v4  ;;  %v1083_v6 = vpop.f32.mrb[7].mxu0 }
 0x64e   :  { %v1092_v7 = vmul.f32 0.35355338, %v1083_v6 }
 0x64f   :  { %v1095_v8 = vadd.f32 %v1093_v5, %v19625_v15 }
 0x650   :  { %v1094_v9 = vadd.f32 %v1092_v7, %v19628_v18 }
 0x651   :  { %v1099_v10 = vsel %vm636_vm3, %v1095_v8, -inf }
 0x652   :  { %1100 = vmax.xlane.f32.xlu1 %v1099_v10  ;;  %v1096_v11 = vsel %vm636_vm3, %v1094_v9, -inf }
 0x653   :  { %1097 = vmax.xlane.f32.xlu0 %v1096_v11 }
 0x6df   :  { %v1101_v12 = vpop.xlane.xlu1 %1100 }
 0x6e0   :  { %v1103_v13 = vsub.f32 %v1095_v8, %v1101_v12  ;;  %v1098_v14 = vpop.xlane.xlu0 %1097 }
 0x6e1   :  { %v1102_v16 = vsub.f32 %v1094_v9, %v1098_v14 }
 0x6e2   :  { %v1106_v17 = vmul.f32 1.442695, %v1103_v13 }
 0x6e3   :  { %v1104_v19 = vmul.f32 1.442695, %v1102_v16 }
 0x6e4   :  { %18937 = vpow2.f32 %v1106_v17 }
 0x6e5   :  { %18939 = vpow2.f32 %v1104_v19 }
 0x6ee   :  { %v18938_v20 = vpop.eup %18937 }
 0x6ef   :  { %v18940_v21 = vpop.eup %18939  ;;  %v1111_v22 = vsel %vm636_vm3, %v18938_v20, 0.0 }
 0x6f0   :  { %1112 = vadd.xlane.f32.xlu1 %v1111_v22  ;;  %v1108_v23 = vsel %vm636_vm3, %v18940_v21, 0.0 }
 0x6f1   :  { %1109 = vadd.xlane.f32.xlu0 %v1108_v23 }
 0x77d   :  { %v1113_v28 = vpop.xlane.xlu1 %1112 }
 0x77e   :  { %18941 = vrcp.f32 %v1113_v28  ;;  %v1110_v29 = vpop.xlane.xlu0 %1109  ;;  %v15011_v28 = vld [vmem:[%s19493_s27 + $0x60] sm:$0xff] }
 0x77f   :  { %18943 = vrcp.f32 %v1110_v29  ;;  %v15012_v29 = vld [vmem:[%s19493_s27 + $0x68] sm:$0xff] }
 0x788   :  { %v18942_v30 = vpop.eup %18941 }
 0x789   :  { %v18944_v33 = vpop.eup %18943  ;;  %v1117_v35 = vmul.f32 %v18942_v30, %v18938_v20  ;;  %v18015_v30 = vpack.c.bf16 %v15012_v29, %v15011_v28  ;;  %v15041_v29 = vld [vmem:[%s19488_s17 + $0x18] sm:$0xff] }
 0x78a   :  { %v1116_v34 = vmul.f32 %v18944_v33, %v18940_v21 }
 0x78c   :  { %16625 = vmatprep.mubr.msk.f32.mxu1 %vm636_vm3, %v1116_v34 }
 0x78d   :  { %16626 = vmatmul.mubr.msk.f32.vlgmr.msra.gmra.mrb[10].mxu1 %vm636_vm3, %v1117_v35  ;;  %v15013_v35 = vld [vmem:[%s19493_s27 + $0x70] sm:$0xff] }
 0x78e   :  { %17984 = vmatpush3.bf16.msra.mxu1 %v17981_v26  ;;  %16646 = vmatprep.mubr.msk.f32.mxu1 %vm236_vm0, %v19578_v41 }
 0x78f   :  { %17986 = vmatprep.subr.bf16.mxu1 %v17985_v36 }
 0x792   :  { %17988 = vmatpush3.bf16.msra.mxu1 %v17985_v36  ;;  %v15014_v36 = vld [vmem:[%s19493_s27 + $0x78] sm:$0xff] }
 0x793   :  { %17998 = vmatprep.subr.bf16.mxu1 %v17997_v39  ;;  %v18019_v40 = vpack.c.bf16 %v15014_v36, %v15013_v35 }
 0x795   :  { %16647 = vmatmul.mubr.msk.f32.vlgmr.msra.gmra.mrb[12].mxu1 %vm236_vm0, %v19586_v46 }
 0x796   :  { %18000 = vmatpush3.bf16.msra.mxu1 %v17997_v39  ;;  %16668 = vmatprep.mubr.msk.f32.mxu1 %vm236_vm0, %v19578_v41 }
 0x797   :  { %18002 = vmatprep.subr.bf16.mxu1 %v18001_v43 }
 0x79a   :  { %18004 = vmatpush3.bf16.msra.mxu1 %v18001_v43  ;;  %v15028_v43 = vld [vmem:[%s19498_s25 + $0x68] sm:$0xff] }
 0x79d   :  { %16669 = vmatmul.mubr.msk.f32.vlgmr.msra.gmra.mrb[14].mxu1 %vm236_vm0, %v19586_v46 }
 0x860   :  { %v16627_v48 = vpop.f32.mrb[10].mxu1 }
 0x861   :  { %v1190_v49 = vpop.f32.mrb[11].mxu1 }
 0x862   :  { %16630 = vmatprep.mubr.msk.f32.mxu0 %vm544_vm1, %v1190_v49  ;;  %v15019_v49 = vld [vmem:[%s19483_s14 + $0x60] sm:$0xff] }
 0x863   :  { %16631 = vmatmul.mubr.msk.f32.vlgmr.msra.gmra.mrb[8].mxu0 %vm544_vm1, %v16627_v48  ;;  %v18035_v48 = vpack.c.bf16 %v15030_v47, %v15029_v45 }
 0x864   :  { %16634 = vmatpush3.msra.mxu0 %v740_v44  ;;  %16635 = vmatprep.mubr.msk.f32.mxu0 %vm544_vm1, %v19656_v55  ;;  %v18031_v44 = vpack.c.bf16 %v15028_v43, %v15027_v42 }
 0x865   :  { %17990 = vmatprep.subr.bf16.mxu0 %v17989_v50 }
 0x868   :  { %v16648_v56 = vpop.f32.mrb[12].mxu1 }
 0x869   :  { %v1448_v57 = vadd.f32 %v16648_v56, %v14983_v51  ;;  %v1442_v58 = vpop.f32.mrb[13].mxu1 }
 0x86a   :  { %v1443_v0 = vadd.f32 %v14983_v51, %v1442_v58  ;;  %v18027_v58 = vpack.c.bf16 %v15022_v53, %v15021_v52 }
 0x86b   :  { %16636 = vmatmul.mubr.msk.f32.vlgmr.msra.gmra.mrb[8].mxu0 %vm544_vm1, %v19654_v54  ;;  %v14991_v54 = vld [vmem:[%s19463_s8 + $0x2] ss:$0 sm:$0xff] }
 0x86c   :  { %17992 = vmatpush3.bf16.msra.mxu0 %v17989_v50  ;;  %16657 = vmatprep.mubr.msk.f32.mxu0 %vm236_vm0, %v19578_v41  ;;  %v15020_v50 = vld [vmem:[%s19483_s14 + $0x68] sm:$0xff] }
 0x86d   :  { %17994 = vmatprep.subr.bf16.mxu0 %v17993_v59  ;;  %v18023_v51 = vpack.c.bf16 %v15020_v50, %v15019_v49 }
 0x870   :  { %17996 = vmatpush3.bf16.msra.mxu0 %v17993_v59  ;;  %v16670_v55 = vpop.f32.mrb[14].mxu1  ;;  %v15016_v59 = vld [vmem:[%s19473_s4 + $0x3] ss:$0 sm:$0xff] }
 0x871   :  { %v1624_v61 = vadd.f32 %v16670_v55, %v14999_v60  ;;  %v1618_v62 = vpop.f32.mrb[15].mxu1 }
 0x872   :  { %v1619_v1 = vadd.f32 %v14999_v60, %v1618_v62 }
 0x873   :  { %16658 = vmatmul.mubr.msk.f32.vlgmr.msra.gmra.mrb[10].mxu0 %vm236_vm0, %v19586_v46 }
 0x874   :  { %v18011_v2 = vpack.c.bf16 %v1624_v61, %v1619_v1  ;;  %16675 = vmatprep.mubr.msk.f32.mxu0 %vm544_vm1, %v1443_v0  ;;  %v15032_v0 = vld [vmem:[%s19478_s21 + $0x3] ss:$0 sm:$0xff] }
 0x876   :  { %18012 = vmatprep.subr.bf16.mxu1 %v18011_v2 }
 0x877   :  { %18014 = vmatpush3.bf16.msra.mxu1 %v18011_v2 }
 0x878   :  { %18016 = vmatprep.subr.bf16.mxu1 %v18015_v30 }
 0x946   :  { %v16659_v3 = vpop.f32.mrb[10].mxu0 }
 0x947   :  { %v1536_v4 = vadd.f32 %v16659_v3, %v14991_v54  ;;  %v1530_v5 = vpop.f32.mrb[11].mxu0 }
 0x948   :  { %v1531_v6 = vadd.f32 %v14991_v54, %v1530_v5  ;;  %v15024_v5 = vld [vmem:[%s19463_s8 + $0x3] ss:$0 sm:$0xff] }
 0x94a   :  { %v18005_v7 = vpack.c.bf16 %v1536_v4, %v1531_v6 }
 0x94c   :  { %18007 = vmatprep.subr.msk.bf16.mxu0 %vm19608_vm2, %v18005_v7 }
 0x94d   :  { %18010 = vmatpush3.bf16.xpose.msk.msra.mxu0 %vm19608_vm2, %v18005_v7 }
 0x94e   :  { %16685 = vmatprep.subr.mxu0 %v15008_v31 }
 0x954   :  { %16676 = vmatmul.mubr.msk.f32.vlgmr.msra.gmra.mrb[12].mxu0 %vm544_vm1, %v1448_v57 }
 0x955   :  { %16686 = vmatpush3.msra.mxu0 %v15008_v31 }
 0x956   :  { %18024 = vmatprep.subr.bf16.mxu0 %v18023_v51 }
 0xa27   :  { %v16677_v8 = vpop.f32.mrb[12].mxu0 }
 0xa28   :  { %v1715_v9 = vmul.f32 0.35355338, %v16677_v8  ;;  %v1705_v10 = vpop.f32.mrb[13].mxu0 }
 0xa29   :  { %v1714_v11 = vmul.f32 0.35355338, %v1705_v10 }
 0xa2a   :  { %v1717_v12 = vadd.f32 %v1715_v9, %v19625_v15 }
 0xa2b   :  { %v1716_v13 = vadd.f32 %v1714_v11, %v19628_v18 }
 0xa2c   :  { %v1721_v14 = vsel %vm636_vm3, %v1717_v12, -inf }
 0xa2d   :  { %1722 = vmax.xlane.f32.xlu1 %v1721_v14  ;;  %v1718_v16 = vsel %vm636_vm3, %v1716_v13, -inf }
 0xa2e   :  { %1719 = vmax.xlane.f32.xlu0 %v1718_v16 }
 0xaba   :  { %v1723_v17 = vpop.xlane.xlu1 %1722 }
 0xabb   :  { %v1725_v19 = vsub.f32 %v1717_v12, %v1723_v17  ;;  %v1720_v20 = vpop.xlane.xlu0 %1719 }
 0xabc   :  { %v1724_v21 = vsub.f32 %v1716_v13, %v1720_v20 }
 0xabd   :  { %v1728_v22 = vmul.f32 1.442695, %v1725_v19 }
 0xabe   :  { %v1726_v23 = vmul.f32 1.442695, %v1724_v21 }
 0xabf   :  { %18945 = vpow2.f32 %v1728_v22 }
 0xac0   :  { %18947 = vpow2.f32 %v1726_v23 }
 0xac9   :  { %v18946_v24 = vpop.eup %18945 }
 0xaca   :  { %v18948_v25 = vpop.eup %18947  ;;  %v1733_v26 = vsel %vm636_vm3, %v18946_v24, 0.0 }
 0xacb   :  { %1734 = vadd.xlane.f32.xlu1 %v1733_v26  ;;  %v1730_v27 = vsel %vm636_vm3, %v18948_v25, 0.0 }
 0xacc   :  { %1731 = vadd.xlane.f32.xlu0 %v1730_v27 }
 0xb58   :  { %v1735_v32 = vpop.xlane.xlu1 %1734 }
 0xb59   :  { %18949 = vrcp.f32 %v1735_v32  ;;  %v1732_v33 = vpop.xlane.xlu0 %1731 }
 0xb5a   :  { %18951 = vrcp.f32 %v1732_v33 }
 0xb63   :  { %v18950_v34 = vpop.eup %18949 }
 0xb64   :  { %v18952_v37 = vpop.eup %18951  ;;  %v1739_v39 = vmul.f32 %v18950_v34, %v18946_v24 }
 0xb65   :  { %v1738_v38 = vmul.f32 %v18952_v37, %v18948_v25 }
 0xb67   :  { %16682 = vmatprep.mubr.msk.f32.mxu1 %vm636_vm3, %v1738_v38  ;;  %v15044_v38 = vld [vmem:[%s19468_s20] ss:$0 sm:$0xff] }
 0xb68   :  { %16683 = vmatmul.mubr.msk.f32.vlgmr.msra.gmra.mrb[16].mxu1 %vm636_vm3, %v1739_v39 }
 0xb69   :  { %18018 = vmatpush3.bf16.msra.mxu1 %v18015_v30  ;;  %16698 = vmatprep.mubr.msk.f32.mxu1 %vm236_vm0, %v19578_v41 }
 0xb6a   :  { %18020 = vmatprep.subr.bf16.mxu1 %v18019_v40 }
 0xb6d   :  { %18022 = vmatpush3.bf16.msra.mxu1 %v18019_v40 }
 0xb6e   :  { %18032 = vmatprep.subr.bf16.mxu1 %v18031_v44 }
 0xb70   :  { %16699 = vmatmul.mubr.msk.f32.vlgmr.msra.gmra.mrb[18].mxu1 %vm236_vm0, %v19586_v46 }
 0xb71   :  { %18034 = vmatpush3.bf16.msra.mxu1 %v18031_v44  ;;  %16720 = vmatprep.mubr.msk.f32.mxu1 %vm236_vm0, %v19578_v41 }
 0xb72   :  { %18036 = vmatprep.subr.bf16.mxu1 %v18035_v48 }
 0xb75   :  { %18038 = vmatpush3.bf16.msra.mxu1 %v18035_v48 }
 0xb78   :  { %16721 = vmatmul.mubr.msk.f32.vlgmr.msra.gmra.mrb[20].mxu1 %vm236_vm0, %v19586_v46 }
 0xc3b   :  { %v16684_v56 = vpop.f32.mrb[16].mxu1 }
 0xc3c   :  { %v1812_v57 = vpop.f32.mrb[17].mxu1 }
 0xc3d   :  { %16687 = vmatprep.mubr.msk.f32.mxu0 %vm544_vm1, %v1812_v57 }
 0xc3e   :  { %16688 = vmatmul.mubr.msk.f32.vlgmr.msra.gmra.mrb[8].mxu0 %vm544_vm1, %v16684_v56 }
 0xc3f   :  { %18026 = vmatpush3.bf16.msra.mxu0 %v18023_v51  ;;  %16709 = vmatprep.mubr.msk.f32.mxu0 %vm236_vm0, %v19578_v41 }
 0xc40   :  { %18028 = vmatprep.subr.bf16.mxu0 %v18027_v58 }
 0xc43   :  { %v16700_v60 = vpop.f32.mrb[18].mxu1  ;;  %18030 = vmatpush3.bf16.msra.mxu0 %v18027_v58 }
 0xc44   :  { %v1991_v55 = vadd.f32 %v16700_v60, %v15016_v59  ;;  %v1985_v61 = vpop.f32.mrb[19].mxu1  ;;  %v2505_v60 = vld [vmem:[%s19518_s3 + $0x8] sm:$0xff] }
 0xc45   :  { %v1986_v62 = vadd.f32 %v15016_v59, %v1985_v61  ;;  %v2504_v59 = vld [vmem:[%s19518_s3] sm:$0xff] }
 0xc46   :  { %16710 = vmatmul.mubr.msk.f32.vlgmr.msra.gmra.mrb[14].mxu0 %vm236_vm0, %v19586_v46  ;;  %v18049_v61 = vpack.c.bf16 %v2505_v60, %v2504_v59 }
 0xc47   :  { %16727 = vmatprep.mubr.msk.f32.mxu0 %vm544_vm1, %v1986_v62  ;;  %v2507_v62 = vld [vmem:[%s19518_s3 + $0x18] sm:$0xff] }
 0xc4b   :  { %v16722_v1 = vpop.f32.mrb[20].mxu1 }
 0xc4c   :  { %v2167_v2 = vadd.f32 %v16722_v1, %v15032_v0  ;;  %v2161_v54 = vpop.f32.mrb[21].mxu1 }
 0xc4d   :  { %v2162_v3 = vadd.f32 %v15032_v0, %v2161_v54 }
 0xc4f   :  { %v18045_v4 = vpack.c.bf16 %v2167_v2, %v2162_v3 }
 0xc51   :  { %18046 = vmatprep.subr.bf16.mxu1 %v18045_v4 }
 0xc52   :  { %18048 = vmatpush3.bf16.msra.mxu1 %v18045_v4 }
 0xc53   :  { %18050 = vmatprep.subr.bf16.mxu1 %v18049_v61 }
 0xd19   :  { %v16711_v6 = vpop.f32.mrb[14].mxu0 }
 0xd1a   :  { %v2079_v7 = vadd.f32 %v16711_v6, %v15024_v5  ;;  %v2073_v8 = vpop.f32.mrb[15].mxu0 }
 0xd1b   :  { %v2074_v9 = vadd.f32 %v15024_v5, %v2073_v8 }
 0xd1d   :  { %v18039_v10 = vpack.c.bf16 %v2079_v7, %v2074_v9  ;;  %v15045_v7 = vld [vmem:[%s19508_s6] ss:$0 sm:$0xff] }
 0xd1f   :  { %18041 = vmatprep.subr.msk.bf16.mxu0 %vm19608_vm2, %v18039_v10 }
 0xd20   :  { %18044 = vmatpush3.bf16.xpose.msk.msra.mxu0 %vm19608_vm2, %v18039_v10 }
 0xd21   :  { %16737 = vmatprep.subr.mxu0 %v15041_v29 }
 0xd27   :  { %16728 = vmatmul.mubr.msk.f32.vlgmr.msra.gmra.mrb[16].mxu0 %vm544_vm1, %v1991_v55  ;;  %v2506_v55 = vld [vmem:[%s19518_s3 + $0x10] sm:$0xff] }
 0xd28   :  { %16738 = vmatpush3.msra.mxu0 %v15041_v29  ;;  %v18053_v0 = vpack.c.bf16 %v2507_v62, %v2506_v55 }
 0xdfa   :  { %v16729_v11 = vpop.f32.mrb[16].mxu0 }
 0xdfb   :  { %v2258_v12 = vmul.f32 0.35355338, %v16729_v11  ;;  %v2248_v13 = vpop.f32.mrb[17].mxu0  ;;  %v15046_v11 = vld [vmem:[%s20999_s0] ss:$0 sm:$0xff] }
 0xdfc   :  { %v2257_v14 = vmul.f32 0.35355338, %v2248_v13 }
 0xdfd   :  { %v2260_v16 = vadd.f32 %v2258_v12, %v19625_v15 }
 0xdfe   :  { %v2259_v17 = vadd.f32 %v2257_v14, %v19628_v18 }
 0xdff   :  { %v2264_v19 = vsel %vm636_vm3, %v2260_v16, -inf }
 0xe00   :  { %2265 = vmax.xlane.f32.xlu1 %v2264_v19  ;;  %v2261_v20 = vsel %vm636_vm3, %v2259_v17, -inf  ;;  %v2615_v19 = vld [vmem:[%s21000_s5 + $0x8] sm:$0xff] }
 0xe01   :  { %2262 = vmax.xlane.f32.xlu0 %v2261_v20 }
 0xe8d   :  { %v2266_v21 = vpop.xlane.xlu1 %2265 }
 0xe8e   :  { %v2268_v22 = vsub.f32 %v2260_v16, %v2266_v21  ;;  %v2263_v23 = vpop.xlane.xlu0 %2262  ;;  %v2616_v21 = vld [vmem:[%s21000_s5 + $0x10] sm:$0xff] }
 0xe8f   :  { %v2267_v24 = vsub.f32 %v2259_v17, %v2263_v23  ;;  %v2614_v17 = vld [vmem:[%s21000_s5] sm:$0xff] }
 0xe90   :  { %v2271_v25 = vmul.f32 1.442695, %v2268_v22  ;;  %v18057_v20 = vpack.c.bf16 %v2615_v19, %v2614_v17  ;;  %v2617_v22 = vld [vmem:[%s21000_s5 + $0x18] sm:$0xff]  ;;  %v15073_v17 = vld [vmem:[%s19498_s25 + $0x90] sm:$0xff] }
 0xe91   :  { %v2269_v26 = vmul.f32 1.442695, %v2267_v24  ;;  %v18061_v23 = vpack.c.bf16 %v2617_v22, %v2616_v21  ;;  %v2618_v24 = vld [vmem:[%s21000_s5 + $0x20] sm:$0xff]  ;;  %v15074_v19 = vld [vmem:[%s19498_s25 + $0x98] sm:$0xff]  ;;  %v15064_v22 = vld [vmem:[%s19483_s14 + $0x88] sm:$0xff] }
 0xe92   :  { %18953 = vpow2.f32 %v2271_v25  ;;  %18058 = vmatprep.subr.bf16.mxu0 %v18057_v20  ;;  %v2619_v25 = vld [vmem:[%s21000_s5 + $0x28] sm:$0xff]  ;;  %v15063_v21 = vld [vmem:[%s19483_s14 + $0x80] sm:$0xff] }
 0xe93   :  { %18955 = vpow2.f32 %v2269_v26  ;;  %v18065_v26 = vpack.c.bf16 %v2619_v25, %v2618_v24 }
 0xe9c   :  { %v18954_v27 = vpop.eup %18953 }
 0xe9d   :  { %v18956_v28 = vpop.eup %18955  ;;  %v2276_v15 = vsel %vm636_vm3, %v18954_v27, 0.0 }
 0xe9e   :  { %2277 = vadd.xlane.f32.xlu1 %v2276_v15  ;;  %v2273_v18 = vsel %vm636_vm3, %v18956_v28, 0.0 }
 0xe9f   :  { %2274 = vadd.xlane.f32.xlu0 %v2273_v18  ;;  %v15047_v18 = vld [vmem:[%s21001_s30] ss:$0 sm:$0xff] }
 0xf2b   :  { %v2278_v30 = vpop.xlane.xlu1 %2277 }
 0xf2c   :  { %18957 = vrcp.f32 %v2278_v30  ;;  %v2275_v31 = vpop.xlane.xlu0 %2274 }
 0xf2d   :  { %18959 = vrcp.f32 %v2275_v31 }
 0xf36   :  { %v18958_v32 = vpop.eup %18957 }
 0xf37   :  { %v18960_v33 = vpop.eup %18959  ;;  %v2282_v35 = vmul.f32 %v18958_v32, %v18954_v27  ;;  %v2620_v27 = vld [vmem:[%s21000_s5 + $0x30] sm:$0xff] }
 0xf38   :  { %v2281_v34 = vmul.f32 %v18960_v33, %v18956_v28  ;;  %v2621_v28 = vld [vmem:[%s21000_s5 + $0x38] sm:$0xff] }
 0xf39   :  { %v18069_v15 = vpack.c.bf16 %v2621_v28, %v2620_v27 }
 0xf3a   :  { %16734 = vmatprep.mubr.msk.f32.mxu1 %vm636_vm3, %v2281_v34 }
 0xf3b   :  { %16735 = vmatmul.mubr.msk.f32.vlgmr.msra.gmra.mrb[22].mxu1 %vm636_vm3, %v2282_v35 }
 0xf3c   :  { %18052 = vmatpush3.bf16.msra.mxu1 %v18049_v61 }
 0xf3d   :  { %18054 = vmatprep.subr.bf16.mxu1 %v18053_v0 }
 0xf40   :  { %18056 = vmatpush3.bf16.msra.mxu1 %v18053_v0 }
0x100e   :  { %v16736_v36 = vpop.f32.mrb[22].mxu1 }
0x100f   :  { %v2355_v37 = vpop.f32.mrb[23].mxu1 }
0x1010   :  { %16739 = vmatprep.mubr.msk.f32.mxu0 %vm544_vm1, %v2355_v37 }
0x1011   :  { %16740 = vmatmul.mubr.msk.f32.vlgmr.msra.gmra.mrb[8].mxu0 %vm544_vm1, %v16736_v36 }
0x1012   :  { %18060 = vmatpush3.bf16.msra.mxu0 %v18057_v20  ;;  %v18093_v20 = vpack.c.bf16 %v15074_v19, %v15073_v17  ;;  %v15091_v19 = vld [vmem:[%s19473_s4 + $0x5] ss:$0 sm:$0xff] }
0x1013   :  { %18062 = vmatprep.subr.bf16.mxu0 %v18061_v23 }
0x1016   :  { %18064 = vmatpush3.bf16.msra.mxu0 %v18061_v23  ;;  %v18081_v23 = vpack.c.bf16 %v15064_v22, %v15063_v21 }
0x1017   :  { %18066 = vmatprep.subr.bf16.mxu0 %v18065_v26 }
0x101a   :  { %18068 = vmatpush3.bf16.msra.mxu0 %v18065_v26 }
0x101b   :  { %18070 = vmatprep.subr.bf16.mxu0 %v18069_v15 }
0x101e   :  { %18072 = vmatpush3.bf16.msra.mxu0 %v18069_v15 }
0x10e4   :  { %v16741_v39 = vpop.f32.mrb[8].mxu0 }
0x10e5   :  { %v2457_v40 = vadd.f32 %v16741_v39, %v15044_v38  ;;  %v2438_v42 = vpop.f32.mrb[9].mxu0 }
0x10e6   :  { %v2456_v43 = vadd.f32 %v15044_v38, %v2438_v42 }
0x10e7   :  { %v2459_v44 = vadd.f32 %v2457_v40, %v19586_v46 }
0x10e8   :  { %v2458_v45 = vadd.f32 %v2456_v43, %v19578_v41 }
0x10e9   :  { %v2465_v47 = vsel %vm236_vm0, %v2459_v44, 0.0 }
0x10ea   :  { %2466 = vadd.xlane.f32.xlu1 %v2465_v47  ;;  %v2462_v48 = vsel %vm236_vm0, %v2458_v45, 0.0 }
0x10eb   :  { %2463 = vadd.xlane.f32.xlu0 %v2462_v48 }
0x1177   :  { %v2467_v49 = vpop.xlane.xlu1 %2466 }
0x1178   :  { %v2469_v50 = vmul.f32 0.03125, %v2467_v49  ;;  %v2464_v51 = vpop.xlane.xlu0 %2463 }
0x1179   :  { %v2468_v52 = vmul.f32 0.03125, %v2464_v51 }
0x117a   :  { %v2471_v53 = vsub.f32 %v2459_v44, %v2469_v50 }
0x117b   :  { %v2470_v56 = vsub.f32 %v2458_v45, %v2468_v52 }
0x117c   :  { %v2473_v57 = vmul.f32 %v2471_v53, %v2471_v53 }
0x117d   :  { %v2472_v46 = vmul.f32 %v2470_v56, %v2470_v56 }
0x117e   :  { %v2477_v41 = vsel %vm236_vm0, %v2473_v57, 0.0 }
0x117f   :  { %2478 = vadd.xlane.f32.xlu1 %v2477_v41  ;;  %v2474_v58 = vsel %vm236_vm0, %v2472_v46, 0.0 }
0x1180   :  { %2475 = vadd.xlane.f32.xlu0 %v2474_v58 }
0x120c   :  { %v2479_v1 = vpop.xlane.xlu1 %2478 }
0x120d   :  { %v2481_v2 = vmul.f32 0.03125, %v2479_v1  ;;  %v2476_v54 = vpop.xlane.xlu0 %2475 }
0x120e   :  { %v2480_v3 = vmul.f32 0.03125, %v2476_v54 }
0x120f   :  { %v2483_v4 = vadd.f32 1e-05, %v2481_v2 }
0x1210   :  { %v2482_v5 = vadd.f32 1e-05, %v2480_v3 }
0x1211   :  { %18961 = vrsqrt.f32 %v2483_v4 }
0x1212   :  { %18963 = vrsqrt.f32 %v2482_v5 }
0x121b   :  { %v18962_v6 = vpop.eup %18961 }
0x121c   :  { %v18964_v8 = vpop.eup %18963  ;;  %v2487_v9 = vmul.f32 %v18962_v6, %v2471_v53  ;;  %v15050_v53 = vld [vmem:[%s21002_s12] ss:$0 sm:$0xff] }
0x121d   :  { %v2486_v10 = vmul.f32 %v18964_v8, %v2470_v56  ;;  %v15056_v8 = vld [vmem:[%s19493_s27 + $0x88] sm:$0xff] }
0x121e   :  { %v2495_v12 = vmul.f32 %v15045_v7, %v2487_v9 }
0x121f   :  { %v2494_v13 = vmul.f32 %v15045_v7, %v2486_v10  ;;  %v15055_v7 = vld [vmem:[%s19493_s27 + $0x80] sm:$0xff] }
0x1220   :  { %v2503_v16 = vadd.f32 %v15046_v11, %v2495_v12  ;;  %v18073_v9 = vpack.c.bf16 %v15056_v8, %v15055_v7  ;;  %v15071_v10 = vld [vmem:[%s19498_s25 + $0x80] sm:$0xff] }
0x1221   :  { %v2502_v14 = vadd.f32 %v15046_v11, %v2494_v13  ;;  %v15072_v11 = vld [vmem:[%s19498_s25 + $0x88] sm:$0xff]  ;;  %v15057_v13 = vld [vmem:[%s19493_s27 + $0x90] sm:$0xff] }
0x1222   :  { %v18089_v12 = vpack.c.bf16 %v15072_v11, %v15071_v10  ;;  %18074 = vmatprep.subr.bf16.mxu1 %v18073_v9  ;;  %v19853_v11 = vld [vmem:[%s19293_s13 + $0x8] sm:$0xff] }
0x1223   :  { %16750 = vmatprep.mubr.msk.f32.mxu1 %vm236_vm0, %v2502_v14 }
0x1224   :  { %16751 = vmatmul.mubr.msk.f32.vlgmr.msra.gmra.mrb[24].mxu1 %vm236_vm0, %v2503_v16  ;;  %18090 = vmatprep.subr.bf16.mxu0 %v18089_v12 }
0x1225   :  { %18076 = vmatpush3.bf16.msra.mxu1 %v18073_v9 }
0x12f7   :  { %v16752_v29 = vpop.f32.mrb[24].mxu1 }
0x12f8   :  { %v2593_v30 = vadd.f32 %v16752_v29, %v15047_v18  ;;  %v2587_v31 = vpop.f32.mrb[25].mxu1  ;;  %v15053_v29 = vld [vmem:[%s21003_s22] ss:$0 sm:$0xff] }
0x12f9   :  { %v2588_v32 = vadd.f32 %v15047_v18, %v2587_v31 }
0x12fa   :  { %v2597_v33 = vmul.f32 %v2593_v30, %v2593_v30 }
0x12fb   :  { %v2596_v34 = vmul.f32 %v2588_v32, %v2588_v32 }
0x12fc   :  { %v2599_v35 = vmul.f32 %v2597_v33, %v2593_v30  ;;  %v15054_v33 = vld [vmem:[%s21004_s23] ss:$0 sm:$0xff] }
0x12fd   :  { %v2598_v36 = vmul.f32 %v2596_v34, %v2588_v32 }
0x12fe   :  { %v2601_v37 = vmul.f32 0.044715, %v2599_v35 }
0x12ff   :  { %v2600_v38 = vmul.f32 0.044715, %v2598_v36  ;;  %v15065_v36 = vld [vmem:[%s19483_s14 + $0x90] sm:$0xff] }
0x1300   :  { %v2603_v39 = vadd.f32 %v2601_v37, %v2593_v30  ;;  %v15066_v37 = vld [vmem:[%s19483_s14 + $0x98] sm:$0xff] }
0x1301   :  { %v2602_v40 = vadd.f32 %v2600_v38, %v2588_v32 }
0x1302   :  { %v2605_v42 = vmul.f32 0.7978846, %v2603_v39 }
0x1303   :  { %v2604_v43 = vmul.f32 0.7978846, %v2602_v40  ;;  %v18085_v40 = vpack.c.bf16 %v15066_v37, %v15065_v36  ;;  %v15094_v37 = vld [vmem:[%s19483_s14 + $0xa0] sm:$0xff] }
0x1304   :  { %18965 = vtanh.f32 %v2605_v42  ;;  %v15076_v42 = vld [vmem:[%s19478_s21 + $0x4] ss:$0 sm:$0xff] }
0x1305   :  { %18967 = vtanh.f32 %v2604_v43  ;;  %v15060_v43 = vld [vmem:[%s19473_s4 + $0x4] ss:$0 sm:$0xff] }
0x130e   :  { %v18966_v44 = vpop.eup %18965 }
0x130f   :  { %v18968_v45 = vpop.eup %18967  ;;  %v2609_v47 = vadd.f32 1.0, %v18966_v44 }
0x1310   :  { %v2608_v48 = vadd.f32 1.0, %v18968_v45 }
0x1311   :  { %v2611_v49 = vmul.f32 0.5, %v2609_v47 }
0x1312   :  { %v2610_v50 = vmul.f32 0.5, %v2608_v48 }
0x1313   :  { %v2613_v52 = vmul.f32 %v2611_v49, %v2593_v30 }
0x1314   :  { %v2612_v51 = vmul.f32 %v2610_v50, %v2588_v32 }
0x1316   :  { %16769 = vmatprep.mubr.msk.f32.mxu0 %vm2629_vm4, %v2612_v51 }
0x1317   :  { %16770 = vmatmul.mubr.msk.f32.vlgmr.msra.gmra.mrb[18].mxu0 %vm2629_vm4, %v2613_v52 }
0x1318   :  { %18092 = vmatpush3.bf16.msra.mxu0 %v18089_v12 }
0x1319   :  { %18094 = vmatprep.subr.bf16.mxu0 %v18093_v20 }
0x131c   :  { %18096 = vmatpush3.bf16.msra.mxu0 %v18093_v20 }
0x13ea   :  { %v16771_v56 = vpop.f32.mrb[18].mxu0 }
0x13eb   :  { %v2708_v57 = vadd.f32 %v16771_v56, %v15050_v53  ;;  %v2702_v46 = vpop.f32.mrb[19].mxu0 }
0x13ec   :  { %v2703_v41 = vadd.f32 %v15050_v53, %v2702_v46  ;;  %v15068_v53 = vld [vmem:[%s19463_s8 + $0x4] ss:$0 sm:$0xff] }
0x13ed   :  { %v2712_v58 = vadd.f32 %v2708_v57, %v2503_v16 }
0x13ee   :  { %v2711_v59 = vadd.f32 %v2703_v41, %v2502_v14  ;;  %v15058_v14 = vld [vmem:[%s19493_s27 + $0x98] sm:$0xff]  ;;  %v15086_v41 = vld [vmem:[%s19493_s27 + $0xa0] sm:$0xff] }
0x13ef   :  { %v2718_v60 = vsel %vm236_vm0, %v2712_v58, 0.0  ;;  %v18077_v16 = vpack.c.bf16 %v15058_v14, %v15057_v13  ;;  %v19857_v13 = vld [vmem:[%s19293_s13] sm:$0xff]  ;;  %s21005_s13 = sld [smem:[#allocation5_spill]] }
0x13f0   :  { %2719 = vadd.xlane.f32.xlu1 %v2718_v60  ;;  %v2715_v55 = vsel %vm236_vm0, %v2711_v59, 0.0 }
0x13f1   :  { %2716 = vadd.xlane.f32.xlu0 %v2715_v55  ;;  %18078 = vmatprep.subr.bf16.mxu1 %v18077_v16 }
0x13f2   :  { %18080 = vmatpush3.bf16.msra.mxu1 %v18077_v16 }
0x13f3   :  { %18082 = vmatprep.subr.bf16.mxu1 %v18081_v23 }
0x147d   :  { %v2720_v61 = vpop.xlane.xlu1 %2719 }
0x147e   :  { %v2722_v62 = vmul.f32 0.03125, %v2720_v61  ;;  %v2717_v0 = vpop.xlane.xlu0 %2716  ;;  %v15088_v61 = vld [vmem:[%s19493_s27 + $0xb0] sm:$0xff] }
0x147f   :  { %v2721_v1 = vmul.f32 0.03125, %v2717_v0 }
0x1480   :  { %v2724_v2 = vsub.f32 %v2712_v58, %v2722_v62  ;;  %v15087_v58 = vld [vmem:[%s19493_s27 + $0xa8] sm:$0xff]  ;;  %v15089_v62 = vld [vmem:[%s19493_s27 + $0xb8] sm:$0xff] }
0x1481   :  { %v2723_v54 = vsub.f32 %v2711_v59, %v2721_v1  ;;  %v18107_v55 = vpack.c.bf16 %v15087_v58, %v15086_v41  ;;  %v18111_v1 = vpack.c.bf16 %v15089_v62, %v15088_v61 }
0x1482   :  { %v2726_v3 = vmul.f32 %v2724_v2, %v2724_v2 }
0x1483   :  { %v2725_v4 = vmul.f32 %v2723_v54, %v2723_v54 }
0x1484   :  { %v2730_v5 = vsel %vm236_vm0, %v2726_v3, 0.0 }
0x1485   :  { %2731 = vadd.xlane.f32.xlu1 %v2730_v5  ;;  %v2727_v6 = vsel %vm236_vm0, %v2725_v4, 0.0  ;;  %v15104_v4 = vld [vmem:[%s19498_s25 + $0xb0] sm:$0xff]  ;;  %v15105_v5 = vld [vmem:[%s19498_s25 + $0xb8] sm:$0xff] }
0x1486   :  { %2728 = vadd.xlane.f32.xlu0 %v2727_v6  ;;  %v18127_v6 = vpack.c.bf16 %v15105_v5, %v15104_v4 }
0x1512   :  { %v2732_v24 = vpop.xlane.xlu1 %2731 }
0x1513   :  { %v2734_v25 = vmul.f32 0.03125, %v2732_v24  ;;  %v2729_v26 = vpop.xlane.xlu0 %2728 }
0x1514   :  { %v2733_v27 = vmul.f32 0.03125, %v2729_v26 }
0x1515   :  { %v2736_v28 = vadd.f32 1e-05, %v2734_v25 }
0x1516   :  { %v2735_v15 = vadd.f32 1e-05, %v2733_v27 }
0x1517   :  { %18969 = vrsqrt.f32 %v2736_v28 }
0x1518   :  { %18971 = vrsqrt.f32 %v2735_v15 }
0x1521   :  { %v18970_v18 = vpop.eup %18969 }
0x1522   :  { %v18972_v30 = vpop.eup %18971  ;;  %v2740_v31 = vmul.f32 %v18970_v18, %v2724_v2  ;;  %v15102_v2 = vld [vmem:[%s19498_s25 + $0xa0] sm:$0xff] }
0x1523   :  { %v2739_v32 = vmul.f32 %v18972_v30, %v2723_v54  ;;  %v15103_v54 = vld [vmem:[%s19498_s25 + $0xa8] sm:$0xff] }
0x1524   :  { %v2748_v34 = vmul.f32 %v15053_v29, %v2740_v31  ;;  %v18123_v3 = vpack.c.bf16 %v15103_v54, %v15102_v2 }
0x1525   :  { %v2747_v35 = vmul.f32 %v15053_v29, %v2739_v32 }
0x1526   :  { %v19813_v39 = vadd.f32 %v15054_v33, %v2748_v34 }
0x1527   :  { %v19811_v38 = vadd.f32 %v15054_v33, %v2747_v35 }
0x1529   :  { %16780 = vmatprep.mubr.msk.f32.mxu1 %vm236_vm0, %v19811_v38  ;;  %16802 = vmatprep.mubr.msk.f32.mxu0 %vm236_vm0, %v19811_v38 }
0x152a   :  { %16781 = vmatmul.mubr.msk.f32.vlgmr.msra.gmra.mrb[26].mxu1 %vm236_vm0, %v19813_v39  ;;  %16803 = vmatmul.mubr.msk.f32.vlgmr.msra.gmra.mrb[20].mxu0 %vm236_vm0, %v19813_v39 }
0x152b   :  { %18084 = vmatpush3.bf16.msra.mxu1 %v18081_v23  ;;  %16791 = vmatprep.mubr.msk.f32.mxu1 %vm236_vm0, %v19811_v38  ;;  %v15107_v23 = vld [vmem:[%s19478_s21 + $0x5] ss:$0 sm:$0xff] }
0x152c   :  { %18086 = vmatprep.subr.bf16.mxu1 %v18085_v40 }
0x152f   :  { %18088 = vmatpush3.bf16.msra.mxu1 %v18085_v40  ;;  %v15095_v40 = vld [vmem:[%s19483_s14 + $0xa8] sm:$0xff] }
0x1532   :  { %16792 = vmatmul.mubr.msk.f32.vlgmr.msra.gmra.mrb[28].mxu1 %vm236_vm0, %v19813_v39 }
0x15fd   :  { %v16782_v44 = vpop.f32.mrb[26].mxu1  ;;  %v16804_v45 = vpop.f32.mrb[20].mxu0 }
0x15fe   :  { %v3024_v47 = vadd.f32 %v16804_v45, %v15076_v42  ;;  %v2842_v48 = vpop.f32.mrb[27].mxu1  ;;  %v3018_v49 = vpop.f32.mrb[21].mxu0  ;;  %v2848_v0 = vadd.f32 %v16782_v44, %v15060_v43 }
0x15ff   :  { %v2843_v50 = vadd.f32 %v15060_v43, %v2842_v48  ;;  %v3019_v51 = vadd.f32 %v15076_v42, %v3018_v49  ;;  %v18115_v42 = vpack.c.bf16 %v15095_v40, %v15094_v37  ;;  %v15097_v48 = vld [vmem:[%s19483_s14 + $0xb8] sm:$0xff]  ;;  %v15129_v37 = vld [vmem:[%s19483_s14 + $0xc0] sm:$0xff]  ;;  %v15130_v40 = vld [vmem:[%s19483_s14 + $0xc8] sm:$0xff] }
0x1601   :  { %v18103_v52 = vpack.c.bf16 %v3024_v47, %v3019_v51  ;;  %16809 = vmatprep.mubr.msk.f32.mxu1 %vm544_vm1, %v2843_v50  ;;  %v15096_v47 = vld [vmem:[%s19483_s14 + $0xb0] sm:$0xff] }
0x1603   :  { %18104 = vmatprep.subr.bf16.mxu0 %v18103_v52 }
0x1604   :  { %18106 = vmatpush3.bf16.msra.mxu0 %v18103_v52  ;;  %v18119_v52 = vpack.c.bf16 %v15097_v48, %v15096_v47  ;;  %v15131_v47 = vld [vmem:[%s19483_s14 + $0xd0] sm:$0xff]  ;;  %v15132_v48 = vld [vmem:[%s19483_s14 + $0xd8] sm:$0xff] }
0x1605   :  { %v16793_v56 = vpop.f32.mrb[28].mxu1  ;;  %18116 = vmatprep.subr.bf16.mxu0 %v18115_v42 }
0x1606   :  { %v2936_v57 = vadd.f32 %v16793_v56, %v15068_v53  ;;  %v2930_v46 = vpop.f32.mrb[29].mxu1 }
0x1607   :  { %v2931_v59 = vadd.f32 %v15068_v53, %v2930_v46  ;;  %v15099_v46 = vld [vmem:[%s19463_s8 + $0x5] ss:$0 sm:$0xff] }
0x1609   :  { %v18097_v60 = vpack.c.bf16 %v2936_v57, %v2931_v59 }
0x160b   :  { %18099 = vmatprep.subr.msk.bf16.mxu1 %vm19608_vm2, %v18097_v60 }
0x160c   :  { %18102 = vmatpush3.bf16.xpose.msk.msra.mxu1 %vm19608_vm2, %v18097_v60 }
0x160d   :  { %18108 = vmatprep.subr.bf16.mxu1 %v18107_v55 }
0x1613   :  { %16810 = vmatmul.mubr.msk.f32.vlgmr.msra.gmra.mrb[30].mxu1 %vm544_vm1, %v2848_v0 }
0x1614   :  { %18110 = vmatpush3.bf16.msra.mxu1 %v18107_v55  ;;  %16827 = vmatprep.mubr.msk.f32.mxu1 %vm236_vm0, %v19811_v38 }
0x1615   :  { %18112 = vmatprep.subr.bf16.mxu1 %v18111_v1 }
0x1618   :  { %18114 = vmatpush3.bf16.msra.mxu1 %v18111_v1 }
0x1619   :  { %18124 = vmatprep.subr.bf16.mxu1 %v18123_v3 }
0x161b   :  { %16828 = vmatmul.mubr.msk.f32.vlgmr.msra.gmra.mrb[32].mxu1 %vm236_vm0, %v19813_v39 }
0x161c   :  { %18126 = vmatpush3.bf16.msra.mxu1 %v18123_v3  ;;  %16849 = vmatprep.mubr.msk.f32.mxu1 %vm236_vm0, %v19811_v38 }
0x161d   :  { %18128 = vmatprep.subr.bf16.mxu1 %v18127_v6 }
0x1620   :  { %18130 = vmatpush3.bf16.msra.mxu1 %v18127_v6 }
0x1623   :  { %16850 = vmatmul.mubr.msk.f32.vlgmr.msra.gmra.mrb[34].mxu1 %vm236_vm0, %v19813_v39 }
0x16e6   :  { %v16811_v7 = vpop.f32.mrb[30].mxu1 }
0x16e7   :  { %v3115_v8 = vmul.f32 0.35355338, %v16811_v7  ;;  %v3105_v9 = vpop.f32.mrb[31].mxu1 }
0x16e8   :  { %v3114_v10 = vmul.f32 0.35355338, %v3105_v9 }
0x16e9   :  { %v3117_v12 = vadd.f32 %v19853_v11, %v3115_v8 }
0x16ea   :  { %v3116_v14 = vadd.f32 %v19857_v13, %v3114_v10 }
0x16eb   :  { %v3121_v16 = vsel %vm636_vm3, %v3117_v12, -inf }
0x16ec   :  { %3122 = vmax.xlane.f32.xlu1 %v3121_v16  ;;  %v3118_v17 = vsel %vm636_vm3, %v3116_v14, -inf }
0x16ed   :  { %3119 = vmax.xlane.f32.xlu0 %v3118_v17 }
0x16ee   :  { %v16829_v20 = vpop.f32.mrb[32].mxu1 }
0x16ef   :  { %v3308_v21 = vadd.f32 %v16829_v20, %v15091_v19  ;;  %v3302_v22 = vpop.f32.mrb[33].mxu1  ;;  %v15122_v20 = vld [vmem:[%s19493_s27 + $0xc8] sm:$0xff] }
0x16f0   :  { %v3303_v53 = vadd.f32 %v15091_v19, %v3302_v22  ;;  %v15121_v19 = vld [vmem:[%s19493_s27 + $0xc0] sm:$0xff]  ;;  %v15116_v22 = vld [vmem:[%s19488_s17 + $0x28] sm:$0xff] }
0x16f6   :  { %v16851_v24 = vpop.f32.mrb[34].mxu1 }
0x16f7   :  { %v3484_v25 = vadd.f32 %v16851_v24, %v15107_v23  ;;  %v3478_v26 = vpop.f32.mrb[35].mxu1 }
0x16f8   :  { %v3479_v27 = vadd.f32 %v15107_v23, %v3478_v26  ;;  %v15123_v26 = vld [vmem:[%s19493_s27 + $0xd0] sm:$0xff] }
0x16fa   :  { %v18137_v28 = vpack.c.bf16 %v3484_v25, %v3479_v27  ;;  %v15124_v27 = vld [vmem:[%s19493_s27 + $0xd8] sm:$0xff] }
0x16fc   :  { %18138 = vmatprep.subr.bf16.mxu1 %v18137_v28 }
0x16fd   :  { %18140 = vmatpush3.bf16.msra.mxu1 %v18137_v28 }
0x1779   :  { %v3123_v15 = vpop.xlane.xlu1 %3122 }
0x177a   :  { %v3125_v18 = vsub.f32 %v3117_v12, %v3123_v15  ;;  %v3120_v29 = vpop.xlane.xlu0 %3119 }
0x177b   :  { %v3124_v30 = vsub.f32 %v3116_v14, %v3120_v29  ;;  %v18145_v29 = vpack.c.bf16 %v15124_v27, %v15123_v26  ;;  %v15151_v26 = vld [vmem:[%s19488_s17 + $0x30] sm:$0xff] }
0x177c   :  { %v3128_v31 = vmul.f32 1.442695, %v3125_v18 }
0x177d   :  { %v3126_v32 = vmul.f32 1.442695, %v3124_v30  ;;  %v15137_v30 = vld [vmem:[%s19498_s25 + $0xc0] sm:$0xff] }
0x177e   :  { %18973 = vpow2.f32 %v3128_v31  ;;  %v15138_v31 = vld [vmem:[%s19498_s25 + $0xc8] sm:$0xff] }
0x177f   :  { %18975 = vpow2.f32 %v3126_v32  ;;  %v18157_v32 = vpack.c.bf16 %v15138_v31, %v15137_v30 }
0x1788   :  { %v18974_v33 = vpop.eup %18973 }
0x1789   :  { %v18976_v34 = vpop.eup %18975  ;;  %v3133_v35 = vsel %vm636_vm3, %v18974_v33, 0.0 }
0x178a   :  { %3134 = vadd.xlane.f32.xlu1 %v3133_v35  ;;  %v3130_v36 = vsel %vm636_vm3, %v18976_v34, 0.0 }
0x178b   :  { %3131 = vadd.xlane.f32.xlu0 %v3130_v36  ;;  %v15085_v36 = vld [vmem:[%s19488_s17 + $0x20] sm:$0xff] }
0x1817   :  { %v3135_v43 = vpop.xlane.xlu1 %3134 }
0x1818   :  { %18977 = vrcp.f32 %v3135_v43  ;;  %v3132_v44 = vpop.xlane.xlu0 %3131 }
0x1819   :  { %18979 = vrcp.f32 %v3132_v44  ;;  %v18149_v44 = vpack.c.bf16 %v15130_v40, %v15129_v37  ;;  %v15172_v37 = vld [vmem:[%s19498_s25 + $0xf0] sm:$0xff]  ;;  %v15173_v40 = vld [vmem:[%s19498_s25 + $0xf8] sm:$0xff] }
0x1822   :  { %v18978_v45 = vpop.eup %18977 }
0x1823   :  { %v18980_v49 = vpop.eup %18979  ;;  %v3139_v51 = vmul.f32 %v18978_v45, %v18974_v33  ;;  %v15139_v33 = vld [vmem:[%s19498_s25 + $0xd0] sm:$0xff]  ;;  %v15126_v45 = vld [vmem:[%s19473_s4 + $0x6] ss:$0 sm:$0xff] }
0x1824   :  { %v3138_v50 = vmul.f32 %v18980_v49, %v18976_v34  ;;  %v15140_v34 = vld [vmem:[%s19498_s25 + $0xd8] sm:$0xff] }
0x1825   :  { %v18161_v35 = vpack.c.bf16 %v15140_v34, %v15139_v33  ;;  %v15170_v34 = vld [vmem:[%s19498_s25 + $0xe0] sm:$0xff] }
0x1826   :  { %16816 = vmatprep.mubr.msk.f32.mxu0 %vm636_vm3, %v3138_v50 }
0x1827   :  { %16817 = vmatmul.mubr.msk.f32.vlgmr.msra.gmra.mrb[22].mxu0 %vm636_vm3, %v3139_v51 }
0x1828   :  { %18118 = vmatpush3.bf16.msra.mxu0 %v18115_v42  ;;  %16838 = vmatprep.mubr.msk.f32.mxu0 %vm236_vm0, %v19811_v38 }
0x1829   :  { %18120 = vmatprep.subr.bf16.mxu0 %v18119_v52 }
0x182c   :  { %18122 = vmatpush3.bf16.msra.mxu0 %v18119_v52  ;;  %v18153_v52 = vpack.c.bf16 %v15132_v48, %v15131_v47  ;;  %v15164_v47 = vld [vmem:[%s19483_s14 + $0xf0] sm:$0xff]  ;;  %v15165_v48 = vld [vmem:[%s19483_s14 + $0xf8] sm:$0xff] }
0x182f   :  { %16839 = vmatmul.mubr.msk.f32.vlgmr.msra.gmra.mrb[24].mxu0 %vm236_vm0, %v19813_v39 }
0x1830   :  { %16856 = vmatprep.mubr.msk.f32.mxu0 %vm544_vm1, %v3303_v53  ;;  %v15142_v53 = vld [vmem:[%s19478_s21 + $0x6] ss:$0 sm:$0xff] }
0x18fa   :  { %v19877_v56 = vpop.f32.mrb[22].mxu0 }
0x18fb   :  { %v19879_v57 = vpop.f32.mrb[23].mxu0 }
0x1902   :  { %v16840_v41 = vpop.f32.mrb[24].mxu0 }
0x1903   :  { %v3396_v58 = vadd.f32 %v16840_v41, %v15099_v46  ;;  %v3390_v59 = vpop.f32.mrb[25].mxu0 }
0x1904   :  { %v3391_v60 = vadd.f32 %v15099_v46, %v3390_v59 }
0x1906   :  { %v18131_v55 = vpack.c.bf16 %v3396_v58, %v3391_v60 }
0x1908   :  { %18133 = vmatprep.subr.msk.bf16.mxu0 %vm19608_vm2, %v18131_v55 }
0x1909   :  { %18136 = vmatpush3.bf16.xpose.msk.msra.mxu0 %vm19608_vm2, %v18131_v55 }
0x190a   :  { %16866 = vmatprep.subr.mxu0 %v15116_v22 }
0x1910   :  { %16857 = vmatmul.mubr.msk.f32.vlgmr.msra.gmra.mrb[26].mxu0 %vm544_vm1, %v3308_v21  ;;  %v18141_v21 = vpack.c.bf16 %v15122_v20, %v15121_v19 }
0x1911   :  { %16867 = vmatpush3.msra.mxu0 %v15116_v22 }
0x1912   :  { %18142 = vmatprep.subr.bf16.mxu1 %v18141_v21  ;;  %16871 = vmatprep.subr.mxu0 %v15085_v36 }
0x19e3   :  { %v16858_v61 = vpop.f32.mrb[26].mxu0 }
0x19e4   :  { %v3575_v62 = vmul.f32 0.35355338, %v16858_v61  ;;  %v3565_v0 = vpop.f32.mrb[27].mxu0 }
0x19e5   :  { %v3574_v1 = vmul.f32 0.35355338, %v3565_v0 }
0x19e6   :  { %v3577_v2 = vadd.f32 %v19853_v11, %v3575_v62 }
0x19e7   :  { %v3576_v54 = vadd.f32 %v19857_v13, %v3574_v1 }
0x19e8   :  { %v3581_v3 = vsel %vm636_vm3, %v3577_v2, -inf }
0x19e9   :  { %3582 = vmax.xlane.f32.xlu1 %v3581_v3  ;;  %v3578_v4 = vsel %vm636_vm3, %v3576_v54, -inf }
0x19ea   :  { %3579 = vmax.xlane.f32.xlu0 %v3578_v4 }
0x1a76   :  { %v3583_v5 = vpop.xlane.xlu1 %3582 }
0x1a77   :  { %v3585_v6 = vsub.f32 %v3577_v2, %v3583_v5  ;;  %v3580_v7 = vpop.xlane.xlu0 %3579 }
0x1a78   :  { %v3584_v8 = vsub.f32 %v3576_v54, %v3580_v7 }
0x1a79   :  { %v3588_v9 = vmul.f32 1.442695, %v3585_v6 }
0x1a7a   :  { %v3586_v10 = vmul.f32 1.442695, %v3584_v8 }
0x1a7b   :  { %18981 = vpow2.f32 %v3588_v9 }
0x1a7c   :  { %18983 = vpow2.f32 %v3586_v10 }
0x1a85   :  { %v18982_v12 = vpop.eup %18981 }
0x1a86   :  { %v18984_v14 = vpop.eup %18983  ;;  %v3593_v16 = vsel %vm636_vm3, %v18982_v12, 0.0 }
0x1a87   :  { %3594 = vadd.xlane.f32.xlu1 %v3593_v16  ;;  %v3590_v17 = vsel %vm636_vm3, %v18984_v14, 0.0 }
0x1a88   :  { %3591 = vadd.xlane.f32.xlu0 %v3590_v17 }
0x1b14   :  { %v3595_v23 = vpop.xlane.xlu1 %3594 }
0x1b15   :  { %18985 = vrcp.f32 %v3595_v23  ;;  %v3592_v24 = vpop.xlane.xlu0 %3591  ;;  %v15154_v23 = vld [vmem:[%s19493_s27 + $0xe0] sm:$0xff] }
0x1b16   :  { %18987 = vrcp.f32 %v3592_v24  ;;  %v15155_v24 = vld [vmem:[%s19493_s27 + $0xe8] sm:$0xff] }
0x1b1f   :  { %v18986_v25 = vpop.eup %18985 }
0x1b20   :  { %v18988_v28 = vpop.eup %18987  ;;  %v3599_v18 = vmul.f32 %v18986_v25, %v18982_v12  ;;  %v18175_v25 = vpack.c.bf16 %v15155_v24, %v15154_v23  ;;  %v15184_v24 = vld [vmem:[%s19488_s17 + $0x38] sm:$0xff]  ;;  %s21006_s17 = sld [smem:[#allocation33_spill]] }
0x1b21   :  { %v3598_v15 = vmul.f32 %v18988_v28, %v18984_v14 }
0x1b23   :  { %16863 = vmatprep.mubr.msk.f32.mxu1 %vm636_vm3, %v3598_v15 }
0x1b24   :  { %16864 = vmatmul.mubr.msk.f32.vlgmr.msra.gmra.mrb[36].mxu1 %vm636_vm3, %v3599_v18  ;;  %v15156_v18 = vld [vmem:[%s19493_s27 + $0xf0] sm:$0xff] }
0x1b25   :  { %18144 = vmatpush3.bf16.msra.mxu1 %v18141_v21  ;;  %16884 = vmatprep.mubr.msk.f32.mxu1 %vm236_vm0, %v19811_v38 }
0x1b26   :  { %18146 = vmatprep.subr.bf16.mxu1 %v18145_v29 }
0x1b29   :  { %18148 = vmatpush3.bf16.msra.mxu1 %v18145_v29  ;;  %v15157_v29 = vld [vmem:[%s19493_s27 + $0xf8] sm:$0xff]  ;;  %s21014_s27 = sld [smem:[#allocation30_spill]] }
0x1b2a   :  { %18158 = vmatprep.subr.bf16.mxu1 %v18157_v32  ;;  %v18179_v33 = vpack.c.bf16 %v15157_v29, %v15156_v18 }
0x1b2c   :  { %16885 = vmatmul.mubr.msk.f32.vlgmr.msra.gmra.mrb[38].mxu1 %vm236_vm0, %v19813_v39 }
0x1b2d   :  { %18160 = vmatpush3.bf16.msra.mxu1 %v18157_v32  ;;  %16906 = vmatprep.mubr.msk.f32.mxu1 %vm236_vm0, %v19811_v38 }
0x1b2e   :  { %18162 = vmatprep.subr.bf16.mxu1 %v18161_v35 }
0x1b31   :  { %18164 = vmatpush3.bf16.msra.mxu1 %v18161_v35  ;;  %v15171_v35 = vld [vmem:[%s19498_s25 + $0xe8] sm:$0xff]  ;;  %s21008_s25 = sld [smem:[#allocation9_spill]] }
0x1b34   :  { %16907 = vmatmul.mubr.msk.f32.vlgmr.msra.gmra.mrb[40].mxu1 %vm236_vm0, %v19813_v39 }
0x1bf7   :  { %v16865_v42 = vpop.f32.mrb[36].mxu1 }
0x1bf8   :  { %v3672_v43 = vpop.f32.mrb[37].mxu1 }
0x1bf9   :  { %16868 = vmatprep.mubr.msk.f32.mxu0 %vm544_vm1, %v3672_v43  ;;  %v15162_v43 = vld [vmem:[%s19483_s14 + $0xe0] sm:$0xff] }
0x1bfa   :  { %16869 = vmatmul.mubr.msk.f32.vlgmr.msra.gmra.mrb[28].mxu0 %vm544_vm1, %v16865_v42  ;;  %v18195_v42 = vpack.c.bf16 %v15173_v40, %v15172_v37  ;;  %v5248_v40 = vld [vmem:[%s21005_s13 + $0x8] sm:$0xff] }
0x1bfb   :  { %16872 = vmatpush3.msra.mxu0 %v15085_v36  ;;  %16873 = vmatprep.mubr.msk.f32.mxu0 %vm544_vm1, %v19879_v57  ;;  %v18191_v36 = vpack.c.bf16 %v15171_v35, %v15170_v34 }
0x1bfc   :  { %18150 = vmatprep.subr.bf16.mxu0 %v18149_v44 }
0x1bff   :  { %v16886_v49 = vpop.f32.mrb[38].mxu1 }
0x1c00   :  { %v3930_v50 = vadd.f32 %v16886_v49, %v15126_v45  ;;  %v3924_v51 = vpop.f32.mrb[39].mxu1 }
0x1c01   :  { %v3925_v58 = vadd.f32 %v15126_v45, %v3924_v51  ;;  %v18187_v51 = vpack.c.bf16 %v15165_v48, %v15164_v47 }
0x1c02   :  { %16874 = vmatmul.mubr.msk.f32.vlgmr.msra.gmra.mrb[28].mxu0 %vm544_vm1, %v19877_v56  ;;  %v15134_v56 = vld [vmem:[%s19463_s8 + $0x6] ss:$0 sm:$0xff] }
0x1c03   :  { %18152 = vmatpush3.bf16.msra.mxu0 %v18149_v44  ;;  %16895 = vmatprep.mubr.msk.f32.mxu0 %vm236_vm0, %v19811_v38  ;;  %v15163_v44 = vld [vmem:[%s19483_s14 + $0xe8] sm:$0xff]  ;;  %s21011_s14 = sld [smem:[#allocation29_spill]] }
0x1c04   :  { %18154 = vmatprep.subr.bf16.mxu0 %v18153_v52  ;;  %v18183_v45 = vpack.c.bf16 %v15163_v44, %v15162_v43  ;;  %v5247_v43 = vld [vmem:[%s21005_s13] sm:$0xff]  ;;  %s21032_s13 = sld [smem:[#allocation21_spill]] }
0x1c05   :  { %v5251_v47 = vsel %vm236_vm0, %v5247_v43, 0.0 }
0x1c07   :  { %18156 = vmatpush3.bf16.msra.mxu0 %v18153_v52  ;;  %v16908_v57 = vpop.f32.mrb[40].mxu1  ;;  %v15159_v52 = vld [vmem:[%s19473_s4 + $0x7] ss:$0 sm:$0xff]  ;;  %s21015_s4 = sld [smem:[#allocation32_spill]] }
0x1c08   :  { %v4106_v46 = vadd.f32 %v16908_v57, %v15142_v53  ;;  %v4100_v41 = vpop.f32.mrb[41].mxu1 }
0x1c09   :  { %v4101_v59 = vadd.f32 %v15142_v53, %v4100_v41 }
0x1c0a   :  { %16896 = vmatmul.mubr.msk.f32.vlgmr.msra.gmra.mrb[30].mxu0 %vm236_vm0, %v19813_v39 }
0x1c0b   :  { %v18171_v60 = vpack.c.bf16 %v4106_v46, %v4101_v59  ;;  %16913 = vmatprep.mubr.msk.f32.mxu0 %vm544_vm1, %v3925_v58  ;;  %v15175_v58 = vld [vmem:[%s19478_s21 + $0x7] ss:$0 sm:$0xff]  ;;  %s21007_s21 = sld [smem:[#allocation10_spill]] }
0x1c0d   :  { %18172 = vmatprep.subr.bf16.mxu1 %v18171_v60 }
0x1c0e   :  { %18174 = vmatpush3.bf16.msra.mxu1 %v18171_v60 }
0x1c0f   :  { %18176 = vmatprep.subr.bf16.mxu1 %v18175_v25 }
0x1cdd   :  { %v16897_v55 = vpop.f32.mrb[30].mxu0 }
0x1cde   :  { %v4018_v61 = vadd.f32 %v16897_v55, %v15134_v56  ;;  %v4012_v62 = vpop.f32.mrb[31].mxu0 }
0x1cdf   :  { %v4013_v0 = vadd.f32 %v15134_v56, %v4012_v62  ;;  %v15167_v62 = vld [vmem:[%s19463_s8 + $0x7] ss:$0 sm:$0xff]  ;;  %s21010_s8 = sld [smem:[#allocation34_spill]] }
0x1ce1   :  { %v18165_v1 = vpack.c.bf16 %v4018_v61, %v4013_v0 }
0x1ce3   :  { %18167 = vmatprep.subr.msk.bf16.mxu0 %vm19608_vm2, %v18165_v1 }
0x1ce4   :  { %18170 = vmatpush3.bf16.xpose.msk.msra.mxu0 %vm19608_vm2, %v18165_v1 }
0x1ce5   :  { %16923 = vmatprep.subr.mxu0 %v15151_v26 }
0x1ceb   :  { %16914 = vmatmul.mubr.msk.f32.vlgmr.msra.gmra.mrb[32].mxu0 %vm544_vm1, %v3930_v50 }
0x1cec   :  { %16924 = vmatpush3.msra.mxu0 %v15151_v26 }
0x1ced   :  { %18184 = vmatprep.subr.bf16.mxu0 %v18183_v45 }
0x1dbe   :  { %v16915_v2 = vpop.f32.mrb[32].mxu0 }
0x1dbf   :  { %v4197_v54 = vmul.f32 0.35355338, %v16915_v2  ;;  %v4187_v3 = vpop.f32.mrb[33].mxu0 }
0x1dc0   :  { %v4196_v4 = vmul.f32 0.35355338, %v4187_v3 }
0x1dc1   :  { %v4199_v5 = vadd.f32 %v19853_v11, %v4197_v54 }
0x1dc2   :  { %v4198_v6 = vadd.f32 %v19857_v13, %v4196_v4 }
0x1dc3   :  { %v4203_v7 = vsel %vm636_vm3, %v4199_v5, -inf }
0x1dc4   :  { %4204 = vmax.xlane.f32.xlu1 %v4203_v7  ;;  %v4200_v8 = vsel %vm636_vm3, %v4198_v6, -inf }
0x1dc5   :  { %4201 = vmax.xlane.f32.xlu0 %v4200_v8 }
0x1e51   :  { %v4205_v9 = vpop.xlane.xlu1 %4204 }
0x1e52   :  { %v4207_v10 = vsub.f32 %v4199_v5, %v4205_v9  ;;  %v4202_v12 = vpop.xlane.xlu0 %4201 }
0x1e53   :  { %v4206_v14 = vsub.f32 %v4198_v6, %v4202_v12 }
0x1e54   :  { %v4210_v16 = vmul.f32 1.442695, %v4207_v10 }
0x1e55   :  { %v4208_v17 = vmul.f32 1.442695, %v4206_v14 }
0x1e56   :  { %18989 = vpow2.f32 %v4210_v16 }
0x1e57   :  { %18991 = vpow2.f32 %v4208_v17 }
0x1e60   :  { %v18990_v19 = vpop.eup %18989 }
0x1e61   :  { %v18992_v20 = vpop.eup %18991  ;;  %v4215_v21 = vsel %vm636_vm3, %v18990_v19, 0.0 }
0x1e62   :  { %4216 = vadd.xlane.f32.xlu1 %v4215_v21  ;;  %v4212_v22 = vsel %vm636_vm3, %v18992_v20, 0.0 }
0x1e63   :  { %4213 = vadd.xlane.f32.xlu0 %v4212_v22 }
0x1eef   :  { %v4217_v27 = vpop.xlane.xlu1 %4216 }
0x1ef0   :  { %18993 = vrcp.f32 %v4217_v27  ;;  %v4214_v28 = vpop.xlane.xlu0 %4213 }
0x1ef1   :  { %18995 = vrcp.f32 %v4214_v28 }
0x1efa   :  { %v18994_v15 = vpop.eup %18993 }
0x1efb   :  { %v18996_v30 = vpop.eup %18995  ;;  %v4221_v32 = vmul.f32 %v18994_v15, %v18990_v19 }
0x1efc   :  { %v4220_v31 = vmul.f32 %v18996_v30, %v18992_v20 }
0x1efe   :  { %16920 = vmatprep.mubr.msk.f32.mxu1 %vm636_vm3, %v4220_v31  ;;  %v15188_v31 = vld [vmem:[%s19468_s20 + $0x1] ss:$0 sm:$0xff]  ;;  %s21013_s20 = sld [smem:[#allocation6_spill]] }
0x1eff   :  { %16921 = vmatmul.mubr.msk.f32.vlgmr.msra.gmra.mrb[42].mxu1 %vm636_vm3, %v4221_v32 }
0x1f00   :  { %18178 = vmatpush3.bf16.msra.mxu1 %v18175_v25  ;;  %16936 = vmatprep.mubr.msk.f32.mxu1 %vm236_vm0, %v19811_v38 }
0x1f01   :  { %18180 = vmatprep.subr.bf16.mxu1 %v18179_v33 }
0x1f04   :  { %18182 = vmatpush3.bf16.msra.mxu1 %v18179_v33 }
0x1f05   :  { %18192 = vmatprep.subr.bf16.mxu1 %v18191_v36 }
0x1f07   :  { %16937 = vmatmul.mubr.msk.f32.vlgmr.msra.gmra.mrb[44].mxu1 %vm236_vm0, %v19813_v39 }
0x1f08   :  { %18194 = vmatpush3.bf16.msra.mxu1 %v18191_v36  ;;  %16958 = vmatprep.mubr.msk.f32.mxu1 %vm236_vm0, %v19811_v38 }
0x1f09   :  { %18196 = vmatprep.subr.bf16.mxu1 %v18195_v42 }
0x1f0c   :  { %18198 = vmatpush3.bf16.msra.mxu1 %v18195_v42 }
0x1f0f   :  { %16959 = vmatmul.mubr.msk.f32.vlgmr.msra.gmra.mrb[46].mxu1 %vm236_vm0, %v19813_v39 }
0x1fd2   :  { %v16922_v49 = vpop.f32.mrb[42].mxu1 }
0x1fd3   :  { %v4294_v50 = vpop.f32.mrb[43].mxu1 }
0x1fd4   :  { %16925 = vmatprep.mubr.msk.f32.mxu0 %vm544_vm1, %v4294_v50 }
0x1fd5   :  { %16926 = vmatmul.mubr.msk.f32.vlgmr.msra.gmra.mrb[28].mxu0 %vm544_vm1, %v16922_v49 }
0x1fd6   :  { %18186 = vmatpush3.bf16.msra.mxu0 %v18183_v45  ;;  %16947 = vmatprep.mubr.msk.f32.mxu0 %vm236_vm0, %v19811_v38  ;;  %v5254_v45 = vsel %vm236_vm0, %v5248_v40, 0.0 }
0x1fd7   :  { %18188 = vmatprep.subr.bf16.mxu0 %v18187_v51 }
0x1fda   :  { %v16938_v53 = vpop.f32.mrb[44].mxu1  ;;  %18190 = vmatpush3.bf16.msra.mxu0 %v18187_v51 }
0x1fdb   :  { %v4473_v57 = vadd.f32 %v16938_v53, %v15159_v52  ;;  %v4467_v46 = vpop.f32.mrb[45].mxu1 }
0x1fdc   :  { %v4468_v41 = vadd.f32 %v15159_v52, %v4467_v46 }
0x1fdd   :  { %16948 = vmatmul.mubr.msk.f32.vlgmr.msra.gmra.mrb[34].mxu0 %vm236_vm0, %v19813_v39 }
0x1fde   :  { %16965 = vmatprep.mubr.msk.f32.mxu0 %vm544_vm1, %v4468_v41 }
0x1fe2   :  { %v16960_v59 = vpop.f32.mrb[46].mxu1 }
0x1fe3   :  { %v4649_v60 = vadd.f32 %v16960_v59, %v15175_v58  ;;  %v4643_v56 = vpop.f32.mrb[47].mxu1 }
0x1fe4   :  { %v4644_v55 = vadd.f32 %v15175_v58, %v4643_v56 }
0x1fe6   :  { %v18205_v61 = vpack.c.bf16 %v4649_v60, %v4644_v55 }
0x1fe8   :  { %18206 = vmatprep.subr.bf16.mxu1 %v18205_v61 }
0x1fe9   :  { %18208 = vmatpush3.bf16.msra.mxu1 %v18205_v61 }
0x20b0   :  { %v16949_v0 = vpop.f32.mrb[34].mxu0 }
0x20b1   :  { %v4561_v1 = vadd.f32 %v16949_v0, %v15167_v62  ;;  %v4555_v2 = vpop.f32.mrb[35].mxu0 }
0x20b2   :  { %v4556_v54 = vadd.f32 %v15167_v62, %v4555_v2  ;;  %v15193_v2 = vld [vmem:[%s19518_s3 + $0x20] sm:$0xff] }
0x20b4   :  { %v18199_v3 = vpack.c.bf16 %v4561_v1, %v4556_v54  ;;  %v15194_v54 = vld [vmem:[%s19518_s3 + $0x28] sm:$0xff] }
0x20b6   :  { %18201 = vmatprep.subr.msk.bf16.mxu0 %vm19608_vm2, %v18199_v3 }
0x20b7   :  { %18204 = vmatpush3.bf16.xpose.msk.msra.mxu0 %vm19608_vm2, %v18199_v3  ;;  %v18209_v3 = vpack.c.bf16 %v15194_v54, %v15193_v2  ;;  %v5472_v2 = vld [vmem:[%s21010_s8 + $0x8] sm:$0xff] }
0x20b8   :  { %16975 = vmatprep.subr.mxu0 %v15184_v24 }
0x20b9   :  { %18210 = vmatprep.subr.bf16.mxu1 %v18209_v3 }
0x20be   :  { %16966 = vmatmul.mubr.msk.f32.vlgmr.msra.gmra.mrb[36].mxu0 %vm544_vm1, %v4473_v57 }
0x20bf   :  { %16976 = vmatpush3.msra.mxu0 %v15184_v24 }
0x2191   :  { %v16967_v4 = vpop.f32.mrb[36].mxu0 }
0x2192   :  { %v4740_v5 = vmul.f32 0.35355338, %v16967_v4  ;;  %v4730_v6 = vpop.f32.mrb[37].mxu0  ;;  %v15195_v4 = vld [vmem:[%s19518_s3 + $0x30] sm:$0xff] }
0x2193   :  { %v4739_v7 = vmul.f32 0.35355338, %v4730_v6 }
0x2194   :  { %v4742_v8 = vadd.f32 %v19853_v11, %v4740_v5  ;;  %v15196_v5 = vld [vmem:[%s19518_s3 + $0x38] sm:$0xff]  ;;  %s21009_s3 = sld [smem:[#allocation31_spill]] }
0x2195   :  { %v4741_v9 = vadd.f32 %v19857_v13, %v4739_v7  ;;  %v18213_v6 = vpack.c.bf16 %v15196_v5, %v15195_v4  ;;  %v5293_v7 = vld [vmem:[%s21006_s17] sm:$0xff] }
0x2196   :  { %v4746_v10 = vsel %vm636_vm3, %v4742_v8, -inf }
0x2197   :  { %4747 = vmax.xlane.f32.xlu1 %v4746_v10  ;;  %v4743_v12 = vsel %vm636_vm3, %v4741_v9, -inf }
0x2198   :  { %4744 = vmax.xlane.f32.xlu0 %v4743_v12 }
0x2224   :  { %v4748_v14 = vpop.xlane.xlu1 %4747 }
0x2225   :  { %v4750_v16 = vsub.f32 %v4742_v8, %v4748_v14  ;;  %v4745_v17 = vpop.xlane.xlu0 %4744  ;;  %v5294_v8 = vld [vmem:[%s21006_s17 + $0x8] sm:$0xff] }
0x2226   :  { %v4749_v19 = vsub.f32 %v4741_v9, %v4745_v17  ;;  %v18233_v9 = vpack.c.bf16 %v5294_v8, %v5293_v7 }
0x2227   :  { %v4753_v20 = vmul.f32 1.442695, %v4750_v16 }
0x2228   :  { %v4751_v21 = vmul.f32 1.442695, %v4749_v19 }
0x2229   :  { %18997 = vpow2.f32 %v4753_v20 }
0x222a   :  { %18999 = vpow2.f32 %v4751_v21 }
0x2233   :  { %v18998_v22 = vpop.eup %18997 }
0x2234   :  { %v19000_v23 = vpop.eup %18999  ;;  %v4758_v11 = vsel %vm636_vm3, %v18998_v22, 0.0 }
0x2235   :  { %4759 = vadd.xlane.f32.xlu1 %v4758_v11  ;;  %v4755_v13 = vsel %vm636_vm3, %v19000_v23, 0.0 }
0x2236   :  { %4756 = vadd.xlane.f32.xlu0 %v4755_v13 }
0x22c2   :  { %v4760_v25 = vpop.xlane.xlu1 %4759 }
0x22c3   :  { %19001 = vrcp.f32 %v4760_v25  ;;  %v4757_v26 = vpop.xlane.xlu0 %4756  ;;  %v15191_v25 = vld [vmem:[%s19508_s6 + $0x1] ss:$0 sm:$0xff]  ;;  %s21012_s6 = sld [smem:[#allocation27_spill]] }
0x22c4   :  { %19003 = vrcp.f32 %v4757_v26 }
0x22cd   :  { %v19002_v27 = vpop.eup %19001 }
0x22ce   :  { %v19004_v28 = vpop.eup %19003  ;;  %v4764_v18 = vmul.f32 %v19002_v27, %v18998_v22 }
0x22cf   :  { %v4763_v15 = vmul.f32 %v19004_v28, %v19000_v23 }
0x22d1   :  { %16972 = vmatprep.mubr.msk.f32.mxu1 %vm636_vm3, %v4763_v15  ;;  %v15192_v15 = vld [vmem:[%s20999_s0 + $0x1] ss:$0 sm:$0xff]  ;;  %s21026_s0 = sld [smem:[#allocation16_spill]] }
0x22d2   :  { %16973 = vmatmul.mubr.msk.f32.vlgmr.msra.gmra.mrb[48].mxu1 %vm636_vm3, %v4764_v18 }
0x22d3   :  { %18212 = vmatpush3.bf16.msra.mxu1 %v18209_v3  ;;  %v15198_v3 = vld [vmem:[%s21001_s30 + $0x1] ss:$0 sm:$0xff]  ;;  %s21028_s30 = sld [smem:[#allocation22_spill]] }
0x22d4   :  { %18214 = vmatprep.subr.bf16.mxu1 %v18213_v6 }
0x22d7   :  { %18216 = vmatpush3.bf16.msra.mxu1 %v18213_v6 }
0x22d8   :  { %18234 = vmatprep.subr.bf16.mxu1 %v18233_v9 }
0x23a5   :  { %v16974_v29 = vpop.f32.mrb[48].mxu1 }
0x23a6   :  { %v4837_v30 = vpop.f32.mrb[49].mxu1 }
0x23a7   :  { %16977 = vmatprep.mubr.msk.f32.mxu0 %vm544_vm1, %v4837_v30 }
0x23a8   :  { %16978 = vmatmul.mubr.msk.f32.vlgmr.msra.gmra.mrb[28].mxu0 %vm544_vm1, %v16974_v29 }
0x247b   :  { %v16979_v32 = vpop.f32.mrb[28].mxu0 }
0x247c   :  { %v4940_v33 = vadd.f32 %v16979_v32, %v15188_v31  ;;  %v4920_v34 = vpop.f32.mrb[29].mxu0  ;;  %v5296_v32 = vld [vmem:[%s21006_s17 + $0x18] sm:$0xff] }
0x247d   :  { %v4939_v35 = vadd.f32 %v15188_v31, %v4920_v34  ;;  %v5295_v31 = vld [vmem:[%s21006_s17 + $0x10] sm:$0xff]  ;;  %v15217_v34 = vld [vmem:[%s21007_s21] ss:$0 sm:$0xff]  ;;  %s21033_s21 = sld [smem:[#allocation23_spill]] }
0x247e   :  { %v4942_v36 = vadd.f32 %v4940_v33, %v19813_v39 }
0x247f   :  { %v4941_v37 = vadd.f32 %v4939_v35, %v19811_v38 }
0x2480   :  { %v4950_v42 = vsel %vm236_vm0, %v4942_v36, 0.0 }
0x2481   :  { %4951 = vadd.xlane.f32.xlu1 %v4950_v42  ;;  %v4947_v44 = vsel %vm236_vm0, %v4941_v37, 0.0 }
0x2482   :  { %4948 = vadd.xlane.f32.xlu0 %v4947_v44 }
0x2485   :  { %5255 = vadd.xlane.f32.xlu1 %v5254_v45  ;;  %v5385_v45 = vld [vmem:[%s21009_s3] sm:$0xff] }
0x2486   :  { %5252 = vadd.xlane.f32.xlu0 %v5251_v47  ;;  %v5386_v47 = vld [vmem:[%s21009_s3 + $0x8] sm:$0xff] }
0x250e   :  { %v4952_v48 = vpop.xlane.xlu1 %4951 }
0x250f   :  { %v4954_v49 = vmul.f32 0.03125, %v4952_v48  ;;  %v4949_v50 = vpop.xlane.xlu0 %4948 }
0x2510   :  { %v4953_v39 = vmul.f32 0.03125, %v4949_v50  ;;  %v18241_v50 = vpack.c.bf16 %v5386_v47, %v5385_v45  ;;  %v5473_v47 = vld [vmem:[%s21010_s8 + $0x10] sm:$0xff] }
0x2511   :  { %v4956_v51 = vsub.f32 %v4942_v36, %v4954_v49 }
0x2512   :  { %v4955_v38 = vsub.f32 %v4941_v37, %v4953_v39  ;;  %v5256_v52 = vpop.xlane.xlu1 %5255  ;;  %v15218_v37 = vld [vmem:[%s21008_s25] ss:$0 sm:$0xff]  ;;  %v5387_v39 = vld [vmem:[%s21009_s3 + $0x10] sm:$0xff]  ;;  %s21034_s25 = sld [smem:[#allocation26_spill]] }
0x2513   :  { %v5258_v53 = vmul.f32 0.03125, %v5256_v52  ;;  %v5253_v57 = vpop.xlane.xlu0 %5252  ;;  %v4958_v46 = vmul.f32 %v4956_v51, %v4956_v51 }
0x2514   :  { %v5257_v41 = vmul.f32 0.03125, %v5253_v57  ;;  %v4957_v58 = vmul.f32 %v4955_v38, %v4955_v38  ;;  %v15202_v57 = vld [vmem:[%s21000_s5 + $0x48] sm:$0xff] }
0x2515   :  { %v5260_v59 = vsub.f32 %v5248_v40, %v5258_v53  ;;  %v4962_v60 = vsel %vm236_vm0, %v4958_v46, 0.0  ;;  %v15201_v53 = vld [vmem:[%s21000_s5 + $0x40] sm:$0xff] }
0x2516   :  { %v5259_v56 = vsub.f32 %v5247_v43, %v5257_v41  ;;  %4963 = vadd.xlane.f32.xlu1 %v4962_v60  ;;  %v4959_v55 = vsel %vm236_vm0, %v4957_v58, 0.0  ;;  %v18237_v43 = vpack.c.bf16 %v5296_v32, %v5295_v31  ;;  %v18217_v46 = vpack.c.bf16 %v15202_v57, %v15201_v53  ;;  %v15203_v41 = vld [vmem:[%s21000_s5 + $0x50] sm:$0xff]  ;;  %v15204_v58 = vld [vmem:[%s21000_s5 + $0x58] sm:$0xff]  ;;  %v15205_v60 = vld [vmem:[%s21000_s5 + $0x60] sm:$0xff] }
0x2517   :  { %4960 = vadd.xlane.f32.xlu0 %v4959_v55  ;;  %v5262_v61 = vmul.f32 %v5260_v59, %v5260_v59 }
0x2518   :  { %v5261_v62 = vmul.f32 %v5259_v56, %v5259_v56  ;;  %18218 = vmatprep.subr.bf16.mxu0 %v18217_v46 }
0x2519   :  { %v5266_v0 = vsel %vm236_vm0, %v5262_v61, 0.0  ;;  %18220 = vmatpush3.bf16.msra.mxu0 %v18217_v46  ;;  %v15207_v61 = vld [vmem:[%s21000_s5 + $0x70] sm:$0xff] }
0x251a   :  { %5267 = vadd.xlane.f32.xlu1 %v5266_v0  ;;  %v5263_v1 = vsel %vm236_vm0, %v5261_v62, 0.0  ;;  %v15208_v62 = vld [vmem:[%s21000_s5 + $0x78] sm:$0xff]  ;;  %v15252_v46 = vld [vmem:[%s21010_s8 + $0x30] sm:$0xff] }
0x251b   :  { %5264 = vadd.xlane.f32.xlu0 %v5263_v1  ;;  %v18229_v0 = vpack.c.bf16 %v15208_v62, %v15207_v61  ;;  %v5471_v1 = vld [vmem:[%s21010_s8] sm:$0xff] }
0x251c   :  { %v18249_v54 = vpack.c.bf16 %v5472_v2, %v5471_v1  ;;  %v20087_v61 = vld [vmem:[%s21013_s20] sm:$0xff] }
0x25a3   :  { %v4964_v10 = vpop.xlane.xlu1 %4963 }
0x25a4   :  { %v4966_v12 = vmul.f32 0.03125, %v4964_v10  ;;  %v4961_v14 = vpop.xlane.xlu0 %4960 }
0x25a5   :  { %v4965_v16 = vmul.f32 0.03125, %v4961_v14 }
0x25a6   :  { %v4968_v17 = vadd.f32 1e-05, %v4966_v12 }
0x25a7   :  { %v4967_v19 = vadd.f32 1e-05, %v4965_v16  ;;  %v5268_v20 = vpop.xlane.xlu1 %5267  ;;  %v15219_v16 = vld [vmem:[%s21011_s14] ss:$0 sm:$0xff] }
0x25a8   :  { %19005 = vrsqrt.f32 %v4968_v17  ;;  %v5270_v21 = vmul.f32 0.03125, %v5268_v20  ;;  %v5265_v22 = vpop.xlane.xlu0 %5264 }
0x25a9   :  { %19007 = vrsqrt.f32 %v4967_v19  ;;  %v5269_v23 = vmul.f32 0.03125, %v5265_v22 }
0x25aa   :  { %v5272_v11 = vadd.f32 1e-05, %v5270_v21 }
0x25ab   :  { %v5271_v13 = vadd.f32 1e-05, %v5269_v23 }
0x25ac   :  { %19009 = vrsqrt.f32 %v5272_v11 }
0x25ad   :  { %19011 = vrsqrt.f32 %v5271_v13 }
0x25b2   :  { %v19006_v24 = vpop.eup %19005 }
0x25b3   :  { %v19008_v26 = vpop.eup %19007  ;;  %v4972_v27 = vmul.f32 %v19006_v24, %v4956_v51  ;;  %v5388_v51 = vld [vmem:[%s21009_s3 + $0x18] sm:$0xff]  ;;  %v15222_v24 = vld [vmem:[%s21012_s6] ss:$0 sm:$0xff] }
0x25b4   :  { %v4971_v28 = vmul.f32 %v19008_v26, %v4955_v38  ;;  %v18245_v52 = vpack.c.bf16 %v5388_v51, %v5387_v39  ;;  %v15250_v39 = vld [vmem:[%s21010_s8 + $0x20] sm:$0xff]  ;;  %v15251_v51 = vld [vmem:[%s21010_s8 + $0x28] sm:$0xff] }
0x25b5   :  { %v4980_v18 = vmul.f32 %v15191_v25, %v4972_v27  ;;  %v18283_v57 = vpack.c.bf16 %v15251_v51, %v15250_v39 }
0x25b6   :  { %v19010_v29 = vpop.eup %19009  ;;  %v4979_v30 = vmul.f32 %v15191_v25, %v4971_v28  ;;  %v15234_v28 = vld [vmem:[%s21006_s17 + $0x20] sm:$0xff] }
0x25b7   :  { %v19012_v33 = vpop.eup %19011  ;;  %v5276_v40 = vmul.f32 %v19010_v29, %v5260_v59  ;;  %v20018_v42 = vadd.f32 %v15192_v15, %v4980_v18  ;;  %v18221_v59 = vpack.c.bf16 %v15204_v58, %v15203_v41  ;;  %v15253_v41 = vld [vmem:[%s21010_s8 + $0x38] sm:$0xff] }
0x25b8   :  { %v5275_v35 = vmul.f32 %v19012_v33, %v5259_v56  ;;  %v20015_v36 = vadd.f32 %v15192_v15, %v4979_v30  ;;  %v15206_v56 = vld [vmem:[%s21000_s5 + $0x68] sm:$0xff]  ;;  %v18287_v58 = vpack.c.bf16 %v15253_v41, %v15252_v46  ;;  %s21027_s5 = sld [smem:[#allocation12_spill]] }
0x25b9   :  { %v5284_v49 = vmul.f32 %v15217_v34, %v5276_v40  ;;  %18222 = vmatprep.subr.bf16.mxu0 %v18221_v59  ;;  %v18225_v55 = vpack.c.bf16 %v15206_v56, %v15205_v60  ;;  %v15235_v15 = vld [vmem:[%s21006_s17 + $0x28] sm:$0xff] }
0x25ba   :  { %v5283_v44 = vmul.f32 %v15217_v34, %v5275_v35  ;;  %16988 = vmatprep.mubr.msk.f32.mxu1 %vm236_vm0, %v20015_v36  ;;  %18224 = vmatpush3.bf16.msra.mxu0 %v18221_v59  ;;  %v18267_v30 = vpack.c.bf16 %v15235_v15, %v15234_v28  ;;  %v15236_v35 = vld [vmem:[%s21006_s17 + $0x30] sm:$0xff]  ;;  %v20084_v60 = vld [vmem:[%s21013_s20 + $0x8] sm:$0xff] }
0x25bb   :  { %16989 = vmatmul.mubr.msk.f32.vlgmr.msra.gmra.mrb[50].mxu1 %vm236_vm0, %v20018_v42  ;;  %v20032_v38 = vadd.f32 %v15218_v37, %v5284_v49  ;;  %18226 = vmatprep.subr.bf16.mxu0 %v18225_v55  ;;  %v5474_v49 = vld [vmem:[%s21010_s8 + $0x18] sm:$0xff] }
0x25bc   :  { %v20026_v48 = vadd.f32 %v15218_v37, %v5283_v44  ;;  %18236 = vmatpush3.bf16.msra.mxu1 %v18233_v9  ;;  %v15237_v37 = vld [vmem:[%s21006_s17 + $0x38] sm:$0xff]  ;;  %v18253_v53 = vpack.c.bf16 %v5474_v49, %v5473_v47 }
0x25bd   :  { %18238 = vmatprep.subr.bf16.mxu1 %v18237_v43  ;;  %v18271_v45 = vpack.c.bf16 %v15237_v37, %v15236_v35 }
0x25be   :  { %17018 = vmatprep.mubr.msk.f32.mxu1 %vm236_vm0, %v20026_v48  ;;  %18228 = vmatpush3.bf16.msra.mxu0 %v18225_v55 }
0x25bf   :  { %18230 = vmatprep.subr.bf16.mxu0 %v18229_v0 }
0x25c0   :  { %18240 = vmatpush3.bf16.msra.mxu1 %v18237_v43 }
0x25c1   :  { %18242 = vmatprep.subr.bf16.mxu1 %v18241_v50 }
0x25c2   :  { %18232 = vmatpush3.bf16.msra.mxu0 %v18229_v0 }
0x25c3   :  { %17019 = vmatmul.mubr.msk.f32.vlgmr.msra.gmra.mrb[52].mxu1 %vm236_vm0, %v20032_v38  ;;  %18250 = vmatprep.subr.bf16.mxu0 %v18249_v54 }
0x25c4   :  { %18244 = vmatpush3.bf16.msra.mxu1 %v18241_v50  ;;  %17029 = vmatprep.mubr.msk.f32.mxu1 %vm236_vm0, %v20026_v48 }
0x25c5   :  { %18246 = vmatprep.subr.bf16.mxu1 %v18245_v52 }
0x25c8   :  { %18248 = vmatpush3.bf16.msra.mxu1 %v18245_v52 }
0x25cb   :  { %17030 = vmatmul.mubr.msk.f32.vlgmr.msra.gmra.mrb[54].mxu1 %vm236_vm0, %v20032_v38 }
0x268e   :  { %v16990_v4 = vpop.f32.mrb[50].mxu1 }
0x268f   :  { %v5080_v5 = vadd.f32 %v16990_v4, %v15198_v3  ;;  %v5074_v6 = vpop.f32.mrb[51].mxu1 }
0x2690   :  { %v5075_v7 = vadd.f32 %v15198_v3, %v5074_v6 }
0x2691   :  { %v5084_v8 = vmul.f32 %v5080_v5, %v5080_v5 }
0x2692   :  { %v5083_v9 = vmul.f32 %v5075_v7, %v5075_v7 }
0x2693   :  { %v5086_v10 = vmul.f32 %v5084_v8, %v5080_v5 }
0x2694   :  { %v5085_v12 = vmul.f32 %v5083_v9, %v5075_v7  ;;  %v15225_v9 = vld [vmem:[%s21014_s27] ss:$0 sm:$0xff] }
0x2695   :  { %v5088_v14 = vmul.f32 0.044715, %v5086_v10 }
0x2696   :  { %v5087_v17 = vmul.f32 0.044715, %v5085_v12  ;;  %v17020_v19 = vpop.f32.mrb[52].mxu1 }
0x2697   :  { %v5090_v20 = vadd.f32 %v5088_v14, %v5080_v5  ;;  %v5376_v21 = vpop.f32.mrb[53].mxu1  ;;  %v5382_v44 = vadd.f32 %v17020_v19, %v15219_v16 }
0x2698   :  { %v5089_v22 = vadd.f32 %v5087_v17, %v5075_v7  ;;  %v5377_v23 = vadd.f32 %v15219_v16, %v5376_v21  ;;  %v15255_v17 = vld [vmem:[%s21014_s27 + $0x1] ss:$0 sm:$0xff] }
0x2699   :  { %v5092_v11 = vmul.f32 0.7978846, %v5090_v20 }
0x269a   :  { %v5091_v13 = vmul.f32 0.7978846, %v5089_v22  ;;  %17047 = vmatprep.mubr.msk.f32.mxu1 %vm544_vm1, %v5377_v23 }
0x269b   :  { %19013 = vtanh.f32 %v5092_v11 }
0x269c   :  { %19015 = vtanh.f32 %v5091_v13 }
0x269e   :  { %v17031_v25 = vpop.f32.mrb[54].mxu1 }
0x269f   :  { %v5468_v26 = vadd.f32 %v17031_v25, %v15222_v24  ;;  %v5462_v27 = vpop.f32.mrb[55].mxu1 }
0x26a0   :  { %v5463_v18 = vadd.f32 %v15222_v24, %v5462_v27 }
0x26a2   :  { %v18257_v29 = vpack.c.bf16 %v5468_v26, %v5463_v18 }
0x26a4   :  { %18259 = vmatprep.subr.msk.bf16.mxu1 %vm19608_vm2, %v18257_v29 }
0x26a5   :  { %v19014_v31 = vpop.eup %19013  ;;  %18262 = vmatpush3.bf16.xpose.msk.msra.mxu1 %vm19608_vm2, %v18257_v29 }
0x26a6   :  { %v19016_v32 = vpop.eup %19015  ;;  %v5096_v33 = vadd.f32 1.0, %v19014_v31  ;;  %18268 = vmatprep.subr.bf16.mxu1 %v18267_v30  ;;  %v15242_v31 = vld [vmem:[%s21009_s3 + $0x20] sm:$0xff] }
0x26a7   :  { %v5095_v34 = vadd.f32 1.0, %v19016_v32  ;;  %v15243_v32 = vld [vmem:[%s21009_s3 + $0x28] sm:$0xff] }
0x26a8   :  { %v5098_v40 = vmul.f32 0.5, %v5096_v33  ;;  %v18275_v33 = vpack.c.bf16 %v15243_v32, %v15242_v31  ;;  %v15287_v31 = vld [vmem:[%s21010_s8 + $0x50] sm:$0xff]  ;;  %v15288_v32 = vld [vmem:[%s21010_s8 + $0x58] sm:$0xff] }
0x26a9   :  { %v5097_v43 = vmul.f32 0.5, %v5095_v34 }
0x26aa   :  { %v5100_v52 = vmul.f32 %v5098_v40, %v5080_v5  ;;  %v15239_v5 = vld [vmem:[%s21011_s14 + $0x1] ss:$0 sm:$0xff]  ;;  %v15244_v40 = vld [vmem:[%s21009_s3 + $0x30] sm:$0xff] }
0x26ab   :  { %v5099_v50 = vmul.f32 %v5097_v43, %v5075_v7  ;;  %v15245_v43 = vld [vmem:[%s21009_s3 + $0x38] sm:$0xff] }
0x26ac   :  { %17048 = vmatmul.mubr.msk.f32.vlgmr.msra.gmra.mrb[56].mxu1 %vm544_vm1, %v5382_v44  ;;  %v18279_v49 = vpack.c.bf16 %v15245_v43, %v15244_v40 }
0x26ad   :  { %18270 = vmatpush3.bf16.msra.mxu1 %v18267_v30  ;;  %17065 = vmatprep.mubr.msk.f32.mxu1 %vm236_vm0, %v20026_v48 }
0x26ae   :  { %17007 = vmatprep.mubr.msk.f32.mxu0 %vm2629_vm4, %v5099_v50  ;;  %18272 = vmatprep.subr.bf16.mxu1 %v18271_v45 }
0x26af   :  { %17008 = vmatmul.mubr.msk.f32.vlgmr.msra.gmra.mrb[38].mxu0 %vm2629_vm4, %v5100_v52  ;;  %v15247_v52 = vld [vmem:[%s21012_s6 + $0x1] ss:$0 sm:$0xff] }
0x26b0   :  { %18252 = vmatpush3.bf16.msra.mxu0 %v18249_v54  ;;  %17040 = vmatprep.mubr.msk.f32.mxu0 %vm236_vm0, %v20026_v48 }
0x26b1   :  { %18274 = vmatpush3.bf16.msra.mxu1 %v18271_v45  ;;  %18254 = vmatprep.subr.bf16.mxu0 %v18253_v53 }
0x26b2   :  { %18284 = vmatprep.subr.bf16.mxu1 %v18283_v57 }
0x26b4   :  { %18256 = vmatpush3.bf16.msra.mxu0 %v18253_v53  ;;  %17066 = vmatmul.mubr.msk.f32.vlgmr.msra.gmra.mrb[58].mxu1 %vm236_vm0, %v20032_v38 }
0x26b5   :  { %18286 = vmatpush3.bf16.msra.mxu1 %v18283_v57  ;;  %17087 = vmatprep.mubr.msk.f32.mxu1 %vm236_vm0, %v20026_v48 }
0x26b6   :  { %18288 = vmatprep.subr.bf16.mxu1 %v18287_v58 }
0x26b7   :  { %17041 = vmatmul.mubr.msk.f32.vlgmr.msra.gmra.mrb[40].mxu0 %vm236_vm0, %v20032_v38 }
0x26b9   :  { %18290 = vmatpush3.bf16.msra.mxu1 %v18287_v58 }
0x26bc   :  { %17088 = vmatmul.mubr.msk.f32.vlgmr.msra.gmra.mrb[60].mxu1 %vm236_vm0, %v20032_v38 }
0x277f   :  { %v17049_v59 = vpop.f32.mrb[56].mxu1 }
0x2780   :  { %v5645_v56 = vmul.f32 0.35355338, %v17049_v59  ;;  %v5635_v55 = vpop.f32.mrb[57].mxu1 }
0x2781   :  { %v5644_v62 = vmul.f32 0.35355338, %v5635_v55 }
0x2782   :  { %v20089_v0 = vpop.f32.mrb[38].mxu0  ;;  %v5647_v1 = vadd.f32 %v5645_v56, %v20084_v60 }
0x2783   :  { %v20092_v2 = vpop.f32.mrb[39].mxu0  ;;  %v5646_v54 = vadd.f32 %v5644_v62, %v20087_v61 }
0x2784   :  { %v5651_v3 = vsel %vm636_vm3, %v5647_v1, -inf }
0x2785   :  { %5652 = vmax.xlane.f32.xlu1 %v5651_v3  ;;  %v5648_v4 = vsel %vm636_vm3, %v5646_v54, -inf }
0x2786   :  { %5649 = vmax.xlane.f32.xlu0 %v5648_v4 }
0x2787   :  { %v17067_v6 = vpop.f32.mrb[58].mxu1 }
0x2788   :  { %v20098_v7 = vadd.f32 %v17067_v6, %v15239_v5  ;;  %v5831_v8 = vpop.f32.mrb[59].mxu1 }
0x2789   :  { %v5832_v50 = vadd.f32 %v15239_v5, %v5831_v8 }
0x278a   :  { %v17042_v10 = vpop.f32.mrb[40].mxu0 }
0x278b   :  { %v5554_v12 = vadd.f32 %v17042_v10, %v15225_v9  ;;  %v5548_v14 = vpop.f32.mrb[41].mxu0 }
0x278c   :  { %v5549_v16 = vadd.f32 %v15225_v9, %v5548_v14 }
0x278e   :  { %v18263_v19 = vpack.c.bf16 %v5554_v12, %v5549_v16 }
0x278f   :  { %v17089_v20 = vpop.f32.mrb[60].mxu1 }
0x2790   :  { %18264 = vmatprep.subr.bf16.mxu0 %v18263_v19  ;;  %v6013_v21 = vadd.f32 %v17089_v20, %v15255_v17  ;;  %v6007_v22 = vpop.f32.mrb[61].mxu1  ;;  %v15270_v20 = vld [vmem:[%s21006_s17 + $0x48] sm:$0xff] }
0x2791   :  { %18266 = vmatpush3.bf16.msra.mxu0 %v18263_v19  ;;  %v6008_v23 = vadd.f32 %v15255_v17, %v6007_v22  ;;  %v15269_v19 = vld [vmem:[%s21006_s17 + $0x40] sm:$0xff]  ;;  %v15264_v22 = vld [vmem:[%s21015_s4 + $0x8] sm:$0xff] }
0x2792   :  { %18276 = vmatprep.subr.bf16.mxu0 %v18275_v33 }
0x2793   :  { %v18297_v11 = vpack.c.bf16 %v6013_v21, %v6008_v23  ;;  %v18301_v21 = vpack.c.bf16 %v15270_v20, %v15269_v19 }
0x2795   :  { %18298 = vmatprep.subr.bf16.mxu1 %v18297_v11 }
0x2796   :  { %18300 = vmatpush3.bf16.msra.mxu1 %v18297_v11 }
0x2797   :  { %18302 = vmatprep.subr.bf16.mxu1 %v18301_v21 }
0x2812   :  { %v5653_v13 = vpop.xlane.xlu1 %5652 }
0x2813   :  { %v5655_v24 = vsub.f32 %v5647_v1, %v5653_v13  ;;  %v5650_v25 = vpop.xlane.xlu0 %5649 }
0x2814   :  { %v5654_v26 = vsub.f32 %v5646_v54, %v5650_v25  ;;  %v15272_v25 = vld [vmem:[%s21006_s17 + $0x58] sm:$0xff] }
0x2815   :  { %v5658_v27 = vmul.f32 1.442695, %v5655_v24  ;;  %v15271_v24 = vld [vmem:[%s21006_s17 + $0x50] sm:$0xff] }
0x2816   :  { %v5656_v28 = vmul.f32 1.442695, %v5654_v26 }
0x2817   :  { %19017 = vpow2.f32 %v5658_v27 }
0x2818   :  { %19019 = vpow2.f32 %v5656_v28 }
0x2821   :  { %v19018_v15 = vpop.eup %19017 }
0x2822   :  { %v19020_v18 = vpop.eup %19019  ;;  %v5663_v29 = vsel %vm636_vm3, %v19018_v15, 0.0 }
0x2823   :  { %5664 = vadd.xlane.f32.xlu1 %v5663_v29  ;;  %v5660_v30 = vsel %vm636_vm3, %v19020_v18, 0.0  ;;  %v15286_v29 = vld [vmem:[%s21010_s8 + $0x48] sm:$0xff] }
0x2824   :  { %5661 = vadd.xlane.f32.xlu0 %v5660_v30 }
0x28b0   :  { %v5665_v34 = vpop.xlane.xlu1 %5664 }
0x28b1   :  { %19021 = vrcp.f32 %v5665_v34  ;;  %v5662_v35 = vpop.xlane.xlu0 %5661  ;;  %v5751_v34 = vld [vmem:[%s21015_s4] sm:$0xff] }
0x28b2   :  { %19023 = vrcp.f32 %v5662_v35  ;;  %v15277_v35 = vld [vmem:[%s21009_s3 + $0x40] sm:$0xff] }
0x28bb   :  { %v19022_v37 = vpop.eup %19021 }
0x28bc   :  { %v19024_v44 = vpop.eup %19023  ;;  %v5669_v47 = vmul.f32 %v19022_v37, %v19018_v15  ;;  %v18305_v15 = vpack.c.bf16 %v15272_v25, %v15271_v24  ;;  %v15278_v37 = vld [vmem:[%s21009_s3 + $0x48] sm:$0xff]  ;;  %v15302_v25 = vld [vmem:[%s21006_s17 + $0x60] sm:$0xff] }
0x28bd   :  { %v5668_v45 = vmul.f32 %v19024_v44, %v19020_v18  ;;  %v15285_v18 = vld [vmem:[%s21010_s8 + $0x40] sm:$0xff]  ;;  %v18309_v44 = vpack.c.bf16 %v15278_v37, %v15277_v35 }
0x28be   :  { %v18317_v30 = vpack.c.bf16 %v15286_v29, %v15285_v18  ;;  %v15318_v37 = vld [vmem:[%s21010_s8 + $0x60] sm:$0xff] }
0x28bf   :  { %17054 = vmatprep.mubr.msk.f32.mxu0 %vm636_vm3, %v5668_v45  ;;  %v15274_v45 = vld [vmem:[%s21011_s14 + $0x2] ss:$0 sm:$0xff] }
0x28c0   :  { %17055 = vmatmul.mubr.msk.f32.vlgmr.msra.gmra.mrb[42].mxu0 %vm636_vm3, %v5669_v47  ;;  %v15279_v47 = vld [vmem:[%s21009_s3 + $0x50] sm:$0xff] }
0x28c1   :  { %18278 = vmatpush3.bf16.msra.mxu0 %v18275_v33  ;;  %17076 = vmatprep.mubr.msk.f32.mxu0 %vm236_vm0, %v20026_v48  ;;  %v18321_v33 = vpack.c.bf16 %v15288_v32, %v15287_v31  ;;  %v15305_v31 = vld [vmem:[%s21006_s17 + $0x78] sm:$0xff] }
0x28c2   :  { %18280 = vmatprep.subr.bf16.mxu0 %v18279_v49 }
0x28c5   :  { %18282 = vmatpush3.bf16.msra.mxu0 %v18279_v49  ;;  %v15280_v49 = vld [vmem:[%s21009_s3 + $0x58] sm:$0xff] }
0x28c8   :  { %17077 = vmatmul.mubr.msk.f32.vlgmr.msra.gmra.mrb[44].mxu0 %vm236_vm0, %v20032_v38 }
0x28c9   :  { %17094 = vmatprep.mubr.msk.f32.mxu0 %vm544_vm1, %v5832_v50 }
0x2993   :  { %v20115_v39 = vpop.f32.mrb[42].mxu0 }
0x2994   :  { %v20117_v51 = vpop.f32.mrb[43].mxu0 }
0x299b   :  { %v17078_v53 = vpop.f32.mrb[44].mxu0 }
0x299c   :  { %v5925_v57 = vadd.f32 %v17078_v53, %v15247_v52  ;;  %v5919_v46 = vpop.f32.mrb[45].mxu0 }
0x299d   :  { %v5920_v41 = vadd.f32 %v15247_v52, %v5919_v46  ;;  %v15290_v46 = vld [vmem:[%s21014_s27 + $0x2] ss:$0 sm:$0xff] }
0x299f   :  { %v18291_v58 = vpack.c.bf16 %v5925_v57, %v5920_v41  ;;  %v18313_v57 = vpack.c.bf16 %v15280_v49, %v15279_v47  ;;  %v15310_v49 = vld [vmem:[%s21009_s3 + $0x60] sm:$0xff] }
0x29a1   :  { %18293 = vmatprep.subr.msk.bf16.mxu0 %vm19608_vm2, %v18291_v58 }
0x29a2   :  { %18296 = vmatpush3.bf16.xpose.msk.msra.mxu0 %vm19608_vm2, %v18291_v58 }
0x29a3   :  { %17104 = vmatprep.subr.mxu0 %v15264_v22 }
0x29a9   :  { %17095 = vmatmul.mubr.msk.f32.vlgmr.msra.gmra.mrb[46].mxu0 %vm544_vm1, %v20098_v7 }
0x29aa   :  { %17105 = vmatpush3.msra.mxu0 %v15264_v22 }
0x29ab   :  { %17109 = vmatprep.subr.mxu0 %v5751_v34 }
0x2a7c   :  { %v17096_v59 = vpop.f32.mrb[46].mxu0 }
0x2a7d   :  { %v6104_v56 = vmul.f32 0.35355338, %v17096_v59  ;;  %v6094_v55 = vpop.f32.mrb[47].mxu0 }
0x2a7e   :  { %v6103_v62 = vmul.f32 0.35355338, %v6094_v55 }
0x2a7f   :  { %v6106_v1 = vadd.f32 %v6104_v56, %v20084_v60 }
0x2a80   :  { %v6105_v54 = vadd.f32 %v6103_v62, %v20087_v61 }
0x2a81   :  { %v6110_v3 = vsel %vm636_vm3, %v6106_v1, -inf }
0x2a82   :  { %6111 = vmax.xlane.f32.xlu1 %v6110_v3  ;;  %v6107_v4 = vsel %vm636_vm3, %v6105_v54, -inf }
0x2a83   :  { %6108 = vmax.xlane.f32.xlu0 %v6107_v4 }
0x2b0f   :  { %v6112_v5 = vpop.xlane.xlu1 %6111 }
0x2b10   :  { %v6114_v6 = vsub.f32 %v6106_v1, %v6112_v5  ;;  %v6109_v8 = vpop.xlane.xlu0 %6108 }
0x2b11   :  { %v6113_v7 = vsub.f32 %v6105_v54, %v6109_v8 }
0x2b12   :  { %v6117_v9 = vmul.f32 1.442695, %v6114_v6 }
0x2b13   :  { %v6115_v10 = vmul.f32 1.442695, %v6113_v7 }
0x2b14   :  { %19025 = vpow2.f32 %v6117_v9 }
0x2b15   :  { %19027 = vpow2.f32 %v6115_v10 }
0x2b1e   :  { %v19026_v12 = vpop.eup %19025 }
0x2b1f   :  { %v19028_v14 = vpop.eup %19027  ;;  %v6122_v16 = vsel %vm636_vm3, %v19026_v12, 0.0 }
0x2b20   :  { %6123 = vadd.xlane.f32.xlu1 %v6122_v16  ;;  %v6119_v17 = vsel %vm636_vm3, %v19028_v14, 0.0 }
0x2b21   :  { %6120 = vadd.xlane.f32.xlu0 %v6119_v17 }
0x2bad   :  { %v6124_v23 = vpop.xlane.xlu1 %6123 }
0x2bae   :  { %19029 = vrcp.f32 %v6124_v23  ;;  %v6121_v11 = vpop.xlane.xlu0 %6120 }
0x2baf   :  { %19031 = vrcp.f32 %v6121_v11 }
0x2bb8   :  { %v19030_v13 = vpop.eup %19029 }
0x2bb9   :  { %v19032_v26 = vpop.eup %19031  ;;  %v6128_v28 = vmul.f32 %v19030_v13, %v19026_v12 }
0x2bba   :  { %v6127_v27 = vmul.f32 %v19032_v26, %v19028_v14  ;;  %v15303_v26 = vld [vmem:[%s21006_s17 + $0x68] sm:$0xff] }
0x2bbc   :  { %17101 = vmatprep.mubr.msk.f32.mxu1 %vm636_vm3, %v6127_v27  ;;  %v18335_v27 = vpack.c.bf16 %v15303_v26, %v15302_v25 }
0x2bbd   :  { %17102 = vmatmul.mubr.msk.f32.vlgmr.msra.gmra.mrb[62].mxu1 %vm636_vm3, %v6128_v28  ;;  %v15299_v28 = vld [vmem:[%s21015_s4 + $0x10] sm:$0xff] }
0x2bbe   :  { %18304 = vmatpush3.bf16.msra.mxu1 %v18301_v21  ;;  %17122 = vmatprep.mubr.msk.f32.mxu1 %vm236_vm0, %v20026_v48 }
0x2bbf   :  { %18306 = vmatprep.subr.bf16.mxu1 %v18305_v15 }
0x2bc2   :  { %18308 = vmatpush3.bf16.msra.mxu1 %v18305_v15 }
0x2bc3   :  { %18318 = vmatprep.subr.bf16.mxu1 %v18317_v30 }
0x2bc5   :  { %17123 = vmatmul.mubr.msk.f32.vlgmr.msra.gmra.mrb[64].mxu1 %vm236_vm0, %v20032_v38 }
0x2bc6   :  { %18320 = vmatpush3.bf16.msra.mxu1 %v18317_v30  ;;  %17144 = vmatprep.mubr.msk.f32.mxu1 %vm236_vm0, %v20026_v48  ;;  %v15304_v30 = vld [vmem:[%s21006_s17 + $0x70] sm:$0xff] }
0x2bc7   :  { %18322 = vmatprep.subr.bf16.mxu1 %v18321_v33  ;;  %v18339_v35 = vpack.c.bf16 %v15305_v31, %v15304_v30 }
0x2bca   :  { %18324 = vmatpush3.bf16.msra.mxu1 %v18321_v33 }
0x2bcd   :  { %17145 = vmatmul.mubr.msk.f32.vlgmr.msra.gmra.mrb[66].mxu1 %vm236_vm0, %v20032_v38 }
0x2c90   :  { %v17103_v40 = vpop.f32.mrb[62].mxu1 }
0x2c91   :  { %v6201_v43 = vpop.f32.mrb[63].mxu1 }
0x2c92   :  { %17106 = vmatprep.mubr.msk.f32.mxu0 %vm544_vm1, %v6201_v43 }
0x2c93   :  { %17107 = vmatmul.mubr.msk.f32.vlgmr.msra.gmra.mrb[48].mxu0 %vm544_vm1, %v17103_v40  ;;  %v15319_v40 = vld [vmem:[%s21010_s8 + $0x68] sm:$0xff] }
0x2c94   :  { %17110 = vmatpush3.msra.mxu0 %v5751_v34  ;;  %17111 = vmatprep.mubr.msk.f32.mxu0 %vm544_vm1, %v20117_v51  ;;  %v18351_v43 = vpack.c.bf16 %v15319_v40, %v15318_v37 }
0x2c95   :  { %18310 = vmatprep.subr.bf16.mxu0 %v18309_v44 }
0x2c98   :  { %v17124_v50 = vpop.f32.mrb[64].mxu1 }
0x2c99   :  { %v6459_v52 = vadd.f32 %v17124_v50, %v15274_v45  ;;  %v6453_v53 = vpop.f32.mrb[65].mxu1  ;;  %v15311_v50 = vld [vmem:[%s21009_s3 + $0x68] sm:$0xff] }
0x2c9a   :  { %v6454_v59 = vadd.f32 %v15274_v45, %v6453_v53  ;;  %v15321_v45 = vld [vmem:[%s21010_s8 + $0x78] sm:$0xff]  ;;  %v15312_v53 = vld [vmem:[%s21009_s3 + $0x70] sm:$0xff] }
0x2c9b   :  { %17112 = vmatmul.mubr.msk.f32.vlgmr.msra.gmra.mrb[48].mxu0 %vm544_vm1, %v20115_v39  ;;  %v15282_v39 = vld [vmem:[%s21012_s6 + $0x2] ss:$0 sm:$0xff] }
0x2c9c   :  { %18312 = vmatpush3.bf16.msra.mxu0 %v18309_v44  ;;  %17133 = vmatprep.mubr.msk.f32.mxu0 %vm236_vm0, %v20026_v48  ;;  %v15320_v44 = vld [vmem:[%s21010_s8 + $0x70] sm:$0xff] }
0x2c9d   :  { %18314 = vmatprep.subr.bf16.mxu0 %v18313_v57  ;;  %v18355_v47 = vpack.c.bf16 %v15321_v45, %v15320_v44 }
0x2ca0   :  { %18316 = vmatpush3.bf16.msra.mxu0 %v18313_v57  ;;  %v17146_v51 = vpop.f32.mrb[66].mxu1  ;;  %v15313_v57 = vld [vmem:[%s21009_s3 + $0x78] sm:$0xff] }
0x2ca1   :  { %v6635_v41 = vadd.f32 %v17146_v51, %v15290_v46  ;;  %v6629_v58 = vpop.f32.mrb[67].mxu1 }
0x2ca2   :  { %v6630_v56 = vadd.f32 %v15290_v46, %v6629_v58  ;;  %v15307_v58 = vld [vmem:[%s21011_s14 + $0x3] ss:$0 sm:$0xff] }
0x2ca3   :  { %17134 = vmatmul.mubr.msk.f32.vlgmr.msra.gmra.mrb[50].mxu0 %vm236_vm0, %v20032_v38 }
0x2ca4   :  { %v18331_v55 = vpack.c.bf16 %v6635_v41, %v6630_v56  ;;  %17151 = vmatprep.mubr.msk.f32.mxu0 %vm544_vm1, %v6454_v59  ;;  %v18347_v41 = vpack.c.bf16 %v15313_v57, %v15312_v53 }
0x2ca6   :  { %18332 = vmatprep.subr.bf16.mxu1 %v18331_v55 }
0x2ca7   :  { %18334 = vmatpush3.bf16.msra.mxu1 %v18331_v55 }
0x2ca8   :  { %18336 = vmatprep.subr.bf16.mxu1 %v18335_v27 }
0x2d76   :  { %v17135_v62 = vpop.f32.mrb[50].mxu0 }
0x2d77   :  { %v6547_v1 = vadd.f32 %v17135_v62, %v15282_v39  ;;  %v6541_v54 = vpop.f32.mrb[51].mxu0  ;;  %v15323_v62 = vld [vmem:[%s21014_s27 + $0x3] ss:$0 sm:$0xff] }
0x2d78   :  { %v6542_v3 = vadd.f32 %v15282_v39, %v6541_v54 }
0x2d7a   :  { %v18325_v4 = vpack.c.bf16 %v6547_v1, %v6542_v3 }
0x2d7c   :  { %18327 = vmatprep.subr.msk.bf16.mxu0 %vm19608_vm2, %v18325_v4 }
0x2d7d   :  { %18330 = vmatpush3.bf16.xpose.msk.msra.mxu0 %vm19608_vm2, %v18325_v4 }
0x2d7e   :  { %17161 = vmatprep.subr.mxu0 %v15299_v28 }
0x2d84   :  { %17152 = vmatmul.mubr.msk.f32.vlgmr.msra.gmra.mrb[52].mxu0 %vm544_vm1, %v6459_v52  ;;  %v18343_v52 = vpack.c.bf16 %v15311_v50, %v15310_v49 }
0x2d85   :  { %17162 = vmatpush3.msra.mxu0 %v15299_v28  ;;  %v15210_v28 = vld [vmem:[%s21002_s12 + $0x1] ss:$0 sm:$0xff]  ;;  %s21029_s12 = sld [smem:[#allocation20_spill]] }
0x2d86   :  { %18344 = vmatprep.subr.bf16.mxu0 %v18343_v52 }
0x2e57   :  { %v17153_v5 = vpop.f32.mrb[52].mxu0 }
0x2e58   :  { %v6726_v6 = vmul.f32 0.35355338, %v17153_v5  ;;  %v6716_v8 = vpop.f32.mrb[53].mxu0 }
0x2e59   :  { %v6725_v7 = vmul.f32 0.35355338, %v6716_v8 }
0x2e5a   :  { %v6728_v9 = vadd.f32 %v6726_v6, %v20084_v60  ;;  %v15315_v6 = vld [vmem:[%s21012_s6 + $0x3] ss:$0 sm:$0xff] }
0x2e5b   :  { %v6727_v10 = vadd.f32 %v6725_v7, %v20087_v61 }
0x2e5c   :  { %v6732_v12 = vsel %vm636_vm3, %v6728_v9, -inf }
0x2e5d   :  { %6733 = vmax.xlane.f32.xlu1 %v6732_v12  ;;  %v6729_v14 = vsel %vm636_vm3, %v6727_v10, -inf }
0x2e5e   :  { %6730 = vmax.xlane.f32.xlu0 %v6729_v14 }
0x2eea   :  { %v6734_v16 = vpop.xlane.xlu1 %6733 }
0x2eeb   :  { %v6736_v17 = vsub.f32 %v6728_v9, %v6734_v16  ;;  %v6731_v19 = vpop.xlane.xlu0 %6730 }
0x2eec   :  { %v6735_v20 = vsub.f32 %v6727_v10, %v6731_v19 }
0x2eed   :  { %v6739_v21 = vmul.f32 1.442695, %v6736_v17 }
0x2eee   :  { %v6737_v22 = vmul.f32 1.442695, %v6735_v20 }
0x2eef   :  { %19033 = vpow2.f32 %v6739_v21 }
0x2ef0   :  { %19035 = vpow2.f32 %v6737_v22 }
0x2ef9   :  { %v19034_v23 = vpop.eup %19033 }
0x2efa   :  { %v19036_v11 = vpop.eup %19035  ;;  %v6744_v13 = vsel %vm636_vm3, %v19034_v23, 0.0 }
0x2efb   :  { %6745 = vadd.xlane.f32.xlu1 %v6744_v13  ;;  %v6741_v24 = vsel %vm636_vm3, %v19036_v11, 0.0 }
0x2efc   :  { %6742 = vadd.xlane.f32.xlu0 %v6741_v24 }
0x2f88   :  { %v6746_v15 = vpop.xlane.xlu1 %6745 }
0x2f89   :  { %19037 = vrcp.f32 %v6746_v15  ;;  %v6743_v18 = vpop.xlane.xlu0 %6742 }
0x2f8a   :  { %19039 = vrcp.f32 %v6743_v18 }
0x2f93   :  { %v19038_v29 = vpop.eup %19037 }
0x2f94   :  { %v19040_v32 = vpop.eup %19039  ;;  %v6750_v34 = vmul.f32 %v19038_v29, %v19034_v23 }
0x2f95   :  { %v6749_v33 = vmul.f32 %v19040_v32, %v19036_v11 }
0x2f97   :  { %17158 = vmatprep.mubr.msk.f32.mxu1 %vm636_vm3, %v6749_v33 }
0x2f98   :  { %17159 = vmatmul.mubr.msk.f32.vlgmr.msra.gmra.mrb[68].mxu1 %vm636_vm3, %v6750_v34 }
0x2f99   :  { %18338 = vmatpush3.bf16.msra.mxu1 %v18335_v27  ;;  %17174 = vmatprep.mubr.msk.f32.mxu1 %vm236_vm0, %v20026_v48 }
0x2f9a   :  { %18340 = vmatprep.subr.bf16.mxu1 %v18339_v35 }
0x2f9d   :  { %18342 = vmatpush3.bf16.msra.mxu1 %v18339_v35 }
0x2f9e   :  { %18352 = vmatprep.subr.bf16.mxu1 %v18351_v43 }
0x2fa0   :  { %17175 = vmatmul.mubr.msk.f32.vlgmr.msra.gmra.mrb[70].mxu1 %vm236_vm0, %v20032_v38 }
0x2fa1   :  { %18354 = vmatpush3.bf16.msra.mxu1 %v18351_v43  ;;  %17196 = vmatprep.mubr.msk.f32.mxu1 %vm236_vm0, %v20026_v48 }
0x2fa2   :  { %18356 = vmatprep.subr.bf16.mxu1 %v18355_v47 }
0x2fa5   :  { %18358 = vmatpush3.bf16.msra.mxu1 %v18355_v47 }
0x2fa8   :  { %17197 = vmatmul.mubr.msk.f32.vlgmr.msra.gmra.mrb[72].mxu1 %vm236_vm0, %v20032_v38 }
0x306b   :  { %v17160_v46 = vpop.f32.mrb[68].mxu1 }
0x306c   :  { %v6823_v51 = vpop.f32.mrb[69].mxu1 }
0x306d   :  { %17163 = vmatprep.mubr.msk.f32.mxu0 %vm544_vm1, %v6823_v51 }
0x306e   :  { %17164 = vmatmul.mubr.msk.f32.vlgmr.msra.gmra.mrb[48].mxu0 %vm544_vm1, %v17160_v46 }
0x306f   :  { %18346 = vmatpush3.bf16.msra.mxu0 %v18343_v52  ;;  %17185 = vmatprep.mubr.msk.f32.mxu0 %vm236_vm0, %v20026_v48  ;;  %v15335_v52 = vld [vmem:[%s21016_s26] ss:$0 sm:$0xff] }
0x3070   :  { %18348 = vmatprep.subr.bf16.mxu0 %v18347_v41 }
0x3073   :  { %v17176_v59 = vpop.f32.mrb[70].mxu1  ;;  %18350 = vmatpush3.bf16.msra.mxu0 %v18347_v41 }
0x3074   :  { %v7002_v56 = vadd.f32 %v17176_v59, %v15307_v58  ;;  %v6996_v55 = vpop.f32.mrb[71].mxu1 }
0x3075   :  { %v6997_v39 = vadd.f32 %v15307_v58, %v6996_v55 }
0x3076   :  { %17186 = vmatmul.mubr.msk.f32.vlgmr.msra.gmra.mrb[54].mxu0 %vm236_vm0, %v20032_v38 }
0x3077   :  { %17203 = vmatprep.mubr.msk.f32.mxu0 %vm544_vm1, %v6997_v39 }
0x307b   :  { %v17198_v1 = vpop.f32.mrb[72].mxu1 }
0x307c   :  { %v7178_v54 = vadd.f32 %v17198_v1, %v15323_v62  ;;  %v7172_v3 = vpop.f32.mrb[73].mxu1 }
0x307d   :  { %v7173_v4 = vadd.f32 %v15323_v62, %v7172_v3 }
0x307f   :  { %v18365_v5 = vpack.c.bf16 %v7178_v54, %v7173_v4  ;;  %v7607_v4 = vld [vmem:[%s21017_s28] sm:$0xff] }
0x3081   :  { %18366 = vmatprep.subr.bf16.mxu1 %v18365_v5 }
0x3082   :  { %18368 = vmatpush3.bf16.msra.mxu1 %v18365_v5 }
0x3149   :  { %v17187_v8 = vpop.f32.mrb[54].mxu0 }
0x314a   :  { %v7090_v7 = vadd.f32 %v17187_v8, %v15315_v6  ;;  %v7084_v9 = vpop.f32.mrb[55].mxu0 }
0x314b   :  { %v7085_v10 = vadd.f32 %v15315_v6, %v7084_v9  ;;  %v7610_v6 = vld [vmem:[%s21017_s28 + $0x18] sm:$0xff] }
0x314d   :  { %v18359_v12 = vpack.c.bf16 %v7090_v7, %v7085_v10 }
0x314f   :  { %18361 = vmatprep.subr.msk.bf16.mxu0 %vm19608_vm2, %v18359_v12 }
0x3150   :  { %18364 = vmatpush3.bf16.xpose.msk.msra.mxu0 %vm19608_vm2, %v18359_v12 }
0x3157   :  { %17204 = vmatmul.mubr.msk.f32.vlgmr.msra.gmra.mrb[56].mxu0 %vm544_vm1, %v7002_v56 }
0x322a   :  { %v17205_v14 = vpop.f32.mrb[56].mxu0 }
0x322b   :  { %v7269_v16 = vmul.f32 0.35355338, %v17205_v14  ;;  %v7259_v17 = vpop.f32.mrb[57].mxu0 }
0x322c   :  { %v7268_v19 = vmul.f32 0.35355338, %v7259_v17 }
0x322d   :  { %v7271_v20 = vadd.f32 %v7269_v16, %v20084_v60  ;;  %v5196_v60 = vadd.f32 %v20089_v0, %v15210_v28  ;;  %v15332_v0 = vld [vmem:[%s21015_s4 + $0x18] sm:$0xff] }
0x322e   :  { %v7270_v21 = vadd.f32 %v7268_v19, %v20087_v61  ;;  %v5191_v61 = vadd.f32 %v15210_v28, %v20092_v2  ;;  %17213 = vmatprep.subr.mxu0 %v15332_v0 }
0x322f   :  { %v7275_v22 = vsel %vm636_vm3, %v7271_v20, -inf  ;;  %v5200_v30 = vadd.f32 %v5196_v60, %v20018_v42  ;;  %17214 = vmatpush3.msra.mxu0 %v15332_v0  ;;  %v7517_v0 = vld [vmem:[%s21018_s1 + $0x10] sm:$0xff] }
0x3230   :  { %7276 = vmax.xlane.f32.xlu1 %v7275_v22  ;;  %v7272_v23 = vsel %vm636_vm3, %v7270_v21, -inf  ;;  %v5199_v32 = vadd.f32 %v5191_v61, %v20015_v36 }
0x3231   :  { %7273 = vmax.xlane.f32.xlu0 %v7272_v23  ;;  %v5208_v33 = vsel %vm236_vm0, %v5200_v30, 0.0 }
0x3232   :  { %v5205_v34 = vsel %vm236_vm0, %v5199_v32, 0.0 }
0x32bd   :  { %v7277_v11 = vpop.xlane.xlu1 %7276 }
0x32be   :  { %v7279_v13 = vsub.f32 %v7271_v20, %v7277_v11  ;;  %v7274_v24 = vpop.xlane.xlu0 %7273 }
0x32bf   :  { %v7278_v25 = vsub.f32 %v7270_v21, %v7274_v24 }
0x32c0   :  { %v7282_v26 = vmul.f32 1.442695, %v7279_v13 }
0x32c1   :  { %v7280_v27 = vmul.f32 1.442695, %v7278_v25 }
0x32c2   :  { %19041 = vpow2.f32 %v7282_v26 }
0x32c3   :  { %19043 = vpow2.f32 %v7280_v27  ;;  %v15215_v27 = vld [vmem:[%s21003_s22 + $0x1] ss:$0 sm:$0xff]  ;;  %s21030_s22 = sld [smem:[#allocation19_spill]] }
0x32cc   :  { %v19042_v15 = vpop.eup %19041 }
0x32cd   :  { %v19044_v18 = vpop.eup %19043  ;;  %v7287_v29 = vsel %vm636_vm3, %v19042_v15, 0.0 }
0x32ce   :  { %7288 = vadd.xlane.f32.xlu1 %v7287_v29  ;;  %v7284_v31 = vsel %vm636_vm3, %v19044_v18, 0.0 }
0x32cf   :  { %7285 = vadd.xlane.f32.xlu0 %v7284_v31 }
0x32d2   :  { %5209 = vadd.xlane.f32.xlu1 %v5208_v33  ;;  %v7516_v33 = vld [vmem:[%s21018_s1 + $0x8] sm:$0xff] }
0x32d3   :  { %5206 = vadd.xlane.f32.xlu0 %v5205_v34 }
0x335b   :  { %v7289_v2 = vpop.xlane.xlu1 %7288 }
0x335c   :  { %19045 = vrcp.f32 %v7289_v2  ;;  %v7286_v35 = vpop.xlane.xlu0 %7285  ;;  %v7518_v2 = vld [vmem:[%s21018_s1 + $0x18] sm:$0xff] }
0x335d   :  { %19047 = vrcp.f32 %v7286_v35  ;;  %v18373_v35 = vpack.c.bf16 %v7518_v2, %v7517_v0 }
0x335f   :  { %v5210_v45 = vpop.xlane.xlu1 %5209 }
0x3360   :  { %v5207_v47 = vpop.xlane.xlu0 %5206  ;;  %v5212_v49 = vmul.f32 0.03125, %v5210_v45 }
0x3361   :  { %v5211_v50 = vmul.f32 0.03125, %v5207_v47 }
0x3362   :  { %v5214_v57 = vsub.f32 %v5200_v30, %v5212_v49 }
0x3363   :  { %v5213_v41 = vsub.f32 %v5199_v32, %v5211_v50  ;;  %v7515_v32 = vld [vmem:[%s21018_s1] sm:$0xff] }
0x3364   :  { %v5216_v39 = vmul.f32 %v5214_v57, %v5214_v57  ;;  %v18369_v34 = vpack.c.bf16 %v7516_v33, %v7515_v32 }
0x3365   :  { %v5215_v1 = vmul.f32 %v5213_v41, %v5213_v41 }
0x3366   :  { %v19046_v42 = vpop.eup %19045  ;;  %v5220_v54 = vsel %vm236_vm0, %v5216_v39, 0.0  ;;  %18370 = vmatprep.subr.bf16.mxu1 %v18369_v34 }
0x3367   :  { %v19048_v37 = vpop.eup %19047  ;;  %v7293_v43 = vmul.f32 %v19046_v42, %v19042_v15  ;;  %v5217_v3 = vsel %vm236_vm0, %v5215_v1, 0.0  ;;  %v15216_v15 = vld [vmem:[%s21004_s23 + $0x1] ss:$0 sm:$0xff]  ;;  %v15341_v1 = vld [vmem:[%s21022_s11] ss:$0 sm:$0xff]  ;;  %s21031_s23 = sld [smem:[#allocation24_spill]] }
0x3368   :  { %v7292_v40 = vmul.f32 %v19048_v37, %v19044_v18  ;;  %v7699_v42 = vld [vmem:[%s21019_s2] sm:$0xff]  ;;  %v7700_v37 = vld [vmem:[%s21019_s2 + $0x8] sm:$0xff] }
0x336a   :  { %17210 = vmatprep.mubr.msk.f32.mxu1 %vm636_vm3, %v7292_v40  ;;  %v18385_v40 = vpack.c.bf16 %v7700_v37, %v7699_v42 }
0x336b   :  { %17211 = vmatmul.mubr.msk.f32.vlgmr.msra.gmra.mrb[74].mxu1 %vm636_vm3, %v7293_v43 }
0x336c   :  { %18372 = vmatpush3.bf16.msra.mxu1 %v18369_v34 }
0x336d   :  { %18374 = vmatprep.subr.bf16.mxu1 %v18373_v35 }
0x3370   :  { %18376 = vmatpush3.bf16.msra.mxu1 %v18373_v35 }
0x3371   :  { %18386 = vmatprep.subr.bf16.mxu1 %v18385_v40 }
0x343e   :  { %v17212_v36 = vpop.f32.mrb[74].mxu1 }
0x343f   :  { %v7366_v44 = vpop.f32.mrb[75].mxu1 }
0x3440   :  { %17215 = vmatprep.mubr.msk.f32.mxu0 %vm544_vm1, %v7366_v44 }
0x3441   :  { %17216 = vmatmul.mubr.msk.f32.vlgmr.msra.gmra.mrb[48].mxu0 %vm544_vm1, %v17212_v36 }
0x3514   :  { %v17217_v53 = vpop.f32.mrb[48].mxu0 }
0x3515   :  { %v7468_v46 = vadd.f32 %v17217_v53, %v15335_v52  ;;  %v7449_v51 = vpop.f32.mrb[49].mxu0 }
0x3516   :  { %v7467_v58 = vadd.f32 %v15335_v52, %v7449_v51  ;;  %v15336_v52 = vld [vmem:[%s21020_s7] ss:$0 sm:$0xff] }
0x3517   :  { %v7470_v59 = vadd.f32 %v7468_v46, %v20032_v38  ;;  %v7608_v38 = vld [vmem:[%s21017_s28 + $0x8] sm:$0xff]  ;;  %v15337_v51 = vld [vmem:[%s21021_s10] ss:$0 sm:$0xff] }
0x3518   :  { %v7469_v56 = vadd.f32 %v7467_v58, %v20026_v48  ;;  %v18377_v5 = vpack.c.bf16 %v7608_v38, %v7607_v4  ;;  %v7609_v48 = vld [vmem:[%s21017_s28 + $0x10] sm:$0xff] }
0x3519   :  { %v7476_v55 = vsel %vm236_vm0, %v7470_v59, 0.0  ;;  %v18381_v8 = vpack.c.bf16 %v7610_v6, %v7609_v48  ;;  %v15361_v48 = vld [vmem:[%s21017_s28 + $0x20] sm:$0xff]  ;;  %v15362_v6 = vld [vmem:[%s21017_s28 + $0x28] sm:$0xff] }
0x351a   :  { %7477 = vadd.xlane.f32.xlu1 %v7476_v55  ;;  %v7473_v62 = vsel %vm236_vm0, %v7469_v56, 0.0  ;;  %18378 = vmatprep.subr.bf16.mxu0 %v18377_v5 }
0x351b   :  { %7474 = vadd.xlane.f32.xlu0 %v7473_v62  ;;  %18380 = vmatpush3.bf16.msra.mxu0 %v18377_v5 }
0x351c   :  { %18382 = vmatprep.subr.bf16.mxu0 %v18381_v8 }
0x351e   :  { %5221 = vadd.xlane.f32.xlu1 %v5220_v54 }
0x351f   :  { %5218 = vadd.xlane.f32.xlu0 %v5217_v3  ;;  %18384 = vmatpush3.bf16.msra.mxu0 %v18381_v8  ;;  %v18411_v8 = vpack.c.bf16 %v15362_v6, %v15361_v48  ;;  %v15372_v48 = vld [vmem:[%s21019_s2 + $0x38] sm:$0xff] }
0x35a7   :  { %v7478_v7 = vpop.xlane.xlu1 %7477 }
0x35a8   :  { %v7480_v9 = vmul.f32 0.03125, %v7478_v7  ;;  %v7475_v10 = vpop.xlane.xlu0 %7474  ;;  %v15338_v7 = vld [vmem:[%s21023_s15] ss:$0 sm:$0xff] }
0x35a9   :  { %v7479_v12 = vmul.f32 0.03125, %v7475_v10  ;;  %v15363_v10 = vld [vmem:[%s21017_s28 + $0x30] sm:$0xff] }
0x35aa   :  { %v7482_v14 = vsub.f32 %v7470_v59, %v7480_v9  ;;  %v7701_v59 = vld [vmem:[%s21019_s2 + $0x10] sm:$0xff] }
0x35ab   :  { %v7481_v16 = vsub.f32 %v7469_v56, %v7479_v12  ;;  %v5222_v17 = vpop.xlane.xlu1 %5221  ;;  %v7702_v56 = vld [vmem:[%s21019_s2 + $0x18] sm:$0xff] }
0x35ac   :  { %v5224_v19 = vmul.f32 0.03125, %v5222_v17  ;;  %v5219_v20 = vpop.xlane.xlu0 %5218  ;;  %v7484_v21 = vmul.f32 %v7482_v14, %v7482_v14  ;;  %v18389_v62 = vpack.c.bf16 %v7702_v56, %v7701_v59  ;;  %v15364_v12 = vld [vmem:[%s21017_s28 + $0x38] sm:$0xff] }
0x35ad   :  { %v5223_v22 = vmul.f32 0.03125, %v5219_v20  ;;  %v7483_v23 = vmul.f32 %v7481_v16, %v7481_v16  ;;  %v15344_v20 = vld [vmem:[%s21024_s16] ss:$0 sm:$0xff]  ;;  %v15356_v59 = vld [vmem:[%s21018_s1 + $0x38] sm:$0xff] }
0x35ae   :  { %v5226_v11 = vadd.f32 1e-05, %v5224_v19  ;;  %v7488_v13 = vsel %vm236_vm0, %v7484_v21, 0.0  ;;  %v18415_v19 = vpack.c.bf16 %v15364_v12, %v15363_v10 }
0x35af   :  { %v5225_v24 = vadd.f32 1e-05, %v5223_v22  ;;  %7489 = vadd.xlane.f32.xlu1 %v7488_v13  ;;  %v7485_v25 = vsel %vm236_vm0, %v7483_v23, 0.0 }
0x35b0   :  { %19049 = vrsqrt.f32 %v5226_v11  ;;  %7486 = vadd.xlane.f32.xlu0 %v7485_v25  ;;  %v20300_v25 = vld [vmem:[%s21025_s18 + $0x8] sm:$0xff] }
0x35b1   :  { %19051 = vrsqrt.f32 %v5225_v24 }
0x35ba   :  { %v19050_v26 = vpop.eup %19049 }
0x35bb   :  { %v19052_v28 = vpop.eup %19051  ;;  %v5230_v60 = vmul.f32 %v19050_v26, %v5214_v57 }
0x35bc   :  { %v5229_v61 = vmul.f32 %v19052_v28, %v5213_v41  ;;  %v20303_v28 = vld [vmem:[%s21025_s18] sm:$0xff] }
0x35bd   :  { %v5238_v18 = vmul.f32 %v15215_v27, %v5230_v60 }
0x35be   :  { %v5237_v29 = vmul.f32 %v15215_v27, %v5229_v61 }
0x35bf   :  { %v20254_v31 = vadd.f32 %v15216_v15, %v5238_v18 }
0x35c0   :  { %v20252_v30 = vadd.f32 %v15216_v15, %v5237_v29  ;;  %v15366_v29 = vld [vmem:[%s21022_s11 + $0x1] ss:$0 sm:$0xff] }
0x35c2   :  { %17237 = vmatprep.mubr.msk.f32.mxu0 %vm236_vm0, %v20252_v30 }
0x35c3   :  { %17238 = vmatmul.mubr.msk.f32.vlgmr.msra.gmra.mrb[58].mxu0 %vm236_vm0, %v20254_v31 }
0x363c   :  { %v7490_v43 = vpop.xlane.xlu1 %7489 }
0x363d   :  { %v7492_v36 = vmul.f32 0.03125, %v7490_v43  ;;  %v7487_v44 = vpop.xlane.xlu0 %7486 }
0x363e   :  { %v7491_v45 = vmul.f32 0.03125, %v7487_v44 }
0x363f   :  { %v7494_v47 = vadd.f32 1e-05, %v7492_v36 }
0x3640   :  { %v7493_v49 = vadd.f32 1e-05, %v7491_v45 }
0x3641   :  { %19053 = vrsqrt.f32 %v7494_v47 }
0x3642   :  { %19055 = vrsqrt.f32 %v7493_v49 }
0x364b   :  { %v19054_v50 = vpop.eup %19053 }
0x364c   :  { %v19056_v53 = vpop.eup %19055  ;;  %v7498_v57 = vmul.f32 %v19054_v50, %v7482_v14 }
0x364d   :  { %v7497_v46 = vmul.f32 %v19056_v53, %v7481_v16  ;;  %v15354_v53 = vld [vmem:[%s21018_s1 + $0x28] sm:$0xff] }
0x364e   :  { %v7506_v41 = vmul.f32 %v15336_v52, %v7498_v57 }
0x364f   :  { %v7505_v58 = vmul.f32 %v15336_v52, %v7497_v46  ;;  %v15353_v52 = vld [vmem:[%s21018_s1 + $0x20] sm:$0xff] }
0x3650   :  { %v20272_v39 = vadd.f32 %v15337_v51, %v7506_v41  ;;  %v18403_v57 = vpack.c.bf16 %v15354_v53, %v15353_v52  ;;  %v15391_v52 = vld [vmem:[%s21018_s1 + $0x58] sm:$0xff] }
0x3651   :  { %v20270_v55 = vadd.f32 %v15337_v51, %v7505_v58  ;;  %v15355_v58 = vld [vmem:[%s21018_s1 + $0x30] sm:$0xff] }
0x3653   :  { %17226 = vmatprep.mubr.msk.f32.mxu1 %vm236_vm0, %v20270_v55 }
0x3654   :  { %17227 = vmatmul.mubr.msk.f32.vlgmr.msra.gmra.mrb[76].mxu1 %vm236_vm0, %v20272_v39 }
0x3655   :  { %18388 = vmatpush3.bf16.msra.mxu1 %v18385_v40  ;;  %17248 = vmatprep.mubr.msk.f32.mxu1 %vm236_vm0, %v20252_v30 }
0x3656   :  { %18390 = vmatprep.subr.bf16.mxu1 %v18389_v62 }
0x3659   :  { %18392 = vmatpush3.bf16.msra.mxu1 %v18389_v62 }
0x365c   :  { %17249 = vmatmul.mubr.msk.f32.vlgmr.msra.gmra.mrb[78].mxu1 %vm236_vm0, %v20254_v31 }
0x3696   :  { %v17239_v54 = vpop.f32.mrb[58].mxu0 }
0x3697   :  { %v7696_v3 = vadd.f32 %v17239_v54, %v15341_v1  ;;  %v7690_v4 = vpop.f32.mrb[59].mxu0  ;;  %v18407_v54 = vpack.c.bf16 %v15356_v59, %v15355_v58  ;;  %v15405_v58 = vld [vmem:[%s21019_s2 + $0x48] sm:$0xff] }
0x3698   :  { %v7691_v38 = vadd.f32 %v15341_v1, %v7690_v4  ;;  %v15370_v4 = vld [vmem:[%s21019_s2 + $0x28] sm:$0xff] }
0x369a   :  { %v18393_v5 = vpack.c.bf16 %v7696_v3, %v7691_v38  ;;  %v15369_v3 = vld [vmem:[%s21019_s2 + $0x20] sm:$0xff] }
0x369b   :  { %v18419_v38 = vpack.c.bf16 %v15370_v4, %v15369_v3  ;;  %v15396_v3 = vld [vmem:[%s21017_s28 + $0x40] sm:$0xff]  ;;  %v15397_v4 = vld [vmem:[%s21017_s28 + $0x48] sm:$0xff] }
0x369c   :  { %18395 = vmatprep.subr.msk.bf16.mxu0 %vm19608_vm2, %v18393_v5 }
0x369d   :  { %18398 = vmatpush3.bf16.xpose.msk.msra.mxu0 %vm19608_vm2, %v18393_v5  ;;  %v15371_v5 = vld [vmem:[%s21019_s2 + $0x30] sm:$0xff] }
0x369e   :  { %18412 = vmatprep.subr.bf16.mxu0 %v18411_v8  ;;  %v18423_v6 = vpack.c.bf16 %v15372_v48, %v15371_v5  ;;  %v18445_v48 = vpack.c.bf16 %v15397_v4, %v15396_v3  ;;  %v15438_v3 = vld [vmem:[%s21019_s2 + $0x68] sm:$0xff] }
0x3727   :  { %v17228_v9 = vpop.f32.mrb[76].mxu1 }
0x3728   :  { %v7598_v14 = vpop.f32.mrb[77].mxu1  ;;  %v7604_v17 = vadd.f32 %v17228_v9, %v15338_v7  ;;  %v15358_v9 = vld [vmem:[%s21023_s15 + $0x1] ss:$0 sm:$0xff] }
0x3729   :  { %v7599_v16 = vadd.f32 %v15338_v7, %v7598_v14 }
0x372b   :  { %17255 = vmatprep.mubr.msk.f32.mxu0 %vm544_vm1, %v7599_v16 }
0x372c   :  { %17256 = vmatmul.mubr.msk.f32.vlgmr.msra.gmra.mrb[60].mxu0 %vm544_vm1, %v7604_v17  ;;  %v15374_v17 = vld [vmem:[%s21024_s16 + $0x1] ss:$0 sm:$0xff] }
0x372d   :  { %18414 = vmatpush3.bf16.msra.mxu0 %v18411_v8  ;;  %17284 = vmatprep.mubr.msk.f32.mxu0 %vm236_vm0, %v20252_v30 }
0x372e   :  { %18416 = vmatprep.subr.bf16.mxu0 %v18415_v19 }
0x372f   :  { %v17250_v21 = vpop.f32.mrb[78].mxu1 }
0x3730   :  { %v7782_v22 = vadd.f32 %v17250_v21, %v15344_v20  ;;  %v7776_v23 = vpop.f32.mrb[79].mxu1 }
0x3731   :  { %v7777_v11 = vadd.f32 %v15344_v20, %v7776_v23  ;;  %18418 = vmatpush3.bf16.msra.mxu0 %v18415_v19 }
0x3733   :  { %v18399_v13 = vpack.c.bf16 %v7782_v22, %v7777_v11 }
0x3734   :  { %17285 = vmatmul.mubr.msk.f32.vlgmr.msra.gmra.mrb[62].mxu0 %vm236_vm0, %v20254_v31 }
0x3735   :  { %18400 = vmatprep.subr.bf16.mxu1 %v18399_v13 }
0x3736   :  { %18402 = vmatpush3.bf16.msra.mxu1 %v18399_v13 }
0x3737   :  { %18404 = vmatprep.subr.bf16.mxu1 %v18403_v57 }
0x37ff   :  { %v17257_v24 = vpop.f32.mrb[60].mxu0 }
0x3800   :  { %v7873_v26 = vmul.f32 0.35355338, %v17257_v24  ;;  %v7863_v27 = vpop.f32.mrb[61].mxu0 }
0x3801   :  { %v7872_v60 = vmul.f32 0.35355338, %v7863_v27 }
0x3802   :  { %v7875_v61 = vadd.f32 %v7873_v26, %v20300_v25 }
0x3803   :  { %v7874_v15 = vadd.f32 %v7872_v60, %v20303_v28 }
0x3804   :  { %v7879_v18 = vsel %vm636_vm3, %v7875_v61, -inf }
0x3805   :  { %7880 = vmax.xlane.f32.xlu1 %v7879_v18  ;;  %v7876_v32 = vsel %vm636_vm3, %v7874_v15, -inf }
0x3806   :  { %7877 = vmax.xlane.f32.xlu0 %v7876_v32 }
0x3807   :  { %v17286_v33 = vpop.f32.mrb[62].mxu0 }
0x3808   :  { %v8153_v34 = vadd.f32 %v17286_v33, %v15366_v29  ;;  %v8147_v0 = vpop.f32.mrb[63].mxu0 }
0x3809   :  { %v8148_v2 = vadd.f32 %v15366_v29, %v8147_v0 }
0x380b   :  { %v18427_v35 = vpack.c.bf16 %v8153_v34, %v8148_v2 }
0x380d   :  { %18429 = vmatprep.subr.msk.bf16.mxu0 %vm19608_vm2, %v18427_v35 }
0x380e   :  { %18432 = vmatpush3.bf16.xpose.msk.msra.mxu0 %vm19608_vm2, %v18427_v35 }
0x3892   :  { %v7881_v42 = vpop.xlane.xlu1 %7880 }
0x3893   :  { %v7883_v37 = vsub.f32 %v7875_v61, %v7881_v42  ;;  %v7878_v40 = vpop.xlane.xlu0 %7877 }
0x3894   :  { %v7882_v43 = vsub.f32 %v7874_v15, %v7878_v40  ;;  %v15388_v40 = vld [vmem:[%s21018_s1 + $0x40] sm:$0xff] }
0x3895   :  { %v7886_v36 = vmul.f32 1.442695, %v7883_v37 }
0x3896   :  { %v7884_v44 = vmul.f32 1.442695, %v7882_v43  ;;  %v15389_v43 = vld [vmem:[%s21018_s1 + $0x48] sm:$0xff] }
0x3897   :  { %19057 = vpow2.f32 %v7886_v36  ;;  %v18437_v36 = vpack.c.bf16 %v15389_v43, %v15388_v40 }
0x3898   :  { %19059 = vpow2.f32 %v7884_v44  ;;  %v15383_v44 = vld [vmem:[%s21026_s0 + $0x8] sm:$0xff] }
0x3899   :  { %17312 = vmatprep.subr.mxu0 %v15383_v44 }
0x38a1   :  { %v19058_v45 = vpop.eup %19057 }
0x38a2   :  { %v19060_v47 = vpop.eup %19059  ;;  %v7891_v49 = vsel %vm636_vm3, %v19058_v45, 0.0 }
0x38a3   :  { %7892 = vadd.xlane.f32.xlu1 %v7891_v49  ;;  %v7888_v50 = vsel %vm636_vm3, %v19060_v47, 0.0 }
0x38a4   :  { %7889 = vadd.xlane.f32.xlu0 %v7888_v50  ;;  %v15390_v50 = vld [vmem:[%s21018_s1 + $0x50] sm:$0xff] }
0x3930   :  { %v7893_v46 = vpop.xlane.xlu1 %7892 }
0x3931   :  { %19061 = vrcp.f32 %v7893_v46  ;;  %v7890_v51 = vpop.xlane.xlu0 %7889 }
0x3932   :  { %19063 = vrcp.f32 %v7890_v51  ;;  %v18441_v51 = vpack.c.bf16 %v15391_v52, %v15390_v50  ;;  %v15422_v50 = vld [vmem:[%s21018_s1 + $0x68] sm:$0xff] }
0x393b   :  { %v19062_v41 = vpop.eup %19061 }
0x393c   :  { %v19064_v56 = vpop.eup %19063  ;;  %v7897_v1 = vmul.f32 %v19062_v41, %v19058_v45  ;;  %v15404_v41 = vld [vmem:[%s21019_s2 + $0x40] sm:$0xff] }
0x393d   :  { %v7896_v62 = vmul.f32 %v19064_v56, %v19060_v47  ;;  %v18453_v59 = vpack.c.bf16 %v15405_v58, %v15404_v41  ;;  %v15406_v56 = vld [vmem:[%s21019_s2 + $0x50] sm:$0xff]  ;;  %v15424_v58 = vld [vmem:[%s21018_s1 + $0x78] sm:$0xff] }
0x393e   :  { %v15423_v41 = vld [vmem:[%s21018_s1 + $0x70] sm:$0xff] }
0x393f   :  { %17262 = vmatprep.mubr.msk.f32.mxu1 %vm636_vm3, %v7896_v62  ;;  %v15407_v62 = vld [vmem:[%s21019_s2 + $0x58] sm:$0xff] }
0x3940   :  { %17263 = vmatmul.mubr.msk.f32.vlgmr.msra.gmra.mrb[80].mxu1 %vm636_vm3, %v7897_v1  ;;  %v18457_v1 = vpack.c.bf16 %v15407_v62, %v15406_v56 }
0x3941   :  { %18406 = vmatpush3.bf16.msra.mxu1 %v18403_v57  ;;  %17273 = vmatprep.mubr.msk.f32.mxu1 %vm236_vm0, %v20270_v55 }
0x3942   :  { %18408 = vmatprep.subr.bf16.mxu1 %v18407_v54 }
0x3945   :  { %18410 = vmatpush3.bf16.msra.mxu1 %v18407_v54  ;;  %v7979_v54 = vld [vmem:[%s21026_s0] sm:$0xff] }
0x3946   :  { %18420 = vmatprep.subr.bf16.mxu1 %v18419_v38 }
0x3948   :  { %17274 = vmatmul.mubr.msk.f32.vlgmr.msra.gmra.mrb[82].mxu1 %vm236_vm0, %v20272_v39 }
0x3949   :  { %18422 = vmatpush3.bf16.msra.mxu1 %v18419_v38  ;;  %17295 = vmatprep.mubr.msk.f32.mxu1 %vm236_vm0, %v20252_v30 }
0x394a   :  { %18424 = vmatprep.subr.bf16.mxu1 %v18423_v6 }
0x394d   :  { %18426 = vmatpush3.bf16.msra.mxu1 %v18423_v6  ;;  %v15393_v6 = vld [vmem:[%s21023_s15 + $0x2] ss:$0 sm:$0xff] }
0x3950   :  { %17296 = vmatmul.mubr.msk.f32.vlgmr.msra.gmra.mrb[84].mxu1 %vm236_vm0, %v20254_v31 }
0x3a13   :  { %v20334_v8 = vpop.f32.mrb[80].mxu1 }
0x3a14   :  { %v20336_v7 = vpop.f32.mrb[81].mxu1 }
0x3a1b   :  { %v17275_v10 = vpop.f32.mrb[82].mxu1 }
0x3a1c   :  { %v8059_v12 = vpop.f32.mrb[83].mxu1  ;;  %v8065_v16 = vadd.f32 %v17275_v10, %v15358_v9  ;;  %v15399_v10 = vld [vmem:[%s21017_s28 + $0x58] sm:$0xff] }
0x3a1d   :  { %v8060_v14 = vadd.f32 %v15358_v9, %v8059_v12  ;;  %v15398_v9 = vld [vmem:[%s21017_s28 + $0x50] sm:$0xff] }
0x3a1f   :  { %17302 = vmatprep.mubr.msk.f32.mxu0 %vm544_vm1, %v8060_v14 }
0x3a20   :  { %17303 = vmatmul.mubr.msk.f32.vlgmr.msra.gmra.mrb[64].mxu0 %vm544_vm1, %v8065_v16 }
0x3a21   :  { %17313 = vmatpush3.msra.mxu0 %v15383_v44 }
0x3a22   :  { %17317 = vmatprep.subr.mxu0 %v7979_v54 }
0x3a23   :  { %v17297_v19 = vpop.f32.mrb[84].mxu1 }
0x3a24   :  { %v8241_v20 = vadd.f32 %v17297_v19, %v15374_v17  ;;  %v8235_v21 = vpop.f32.mrb[85].mxu1  ;;  %v15409_v19 = vld [vmem:[%s21024_s16 + $0x2] ss:$0 sm:$0xff] }
0x3a25   :  { %v8236_v22 = vadd.f32 %v15374_v17, %v8235_v21  ;;  %v18449_v17 = vpack.c.bf16 %v15399_v10, %v15398_v9  ;;  %v15430_v9 = vld [vmem:[%s21017_s28 + $0x68] sm:$0xff] }
0x3a27   :  { %v18433_v23 = vpack.c.bf16 %v8241_v20, %v8236_v22 }
0x3a29   :  { %18434 = vmatprep.subr.bf16.mxu1 %v18433_v23 }
0x3a2a   :  { %18436 = vmatpush3.bf16.msra.mxu1 %v18433_v23 }
0x3a2b   :  { %18438 = vmatprep.subr.bf16.mxu1 %v18437_v36 }
0x3af3   :  { %v17304_v11 = vpop.f32.mrb[64].mxu0 }
0x3af4   :  { %v8332_v13 = vmul.f32 0.35355338, %v17304_v11  ;;  %v8322_v24 = vpop.f32.mrb[65].mxu0 }
0x3af5   :  { %v8331_v26 = vmul.f32 0.35355338, %v8322_v24 }
0x3af6   :  { %v8334_v27 = vadd.f32 %v8332_v13, %v20300_v25 }
0x3af7   :  { %v8333_v60 = vadd.f32 %v8331_v26, %v20303_v28 }
0x3af8   :  { %v8338_v61 = vsel %vm636_vm3, %v8334_v27, -inf }
0x3af9   :  { %8339 = vmax.xlane.f32.xlu1 %v8338_v61  ;;  %v8335_v15 = vsel %vm636_vm3, %v8333_v60, -inf }
0x3afa   :  { %8336 = vmax.xlane.f32.xlu0 %v8335_v15 }
0x3b86   :  { %v8340_v18 = vpop.xlane.xlu1 %8339 }
0x3b87   :  { %v8342_v29 = vsub.f32 %v8334_v27, %v8340_v18  ;;  %v8337_v32 = vpop.xlane.xlu0 %8336 }
0x3b88   :  { %v8341_v33 = vsub.f32 %v8333_v60, %v8337_v32 }
0x3b89   :  { %v8345_v34 = vmul.f32 1.442695, %v8342_v29 }
0x3b8a   :  { %v8343_v0 = vmul.f32 1.442695, %v8341_v33 }
0x3b8b   :  { %19065 = vpow2.f32 %v8345_v34 }
0x3b8c   :  { %19067 = vpow2.f32 %v8343_v0 }
0x3b95   :  { %v19066_v2 = vpop.eup %19065 }
0x3b96   :  { %v19068_v35 = vpop.eup %19067  ;;  %v8350_v42 = vsel %vm636_vm3, %v19066_v2, 0.0 }
0x3b97   :  { %8351 = vadd.xlane.f32.xlu1 %v8350_v42  ;;  %v8347_v37 = vsel %vm636_vm3, %v19068_v35, 0.0 }
0x3b98   :  { %8348 = vadd.xlane.f32.xlu0 %v8347_v37 }
0x3c24   :  { %v8352_v45 = vpop.xlane.xlu1 %8351 }
0x3c25   :  { %19069 = vrcp.f32 %v8352_v45  ;;  %v8349_v47 = vpop.xlane.xlu0 %8348 }
0x3c26   :  { %19071 = vrcp.f32 %v8349_v47 }
0x3c2f   :  { %v19070_v49 = vpop.eup %19069 }
0x3c30   :  { %v19072_v53 = vpop.eup %19071  ;;  %v8356_v46 = vmul.f32 %v19070_v49, %v19066_v2  ;;  %v15421_v49 = vld [vmem:[%s21018_s1 + $0x60] sm:$0xff] }
0x3c31   :  { %v8355_v57 = vmul.f32 %v19072_v53, %v19068_v35  ;;  %v18471_v52 = vpack.c.bf16 %v15422_v50, %v15421_v49  ;;  %v15418_v53 = vld [vmem:[%s21026_s0 + $0x10] sm:$0xff] }
0x3c33   :  { %17309 = vmatprep.mubr.msk.f32.mxu1 %vm636_vm3, %v8355_v57 }
0x3c34   :  { %17310 = vmatmul.mubr.msk.f32.vlgmr.msra.gmra.mrb[86].mxu1 %vm636_vm3, %v8356_v46 }
0x3c35   :  { %18440 = vmatpush3.bf16.msra.mxu1 %v18437_v36  ;;  %17330 = vmatprep.mubr.msk.f32.mxu1 %vm236_vm0, %v20270_v55 }
0x3c36   :  { %18442 = vmatprep.subr.bf16.mxu1 %v18441_v51 }
0x3c39   :  { %18444 = vmatpush3.bf16.msra.mxu1 %v18441_v51 }
0x3c3a   :  { %18454 = vmatprep.subr.bf16.mxu1 %v18453_v59 }
0x3c3c   :  { %17331 = vmatmul.mubr.msk.f32.vlgmr.msra.gmra.mrb[88].mxu1 %vm236_vm0, %v20272_v39 }
0x3c3d   :  { %18456 = vmatpush3.bf16.msra.mxu1 %v18453_v59  ;;  %17352 = vmatprep.mubr.msk.f32.mxu1 %vm236_vm0, %v20252_v30 }
0x3c3e   :  { %18458 = vmatprep.subr.bf16.mxu1 %v18457_v1 }
0x3c41   :  { %18460 = vmatpush3.bf16.msra.mxu1 %v18457_v1  ;;  %v18475_v1 = vpack.c.bf16 %v15424_v58, %v15423_v41 }
0x3c44   :  { %17353 = vmatmul.mubr.msk.f32.vlgmr.msra.gmra.mrb[90].mxu1 %vm236_vm0, %v20254_v31 }
0x3d07   :  { %v17311_v38 = vpop.f32.mrb[86].mxu1 }
0x3d08   :  { %v8429_v5 = vpop.f32.mrb[87].mxu1 }
0x3d09   :  { %17314 = vmatprep.mubr.msk.f32.mxu0 %vm544_vm1, %v8429_v5  ;;  %v15440_v5 = vld [vmem:[%s21019_s2 + $0x78] sm:$0xff] }
0x3d0a   :  { %17315 = vmatmul.mubr.msk.f32.vlgmr.msra.gmra.mrb[66].mxu0 %vm544_vm1, %v17311_v38  ;;  %v15439_v38 = vld [vmem:[%s21019_s2 + $0x70] sm:$0xff] }
0x3d0b   :  { %17318 = vmatpush3.msra.mxu0 %v7979_v54  ;;  %17319 = vmatprep.mubr.msk.f32.mxu0 %vm544_vm1, %v20336_v7  ;;  %v15437_v54 = vld [vmem:[%s21019_s2 + $0x60] sm:$0xff] }
0x3d0c   :  { %18446 = vmatprep.subr.bf16.mxu0 %v18445_v48  ;;  %v18487_v4 = vpack.c.bf16 %v15438_v3, %v15437_v54 }
0x3d0f   :  { %v17332_v12 = vpop.f32.mrb[88].mxu1 }
0x3d10   :  { %v8687_v14 = vadd.f32 %v17332_v12, %v15393_v6  ;;  %v8681_v16 = vpop.f32.mrb[89].mxu1  ;;  %v15431_v12 = vld [vmem:[%s21017_s28 + $0x70] sm:$0xff] }
0x3d11   :  { %v8682_v22 = vadd.f32 %v15393_v6, %v8681_v16  ;;  %v15429_v6 = vld [vmem:[%s21017_s28 + $0x60] sm:$0xff] }
0x3d12   :  { %17320 = vmatmul.mubr.msk.f32.vlgmr.msra.gmra.mrb[66].mxu0 %vm544_vm1, %v20334_v8  ;;  %v15401_v8 = vld [vmem:[%s21022_s11 + $0x2] ss:$0 sm:$0xff]  ;;  %v18479_v10 = vpack.c.bf16 %v15430_v9, %v15429_v6 }
0x3d13   :  { %18448 = vmatpush3.bf16.msra.mxu0 %v18445_v48  ;;  %17341 = vmatprep.mubr.msk.f32.mxu0 %vm236_vm0, %v20252_v30  ;;  %v18491_v48 = vpack.c.bf16 %v15440_v5, %v15439_v38 }
0x3d14   :  { %18450 = vmatprep.subr.bf16.mxu0 %v18449_v17 }
0x3d17   :  { %18452 = vmatpush3.bf16.msra.mxu0 %v18449_v17  ;;  %v17354_v7 = vpop.f32.mrb[90].mxu1 }
0x3d18   :  { %v8863_v20 = vadd.f32 %v17354_v7, %v15409_v19  ;;  %v8857_v21 = vpop.f32.mrb[91].mxu1  ;;  %v15426_v7 = vld [vmem:[%s21023_s15 + $0x3] ss:$0 sm:$0xff] }
0x3d19   :  { %v8858_v23 = vadd.f32 %v15409_v19, %v8857_v21 }
0x3d1a   :  { %17342 = vmatmul.mubr.msk.f32.vlgmr.msra.gmra.mrb[68].mxu0 %vm236_vm0, %v20254_v31 }
0x3d1b   :  { %v18467_v11 = vpack.c.bf16 %v8863_v20, %v8858_v23  ;;  %17359 = vmatprep.mubr.msk.f32.mxu0 %vm544_vm1, %v8682_v22 }
0x3d1d   :  { %18468 = vmatprep.subr.bf16.mxu1 %v18467_v11 }
0x3d1e   :  { %18470 = vmatpush3.bf16.msra.mxu1 %v18467_v11  ;;  %v15442_v11 = vld [vmem:[%s21024_s16 + $0x3] ss:$0 sm:$0xff] }
0x3d1f   :  { %18472 = vmatprep.subr.bf16.mxu1 %v18471_v52 }
0x3ded   :  { %v17343_v13 = vpop.f32.mrb[68].mxu0 }
0x3dee   :  { %v8775_v24 = vadd.f32 %v17343_v13, %v15401_v8  ;;  %v8769_v26 = vpop.f32.mrb[69].mxu0 }
0x3def   :  { %v8770_v27 = vadd.f32 %v15401_v8, %v8769_v26 }
0x3df1   :  { %v18461_v60 = vpack.c.bf16 %v8775_v24, %v8770_v27 }
0x3df3   :  { %18463 = vmatprep.subr.msk.bf16.mxu0 %vm19608_vm2, %v18461_v60 }
0x3df4   :  { %18466 = vmatpush3.bf16.xpose.msk.msra.mxu0 %vm19608_vm2, %v18461_v60  ;;  %v15434_v60 = vld [vmem:[%s21022_s11 + $0x3] ss:$0 sm:$0xff] }
0x3df5   :  { %17369 = vmatprep.subr.mxu0 %v15418_v53 }
0x3dfb   :  { %17360 = vmatmul.mubr.msk.f32.vlgmr.msra.gmra.mrb[70].mxu0 %vm544_vm1, %v8687_v14  ;;  %v15432_v14 = vld [vmem:[%s21017_s28 + $0x78] sm:$0xff] }
0x3dfc   :  { %17370 = vmatpush3.msra.mxu0 %v15418_v53  ;;  %v18483_v19 = vpack.c.bf16 %v15432_v14, %v15431_v12  ;;  %v15451_v53 = vld [vmem:[%s21026_s0 + $0x18] sm:$0xff] }
0x3dfd   :  { %18480 = vmatprep.subr.bf16.mxu0 %v18479_v10 }
0x3ece   :  { %v17361_v61 = vpop.f32.mrb[70].mxu0 }
0x3ecf   :  { %v8954_v15 = vmul.f32 0.35355338, %v17361_v61  ;;  %v8944_v18 = vpop.f32.mrb[71].mxu0 }
0x3ed0   :  { %v8953_v29 = vmul.f32 0.35355338, %v8944_v18 }
0x3ed1   :  { %v8956_v32 = vadd.f32 %v8954_v15, %v20300_v25 }
0x3ed2   :  { %v8955_v33 = vadd.f32 %v8953_v29, %v20303_v28 }
0x3ed3   :  { %v8960_v34 = vsel %vm636_vm3, %v8956_v32, -inf }
0x3ed4   :  { %8961 = vmax.xlane.f32.xlu1 %v8960_v34  ;;  %v8957_v0 = vsel %vm636_vm3, %v8955_v33, -inf }
0x3ed5   :  { %8958 = vmax.xlane.f32.xlu0 %v8957_v0 }
0x3f61   :  { %v8962_v2 = vpop.xlane.xlu1 %8961 }
0x3f62   :  { %v8964_v35 = vsub.f32 %v8956_v32, %v8962_v2  ;;  %v8959_v42 = vpop.xlane.xlu0 %8958 }
0x3f63   :  { %v8963_v37 = vsub.f32 %v8955_v33, %v8959_v42 }
0x3f64   :  { %v8967_v40 = vmul.f32 1.442695, %v8964_v35 }
0x3f65   :  { %v8965_v43 = vmul.f32 1.442695, %v8963_v37 }
0x3f66   :  { %19073 = vpow2.f32 %v8967_v40 }
0x3f67   :  { %19075 = vpow2.f32 %v8965_v43 }
0x3f70   :  { %v19074_v36 = vpop.eup %19073 }
0x3f71   :  { %v19076_v44 = vpop.eup %19075  ;;  %v8972_v45 = vsel %vm636_vm3, %v19074_v36, 0.0 }
0x3f72   :  { %8973 = vadd.xlane.f32.xlu1 %v8972_v45  ;;  %v8969_v47 = vsel %vm636_vm3, %v19076_v44, 0.0 }
0x3f73   :  { %8970 = vadd.xlane.f32.xlu0 %v8969_v47 }
0x3fff   :  { %v8974_v57 = vpop.xlane.xlu1 %8973 }
0x4000   :  { %19077 = vrcp.f32 %v8974_v57  ;;  %v8971_v46 = vpop.xlane.xlu0 %8970 }
0x4001   :  { %19079 = vrcp.f32 %v8971_v46 }
0x400a   :  { %v19078_v51 = vpop.eup %19077 }
0x400b   :  { %v19080_v59 = vpop.eup %19079  ;;  %v8978_v62 = vmul.f32 %v19078_v51, %v19074_v36 }
0x400c   :  { %v8977_v56 = vmul.f32 %v19080_v59, %v19076_v44 }
0x400e   :  { %17366 = vmatprep.mubr.msk.f32.mxu1 %vm636_vm3, %v8977_v56 }
0x400f   :  { %17367 = vmatmul.mubr.msk.f32.vlgmr.msra.gmra.mrb[92].mxu1 %vm636_vm3, %v8978_v62 }
0x4010   :  { %18474 = vmatpush3.bf16.msra.mxu1 %v18471_v52  ;;  %17382 = vmatprep.mubr.msk.f32.mxu1 %vm236_vm0, %v20270_v55 }
0x4011   :  { %18476 = vmatprep.subr.bf16.mxu1 %v18475_v1 }
0x4014   :  { %18478 = vmatpush3.bf16.msra.mxu1 %v18475_v1  ;;  %v15454_v1 = vld [vmem:[%s21027_s5] ss:$0 sm:$0xff] }
0x4015   :  { %18488 = vmatprep.subr.bf16.mxu1 %v18487_v4 }
0x4017   :  { %17383 = vmatmul.mubr.msk.f32.vlgmr.msra.gmra.mrb[94].mxu1 %vm236_vm0, %v20272_v39 }
0x4018   :  { %18490 = vmatpush3.bf16.msra.mxu1 %v18487_v4  ;;  %17404 = vmatprep.mubr.msk.f32.mxu1 %vm236_vm0, %v20252_v30 }
0x4019   :  { %18492 = vmatprep.subr.bf16.mxu1 %v18491_v48 }
0x401c   :  { %18494 = vmatpush3.bf16.msra.mxu1 %v18491_v48 }
0x401f   :  { %17405 = vmatmul.mubr.msk.f32.vlgmr.msra.gmra.mrb[96].mxu1 %vm236_vm0, %v20254_v31 }
0x40e2   :  { %v17368_v16 = vpop.f32.mrb[92].mxu1 }
0x40e3   :  { %v9051_v17 = vpop.f32.mrb[93].mxu1 }
0x40e4   :  { %17371 = vmatprep.mubr.msk.f32.mxu0 %vm544_vm1, %v9051_v17 }
0x40e5   :  { %17372 = vmatmul.mubr.msk.f32.vlgmr.msra.gmra.mrb[66].mxu0 %vm544_vm1, %v17368_v16 }
0x40e6   :  { %18482 = vmatpush3.bf16.msra.mxu0 %v18479_v10  ;;  %17393 = vmatprep.mubr.msk.f32.mxu0 %vm236_vm0, %v20252_v30 }
0x40e7   :  { %18484 = vmatprep.subr.bf16.mxu0 %v18483_v19 }
0x40ea   :  { %v17384_v20 = vpop.f32.mrb[94].mxu1  ;;  %18486 = vmatpush3.bf16.msra.mxu0 %v18483_v19 }
0x40eb   :  { %v9230_v21 = vadd.f32 %v17384_v20, %v15426_v7  ;;  %v9224_v22 = vpop.f32.mrb[95].mxu1 }
0x40ec   :  { %v9225_v23 = vadd.f32 %v15426_v7, %v9224_v22  ;;  %v9744_v22 = vld [vmem:[%s21028_s30 + $0x8] sm:$0xff] }
0x40ed   :  { %17394 = vmatmul.mubr.msk.f32.vlgmr.msra.gmra.mrb[72].mxu0 %vm236_vm0, %v20254_v31 }
0x40ee   :  { %17411 = vmatprep.mubr.msk.f32.mxu0 %vm544_vm1, %v9225_v23 }
0x40f2   :  { %v17406_v8 = vpop.f32.mrb[96].mxu1 }
0x40f3   :  { %v9406_v13 = vadd.f32 %v17406_v8, %v15442_v11  ;;  %v9400_v24 = vpop.f32.mrb[97].mxu1  ;;  %v9746_v8 = vld [vmem:[%s21028_s30 + $0x18] sm:$0xff] }
0x40f4   :  { %v9401_v26 = vadd.f32 %v15442_v11, %v9400_v24  ;;  %v9745_v11 = vld [vmem:[%s21028_s30 + $0x10] sm:$0xff] }
0x40f6   :  { %v18501_v27 = vpack.c.bf16 %v9406_v13, %v9401_v26  ;;  %v18509_v13 = vpack.c.bf16 %v9746_v8, %v9745_v11 }
0x40f8   :  { %18502 = vmatprep.subr.bf16.mxu1 %v18501_v27 }
0x40f9   :  { %18504 = vmatpush3.bf16.msra.mxu1 %v18501_v27 }
0x41c0   :  { %v17395_v61 = vpop.f32.mrb[72].mxu0 }
0x41c1   :  { %v9318_v15 = vadd.f32 %v17395_v61, %v15434_v60  ;;  %v9312_v18 = vpop.f32.mrb[73].mxu0 }
0x41c2   :  { %v9313_v29 = vadd.f32 %v15434_v60, %v9312_v18 }
0x41c4   :  { %v18495_v32 = vpack.c.bf16 %v9318_v15, %v9313_v29  ;;  %v15455_v29 = vld [vmem:[%s21029_s12] ss:$0 sm:$0xff] }
0x41c6   :  { %18497 = vmatprep.subr.msk.bf16.mxu0 %vm19608_vm2, %v18495_v32 }
0x41c7   :  { %18500 = vmatpush3.bf16.xpose.msk.msra.mxu0 %vm19608_vm2, %v18495_v32 }
0x41c8   :  { %17421 = vmatprep.subr.mxu0 %v15451_v53 }
0x41ce   :  { %17412 = vmatmul.mubr.msk.f32.vlgmr.msra.gmra.mrb[74].mxu0 %vm544_vm1, %v9230_v21  ;;  %v9743_v21 = vld [vmem:[%s21028_s30] sm:$0xff] }
0x41cf   :  { %17422 = vmatpush3.msra.mxu0 %v15451_v53  ;;  %v18505_v23 = vpack.c.bf16 %v9744_v22, %v9743_v21 }
0x41d1   :  { %18506 = vmatprep.subr.bf16.mxu1 %v18505_v23 }
0x42a1   :  { %v17413_v33 = vpop.f32.mrb[74].mxu0 }
0x42a2   :  { %v9497_v34 = vmul.f32 0.35355338, %v17413_v33  ;;  %v9487_v0 = vpop.f32.mrb[75].mxu0 }
0x42a3   :  { %v9496_v2 = vmul.f32 0.35355338, %v9487_v0  ;;  %v15456_v0 = vld [vmem:[%s21030_s22] ss:$0 sm:$0xff] }
0x42a4   :  { %v9499_v35 = vadd.f32 %v9497_v34, %v20300_v25 }
0x42a5   :  { %v9498_v42 = vadd.f32 %v9496_v2, %v20303_v28 }
0x42a6   :  { %v9503_v37 = vsel %vm636_vm3, %v9499_v35, -inf }
0x42a7   :  { %9504 = vmax.xlane.f32.xlu1 %v9503_v37  ;;  %v9500_v40 = vsel %vm636_vm3, %v9498_v42, -inf }
0x42a8   :  { %9501 = vmax.xlane.f32.xlu0 %v9500_v40  ;;  %v9853_v40 = vld [vmem:[%s21031_s23] sm:$0xff] }
0x4334   :  { %v9505_v43 = vpop.xlane.xlu1 %9504 }
0x4335   :  { %v9507_v36 = vsub.f32 %v9499_v35, %v9505_v43  ;;  %v9502_v44 = vpop.xlane.xlu0 %9501  ;;  %v9854_v43 = vld [vmem:[%s21031_s23 + $0x8] sm:$0xff] }
0x4336   :  { %v9506_v45 = vsub.f32 %v9498_v42, %v9502_v44  ;;  %v9855_v44 = vld [vmem:[%s21031_s23 + $0x10] sm:$0xff] }
0x4337   :  { %v9510_v47 = vmul.f32 1.442695, %v9507_v36  ;;  %v18513_v36 = vpack.c.bf16 %v9854_v43, %v9853_v40  ;;  %v15468_v40 = vld [vmem:[%s21006_s17 + $0x98] sm:$0xff] }
0x4338   :  { %v9508_v49 = vmul.f32 1.442695, %v9506_v45  ;;  %v9856_v45 = vld [vmem:[%s21031_s23 + $0x18] sm:$0xff] }
0x4339   :  { %19081 = vpow2.f32 %v9510_v47  ;;  %18514 = vmatprep.subr.bf16.mxu0 %v18513_v36  ;;  %v18517_v47 = vpack.c.bf16 %v9856_v45, %v9855_v44  ;;  %v15484_v44 = vld [vmem:[%s21010_s8 + $0x98] sm:$0xff] }
0x433a   :  { %19083 = vpow2.f32 %v9508_v49  ;;  %v9857_v49 = vld [vmem:[%s21031_s23 + $0x20] sm:$0xff] }
0x4343   :  { %v19082_v50 = vpop.eup %19081 }
0x4344   :  { %v19084_v52 = vpop.eup %19083  ;;  %v9515_v25 = vsel %vm636_vm3, %v19082_v50, 0.0 }
0x4345   :  { %9516 = vadd.xlane.f32.xlu1 %v9515_v25  ;;  %v9512_v28 = vsel %vm636_vm3, %v19084_v52, 0.0  ;;  %v9859_v25 = vld [vmem:[%s21031_s23 + $0x30] sm:$0xff] }
0x4346   :  { %9513 = vadd.xlane.f32.xlu0 %v9512_v28  ;;  %v9860_v28 = vld [vmem:[%s21031_s23 + $0x38] sm:$0xff] }
0x4347   :  { %v18525_v53 = vpack.c.bf16 %v9860_v28, %v9859_v25 }
0x43d2   :  { %v9517_v57 = vpop.xlane.xlu1 %9516 }
0x43d3   :  { %19085 = vrcp.f32 %v9517_v57  ;;  %v9514_v46 = vpop.xlane.xlu0 %9513  ;;  %v15457_v57 = vld [vmem:[%s21032_s13] ss:$0 sm:$0xff] }
0x43d4   :  { %19087 = vrcp.f32 %v9514_v46 }
0x43dd   :  { %v19086_v51 = vpop.eup %19085 }
0x43de   :  { %v19088_v41 = vpop.eup %19087  ;;  %v9521_v59 = vmul.f32 %v19086_v51, %v19082_v50  ;;  %v9858_v50 = vld [vmem:[%s21031_s23 + $0x28] sm:$0xff] }
0x43df   :  { %v9520_v58 = vmul.f32 %v19088_v41, %v19084_v52  ;;  %v18521_v52 = vpack.c.bf16 %v9858_v50, %v9857_v49  ;;  %v15474_v49 = vld [vmem:[%s21009_s3 + $0x88] sm:$0xff] }
0x43e1   :  { %17418 = vmatprep.mubr.msk.f32.mxu1 %vm636_vm3, %v9520_v58 }
0x43e2   :  { %17419 = vmatmul.mubr.msk.f32.vlgmr.msra.gmra.mrb[98].mxu1 %vm636_vm3, %v9521_v59 }
0x43e3   :  { %18508 = vmatpush3.bf16.msra.mxu1 %v18505_v23 }
0x43e4   :  { %18510 = vmatprep.subr.bf16.mxu1 %v18509_v13 }
0x43e7   :  { %18512 = vmatpush3.bf16.msra.mxu1 %v18509_v13 }
0x44b5   :  { %v17420_v56 = vpop.f32.mrb[98].mxu1 }
0x44b6   :  { %v9594_v62 = vpop.f32.mrb[99].mxu1 }
0x44b7   :  { %17423 = vmatprep.mubr.msk.f32.mxu0 %vm544_vm1, %v9594_v62 }
0x44b8   :  { %17424 = vmatmul.mubr.msk.f32.vlgmr.msra.gmra.mrb[66].mxu0 %vm544_vm1, %v17420_v56 }
0x44b9   :  { %18516 = vmatpush3.bf16.msra.mxu0 %v18513_v36  ;;  %v15483_v36 = vld [vmem:[%s21010_s8 + $0x90] sm:$0xff] }
0x44ba   :  { %18518 = vmatprep.subr.bf16.mxu0 %v18517_v47  ;;  %v18549_v45 = vpack.c.bf16 %v15484_v44, %v15483_v36 }
0x44bd   :  { %18520 = vmatpush3.bf16.msra.mxu0 %v18517_v47  ;;  %v15473_v47 = vld [vmem:[%s21009_s3 + $0x80] sm:$0xff] }
0x44be   :  { %18522 = vmatprep.subr.bf16.mxu0 %v18521_v52  ;;  %v18537_v50 = vpack.c.bf16 %v15474_v49, %v15473_v47  ;;  %v15501_v47 = vld [vmem:[%s21011_s14 + $0x5] ss:$0 sm:$0xff] }
0x44c1   :  { %18524 = vmatpush3.bf16.msra.mxu0 %v18521_v52 }
0x44c2   :  { %18526 = vmatprep.subr.bf16.mxu0 %v18525_v53 }
0x44c5   :  { %18528 = vmatpush3.bf16.msra.mxu0 %v18525_v53 }
0x458b   :  { %v17425_v54 = vpop.f32.mrb[66].mxu0 }
0x458c   :  { %v9696_v3 = vadd.f32 %v17425_v54, %v15454_v1  ;;  %v9677_v4 = vpop.f32.mrb[67].mxu0 }
0x458d   :  { %v9695_v38 = vadd.f32 %v15454_v1, %v9677_v4 }
0x458e   :  { %v9698_v5 = vadd.f32 %v9696_v3, %v20272_v39 }
0x458f   :  { %v9697_v48 = vadd.f32 %v9695_v38, %v20270_v55 }
0x4590   :  { %v9704_v6 = vsel %vm236_vm0, %v9698_v5, 0.0 }
0x4591   :  { %9705 = vadd.xlane.f32.xlu1 %v9704_v6  ;;  %v9701_v9 = vsel %vm236_vm0, %v9697_v48, 0.0 }
0x4592   :  { %9702 = vadd.xlane.f32.xlu0 %v9701_v9 }
0x461e   :  { %v9706_v10 = vpop.xlane.xlu1 %9705 }
0x461f   :  { %v9708_v12 = vmul.f32 0.03125, %v9706_v10  ;;  %v9703_v14 = vpop.xlane.xlu0 %9702 }
0x4620   :  { %v9707_v16 = vmul.f32 0.03125, %v9703_v14 }
0x4621   :  { %v9710_v17 = vsub.f32 %v9698_v5, %v9708_v12 }
0x4622   :  { %v9709_v19 = vsub.f32 %v9697_v48, %v9707_v16 }
0x4623   :  { %v9712_v7 = vmul.f32 %v9710_v17, %v9710_v17 }
0x4624   :  { %v9711_v39 = vmul.f32 %v9709_v19, %v9709_v19 }
0x4625   :  { %v9716_v55 = vsel %vm236_vm0, %v9712_v7, 0.0  ;;  %v15460_v7 = vld [vmem:[%s21033_s21] ss:$0 sm:$0xff] }
0x4626   :  { %9717 = vadd.xlane.f32.xlu1 %v9716_v55  ;;  %v9713_v20 = vsel %vm236_vm0, %v9711_v39, 0.0 }
0x4627   :  { %9714 = vadd.xlane.f32.xlu0 %v9713_v20 }
0x46b3   :  { %v9718_v24 = vpop.xlane.xlu1 %9717 }
0x46b4   :  { %v9720_v26 = vmul.f32 0.03125, %v9718_v24  ;;  %v9715_v27 = vpop.xlane.xlu0 %9714 }
0x46b5   :  { %v9719_v60 = vmul.f32 0.03125, %v9715_v27 }
0x46b6   :  { %v9722_v61 = vadd.f32 1e-05, %v9720_v26 }
0x46b7   :  { %v9721_v15 = vadd.f32 1e-05, %v9719_v60 }
0x46b8   :  { %19089 = vrsqrt.f32 %v9722_v61 }
0x46b9   :  { %19091 = vrsqrt.f32 %v9721_v15 }
0x46c2   :  { %v19090_v18 = vpop.eup %19089 }
0x46c3   :  { %v19092_v32 = vpop.eup %19091  ;;  %v9726_v33 = vmul.f32 %v19090_v18, %v9710_v17 }
0x46c4   :  { %v9725_v34 = vmul.f32 %v19092_v32, %v9709_v19 }
0x46c5   :  { %v9734_v2 = vmul.f32 %v15455_v29, %v9726_v33  ;;  %v15465_v33 = vld [vmem:[%s21006_s17 + $0x80] sm:$0xff] }
0x46c6   :  { %v9733_v35 = vmul.f32 %v15455_v29, %v9725_v34  ;;  %v15466_v34 = vld [vmem:[%s21006_s17 + $0x88] sm:$0xff] }
0x46c7   :  { %v9742_v37 = vadd.f32 %v15456_v0, %v9734_v2  ;;  %v15481_v2 = vld [vmem:[%s21010_s8 + $0x80] sm:$0xff] }
0x46c8   :  { %v9741_v42 = vadd.f32 %v15456_v0, %v9733_v35  ;;  %v18529_v0 = vpack.c.bf16 %v15466_v34, %v15465_v33  ;;  %v15482_v35 = vld [vmem:[%s21010_s8 + $0x88] sm:$0xff]  ;;  %v15515_v33 = vld [vmem:[%s21010_s8 + $0xb8] sm:$0xff] }
0x46ca   :  { %17434 = vmatprep.mubr.msk.f32.mxu1 %vm236_vm0, %v9741_v42  ;;  %18530 = vmatprep.subr.bf16.mxu1 %v18529_v0 }
0x46cb   :  { %17435 = vmatmul.mubr.msk.f32.vlgmr.msra.gmra.mrb[100].mxu1 %vm236_vm0, %v9742_v37 }
0x46cc   :  { %18532 = vmatpush3.bf16.msra.mxu1 %v18529_v0 }
0x479e   :  { %v17436_v46 = vpop.f32.mrb[100].mxu1 }
0x479f   :  { %v9832_v51 = vadd.f32 %v17436_v46, %v15457_v57  ;;  %v9826_v41 = vpop.f32.mrb[101].mxu1 }
0x47a0   :  { %v9827_v58 = vadd.f32 %v15457_v57, %v9826_v41  ;;  %v15463_v41 = vld [vmem:[%s21034_s25] ss:$0 sm:$0xff] }
0x47a1   :  { %v9836_v59 = vmul.f32 %v9832_v51, %v9832_v51 }
0x47a2   :  { %v9835_v56 = vmul.f32 %v9827_v58, %v9827_v58 }
0x47a3   :  { %v9838_v62 = vmul.f32 %v9836_v59, %v9832_v51 }
0x47a4   :  { %v9837_v1 = vmul.f32 %v9835_v56, %v9827_v58 }
0x47a5   :  { %v9840_v54 = vmul.f32 0.044715, %v9838_v62  ;;  %v15464_v62 = vld [vmem:[%s21035_s19] ss:$0 sm:$0xff] }
0x47a6   :  { %v9839_v3 = vmul.f32 0.044715, %v9837_v1 }
0x47a7   :  { %v9842_v4 = vadd.f32 %v9840_v54, %v9832_v51 }
0x47a8   :  { %v9841_v38 = vadd.f32 %v9839_v3, %v9827_v58  ;;  %v15475_v3 = vld [vmem:[%s21009_s3 + $0x90] sm:$0xff] }
0x47a9   :  { %v9844_v5 = vmul.f32 0.7978846, %v9842_v4  ;;  %v15476_v4 = vld [vmem:[%s21009_s3 + $0x98] sm:$0xff] }
0x47aa   :  { %v9843_v48 = vmul.f32 0.7978846, %v9841_v38 }
0x47ab   :  { %19093 = vtanh.f32 %v9844_v5 }
0x47ac   :  { %19095 = vtanh.f32 %v9843_v48  ;;  %v18541_v48 = vpack.c.bf16 %v15476_v4, %v15475_v3 }
0x47b5   :  { %v19094_v6 = vpop.eup %19093 }
0x47b6   :  { %v19096_v9 = vpop.eup %19095  ;;  %v9848_v10 = vadd.f32 1.0, %v19094_v6  ;;  %v15486_v6 = vld [vmem:[%s21014_s27 + $0x4] ss:$0 sm:$0xff] }
0x47b7   :  { %v9847_v12 = vadd.f32 1.0, %v19096_v9  ;;  %v15470_v9 = vld [vmem:[%s21011_s14 + $0x4] ss:$0 sm:$0xff] }
0x47b8   :  { %v9850_v14 = vmul.f32 0.5, %v9848_v10 }
0x47b9   :  { %v9849_v16 = vmul.f32 0.5, %v9847_v12 }
0x47ba   :  { %v9852_v19 = vmul.f32 %v9850_v14, %v9832_v51 }
0x47bb   :  { %v9851_v17 = vmul.f32 %v9849_v16, %v9827_v58 }
0x47bd   :  { %17453 = vmatprep.mubr.msk.f32.mxu0 %vm2629_vm4, %v9851_v17 }
0x47be   :  { %17454 = vmatmul.mubr.msk.f32.vlgmr.msra.gmra.mrb[76].mxu0 %vm2629_vm4, %v9852_v19 }
0x4891   :  { %v17455_v39 = vpop.f32.mrb[76].mxu0 }
0x4892   :  { %v9946_v55 = vadd.f32 %v17455_v39, %v15460_v7  ;;  %v9940_v20 = vpop.f32.mrb[77].mxu0 }
0x4893   :  { %v9941_v21 = vadd.f32 %v15460_v7, %v9940_v20 }
0x4894   :  { %v9950_v22 = vadd.f32 %v9946_v55, %v9742_v37  ;;  %v15467_v37 = vld [vmem:[%s21006_s17 + $0x90] sm:$0xff]  ;;  %v15478_v55 = vld [vmem:[%s21012_s6 + $0x4] ss:$0 sm:$0xff] }
0x4895   :  { %v9949_v23 = vadd.f32 %v9941_v21, %v9741_v42  ;;  %v18545_v42 = vpack.c.bf16 %v15482_v35, %v15481_v2  ;;  %v18533_v43 = vpack.c.bf16 %v15468_v40, %v15467_v37  ;;  %v20533_v37 = vld [vmem:[%s21013_s20 + $0x8] sm:$0xff] }
0x4896   :  { %v9956_v11 = vsel %vm236_vm0, %v9950_v22, 0.0 }
0x4897   :  { %9957 = vadd.xlane.f32.xlu1 %v9956_v11  ;;  %v9953_v8 = vsel %vm236_vm0, %v9949_v23, 0.0  ;;  %18546 = vmatprep.subr.bf16.mxu0 %v18545_v42  ;;  %v15497_v11 = vld [vmem:[%s21006_s17 + $0xa8] sm:$0xff] }
0x4898   :  { %9954 = vadd.xlane.f32.xlu0 %v9953_v8  ;;  %18548 = vmatpush3.bf16.msra.mxu0 %v18545_v42 }
0x4899   :  { %18534 = vmatprep.subr.bf16.mxu1 %v18533_v43  ;;  %18550 = vmatprep.subr.bf16.mxu0 %v18549_v45 }
0x489a   :  { %18536 = vmatpush3.bf16.msra.mxu1 %v18533_v43  ;;  %v20537_v43 = vld [vmem:[%s21013_s20] sm:$0xff] }
0x489b   :  { %18538 = vmatprep.subr.bf16.mxu1 %v18537_v50 }
0x489c   :  { %18552 = vmatpush3.bf16.msra.mxu0 %v18549_v45 }
0x4924   :  { %v9958_v13 = vpop.xlane.xlu1 %9957 }
0x4925   :  { %v9960_v24 = vmul.f32 0.03125, %v9958_v13  ;;  %v9955_v26 = vpop.xlane.xlu0 %9954 }
0x4926   :  { %v9959_v27 = vmul.f32 0.03125, %v9955_v26  ;;  %v15498_v26 = vld [vmem:[%s21006_s17 + $0xb0] sm:$0xff] }
0x4927   :  { %v9962_v60 = vsub.f32 %v9950_v22, %v9960_v24 }
0x4928   :  { %v9961_v61 = vsub.f32 %v9949_v23, %v9959_v27  ;;  %v15496_v23 = vld [vmem:[%s21006_s17 + $0xa0] sm:$0xff]  ;;  %v15499_v27 = vld [vmem:[%s21006_s17 + $0xb8] sm:$0xff] }
0x4929   :  { %v9964_v15 = vmul.f32 %v9962_v60, %v9962_v60  ;;  %v18563_v24 = vpack.c.bf16 %v15497_v11, %v15496_v23  ;;  %v15509_v11 = vld [vmem:[%s21012_s6 + $0x5] ss:$0 sm:$0xff] }
0x492a   :  { %v9963_v18 = vmul.f32 %v9961_v61, %v9961_v61 }
0x492b   :  { %v9968_v29 = vsel %vm236_vm0, %v9964_v15, 0.0  ;;  %v15512_v15 = vld [vmem:[%s21010_s8 + $0xa0] sm:$0xff] }
0x492c   :  { %9969 = vadd.xlane.f32.xlu1 %v9968_v29  ;;  %v9965_v32 = vsel %vm236_vm0, %v9963_v18, 0.0  ;;  %v15513_v18 = vld [vmem:[%s21010_s8 + $0xa8] sm:$0xff] }
0x492d   :  { %9966 = vadd.xlane.f32.xlu0 %v9965_v32  ;;  %v18579_v29 = vpack.c.bf16 %v15513_v18, %v15512_v15  ;;  %v15514_v32 = vld [vmem:[%s21010_s8 + $0xb0] sm:$0xff] }
0x492e   :  { %v18583_v34 = vpack.c.bf16 %v15515_v33, %v15514_v32 }
0x49b9   :  { %v9970_v52 = vpop.xlane.xlu1 %9969 }
0x49ba   :  { %v9972_v25 = vmul.f32 0.03125, %v9970_v52  ;;  %v9967_v28 = vpop.xlane.xlu0 %9966 }
0x49bb   :  { %v9971_v53 = vmul.f32 0.03125, %v9967_v28 }
0x49bc   :  { %v9974_v57 = vadd.f32 1e-05, %v9972_v25  ;;  %v15517_v25 = vld [vmem:[%s21014_s27 + $0x5] ss:$0 sm:$0xff] }
0x49bd   :  { %v9973_v46 = vadd.f32 1e-05, %v9971_v53 }
0x49be   :  { %19097 = vrsqrt.f32 %v9974_v57 }
0x49bf   :  { %19099 = vrsqrt.f32 %v9973_v46 }
0x49c8   :  { %v19098_v51 = vpop.eup %19097 }
0x49c9   :  { %v19100_v58 = vpop.eup %19099  ;;  %v9978_v59 = vmul.f32 %v19098_v51, %v9962_v60 }
0x49ca   :  { %v9977_v56 = vmul.f32 %v19100_v58, %v9961_v61  ;;  %v18567_v61 = vpack.c.bf16 %v15499_v27, %v15498_v26 }
0x49cb   :  { %v9986_v1 = vmul.f32 %v15463_v41, %v9978_v59 }
0x49cc   :  { %v9985_v54 = vmul.f32 %v15463_v41, %v9977_v56 }
0x49cd   :  { %v20493_v5 = vadd.f32 %v15464_v62, %v9986_v1 }
0x49ce   :  { %v20491_v38 = vadd.f32 %v15464_v62, %v9985_v54 }
0x49d0   :  { %17464 = vmatprep.mubr.msk.f32.mxu1 %vm236_vm0, %v20491_v38  ;;  %17486 = vmatprep.mubr.msk.f32.mxu0 %vm236_vm0, %v20491_v38 }
0x49d1   :  { %17465 = vmatmul.mubr.msk.f32.vlgmr.msra.gmra.mrb[102].mxu1 %vm236_vm0, %v20493_v5  ;;  %17487 = vmatmul.mubr.msk.f32.vlgmr.msra.gmra.mrb[78].mxu0 %vm236_vm0, %v20493_v5 }
0x49d2   :  { %18540 = vmatpush3.bf16.msra.mxu1 %v18537_v50  ;;  %17475 = vmatprep.mubr.msk.f32.mxu1 %vm236_vm0, %v20491_v38 }
0x49d3   :  { %18542 = vmatprep.subr.bf16.mxu1 %v18541_v48 }
0x49d6   :  { %18544 = vmatpush3.bf16.msra.mxu1 %v18541_v48 }
0x49d9   :  { %17476 = vmatmul.mubr.msk.f32.vlgmr.msra.gmra.mrb[104].mxu1 %vm236_vm0, %v20493_v5 }
0x4aa4   :  { %v17466_v10 = vpop.f32.mrb[102].mxu1  ;;  %v17488_v12 = vpop.f32.mrb[78].mxu0 }
0x4aa5   :  { %v10262_v14 = vadd.f32 %v17488_v12, %v15486_v6  ;;  %v10080_v16 = vpop.f32.mrb[103].mxu1  ;;  %v10256_v17 = vpop.f32.mrb[79].mxu0  ;;  %v10086_v60 = vadd.f32 %v17466_v10, %v15470_v9 }
0x4aa6   :  { %v10081_v19 = vadd.f32 %v15470_v9, %v10080_v16  ;;  %v10257_v7 = vadd.f32 %v15486_v6, %v10256_v17  ;;  %v15504_v6 = vld [vmem:[%s21009_s3 + $0xa0] sm:$0xff]  ;;  %v15505_v9 = vld [vmem:[%s21009_s3 + $0xa8] sm:$0xff]  ;;  %v15506_v17 = vld [vmem:[%s21009_s3 + $0xb0] sm:$0xff] }
0x4aa7   :  { %v18571_v10 = vpack.c.bf16 %v15505_v9, %v15504_v6  ;;  %v15495_v9 = vld [vmem:[%s21015_s4 + $0x20] sm:$0xff] }
0x4aa8   :  { %v18559_v39 = vpack.c.bf16 %v10262_v14, %v10257_v7  ;;  %17493 = vmatprep.mubr.msk.f32.mxu1 %vm544_vm1, %v10081_v19  ;;  %v15507_v19 = vld [vmem:[%s21009_s3 + $0xb8] sm:$0xff] }
0x4aaa   :  { %18560 = vmatprep.subr.bf16.mxu0 %v18559_v39 }
0x4aab   :  { %18562 = vmatpush3.bf16.msra.mxu0 %v18559_v39 }
0x4aac   :  { %v17477_v20 = vpop.f32.mrb[104].mxu1  ;;  %18572 = vmatprep.subr.bf16.mxu0 %v18571_v10 }
0x4aad   :  { %v10174_v21 = vadd.f32 %v17477_v20, %v15478_v55  ;;  %v10168_v22 = vpop.f32.mrb[105].mxu1  ;;  %v18575_v20 = vpack.c.bf16 %v15507_v19, %v15506_v17  ;;  %v15536_v19 = vld [vmem:[%s21011_s14 + $0x6] ss:$0 sm:$0xff] }
0x4aae   :  { %v10169_v8 = vadd.f32 %v15478_v55, %v10168_v22 }
0x4ab0   :  { %v18553_v13 = vpack.c.bf16 %v10174_v21, %v10169_v8 }
0x4ab2   :  { %18555 = vmatprep.subr.msk.bf16.mxu1 %vm19608_vm2, %v18553_v13 }
0x4ab3   :  { %18558 = vmatpush3.bf16.xpose.msk.msra.mxu1 %vm19608_vm2, %v18553_v13 }
0x4ab4   :  { %18564 = vmatprep.subr.bf16.mxu1 %v18563_v24 }
0x4aba   :  { %17494 = vmatmul.mubr.msk.f32.vlgmr.msra.gmra.mrb[106].mxu1 %vm544_vm1, %v10086_v60 }
0x4abb   :  { %18566 = vmatpush3.bf16.msra.mxu1 %v18563_v24  ;;  %17511 = vmatprep.mubr.msk.f32.mxu1 %vm236_vm0, %v20491_v38 }
0x4abc   :  { %18568 = vmatprep.subr.bf16.mxu1 %v18567_v61 }
0x4abf   :  { %18570 = vmatpush3.bf16.msra.mxu1 %v18567_v61 }
0x4ac0   :  { %18580 = vmatprep.subr.bf16.mxu1 %v18579_v29 }
0x4ac2   :  { %17512 = vmatmul.mubr.msk.f32.vlgmr.msra.gmra.mrb[108].mxu1 %vm236_vm0, %v20493_v5 }
0x4ac3   :  { %18582 = vmatpush3.bf16.msra.mxu1 %v18579_v29  ;;  %17533 = vmatprep.mubr.msk.f32.mxu1 %vm236_vm0, %v20491_v38 }
0x4ac4   :  { %18584 = vmatprep.subr.bf16.mxu1 %v18583_v34 }
0x4ac7   :  { %18586 = vmatpush3.bf16.msra.mxu1 %v18583_v34 }
0x4aca   :  { %17534 = vmatmul.mubr.msk.f32.vlgmr.msra.gmra.mrb[110].mxu1 %vm236_vm0, %v20493_v5 }
0x4b8d   :  { %v17495_v0 = vpop.f32.mrb[106].mxu1 }
0x4b8e   :  { %v10353_v2 = vmul.f32 0.35355338, %v17495_v0  ;;  %v10343_v35 = vpop.f32.mrb[107].mxu1 }
0x4b8f   :  { %v10352_v42 = vmul.f32 0.35355338, %v10343_v35 }
0x4b90   :  { %v10355_v40 = vadd.f32 %v20533_v37, %v10353_v2 }
0x4b91   :  { %v10354_v36 = vadd.f32 %v20537_v43, %v10352_v42 }
0x4b92   :  { %v10359_v44 = vsel %vm636_vm3, %v10355_v40, -inf }
0x4b93   :  { %10360 = vmax.xlane.f32.xlu1 %v10359_v44  ;;  %v10356_v45 = vsel %vm636_vm3, %v10354_v36, -inf }
0x4b94   :  { %10357 = vmax.xlane.f32.xlu0 %v10356_v45 }
0x4b95   :  { %v17513_v49 = vpop.f32.mrb[108].mxu1 }
0x4b96   :  { %v10546_v50 = vadd.f32 %v17513_v49, %v15501_v47  ;;  %v10540_v52 = vpop.f32.mrb[109].mxu1 }
0x4b97   :  { %v10541_v21 = vadd.f32 %v15501_v47, %v10540_v52  ;;  %v15532_v52 = vld [vmem:[%s21006_s17 + $0xc8] sm:$0xff] }
0x4b9d   :  { %v17535_v28 = vpop.f32.mrb[110].mxu1 }
0x4b9e   :  { %v10722_v53 = vadd.f32 %v17535_v28, %v15517_v25  ;;  %v10716_v57 = vpop.f32.mrb[111].mxu1  ;;  %v15526_v28 = vld [vmem:[%s21015_s4 + $0x28] sm:$0xff] }
0x4b9f   :  { %v10717_v46 = vadd.f32 %v15517_v25, %v10716_v57 }
0x4ba1   :  { %v18593_v51 = vpack.c.bf16 %v10722_v53, %v10717_v46 }
0x4ba3   :  { %18594 = vmatprep.subr.bf16.mxu1 %v18593_v51 }
0x4ba4   :  { %18596 = vmatpush3.bf16.msra.mxu1 %v18593_v51  ;;  %v15533_v51 = vld [vmem:[%s21006_s17 + $0xd0] sm:$0xff] }
0x4c20   :  { %v10361_v41 = vpop.xlane.xlu1 %10360 }
0x4c21   :  { %v10363_v58 = vsub.f32 %v10355_v40, %v10361_v41  ;;  %v10358_v59 = vpop.xlane.xlu0 %10357  ;;  %v15534_v41 = vld [vmem:[%s21006_s17 + $0xd8] sm:$0xff] }
0x4c22   :  { %v10362_v56 = vsub.f32 %v10354_v36, %v10358_v59 }
0x4c23   :  { %v10366_v62 = vmul.f32 1.442695, %v10363_v58 }
0x4c24   :  { %v10364_v1 = vmul.f32 1.442695, %v10362_v56 }
0x4c25   :  { %19101 = vpow2.f32 %v10366_v62  ;;  %v18601_v62 = vpack.c.bf16 %v15534_v41, %v15533_v51  ;;  %v15565_v51 = vld [vmem:[%s21006_s17 + $0xe8] sm:$0xff] }
0x4c26   :  { %19103 = vpow2.f32 %v10364_v1  ;;  %v15547_v1 = vld [vmem:[%s21010_s8 + $0xc0] sm:$0xff] }
0x4c2f   :  { %v19102_v54 = vpop.eup %19101 }
0x4c30   :  { %v19104_v3 = vpop.eup %19103  ;;  %v10371_v4 = vsel %vm636_vm3, %v19102_v54, 0.0 }
0x4c31   :  { %10372 = vadd.xlane.f32.xlu1 %v10371_v4  ;;  %v10368_v48 = vsel %vm636_vm3, %v19104_v3, 0.0  ;;  %v15549_v4 = vld [vmem:[%s21010_s8 + $0xd0] sm:$0xff] }
0x4c32   :  { %10369 = vadd.xlane.f32.xlu0 %v10368_v48  ;;  %v15550_v48 = vld [vmem:[%s21010_s8 + $0xd8] sm:$0xff] }
0x4c33   :  { %v18617_v6 = vpack.c.bf16 %v15550_v48, %v15549_v4 }
0x4cbe   :  { %v10373_v12 = vpop.xlane.xlu1 %10372 }
0x4cbf   :  { %19105 = vrcp.f32 %v10373_v12  ;;  %v10370_v14 = vpop.xlane.xlu0 %10369  ;;  %v15540_v12 = vld [vmem:[%s21009_s3 + $0xc8] sm:$0xff] }
0x4cc0   :  { %19107 = vrcp.f32 %v10370_v14 }
0x4cc9   :  { %v19106_v16 = vpop.eup %19105 }
0x4cca   :  { %v19108_v7 = vpop.eup %19107  ;;  %v10377_v55 = vmul.f32 %v19106_v16, %v19102_v54  ;;  %v15548_v54 = vld [vmem:[%s21010_s8 + $0xc8] sm:$0xff] }
0x4ccb   :  { %v10376_v39 = vmul.f32 %v19108_v7, %v19104_v3  ;;  %v18613_v3 = vpack.c.bf16 %v15548_v54, %v15547_v1  ;;  %v15541_v7 = vld [vmem:[%s21009_s3 + $0xd0] sm:$0xff]  ;;  %v15567_v54 = vld [vmem:[%s21006_s17 + $0xf8] sm:$0xff] }
0x4ccc   :  { %v15566_v1 = vld [vmem:[%s21006_s17 + $0xf0] sm:$0xff] }
0x4ccd   :  { %17500 = vmatprep.mubr.msk.f32.mxu0 %vm636_vm3, %v10376_v39  ;;  %v15542_v39 = vld [vmem:[%s21009_s3 + $0xd8] sm:$0xff] }
0x4cce   :  { %17501 = vmatmul.mubr.msk.f32.vlgmr.msra.gmra.mrb[80].mxu0 %vm636_vm3, %v10377_v55 }
0x4ccf   :  { %18574 = vmatpush3.bf16.msra.mxu0 %v18571_v10  ;;  %17522 = vmatprep.mubr.msk.f32.mxu0 %vm236_vm0, %v20491_v38  ;;  %v15539_v10 = vld [vmem:[%s21009_s3 + $0xc0] sm:$0xff] }
0x4cd0   :  { %18576 = vmatprep.subr.bf16.mxu0 %v18575_v20  ;;  %v18605_v17 = vpack.c.bf16 %v15540_v12, %v15539_v10  ;;  %v15581_v10 = vld [vmem:[%s21010_s8 + $0xe8] sm:$0xff] }
0x4cd3   :  { %18578 = vmatpush3.bf16.msra.mxu0 %v18575_v20 }
0x4cd6   :  { %17523 = vmatmul.mubr.msk.f32.vlgmr.msra.gmra.mrb[82].mxu0 %vm236_vm0, %v20493_v5 }
0x4cd7   :  { %17540 = vmatprep.mubr.msk.f32.mxu0 %vm544_vm1, %v10541_v21 }
0x4da1   :  { %v20557_v22 = vpop.f32.mrb[80].mxu0 }
0x4da2   :  { %v20559_v23 = vpop.f32.mrb[81].mxu0 }
0x4da9   :  { %v17524_v8 = vpop.f32.mrb[82].mxu0 }
0x4daa   :  { %v10634_v13 = vadd.f32 %v17524_v8, %v15509_v11  ;;  %v10628_v24 = vpop.f32.mrb[83].mxu0  ;;  %v15552_v8 = vld [vmem:[%s21014_s27 + $0x6] ss:$0 sm:$0xff] }
0x4dab   :  { %v10629_v26 = vadd.f32 %v15509_v11, %v10628_v24  ;;  %v18609_v11 = vpack.c.bf16 %v15542_v39, %v15541_v7  ;;  %v15573_v7 = vld [vmem:[%s21009_s3 + $0xe8] sm:$0xff] }
0x4dad   :  { %v18587_v27 = vpack.c.bf16 %v10634_v13, %v10629_v26 }
0x4daf   :  { %18589 = vmatprep.subr.msk.bf16.mxu0 %vm19608_vm2, %v18587_v27 }
0x4db0   :  { %18592 = vmatpush3.bf16.xpose.msk.msra.mxu0 %vm19608_vm2, %v18587_v27 }
0x4db1   :  { %17550 = vmatprep.subr.mxu0 %v15526_v28 }
0x4db7   :  { %17541 = vmatmul.mubr.msk.f32.vlgmr.msra.gmra.mrb[84].mxu0 %vm544_vm1, %v10546_v50  ;;  %v15531_v50 = vld [vmem:[%s21006_s17 + $0xc0] sm:$0xff] }
0x4db8   :  { %v18597_v25 = vpack.c.bf16 %v15532_v52, %v15531_v50  ;;  %17551 = vmatpush3.msra.mxu0 %v15526_v28 }
0x4db9   :  { %17555 = vmatprep.subr.mxu0 %v15495_v9 }
0x4dba   :  { %18598 = vmatprep.subr.bf16.mxu1 %v18597_v25 }
0x4e8a   :  { %v17542_v60 = vpop.f32.mrb[84].mxu0 }
0x4e8b   :  { %v10813_v61 = vmul.f32 0.35355338, %v17542_v60  ;;  %v10803_v15 = vpop.f32.mrb[85].mxu0 }
0x4e8c   :  { %v10812_v18 = vmul.f32 0.35355338, %v10803_v15 }
0x4e8d   :  { %v10815_v29 = vadd.f32 %v20533_v37, %v10813_v61 }
0x4e8e   :  { %v10814_v32 = vadd.f32 %v20537_v43, %v10812_v18 }
0x4e8f   :  { %v10819_v33 = vsel %vm636_vm3, %v10815_v29, -inf }
0x4e90   :  { %10820 = vmax.xlane.f32.xlu1 %v10819_v33  ;;  %v10816_v34 = vsel %vm636_vm3, %v10814_v32, -inf }
0x4e91   :  { %10817 = vmax.xlane.f32.xlu0 %v10816_v34 }
0x4f1d   :  { %v10821_v0 = vpop.xlane.xlu1 %10820 }
0x4f1e   :  { %v10823_v2 = vsub.f32 %v10815_v29, %v10821_v0  ;;  %v10818_v35 = vpop.xlane.xlu0 %10817 }
0x4f1f   :  { %v10822_v42 = vsub.f32 %v10814_v32, %v10818_v35 }
0x4f20   :  { %v10826_v40 = vmul.f32 1.442695, %v10823_v2 }
0x4f21   :  { %v10824_v36 = vmul.f32 1.442695, %v10822_v42 }
0x4f22   :  { %19109 = vpow2.f32 %v10826_v40 }
0x4f23   :  { %19111 = vpow2.f32 %v10824_v36 }
0x4f2c   :  { %v19110_v44 = vpop.eup %19109 }
0x4f2d   :  { %v19112_v45 = vpop.eup %19111  ;;  %v10831_v47 = vsel %vm636_vm3, %v19110_v44, 0.0 }
0x4f2e   :  { %10832 = vadd.xlane.f32.xlu1 %v10831_v47  ;;  %v10828_v49 = vsel %vm636_vm3, %v19112_v45, 0.0 }
0x4f2f   :  { %10829 = vadd.xlane.f32.xlu0 %v10828_v49 }
0x4fbb   :  { %v10833_v53 = vpop.xlane.xlu1 %10832 }
0x4fbc   :  { %19113 = vrcp.f32 %v10833_v53  ;;  %v10830_v57 = vpop.xlane.xlu0 %10829 }
0x4fbd   :  { %19115 = vrcp.f32 %v10830_v57 }
0x4fc6   :  { %v19114_v46 = vpop.eup %19113 }
0x4fc7   :  { %v19116_v58 = vpop.eup %19115  ;;  %v10837_v56 = vmul.f32 %v19114_v46, %v19110_v44  ;;  %v15564_v46 = vld [vmem:[%s21006_s17 + $0xe0] sm:$0xff] }
0x4fc8   :  { %v10836_v59 = vmul.f32 %v19116_v58, %v19112_v45  ;;  %v18631_v41 = vpack.c.bf16 %v15565_v51, %v15564_v46  ;;  %v15561_v58 = vld [vmem:[%s21015_s4 + $0x30] sm:$0xff] }
0x4fca   :  { %17547 = vmatprep.mubr.msk.f32.mxu1 %vm636_vm3, %v10836_v59 }
0x4fcb   :  { %17548 = vmatmul.mubr.msk.f32.vlgmr.msra.gmra.mrb[112].mxu1 %vm636_vm3, %v10837_v56 }
0x4fcc   :  { %18600 = vmatpush3.bf16.msra.mxu1 %v18597_v25  ;;  %17568 = vmatprep.mubr.msk.f32.mxu1 %vm236_vm0, %v20491_v38 }
0x4fcd   :  { %18602 = vmatprep.subr.bf16.mxu1 %v18601_v62 }
0x4fd0   :  { %18604 = vmatpush3.bf16.msra.mxu1 %v18601_v62 }
0x4fd1   :  { %18614 = vmatprep.subr.bf16.mxu1 %v18613_v3 }
0x4fd3   :  { %17569 = vmatmul.mubr.msk.f32.vlgmr.msra.gmra.mrb[114].mxu1 %vm236_vm0, %v20493_v5 }
0x4fd4   :  { %18616 = vmatpush3.bf16.msra.mxu1 %v18613_v3  ;;  %17590 = vmatprep.mubr.msk.f32.mxu1 %vm236_vm0, %v20491_v38 }
0x4fd5   :  { %18618 = vmatprep.subr.bf16.mxu1 %v18617_v6 }
0x4fd8   :  { %18620 = vmatpush3.bf16.msra.mxu1 %v18617_v6  ;;  %v18635_v6 = vpack.c.bf16 %v15567_v54, %v15566_v1 }
0x4fdb   :  { %17591 = vmatmul.mubr.msk.f32.vlgmr.msra.gmra.mrb[116].mxu1 %vm236_vm0, %v20493_v5 }
0x509e   :  { %v17549_v14 = vpop.f32.mrb[112].mxu1 }
0x509f   :  { %v10910_v16 = vpop.f32.mrb[113].mxu1 }
0x50a0   :  { %17552 = vmatprep.mubr.msk.f32.mxu0 %vm544_vm1, %v10910_v16  ;;  %v15583_v16 = vld [vmem:[%s21010_s8 + $0xf8] sm:$0xff] }
0x50a1   :  { %17553 = vmatmul.mubr.msk.f32.vlgmr.msra.gmra.mrb[86].mxu0 %vm544_vm1, %v17549_v14  ;;  %v15582_v14 = vld [vmem:[%s21010_s8 + $0xf0] sm:$0xff] }
0x50a2   :  { %17556 = vmatpush3.msra.mxu0 %v15495_v9  ;;  %17557 = vmatprep.mubr.msk.f32.mxu0 %vm544_vm1, %v20559_v23  ;;  %v15580_v9 = vld [vmem:[%s21010_s8 + $0xe0] sm:$0xff] }
0x50a3   :  { %18606 = vmatprep.subr.bf16.mxu0 %v18605_v17  ;;  %v18647_v12 = vpack.c.bf16 %v15581_v10, %v15580_v9  ;;  %v15613_v9 = vld [vmem:[%s21017_s28 + $0x90] sm:$0xff]  ;;  %v15614_v10 = vld [vmem:[%s21017_s28 + $0x98] sm:$0xff] }
0x50a6   :  { %v17570_v55 = vpop.f32.mrb[114].mxu1 }
0x50a7   :  { %v11168_v20 = vadd.f32 %v17570_v55, %v15536_v19  ;;  %v11162_v21 = vpop.f32.mrb[115].mxu1  ;;  %v15574_v55 = vld [vmem:[%s21009_s3 + $0xf0] sm:$0xff] }
0x50a8   :  { %v11163_v26 = vadd.f32 %v15536_v19, %v11162_v21  ;;  %v15572_v19 = vld [vmem:[%s21009_s3 + $0xe0] sm:$0xff] }
0x50a9   :  { %17558 = vmatmul.mubr.msk.f32.vlgmr.msra.gmra.mrb[86].mxu0 %vm544_vm1, %v20557_v22  ;;  %v15544_v22 = vld [vmem:[%s21012_s6 + $0x6] ss:$0 sm:$0xff]  ;;  %v18639_v39 = vpack.c.bf16 %v15573_v7, %v15572_v19 }
0x50aa   :  { %18608 = vmatpush3.bf16.msra.mxu0 %v18605_v17  ;;  %17579 = vmatprep.mubr.msk.f32.mxu0 %vm236_vm0, %v20491_v38  ;;  %v18651_v17 = vpack.c.bf16 %v15583_v16, %v15582_v14  ;;  %v18677_v16 = vpack.c.bf16 %v15614_v10, %v15613_v9  ;;  %v15608_v9 = vld [vmem:[%s21023_s15 + $0x4] ss:$0 sm:$0xff] }
0x50ab   :  { %18610 = vmatprep.subr.bf16.mxu0 %v18609_v11 }
0x50ae   :  { %18612 = vmatpush3.bf16.msra.mxu0 %v18609_v11  ;;  %v17592_v23 = vpop.f32.mrb[116].mxu1 }
0x50af   :  { %v11344_v13 = vadd.f32 %v17592_v23, %v15552_v8  ;;  %v11338_v24 = vpop.f32.mrb[117].mxu1  ;;  %v15569_v23 = vld [vmem:[%s21011_s14 + $0x7] ss:$0 sm:$0xff] }
0x50b0   :  { %v11339_v27 = vadd.f32 %v15552_v8, %v11338_v24 }
0x50b1   :  { %17580 = vmatmul.mubr.msk.f32.vlgmr.msra.gmra.mrb[88].mxu0 %vm236_vm0, %v20493_v5 }
0x50b2   :  { %v18627_v60 = vpack.c.bf16 %v11344_v13, %v11339_v27  ;;  %17597 = vmatprep.mubr.msk.f32.mxu0 %vm544_vm1, %v11163_v26 }
0x50b4   :  { %18628 = vmatprep.subr.bf16.mxu1 %v18627_v60 }
0x50b5   :  { %18630 = vmatpush3.bf16.msra.mxu1 %v18627_v60  ;;  %v15585_v60 = vld [vmem:[%s21014_s27 + $0x7] ss:$0 sm:$0xff] }
0x50b6   :  { %18632 = vmatprep.subr.bf16.mxu1 %v18631_v41 }
0x5184   :  { %v17581_v61 = vpop.f32.mrb[88].mxu0 }
0x5185   :  { %v11256_v15 = vadd.f32 %v17581_v61, %v15544_v22  ;;  %v11250_v18 = vpop.f32.mrb[89].mxu0 }
0x5186   :  { %v11251_v29 = vadd.f32 %v15544_v22, %v11250_v18 }
0x5188   :  { %v18621_v32 = vpack.c.bf16 %v11256_v15, %v11251_v29 }
0x518a   :  { %18623 = vmatprep.subr.msk.bf16.mxu0 %vm19608_vm2, %v18621_v32 }
0x518b   :  { %18626 = vmatpush3.bf16.xpose.msk.msra.mxu0 %vm19608_vm2, %v18621_v32  ;;  %v15577_v32 = vld [vmem:[%s21012_s6 + $0x7] ss:$0 sm:$0xff] }
0x518c   :  { %17607 = vmatprep.subr.mxu0 %v15561_v58 }
0x5192   :  { %17598 = vmatmul.mubr.msk.f32.vlgmr.msra.gmra.mrb[90].mxu0 %vm544_vm1, %v11168_v20  ;;  %v15575_v20 = vld [vmem:[%s21009_s3 + $0xf8] sm:$0xff] }
0x5193   :  { %17608 = vmatpush3.msra.mxu0 %v15561_v58  ;;  %v18643_v8 = vpack.c.bf16 %v15575_v20, %v15574_v55  ;;  %v15594_v58 = vld [vmem:[%s21015_s4 + $0x38] sm:$0xff] }
0x5194   :  { %18640 = vmatprep.subr.bf16.mxu0 %v18639_v39 }
0x5265   :  { %v17599_v33 = vpop.f32.mrb[90].mxu0 }
0x5266   :  { %v11435_v34 = vmul.f32 0.35355338, %v17599_v33  ;;  %v11425_v0 = vpop.f32.mrb[91].mxu0 }
0x5267   :  { %v11434_v2 = vmul.f32 0.35355338, %v11425_v0 }
0x5268   :  { %v11437_v35 = vadd.f32 %v20533_v37, %v11435_v34 }
0x5269   :  { %v11436_v42 = vadd.f32 %v20537_v43, %v11434_v2 }
0x526a   :  { %v11441_v40 = vsel %vm636_vm3, %v11437_v35, -inf }
0x526b   :  { %11442 = vmax.xlane.f32.xlu1 %v11441_v40  ;;  %v11438_v36 = vsel %vm636_vm3, %v11436_v42, -inf }
0x526c   :  { %11439 = vmax.xlane.f32.xlu0 %v11438_v36 }
0x52f8   :  { %v11443_v44 = vpop.xlane.xlu1 %11442 }
0x52f9   :  { %v11445_v45 = vsub.f32 %v11437_v35, %v11443_v44  ;;  %v11440_v47 = vpop.xlane.xlu0 %11439 }
0x52fa   :  { %v11444_v49 = vsub.f32 %v11436_v42, %v11440_v47 }
0x52fb   :  { %v11448_v50 = vmul.f32 1.442695, %v11445_v45 }
0x52fc   :  { %v11446_v52 = vmul.f32 1.442695, %v11444_v49 }
0x52fd   :  { %19117 = vpow2.f32 %v11448_v50 }
0x52fe   :  { %19119 = vpow2.f32 %v11446_v52 }
0x5307   :  { %v19118_v25 = vpop.eup %19117 }
0x5308   :  { %v19120_v28 = vpop.eup %19119  ;;  %v11453_v53 = vsel %vm636_vm3, %v19118_v25, 0.0 }
0x5309   :  { %11454 = vadd.xlane.f32.xlu1 %v11453_v53  ;;  %v11450_v57 = vsel %vm636_vm3, %v19120_v28, 0.0 }
0x530a   :  { %11451 = vadd.xlane.f32.xlu0 %v11450_v57 }
0x5396   :  { %v11455_v59 = vpop.xlane.xlu1 %11454 }
0x5397   :  { %19121 = vrcp.f32 %v11455_v59  ;;  %v11452_v56 = vpop.xlane.xlu0 %11451 }
0x5398   :  { %19123 = vrcp.f32 %v11452_v56 }
0x53a1   :  { %v19122_v62 = vpop.eup %19121 }
0x53a2   :  { %v19124_v3 = vpop.eup %19123  ;;  %v11459_v48 = vmul.f32 %v19122_v62, %v19118_v25 }
0x53a3   :  { %v11458_v4 = vmul.f32 %v19124_v3, %v19120_v28 }
0x53a5   :  { %17604 = vmatprep.mubr.msk.f32.mxu1 %vm636_vm3, %v11458_v4  ;;  %v15611_v4 = vld [vmem:[%s21017_s28 + $0x80] sm:$0xff] }
0x53a6   :  { %17605 = vmatmul.mubr.msk.f32.vlgmr.msra.gmra.mrb[118].mxu1 %vm636_vm3, %v11459_v48  ;;  %v15612_v48 = vld [vmem:[%s21017_s28 + $0x88] sm:$0xff] }
0x53a7   :  { %18634 = vmatpush3.bf16.msra.mxu1 %v18631_v41  ;;  %17620 = vmatprep.mubr.msk.f32.mxu1 %vm236_vm0, %v20491_v38 }
0x53a8   :  { %18636 = vmatprep.subr.bf16.mxu1 %v18635_v6 }
0x53ab   :  { %18638 = vmatpush3.bf16.msra.mxu1 %v18635_v6  ;;  %v18673_v6 = vpack.c.bf16 %v15612_v48, %v15611_v4  ;;  %v15642_v4 = vld [vmem:[%s21017_s28 + $0xa0] sm:$0xff]  ;;  %v15643_v48 = vld [vmem:[%s21017_s28 + $0xa8] sm:$0xff] }
0x53ac   :  { %18648 = vmatprep.subr.bf16.mxu1 %v18647_v12 }
0x53ae   :  { %17621 = vmatmul.mubr.msk.f32.vlgmr.msra.gmra.mrb[120].mxu1 %vm236_vm0, %v20493_v5 }
0x53af   :  { %18650 = vmatpush3.bf16.msra.mxu1 %v18647_v12  ;;  %17642 = vmatprep.mubr.msk.f32.mxu1 %vm236_vm0, %v20491_v38 }
0x53b0   :  { %18652 = vmatprep.subr.bf16.mxu1 %v18651_v17 }
0x53b3   :  { %18654 = vmatpush3.bf16.msra.mxu1 %v18651_v17  ;;  %v15598_v17 = vld [vmem:[%s21016_s26 + $0x1] ss:$0 sm:$0xff] }
0x53b6   :  { %17643 = vmatmul.mubr.msk.f32.vlgmr.msra.gmra.mrb[122].mxu1 %vm236_vm0, %v20493_v5 }
0x5479   :  { %v17606_v21 = vpop.f32.mrb[118].mxu1 }
0x547a   :  { %v11532_v11 = vpop.f32.mrb[119].mxu1 }
0x547b   :  { %17609 = vmatprep.mubr.msk.f32.mxu0 %vm544_vm1, %v11532_v11 }
0x547c   :  { %17610 = vmatmul.mubr.msk.f32.vlgmr.msra.gmra.mrb[86].mxu0 %vm544_vm1, %v17606_v21 }
0x547d   :  { %18642 = vmatpush3.bf16.msra.mxu0 %v18639_v39  ;;  %17631 = vmatprep.mubr.msk.f32.mxu0 %vm236_vm0, %v20491_v38 }
0x547e   :  { %18644 = vmatprep.subr.bf16.mxu0 %v18643_v8 }
0x5481   :  { %v17622_v13 = vpop.f32.mrb[120].mxu1  ;;  %18646 = vmatpush3.bf16.msra.mxu0 %v18643_v8  ;;  %v15616_v8 = vld [vmem:[%s21022_s11 + $0x4] ss:$0 sm:$0xff] }
0x5482   :  { %v11711_v24 = vadd.f32 %v17622_v13, %v15569_v23  ;;  %v11705_v26 = vpop.f32.mrb[121].mxu1 }
0x5483   :  { %v11706_v27 = vadd.f32 %v15569_v23, %v11705_v26 }
0x5484   :  { %17632 = vmatmul.mubr.msk.f32.vlgmr.msra.gmra.mrb[92].mxu0 %vm236_vm0, %v20493_v5 }
0x5485   :  { %17649 = vmatprep.mubr.msk.f32.mxu0 %vm544_vm1, %v11706_v27 }
0x5489   :  { %v17644_v22 = vpop.f32.mrb[122].mxu1 }
0x548a   :  { %v11887_v61 = vadd.f32 %v17644_v22, %v15585_v60  ;;  %v11881_v15 = vpop.f32.mrb[123].mxu1 }
0x548b   :  { %v11882_v18 = vadd.f32 %v15585_v60, %v11881_v15 }
0x548d   :  { %v18661_v29 = vpack.c.bf16 %v11887_v61, %v11882_v18 }
0x548f   :  { %18662 = vmatprep.subr.bf16.mxu1 %v18661_v29 }
0x5490   :  { %18664 = vmatpush3.bf16.msra.mxu1 %v18661_v29 }
0x5557   :  { %v17633_v33 = vpop.f32.mrb[92].mxu0 }
0x5558   :  { %v11799_v34 = vadd.f32 %v17633_v33, %v15577_v32  ;;  %v11793_v0 = vpop.f32.mrb[93].mxu0 }
0x5559   :  { %v11794_v2 = vadd.f32 %v15577_v32, %v11793_v0  ;;  %v15603_v0 = vld [vmem:[%s21018_s1 + $0x80] sm:$0xff] }
0x555b   :  { %v18655_v35 = vpack.c.bf16 %v11799_v34, %v11794_v2  ;;  %v15604_v2 = vld [vmem:[%s21018_s1 + $0x88] sm:$0xff] }
0x555d   :  { %18657 = vmatprep.subr.msk.bf16.mxu0 %vm19608_vm2, %v18655_v35 }
0x555e   :  { %18660 = vmatpush3.bf16.xpose.msk.msra.mxu0 %vm19608_vm2, %v18655_v35  ;;  %v18665_v35 = vpack.c.bf16 %v15604_v2, %v15603_v0 }
0x555f   :  { %17659 = vmatprep.subr.mxu0 %v15594_v58 }
0x5560   :  { %18666 = vmatprep.subr.bf16.mxu1 %v18665_v35 }
0x5565   :  { %17650 = vmatmul.mubr.msk.f32.vlgmr.msra.gmra.mrb[94].mxu0 %vm544_vm1, %v11711_v24 }
0x5566   :  { %17660 = vmatpush3.msra.mxu0 %v15594_v58 }
0x5567   :  { %18674 = vmatprep.subr.bf16.mxu0 %v18673_v6 }
0x5638   :  { %v17651_v42 = vpop.f32.mrb[94].mxu0 }
0x5639   :  { %v11978_v40 = vmul.f32 0.35355338, %v17651_v42  ;;  %v11968_v36 = vpop.f32.mrb[95].mxu0  ;;  %v15605_v42 = vld [vmem:[%s21018_s1 + $0x90] sm:$0xff] }
0x563a   :  { %v11977_v44 = vmul.f32 0.35355338, %v11968_v36 }
0x563b   :  { %v11980_v45 = vadd.f32 %v20533_v37, %v11978_v40  ;;  %v15606_v40 = vld [vmem:[%s21018_s1 + $0x98] sm:$0xff] }
0x563c   :  { %v11979_v47 = vadd.f32 %v20537_v43, %v11977_v44  ;;  %v18669_v36 = vpack.c.bf16 %v15606_v40, %v15605_v42  ;;  %v15619_v44 = vld [vmem:[%s21019_s2 + $0x80] sm:$0xff] }
0x563d   :  { %v11984_v49 = vsel %vm636_vm3, %v11980_v45, -inf }
0x563e   :  { %11985 = vmax.xlane.f32.xlu1 %v11984_v49  ;;  %v11981_v50 = vsel %vm636_vm3, %v11979_v47, -inf }
0x563f   :  { %11982 = vmax.xlane.f32.xlu0 %v11981_v50 }
0x56cb   :  { %v11986_v52 = vpop.xlane.xlu1 %11985 }
0x56cc   :  { %v11988_v25 = vsub.f32 %v11980_v45, %v11986_v52  ;;  %v11983_v28 = vpop.xlane.xlu0 %11982  ;;  %v15620_v45 = vld [vmem:[%s21019_s2 + $0x88] sm:$0xff] }
0x56cd   :  { %v11987_v53 = vsub.f32 %v11979_v47, %v11983_v28  ;;  %v18681_v47 = vpack.c.bf16 %v15620_v45, %v15619_v44 }
0x56ce   :  { %v11991_v57 = vmul.f32 1.442695, %v11988_v25 }
0x56cf   :  { %v11989_v46 = vmul.f32 1.442695, %v11987_v53 }
0x56d0   :  { %19125 = vpow2.f32 %v11991_v57 }
0x56d1   :  { %19127 = vpow2.f32 %v11989_v46  ;;  %v15601_v46 = vld [vmem:[%s21020_s7 + $0x1] ss:$0 sm:$0xff] }
0x56da   :  { %v19126_v51 = vpop.eup %19125 }
0x56db   :  { %v19128_v41 = vpop.eup %19127  ;;  %v11996_v37 = vsel %vm636_vm3, %v19126_v51, 0.0 }
0x56dc   :  { %11997 = vadd.xlane.f32.xlu1 %v11996_v37  ;;  %v11993_v43 = vsel %vm636_vm3, %v19128_v41, 0.0 }
0x56dd   :  { %11994 = vadd.xlane.f32.xlu0 %v11993_v43  ;;  %v15602_v43 = vld [vmem:[%s21021_s10 + $0x1] ss:$0 sm:$0xff] }
0x5769   :  { %v11998_v59 = vpop.xlane.xlu1 %11997 }
0x576a   :  { %19129 = vrcp.f32 %v11998_v59  ;;  %v11995_v56 = vpop.xlane.xlu0 %11994 }
0x576b   :  { %19131 = vrcp.f32 %v11995_v56  ;;  %v15621_v56 = vld [vmem:[%s21019_s2 + $0x90] sm:$0xff] }
0x5774   :  { %v19130_v62 = vpop.eup %19129 }
0x5775   :  { %v19132_v1 = vpop.eup %19131  ;;  %v12002_v3 = vmul.f32 %v19130_v62, %v19126_v51  ;;  %v15622_v62 = vld [vmem:[%s21019_s2 + $0x98] sm:$0xff] }
0x5776   :  { %v12001_v54 = vmul.f32 %v19132_v1, %v19128_v41 }
0x5778   :  { %17656 = vmatprep.mubr.msk.f32.mxu1 %vm636_vm3, %v12001_v54 }
0x5779   :  { %17657 = vmatmul.mubr.msk.f32.vlgmr.msra.gmra.mrb[124].mxu1 %vm636_vm3, %v12002_v3  ;;  %v18685_v3 = vpack.c.bf16 %v15622_v62, %v15621_v56  ;;  %v15651_v56 = vld [vmem:[%s21019_s2 + $0xa8] sm:$0xff] }
0x577a   :  { %18668 = vmatpush3.bf16.msra.mxu1 %v18665_v35 }
0x577b   :  { %18670 = vmatprep.subr.bf16.mxu1 %v18669_v36 }
0x577e   :  { %18672 = vmatpush3.bf16.msra.mxu1 %v18669_v36 }
0x577f   :  { %18682 = vmatprep.subr.bf16.mxu1 %v18681_v47 }
0x584c   :  { %v17658_v12 = vpop.f32.mrb[124].mxu1 }
0x584d   :  { %v12075_v14 = vpop.f32.mrb[125].mxu1 }
0x584e   :  { %17661 = vmatprep.mubr.msk.f32.mxu0 %vm544_vm1, %v12075_v14  ;;  %v15645_v14 = vld [vmem:[%s21017_s28 + $0xb8] sm:$0xff] }
0x584f   :  { %17662 = vmatmul.mubr.msk.f32.vlgmr.msra.gmra.mrb[86].mxu0 %vm544_vm1, %v17658_v12  ;;  %v15644_v12 = vld [vmem:[%s21017_s28 + $0xb0] sm:$0xff] }
0x5850   :  { %18676 = vmatpush3.bf16.msra.mxu0 %v18673_v6  ;;  %17683 = vmatprep.mubr.msk.f32.mxu0 %vm236_vm0, %v20252_v30  ;;  %v18707_v6 = vpack.c.bf16 %v15643_v48, %v15642_v4  ;;  %v15653_v4 = vld [vmem:[%s21019_s2 + $0xb8] sm:$0xff] }
0x5851   :  { %18678 = vmatprep.subr.bf16.mxu0 %v18677_v16 }
0x5854   :  { %18680 = vmatpush3.bf16.msra.mxu0 %v18677_v16 }
0x5857   :  { %17684 = vmatmul.mubr.msk.f32.vlgmr.msra.gmra.mrb[96].mxu0 %vm236_vm0, %v20254_v31 }
0x5922   :  { %v17663_v19 = vpop.f32.mrb[86].mxu0 }
0x5923   :  { %v12178_v7 = vadd.f32 %v17663_v19, %v15598_v17  ;;  %v12158_v39 = vpop.f32.mrb[87].mxu0 }
0x5924   :  { %v12177_v55 = vadd.f32 %v15598_v17, %v12158_v39  ;;  %v15624_v39 = vld [vmem:[%s21024_s16 + $0x4] ss:$0 sm:$0xff] }
0x5925   :  { %v12180_v20 = vadd.f32 %v12178_v7, %v20493_v5  ;;  %v18711_v7 = vpack.c.bf16 %v15645_v14, %v15644_v12 }
0x5926   :  { %v12179_v21 = vadd.f32 %v12177_v55, %v20491_v38 }
0x5927   :  { %v12188_v11 = vsel %vm236_vm0, %v12180_v20, 0.0 }
0x5928   :  { %12189 = vadd.xlane.f32.xlu1 %v12188_v11  ;;  %v12185_v23 = vsel %vm236_vm0, %v12179_v21, 0.0 }
0x5929   :  { %12186 = vadd.xlane.f32.xlu0 %v12185_v23 }
0x592a   :  { %v17685_v13 = vpop.f32.mrb[96].mxu0 }
0x592b   :  { %v12406_v24 = vadd.f32 %v17685_v13, %v15616_v8  ;;  %v12400_v26 = vpop.f32.mrb[97].mxu0 }
0x592c   :  { %v12401_v27 = vadd.f32 %v15616_v8, %v12400_v26 }
0x592e   :  { %v18689_v60 = vpack.c.bf16 %v12406_v24, %v12401_v27  ;;  %v20726_v27 = vld [vmem:[%s21025_s18 + $0x8] sm:$0xff] }
0x5930   :  { %18691 = vmatprep.subr.msk.bf16.mxu0 %vm19608_vm2, %v18689_v60 }
0x5931   :  { %18694 = vmatpush3.bf16.xpose.msk.msra.mxu0 %vm19608_vm2, %v18689_v60 }
0x5932   :  { %18708 = vmatprep.subr.bf16.mxu0 %v18707_v6 }
0x59b5   :  { %v12190_v38 = vpop.xlane.xlu1 %12189 }
0x59b6   :  { %v12192_v5 = vmul.f32 0.03125, %v12190_v38  ;;  %v12187_v22 = vpop.xlane.xlu0 %12186  ;;  %v20730_v38 = vld [vmem:[%s21025_s18] sm:$0xff] }
0x59b7   :  { %v12191_v61 = vmul.f32 0.03125, %v12187_v22 }
0x59b8   :  { %v12194_v15 = vsub.f32 %v12180_v20, %v12192_v5 }
0x59b9   :  { %v12193_v18 = vsub.f32 %v12179_v21, %v12191_v61  ;;  %v15647_v61 = vld [vmem:[%s21022_s11 + $0x5] ss:$0 sm:$0xff] }
0x59ba   :  { %v12196_v29 = vmul.f32 %v12194_v15, %v12194_v15 }
0x59bb   :  { %v12195_v32 = vmul.f32 %v12193_v18, %v12193_v18 }
0x59bc   :  { %v12200_v33 = vsel %vm236_vm0, %v12196_v29, 0.0 }
0x59bd   :  { %12201 = vadd.xlane.f32.xlu1 %v12200_v33  ;;  %v12197_v34 = vsel %vm236_vm0, %v12195_v32, 0.0 }
0x59be   :  { %12198 = vadd.xlane.f32.xlu0 %v12197_v34 }
0x5a4a   :  { %v12202_v49 = vpop.xlane.xlu1 %12201 }
0x5a4b   :  { %v12204_v50 = vmul.f32 0.03125, %v12202_v49  ;;  %v12199_v52 = vpop.xlane.xlu0 %12198 }
0x5a4c   :  { %v12203_v25 = vmul.f32 0.03125, %v12199_v52  ;;  %v15635_v52 = vld [vmem:[%s21018_s1 + $0xa8] sm:$0xff] }
0x5a4d   :  { %v12206_v28 = vadd.f32 1e-05, %v12204_v50  ;;  %v15634_v50 = vld [vmem:[%s21018_s1 + $0xa0] sm:$0xff] }
0x5a4e   :  { %v12205_v53 = vadd.f32 1e-05, %v12203_v25  ;;  %v18699_v25 = vpack.c.bf16 %v15635_v52, %v15634_v50  ;;  %v15672_v50 = vld [vmem:[%s21018_s1 + $0xd8] sm:$0xff] }
0x5a4f   :  { %19133 = vrsqrt.f32 %v12206_v28 }
0x5a50   :  { %19135 = vrsqrt.f32 %v12205_v53 }
0x5a59   :  { %v19134_v57 = vpop.eup %19133 }
0x5a5a   :  { %v19136_v51 = vpop.eup %19135  ;;  %v12210_v41 = vmul.f32 %v19134_v57, %v12194_v15 }
0x5a5b   :  { %v12209_v37 = vmul.f32 %v19136_v51, %v12193_v18  ;;  %v15637_v51 = vld [vmem:[%s21018_s1 + $0xb8] sm:$0xff] }
0x5a5c   :  { %v12218_v58 = vmul.f32 %v15601_v46, %v12210_v41 }
0x5a5d   :  { %v12217_v59 = vmul.f32 %v15601_v46, %v12209_v37  ;;  %v15636_v46 = vld [vmem:[%s21018_s1 + $0xb0] sm:$0xff] }
0x5a5e   :  { %v20703_v54 = vadd.f32 %v15602_v43, %v12218_v58  ;;  %v18703_v58 = vpack.c.bf16 %v15637_v51, %v15636_v46  ;;  %v15686_v46 = vld [vmem:[%s21019_s2 + $0xc8] sm:$0xff] }
0x5a5f   :  { %v20701_v1 = vadd.f32 %v15602_v43, %v12217_v59  ;;  %v15650_v59 = vld [vmem:[%s21019_s2 + $0xa0] sm:$0xff] }
0x5a60   :  { %v18715_v62 = vpack.c.bf16 %v15651_v56, %v15650_v59  ;;  %v15677_v59 = vld [vmem:[%s21017_s28 + $0xc0] sm:$0xff]  ;;  %v15678_v56 = vld [vmem:[%s21017_s28 + $0xc8] sm:$0xff] }
0x5a61   :  { %17672 = vmatprep.mubr.msk.f32.mxu1 %vm236_vm0, %v20701_v1 }
0x5a62   :  { %17673 = vmatmul.mubr.msk.f32.vlgmr.msra.gmra.mrb[126].mxu1 %vm236_vm0, %v20703_v54 }
0x5a63   :  { %18684 = vmatpush3.bf16.msra.mxu1 %v18681_v47  ;;  %17694 = vmatprep.mubr.msk.f32.mxu1 %vm236_vm0, %v20252_v30 }
0x5a64   :  { %18686 = vmatprep.subr.bf16.mxu1 %v18685_v3 }
0x5a67   :  { %18688 = vmatpush3.bf16.msra.mxu1 %v18685_v3  ;;  %v15652_v3 = vld [vmem:[%s21019_s2 + $0xb0] sm:$0xff] }
0x5a68   :  { %v18719_v48 = vpack.c.bf16 %v15653_v4, %v15652_v3  ;;  %v18741_v4 = vpack.c.bf16 %v15678_v56, %v15677_v59  ;;  %v15719_v59 = vld [vmem:[%s21019_s2 + $0xe8] sm:$0xff] }
0x5a6a   :  { %17695 = vmatmul.mubr.msk.f32.vlgmr.msra.gmra.mrb[128].mxu1 %vm236_vm0, %v20254_v31 }
0x5b35   :  { %v17674_v10 = vpop.f32.mrb[126].mxu1 }
0x5b36   :  { %v12312_v16 = vpop.f32.mrb[127].mxu1  ;;  %v12318_v19 = vadd.f32 %v17674_v10, %v15608_v9  ;;  %v15639_v10 = vld [vmem:[%s21023_s15 + $0x5] ss:$0 sm:$0xff] }
0x5b37   :  { %v12313_v17 = vadd.f32 %v15608_v9, %v12312_v16 }
0x5b39   :  { %17701 = vmatprep.mubr.msk.f32.mxu0 %vm544_vm1, %v12313_v17 }
0x5b3a   :  { %17702 = vmatmul.mubr.msk.f32.vlgmr.msra.gmra.mrb[98].mxu0 %vm544_vm1, %v12318_v19  ;;  %v15655_v19 = vld [vmem:[%s21024_s16 + $0x5] ss:$0 sm:$0xff] }
0x5b3b   :  { %18710 = vmatpush3.bf16.msra.mxu0 %v18707_v6  ;;  %17730 = vmatprep.mubr.msk.f32.mxu0 %vm236_vm0, %v20252_v30 }
0x5b3c   :  { %18712 = vmatprep.subr.bf16.mxu0 %v18711_v7 }
0x5b3d   :  { %v17696_v55 = vpop.f32.mrb[128].mxu1 }
0x5b3e   :  { %v12494_v20 = vadd.f32 %v17696_v55, %v15624_v39  ;;  %v12488_v21 = vpop.f32.mrb[129].mxu1 }
0x5b3f   :  { %v12489_v11 = vadd.f32 %v15624_v39, %v12488_v21  ;;  %18714 = vmatpush3.bf16.msra.mxu0 %v18711_v7 }
0x5b41   :  { %v18695_v8 = vpack.c.bf16 %v12494_v20, %v12489_v11 }
0x5b42   :  { %17731 = vmatmul.mubr.msk.f32.vlgmr.msra.gmra.mrb[100].mxu0 %vm236_vm0, %v20254_v31 }
0x5b43   :  { %18696 = vmatprep.subr.bf16.mxu1 %v18695_v8 }
0x5b44   :  { %18698 = vmatpush3.bf16.msra.mxu1 %v18695_v8 }
0x5b45   :  { %18700 = vmatprep.subr.bf16.mxu1 %v18699_v25 }
0x5c0d   :  { %v17703_v23 = vpop.f32.mrb[98].mxu0 }
0x5c0e   :  { %v12585_v13 = vmul.f32 0.35355338, %v17703_v23  ;;  %v12575_v24 = vpop.f32.mrb[99].mxu0 }
0x5c0f   :  { %v12584_v26 = vmul.f32 0.35355338, %v12575_v24 }
0x5c10   :  { %v12587_v60 = vadd.f32 %v20726_v27, %v12585_v13 }
0x5c11   :  { %v12586_v5 = vadd.f32 %v20730_v38, %v12584_v26 }
0x5c12   :  { %v12591_v22 = vsel %vm636_vm3, %v12587_v60, -inf }
0x5c13   :  { %12592 = vmax.xlane.f32.xlu1 %v12591_v22  ;;  %v12588_v15 = vsel %vm636_vm3, %v12586_v5, -inf }
0x5c14   :  { %12589 = vmax.xlane.f32.xlu0 %v12588_v15 }
0x5c15   :  { %v17732_v18 = vpop.f32.mrb[100].mxu0 }
0x5c16   :  { %v12866_v29 = vadd.f32 %v17732_v18, %v15647_v61  ;;  %v12860_v32 = vpop.f32.mrb[101].mxu0 }
0x5c17   :  { %v12861_v33 = vadd.f32 %v15647_v61, %v12860_v32 }
0x5c19   :  { %v18723_v34 = vpack.c.bf16 %v12866_v29, %v12861_v33 }
0x5c1b   :  { %18725 = vmatprep.subr.msk.bf16.mxu0 %vm19608_vm2, %v18723_v34 }
0x5c1c   :  { %18728 = vmatpush3.bf16.xpose.msk.msra.mxu0 %vm19608_vm2, %v18723_v34 }
0x5ca0   :  { %v12593_v0 = vpop.xlane.xlu1 %12592 }
0x5ca1   :  { %v12595_v2 = vsub.f32 %v12587_v60, %v12593_v0  ;;  %v12590_v35 = vpop.xlane.xlu0 %12589 }
0x5ca2   :  { %v12594_v42 = vsub.f32 %v12586_v5, %v12590_v35  ;;  %v15669_v35 = vld [vmem:[%s21018_s1 + $0xc0] sm:$0xff] }
0x5ca3   :  { %v12598_v40 = vmul.f32 1.442695, %v12595_v2 }
0x5ca4   :  { %v12596_v36 = vmul.f32 1.442695, %v12594_v42  ;;  %v15670_v42 = vld [vmem:[%s21018_s1 + $0xc8] sm:$0xff] }
0x5ca5   :  { %19137 = vpow2.f32 %v12598_v40  ;;  %v18733_v40 = vpack.c.bf16 %v15670_v42, %v15669_v35 }
0x5ca6   :  { %19139 = vpow2.f32 %v12596_v36  ;;  %v15664_v36 = vld [vmem:[%s21026_s0 + $0x28] sm:$0xff] }
0x5ca7   :  { %17758 = vmatprep.subr.mxu0 %v15664_v36 }
0x5caf   :  { %v19138_v44 = vpop.eup %19137 }
0x5cb0   :  { %v19140_v45 = vpop.eup %19139  ;;  %v12603_v47 = vsel %vm636_vm3, %v19138_v44, 0.0 }
0x5cb1   :  { %12604 = vadd.xlane.f32.xlu1 %v12603_v47  ;;  %v12600_v49 = vsel %vm636_vm3, %v19140_v45, 0.0 }
0x5cb2   :  { %12601 = vadd.xlane.f32.xlu0 %v12600_v49  ;;  %v15671_v49 = vld [vmem:[%s21018_s1 + $0xd0] sm:$0xff] }
0x5d3e   :  { %v12605_v28 = vpop.xlane.xlu1 %12604 }
0x5d3f   :  { %19141 = vrcp.f32 %v12605_v28  ;;  %v12602_v53 = vpop.xlane.xlu0 %12601 }
0x5d40   :  { %19143 = vrcp.f32 %v12602_v53  ;;  %v18737_v53 = vpack.c.bf16 %v15672_v50, %v15671_v49  ;;  %v15703_v49 = vld [vmem:[%s21018_s1 + $0xe8] sm:$0xff] }
0x5d49   :  { %v19142_v57 = vpop.eup %19141 }
0x5d4a   :  { %v19144_v41 = vpop.eup %19143  ;;  %v12609_v43 = vmul.f32 %v19142_v57, %v19138_v44  ;;  %v15685_v57 = vld [vmem:[%s21019_s2 + $0xc0] sm:$0xff] }
0x5d4b   :  { %v12608_v37 = vmul.f32 %v19144_v41, %v19140_v45  ;;  %v18749_v51 = vpack.c.bf16 %v15686_v46, %v15685_v57  ;;  %v15687_v41 = vld [vmem:[%s21019_s2 + $0xd0] sm:$0xff]  ;;  %v15705_v46 = vld [vmem:[%s21018_s1 + $0xf8] sm:$0xff] }
0x5d4c   :  { %v15704_v57 = vld [vmem:[%s21018_s1 + $0xf0] sm:$0xff] }
0x5d4d   :  { %17708 = vmatprep.mubr.msk.f32.mxu1 %vm636_vm3, %v12608_v37  ;;  %v15688_v37 = vld [vmem:[%s21019_s2 + $0xd8] sm:$0xff] }
0x5d4e   :  { %17709 = vmatmul.mubr.msk.f32.vlgmr.msra.gmra.mrb[130].mxu1 %vm636_vm3, %v12609_v43  ;;  %v18753_v43 = vpack.c.bf16 %v15688_v37, %v15687_v41 }
0x5d4f   :  { %18702 = vmatpush3.bf16.msra.mxu1 %v18699_v25  ;;  %17719 = vmatprep.mubr.msk.f32.mxu1 %vm236_vm0, %v20701_v1 }
0x5d50   :  { %18704 = vmatprep.subr.bf16.mxu1 %v18703_v58 }
0x5d53   :  { %18706 = vmatpush3.bf16.msra.mxu1 %v18703_v58  ;;  %v15633_v58 = vld [vmem:[%s21026_s0 + $0x20] sm:$0xff] }
0x5d54   :  { %18716 = vmatprep.subr.bf16.mxu1 %v18715_v62 }
0x5d56   :  { %17720 = vmatmul.mubr.msk.f32.vlgmr.msra.gmra.mrb[132].mxu1 %vm236_vm0, %v20703_v54 }
0x5d57   :  { %18718 = vmatpush3.bf16.msra.mxu1 %v18715_v62  ;;  %17741 = vmatprep.mubr.msk.f32.mxu1 %vm236_vm0, %v20252_v30 }
0x5d58   :  { %18720 = vmatprep.subr.bf16.mxu1 %v18719_v48 }
0x5d5b   :  { %18722 = vmatpush3.bf16.msra.mxu1 %v18719_v48  ;;  %v15674_v48 = vld [vmem:[%s21023_s15 + $0x6] ss:$0 sm:$0xff] }
0x5d5e   :  { %17742 = vmatmul.mubr.msk.f32.vlgmr.msra.gmra.mrb[134].mxu1 %vm236_vm0, %v20254_v31 }
0x5e21   :  { %v20760_v6 = vpop.f32.mrb[130].mxu1 }
0x5e22   :  { %v20762_v9 = vpop.f32.mrb[131].mxu1 }
0x5e29   :  { %v17721_v12 = vpop.f32.mrb[132].mxu1 }
0x5e2a   :  { %v12772_v14 = vpop.f32.mrb[133].mxu1  ;;  %v12778_v17 = vadd.f32 %v17721_v12, %v15639_v10  ;;  %v15680_v12 = vld [vmem:[%s21017_s28 + $0xd8] sm:$0xff] }
0x5e2b   :  { %v12773_v16 = vadd.f32 %v15639_v10, %v12772_v14  ;;  %v15679_v10 = vld [vmem:[%s21017_s28 + $0xd0] sm:$0xff] }
0x5e2d   :  { %17748 = vmatprep.mubr.msk.f32.mxu0 %vm544_vm1, %v12773_v16 }
0x5e2e   :  { %17749 = vmatmul.mubr.msk.f32.vlgmr.msra.gmra.mrb[102].mxu0 %vm544_vm1, %v12778_v17 }
0x5e2f   :  { %17759 = vmatpush3.msra.mxu0 %v15664_v36 }
0x5e30   :  { %17763 = vmatprep.subr.mxu0 %v15633_v58 }
0x5e31   :  { %v17743_v7 = vpop.f32.mrb[134].mxu1 }
0x5e32   :  { %v12954_v39 = vadd.f32 %v17743_v7, %v15655_v19  ;;  %v12948_v55 = vpop.f32.mrb[135].mxu1  ;;  %v15690_v7 = vld [vmem:[%s21024_s16 + $0x6] ss:$0 sm:$0xff] }
0x5e33   :  { %v12949_v20 = vadd.f32 %v15655_v19, %v12948_v55  ;;  %v18745_v19 = vpack.c.bf16 %v15680_v12, %v15679_v10  ;;  %v15711_v10 = vld [vmem:[%s21017_s28 + $0xe8] sm:$0xff] }
0x5e35   :  { %v18729_v21 = vpack.c.bf16 %v12954_v39, %v12949_v20 }
0x5e37   :  { %18730 = vmatprep.subr.bf16.mxu1 %v18729_v21 }
0x5e38   :  { %18732 = vmatpush3.bf16.msra.mxu1 %v18729_v21 }
0x5e39   :  { %18734 = vmatprep.subr.bf16.mxu1 %v18733_v40 }
0x5f01   :  { %v17750_v11 = vpop.f32.mrb[102].mxu0 }
0x5f02   :  { %v13045_v8 = vmul.f32 0.35355338, %v17750_v11  ;;  %v13035_v23 = vpop.f32.mrb[103].mxu0 }
0x5f03   :  { %v13044_v13 = vmul.f32 0.35355338, %v13035_v23 }
0x5f04   :  { %v13047_v24 = vadd.f32 %v20726_v27, %v13045_v8 }
0x5f05   :  { %v13046_v26 = vadd.f32 %v20730_v38, %v13044_v13 }
0x5f06   :  { %v13051_v60 = vsel %vm636_vm3, %v13047_v24, -inf }
0x5f07   :  { %13052 = vmax.xlane.f32.xlu1 %v13051_v60  ;;  %v13048_v5 = vsel %vm636_vm3, %v13046_v26, -inf }
0x5f08   :  { %13049 = vmax.xlane.f32.xlu0 %v13048_v5 }
0x5f94   :  { %v13053_v22 = vpop.xlane.xlu1 %13052 }
0x5f95   :  { %v13055_v61 = vsub.f32 %v13047_v24, %v13053_v22  ;;  %v13050_v15 = vpop.xlane.xlu0 %13049 }
0x5f96   :  { %v13054_v18 = vsub.f32 %v13046_v26, %v13050_v15 }
0x5f97   :  { %v13058_v29 = vmul.f32 1.442695, %v13055_v61 }
0x5f98   :  { %v13056_v32 = vmul.f32 1.442695, %v13054_v18 }
0x5f99   :  { %19145 = vpow2.f32 %v13058_v29 }
0x5f9a   :  { %19147 = vpow2.f32 %v13056_v32 }
0x5fa3   :  { %v19146_v33 = vpop.eup %19145 }
0x5fa4   :  { %v19148_v34 = vpop.eup %19147  ;;  %v13063_v0 = vsel %vm636_vm3, %v19146_v33, 0.0 }
0x5fa5   :  { %13064 = vadd.xlane.f32.xlu1 %v13063_v0  ;;  %v13060_v2 = vsel %vm636_vm3, %v19148_v34, 0.0 }
0x5fa6   :  { %13061 = vadd.xlane.f32.xlu0 %v13060_v2 }
0x6032   :  { %v13065_v44 = vpop.xlane.xlu1 %13064 }
0x6033   :  { %19149 = vrcp.f32 %v13065_v44  ;;  %v13062_v45 = vpop.xlane.xlu0 %13061 }
0x6034   :  { %19151 = vrcp.f32 %v13062_v45 }
0x603d   :  { %v19150_v47 = vpop.eup %19149 }
0x603e   :  { %v19152_v52 = vpop.eup %19151  ;;  %v13069_v28 = vmul.f32 %v19150_v47, %v19146_v33  ;;  %v15702_v47 = vld [vmem:[%s21018_s1 + $0xe0] sm:$0xff] }
0x603f   :  { %v13068_v25 = vmul.f32 %v19152_v52, %v19148_v34  ;;  %v18767_v50 = vpack.c.bf16 %v15703_v49, %v15702_v47  ;;  %v15699_v52 = vld [vmem:[%s21026_s0 + $0x30] sm:$0xff]  ;;  %v15732_v47 = vld [vmem:[%s21026_s0 + $0x38] sm:$0xff] }
0x6041   :  { %17755 = vmatprep.mubr.msk.f32.mxu1 %vm636_vm3, %v13068_v25 }
0x6042   :  { %17756 = vmatmul.mubr.msk.f32.vlgmr.msra.gmra.mrb[136].mxu1 %vm636_vm3, %v13069_v28 }
0x6043   :  { %18736 = vmatpush3.bf16.msra.mxu1 %v18733_v40  ;;  %17776 = vmatprep.mubr.msk.f32.mxu1 %vm236_vm0, %v20701_v1 }
0x6044   :  { %18738 = vmatprep.subr.bf16.mxu1 %v18737_v53 }
0x6047   :  { %18740 = vmatpush3.bf16.msra.mxu1 %v18737_v53 }
0x6048   :  { %18750 = vmatprep.subr.bf16.mxu1 %v18749_v51 }
0x604a   :  { %17777 = vmatmul.mubr.msk.f32.vlgmr.msra.gmra.mrb[138].mxu1 %vm236_vm0, %v20703_v54 }
0x604b   :  { %18752 = vmatpush3.bf16.msra.mxu1 %v18749_v51  ;;  %17798 = vmatprep.mubr.msk.f32.mxu1 %vm236_vm0, %v20252_v30 }
0x604c   :  { %18754 = vmatprep.subr.bf16.mxu1 %v18753_v43 }
0x604f   :  { %18756 = vmatpush3.bf16.msra.mxu1 %v18753_v43  ;;  %v18771_v43 = vpack.c.bf16 %v15705_v46, %v15704_v57 }
0x6052   :  { %17799 = vmatmul.mubr.msk.f32.vlgmr.msra.gmra.mrb[140].mxu1 %vm236_vm0, %v20254_v31 }
0x6115   :  { %v17757_v62 = vpop.f32.mrb[136].mxu1 }
0x6116   :  { %v13142_v3 = vpop.f32.mrb[137].mxu1 }
0x6117   :  { %17760 = vmatprep.mubr.msk.f32.mxu0 %vm544_vm1, %v13142_v3  ;;  %v15721_v3 = vld [vmem:[%s21019_s2 + $0xf8] sm:$0xff] }
0x6118   :  { %17761 = vmatmul.mubr.msk.f32.vlgmr.msra.gmra.mrb[104].mxu0 %vm544_vm1, %v17757_v62  ;;  %v15720_v62 = vld [vmem:[%s21019_s2 + $0xf0] sm:$0xff] }
0x6119   :  { %17764 = vmatpush3.msra.mxu0 %v15633_v58  ;;  %17765 = vmatprep.mubr.msk.f32.mxu0 %vm544_vm1, %v20762_v9  ;;  %v15718_v58 = vld [vmem:[%s21019_s2 + $0xe0] sm:$0xff] }
0x611a   :  { %18742 = vmatprep.subr.bf16.mxu0 %v18741_v4  ;;  %v18783_v56 = vpack.c.bf16 %v15719_v59, %v15718_v58 }
0x611d   :  { %v17778_v14 = vpop.f32.mrb[138].mxu1 }
0x611e   :  { %v13400_v16 = vadd.f32 %v17778_v14, %v15674_v48  ;;  %v13394_v17 = vpop.f32.mrb[139].mxu1  ;;  %v15712_v14 = vld [vmem:[%s21017_s28 + $0xf0] sm:$0xff] }
0x611f   :  { %v13395_v20 = vadd.f32 %v15674_v48, %v13394_v17  ;;  %v15710_v48 = vld [vmem:[%s21017_s28 + $0xe0] sm:$0xff] }
0x6120   :  { %17766 = vmatmul.mubr.msk.f32.vlgmr.msra.gmra.mrb[104].mxu0 %vm544_vm1, %v20760_v6  ;;  %v15682_v6 = vld [vmem:[%s21022_s11 + $0x6] ss:$0 sm:$0xff]  ;;  %v18775_v12 = vpack.c.bf16 %v15711_v10, %v15710_v48 }
0x6121   :  { %18744 = vmatpush3.bf16.msra.mxu0 %v18741_v4  ;;  %17787 = vmatprep.mubr.msk.f32.mxu0 %vm236_vm0, %v20252_v30  ;;  %v18787_v4 = vpack.c.bf16 %v15721_v3, %v15720_v62 }
0x6122   :  { %18746 = vmatprep.subr.bf16.mxu0 %v18745_v19 }
0x6125   :  { %18748 = vmatpush3.bf16.msra.mxu0 %v18745_v19  ;;  %v17800_v9 = vpop.f32.mrb[140].mxu1 }
0x6126   :  { %v13576_v39 = vadd.f32 %v17800_v9, %v15690_v7  ;;  %v13570_v55 = vpop.f32.mrb[141].mxu1  ;;  %v15707_v9 = vld [vmem:[%s21023_s15 + $0x7] ss:$0 sm:$0xff] }
0x6127   :  { %v13571_v21 = vadd.f32 %v15690_v7, %v13570_v55 }
0x6128   :  { %17788 = vmatmul.mubr.msk.f32.vlgmr.msra.gmra.mrb[106].mxu0 %vm236_vm0, %v20254_v31 }
0x6129   :  { %v18763_v11 = vpack.c.bf16 %v13576_v39, %v13571_v21  ;;  %17805 = vmatprep.mubr.msk.f32.mxu0 %vm544_vm1, %v13395_v20 }
0x612b   :  { %18764 = vmatprep.subr.bf16.mxu1 %v18763_v11 }
0x612c   :  { %18766 = vmatpush3.bf16.msra.mxu1 %v18763_v11  ;;  %v15723_v11 = vld [vmem:[%s21024_s16 + $0x7] ss:$0 sm:$0xff] }
0x612d   :  { %18768 = vmatprep.subr.bf16.mxu1 %v18767_v50 }
0x61fb   :  { %v17789_v8 = vpop.f32.mrb[106].mxu0 }
0x61fc   :  { %v13488_v23 = vadd.f32 %v17789_v8, %v15682_v6  ;;  %v13482_v13 = vpop.f32.mrb[107].mxu0 }
0x61fd   :  { %v13483_v24 = vadd.f32 %v15682_v6, %v13482_v13 }
0x61ff   :  { %v18757_v26 = vpack.c.bf16 %v13488_v23, %v13483_v24 }
0x6201   :  { %18759 = vmatprep.subr.msk.bf16.mxu0 %vm19608_vm2, %v18757_v26 }
0x6202   :  { %18762 = vmatpush3.bf16.xpose.msk.msra.mxu0 %vm19608_vm2, %v18757_v26 }
0x6203   :  { %17815 = vmatprep.subr.mxu0 %v15699_v52 }
0x6209   :  { %17806 = vmatmul.mubr.msk.f32.vlgmr.msra.gmra.mrb[108].mxu0 %vm544_vm1, %v13400_v16  ;;  %v15713_v16 = vld [vmem:[%s21017_s28 + $0xf8] sm:$0xff] }
0x620a   :  { %17816 = vmatpush3.msra.mxu0 %v15699_v52  ;;  %v18779_v7 = vpack.c.bf16 %v15713_v16, %v15712_v14 }
0x620b   :  { %18776 = vmatprep.subr.bf16.mxu0 %v18775_v12 }
0x62dc   :  { %v17807_v60 = vpop.f32.mrb[108].mxu0 }
0x62dd   :  { %v13667_v5 = vmul.f32 0.35355338, %v17807_v60  ;;  %v13657_v22 = vpop.f32.mrb[109].mxu0 }
0x62de   :  { %v13666_v61 = vmul.f32 0.35355338, %v13657_v22 }
0x62df   :  { %v13669_v15 = vadd.f32 %v20726_v27, %v13667_v5 }
0x62e0   :  { %v13668_v18 = vadd.f32 %v20730_v38, %v13666_v61 }
0x62e1   :  { %v13673_v29 = vsel %vm636_vm3, %v13669_v15, -inf }
0x62e2   :  { %13674 = vmax.xlane.f32.xlu1 %v13673_v29  ;;  %v13670_v32 = vsel %vm636_vm3, %v13668_v18, -inf }
0x62e3   :  { %13671 = vmax.xlane.f32.xlu0 %v13670_v32 }
0x636f   :  { %v13675_v33 = vpop.xlane.xlu1 %13674 }
0x6370   :  { %v13677_v34 = vsub.f32 %v13669_v15, %v13675_v33  ;;  %v13672_v0 = vpop.xlane.xlu0 %13671 }
0x6371   :  { %v13676_v2 = vsub.f32 %v13668_v18, %v13672_v0 }
0x6372   :  { %v13680_v35 = vmul.f32 1.442695, %v13677_v34 }
0x6373   :  { %v13678_v42 = vmul.f32 1.442695, %v13676_v2 }
0x6374   :  { %19153 = vpow2.f32 %v13680_v35 }
0x6375   :  { %19155 = vpow2.f32 %v13678_v42 }
0x637e   :  { %v19154_v40 = vpop.eup %19153 }
0x637f   :  { %v19156_v36 = vpop.eup %19155  ;;  %v13685_v44 = vsel %vm636_vm3, %v19154_v40, 0.0 }
0x6380   :  { %13686 = vadd.xlane.f32.xlu1 %v13685_v44  ;;  %v13682_v45 = vsel %vm636_vm3, %v19156_v36, 0.0 }
0x6381   :  { %13683 = vadd.xlane.f32.xlu0 %v13682_v45 }
0x640d   :  { %v13687_v25 = vpop.xlane.xlu1 %13686 }
0x640e   :  { %19157 = vrcp.f32 %v13687_v25  ;;  %v13684_v28 = vpop.xlane.xlu0 %13683 }
0x640f   :  { %19159 = vrcp.f32 %v13684_v28 }
0x6418   :  { %v19158_v53 = vpop.eup %19157 }
0x6419   :  { %v19160_v51 = vpop.eup %19159  ;;  %v13691_v37 = vmul.f32 %v19158_v53, %v19154_v40 }
0x641a   :  { %v13690_v41 = vmul.f32 %v19160_v51, %v19156_v36  ;;  %v15736_v51 = vld [vmem:[%s21027_s5 + $0x1] ss:$0 sm:$0xff] }
0x641c   :  { %17812 = vmatprep.mubr.msk.f32.mxu1 %vm636_vm3, %v13690_v41 }
0x641d   :  { %17813 = vmatmul.mubr.msk.f32.vlgmr.msra.gmra.mrb[142].mxu1 %vm636_vm3, %v13691_v37 }
0x641e   :  { %18770 = vmatpush3.bf16.msra.mxu1 %v18767_v50  ;;  %17828 = vmatprep.mubr.msk.f32.mxu1 %vm236_vm0, %v20701_v1 }
0x641f   :  { %18772 = vmatprep.subr.bf16.mxu1 %v18771_v43 }
0x6422   :  { %18774 = vmatpush3.bf16.msra.mxu1 %v18771_v43 }
0x6423   :  { %18784 = vmatprep.subr.bf16.mxu1 %v18783_v56 }
0x6425   :  { %17829 = vmatmul.mubr.msk.f32.vlgmr.msra.gmra.mrb[144].mxu1 %vm236_vm0, %v20703_v54 }
0x6426   :  { %18786 = vmatpush3.bf16.msra.mxu1 %v18783_v56  ;;  %17850 = vmatprep.mubr.msk.f32.mxu1 %vm236_vm0, %v20252_v30 }
0x6427   :  { %18788 = vmatprep.subr.bf16.mxu1 %v18787_v4 }
0x642a   :  { %18790 = vmatpush3.bf16.msra.mxu1 %v18787_v4 }
0x642d   :  { %17851 = vmatmul.mubr.msk.f32.vlgmr.msra.gmra.mrb[146].mxu1 %vm236_vm0, %v20254_v31 }
0x64f0   :  { %v17814_v17 = vpop.f32.mrb[142].mxu1 }
0x64f1   :  { %v13764_v19 = vpop.f32.mrb[143].mxu1 }
0x64f2   :  { %17817 = vmatprep.mubr.msk.f32.mxu0 %vm544_vm1, %v13764_v19 }
0x64f3   :  { %17818 = vmatmul.mubr.msk.f32.vlgmr.msra.gmra.mrb[104].mxu0 %vm544_vm1, %v17814_v17 }
0x64f4   :  { %18778 = vmatpush3.bf16.msra.mxu0 %v18775_v12  ;;  %17839 = vmatprep.mubr.msk.f32.mxu0 %vm236_vm0, %v20252_v30  ;;  %v15715_v30 = vld [vmem:[%s21022_s11 + $0x7] ss:$0 sm:$0xff] }
0x64f5   :  { %18780 = vmatprep.subr.bf16.mxu0 %v18779_v7 }
0x64f8   :  { %v17830_v39 = vpop.f32.mrb[144].mxu1  ;;  %18782 = vmatpush3.bf16.msra.mxu0 %v18779_v7  ;;  %v15741_v7 = vld [vmem:[%s21028_s30 + $0x20] sm:$0xff] }
0x64f9   :  { %v13943_v55 = vadd.f32 %v17830_v39, %v15707_v9  ;;  %v13937_v20 = vpop.f32.mrb[145].mxu1 }
0x64fa   :  { %v13938_v21 = vadd.f32 %v15707_v9, %v13937_v20  ;;  %v15742_v9 = vld [vmem:[%s21028_s30 + $0x28] sm:$0xff]  ;;  %v15744_v20 = vld [vmem:[%s21028_s30 + $0x38] sm:$0xff] }
0x64fb   :  { %17840 = vmatmul.mubr.msk.f32.vlgmr.msra.gmra.mrb[110].mxu0 %vm236_vm0, %v20254_v31  ;;  %v18801_v39 = vpack.c.bf16 %v15742_v9, %v15741_v7 }
0x64fc   :  { %17857 = vmatprep.mubr.msk.f32.mxu0 %vm544_vm1, %v13938_v21 }
0x6500   :  { %v17852_v6 = vpop.f32.mrb[146].mxu1 }
0x6501   :  { %v14119_v8 = vadd.f32 %v17852_v6, %v15723_v11  ;;  %v14113_v23 = vpop.f32.mrb[147].mxu1 }
0x6502   :  { %v14114_v13 = vadd.f32 %v15723_v11, %v14113_v23 }
0x6504   :  { %v18797_v24 = vpack.c.bf16 %v14119_v8, %v14114_v13 }
0x6506   :  { %18798 = vmatprep.subr.bf16.mxu1 %v18797_v24 }
0x6507   :  { %18800 = vmatpush3.bf16.msra.mxu1 %v18797_v24 }
0x6508   :  { %18802 = vmatprep.subr.bf16.mxu1 %v18801_v39 }
0x65ce   :  { %v17841_v26 = vpop.f32.mrb[110].mxu0 }
0x65cf   :  { %v14031_v60 = vadd.f32 %v17841_v26, %v15715_v30  ;;  %v14025_v5 = vpop.f32.mrb[111].mxu0  ;;  %v15739_v26 = vld [vmem:[%s21029_s12 + $0x1] ss:$0 sm:$0xff] }
0x65d0   :  { %v14026_v22 = vadd.f32 %v15715_v30, %v14025_v5 }
0x65d2   :  { %v18791_v61 = vpack.c.bf16 %v14031_v60, %v14026_v22 }
0x65d4   :  { %18793 = vmatprep.subr.msk.bf16.mxu0 %vm19608_vm2, %v18791_v61 }
0x65d5   :  { %18796 = vmatpush3.bf16.xpose.msk.msra.mxu0 %vm19608_vm2, %v18791_v61  ;;  %v15740_v61 = vld [vmem:[%s21030_s22 + $0x1] ss:$0 sm:$0xff] }
0x65d6   :  { %17867 = vmatprep.subr.mxu0 %v15732_v47 }
0x65dc   :  { %17858 = vmatmul.mubr.msk.f32.vlgmr.msra.gmra.mrb[112].mxu0 %vm544_vm1, %v13943_v55  ;;  %v15743_v55 = vld [vmem:[%s21028_s30 + $0x30] sm:$0xff] }
0x65dd   :  { %17868 = vmatpush3.msra.mxu0 %v15732_v47  ;;  %v18805_v21 = vpack.c.bf16 %v15744_v20, %v15743_v55 }
0x66af   :  { %v17859_v31 = vpop.f32.mrb[112].mxu0 }
0x66b0   :  { %v14210_v15 = vmul.f32 0.35355338, %v17859_v31  ;;  %v14200_v18 = vpop.f32.mrb[113].mxu0 }
0x66b1   :  { %v14209_v29 = vmul.f32 0.35355338, %v14200_v18 }
0x66b2   :  { %v14212_v32 = vadd.f32 %v20726_v27, %v14210_v15 }
0x66b3   :  { %v14211_v33 = vadd.f32 %v20730_v38, %v14209_v29 }
0x66b4   :  { %v14216_v34 = vsel %vm636_vm3, %v14212_v32, -inf }
0x66b5   :  { %14217 = vmax.xlane.f32.xlu1 %v14216_v34  ;;  %v14213_v0 = vsel %vm636_vm3, %v14211_v33, -inf }
0x66b6   :  { %14214 = vmax.xlane.f32.xlu0 %v14213_v0  ;;  %v15751_v0 = vld [vmem:[%s21031_s23 + $0x50] sm:$0xff] }
0x6742   :  { %v14218_v2 = vpop.xlane.xlu1 %14217 }
0x6743   :  { %v14220_v63 = vsub.f32 %v14212_v32, %v14218_v2  ;;  %v14215_v35 = vpop.xlane.xlu0 %14214  ;;  %v15749_v32 = vld [vmem:[%s21031_s23 + $0x40] sm:$0xff]  ;;  %v15752_v2 = vld [vmem:[%s21031_s23 + $0x58] sm:$0xff] }
0x6744   :  { %v14219_v42 = vsub.f32 %v14211_v33, %v14215_v35  ;;  %v15750_v33 = vld [vmem:[%s21031_s23 + $0x48] sm:$0xff]  ;;  %v15753_v35 = vld [vmem:[%s21031_s23 + $0x60] sm:$0xff] }
0x6745   :  { %v14223_v40 = vmul.f32 1.442695, %v14220_v63  ;;  %v18809_v34 = vpack.c.bf16 %v15750_v33, %v15749_v32  ;;  %v18813_v63 = vpack.c.bf16 %v15752_v2, %v15751_v0  ;;  %v15763_v0 = vld [vmem:[%s21034_s25 + $0x1] ss:$0 sm:$0xff] }
0x6746   :  { %v14221_v36 = vmul.f32 1.442695, %v14219_v42  ;;  %v15754_v42 = vld [vmem:[%s21031_s23 + $0x68] sm:$0xff] }
0x6747   :  { %19161 = vpow2.f32 %v14223_v40  ;;  %18810 = vmatprep.subr.bf16.mxu0 %v18809_v34  ;;  %v18817_v40 = vpack.c.bf16 %v15754_v42, %v15753_v35  ;;  %v15764_v42 = vld [vmem:[%s21035_s19 + $0x1] ss:$0 sm:$0xff] }
0x6748   :  { %19163 = vpow2.f32 %v14221_v36  ;;  %v15755_v36 = vld [vmem:[%s21031_s23 + $0x70] sm:$0xff] }
0x6751   :  { %v19162_v44 = vpop.eup %19161 }
0x6752   :  { %v19164_v45 = vpop.eup %19163  ;;  %v14228_v27 = vsel %vm636_vm3, %v19162_v44, 0.0 }
0x6753   :  { %14229 = vadd.xlane.f32.xlu1 %v14228_v27  ;;  %v14225_v38 = vsel %vm636_vm3, %v19164_v45, 0.0  ;;  %v15746_v27 = vld [vmem:[%s21032_s13 + $0x1] ss:$0 sm:$0xff] }
0x6754   :  { %14226 = vadd.xlane.f32.xlu0 %v14225_v38 }
0x67e0   :  { %v14230_v49 = vpop.xlane.xlu1 %14229 }
0x67e1   :  { %19165 = vrcp.f32 %v14230_v49  ;;  %v14227_v50 = vpop.xlane.xlu0 %14226 }
0x67e2   :  { %19167 = vrcp.f32 %v14227_v50 }
0x67eb   :  { %v19166_v52 = vpop.eup %19165 }
0x67ec   :  { %v19168_v25 = vpop.eup %19167  ;;  %v14234_v53 = vmul.f32 %v19166_v52, %v19162_v44  ;;  %v15756_v44 = vld [vmem:[%s21031_s23 + $0x78] sm:$0xff] }
0x67ed   :  { %v14233_v28 = vmul.f32 %v19168_v25, %v19164_v45  ;;  %v18821_v45 = vpack.c.bf16 %v15756_v44, %v15755_v36 }
0x67ef   :  { %17864 = vmatprep.mubr.msk.f32.mxu1 %vm636_vm3, %v14233_v28 }
0x67f0   :  { %17865 = vmatmul.mubr.msk.f32.vlgmr.msra.gmra.mrb[148].mxu1 %vm636_vm3, %v14234_v53 }
0x67f1   :  { %18804 = vmatpush3.bf16.msra.mxu1 %v18801_v39 }
0x67f2   :  { %18806 = vmatprep.subr.bf16.mxu1 %v18805_v21 }
0x67f5   :  { %18808 = vmatpush3.bf16.msra.mxu1 %v18805_v21 }
0x68c3   :  { %v17866_v57 = vpop.f32.mrb[148].mxu1 }
0x68c4   :  { %v14307_v46 = vpop.f32.mrb[149].mxu1 }
0x68c5   :  { %17869 = vmatprep.mubr.msk.f32.mxu0 %vm544_vm1, %v14307_v46 }
0x68c6   :  { %17870 = vmatmul.mubr.msk.f32.vlgmr.msra.gmra.mrb[104].mxu0 %vm544_vm1, %v17866_v57 }
0x68c7   :  { %18812 = vmatpush3.bf16.msra.mxu0 %v18809_v34 }
0x68c8   :  { %18814 = vmatprep.subr.bf16.mxu0 %v18813_v63 }
0x68cb   :  { %18816 = vmatpush3.bf16.msra.mxu0 %v18813_v63 }
0x68cc   :  { %18818 = vmatprep.subr.bf16.mxu0 %v18817_v40 }
0x68cf   :  { %18820 = vmatpush3.bf16.msra.mxu0 %v18817_v40 }
0x68d0   :  { %18822 = vmatprep.subr.bf16.mxu0 %v18821_v45 }
0x68d3   :  { %18824 = vmatpush3.bf16.msra.mxu0 %v18821_v45 }
0x6999   :  { %v17871_v41 = vpop.f32.mrb[104].mxu0 }
0x699a   :  { %v14410_v37 = vadd.f32 %v17871_v41, %v15736_v51  ;;  %v14390_v43 = vpop.f32.mrb[105].mxu0 }
0x699b   :  { %v14409_v58 = vadd.f32 %v15736_v51, %v14390_v43 }
0x699c   :  { %v14412_v59 = vadd.f32 %v14410_v37, %v20703_v54 }
0x699d   :  { %v14411_v56 = vadd.f32 %v14409_v58, %v20701_v1 }
0x699e   :  { %v14420_v62 = vsel %vm236_vm0, %v14412_v59, 0.0 }
0x699f   :  { %14421 = vadd.xlane.f32.xlu1 %v14420_v62  ;;  %v14417_v3 = vsel %vm236_vm0, %v14411_v56, 0.0 }
0x69a0   :  { %14418 = vadd.xlane.f32.xlu0 %v14417_v3 }
0x6a2c   :  { %v14422_v4 = vpop.xlane.xlu1 %14421 }
0x6a2d   :  { %v14424_v48 = vmul.f32 0.03125, %v14422_v4  ;;  %v14419_v10 = vpop.xlane.xlu0 %14418 }
0x6a2e   :  { %v14423_v12 = vmul.f32 0.03125, %v14419_v10 }
0x6a2f   :  { %v14426_v14 = vsub.f32 %v14412_v59, %v14424_v48 }
0x6a30   :  { %v14425_v16 = vsub.f32 %v14411_v56, %v14423_v12  ;;  %v15758_v12 = vld [vmem:[%s21033_s21 + $0x1] ss:$0 sm:$0xff] }
0x6a31   :  { %v14428_v17 = vmul.f32 %v14426_v14, %v14426_v14 }
0x6a32   :  { %v14427_v54 = vmul.f32 %v14425_v16, %v14425_v16 }
0x6a33   :  { %v14432_v1 = vsel %vm236_vm0, %v14428_v17, 0.0 }
0x6a34   :  { %14433 = vadd.xlane.f32.xlu1 %v14432_v1  ;;  %v14429_v19 = vsel %vm236_vm0, %v14427_v54, 0.0 }
0x6a35   :  { %14430 = vadd.xlane.f32.xlu0 %v14429_v19 }
0x6ac1   :  { %v14434_v11 = vpop.xlane.xlu1 %14433 }
0x6ac2   :  { %v14436_v6 = vmul.f32 0.03125, %v14434_v11  ;;  %v14431_v8 = vpop.xlane.xlu0 %14430 }
0x6ac3   :  { %v14435_v23 = vmul.f32 0.03125, %v14431_v8 }
0x6ac4   :  { %v14438_v13 = vadd.f32 1e-05, %v14436_v6 }
0x6ac5   :  { %v14437_v24 = vadd.f32 1e-05, %v14435_v23 }
0x6ac6   :  { %19169 = vrsqrt.f32 %v14438_v13 }
0x6ac7   :  { %19171 = vrsqrt.f32 %v14437_v24 }
0x6ad0   :  { %v19170_v30 = vpop.eup %19169 }
0x6ad1   :  { %v19172_v60 = vpop.eup %19171  ;;  %v14442_v5 = vmul.f32 %v19170_v30, %v14426_v14  ;;  %v14717_v30 = vld [vmem:[%s19548_s9] sm:$0xff] }
0x6ad2   :  { %v14441_v22 = vmul.f32 %v19172_v60, %v14425_v16 }
0x6ad3   :  { %v14450_v31 = vmul.f32 %v15739_v26, %v14442_v5  ;;  %v14719_v5 = vld [vmem:[%s19548_s9 + $0x10] sm:$0xff] }
0x6ad4   :  { %v14449_v15 = vmul.f32 %v15739_v26, %v14441_v22  ;;  %v14718_v26 = vld [vmem:[%s19548_s9 + $0x8] sm:$0xff]  ;;  %v14720_v22 = vld [vmem:[%s19548_s9 + $0x18] sm:$0xff]  ;;  %s21036_s9 = sld [smem:[#allocation8_spill]] }
0x6ad5   :  { %v14458_v29 = vadd.f32 %v15740_v61, %v14450_v31  ;;  %v18825_v60 = vpack.c.bf16 %v14718_v26, %v14717_v30 }
0x6ad6   :  { %v14457_v18 = vadd.f32 %v15740_v61, %v14449_v15  ;;  %v18829_v61 = vpack.c.bf16 %v14720_v22, %v14719_v5 }
0x6ad7   :  { %18826 = vmatprep.subr.bf16.mxu1 %v18825_v60 }
0x6ad8   :  { %17880 = vmatprep.mubr.msk.f32.mxu1 %vm236_vm0, %v14457_v18 }
0x6ad9   :  { %17881 = vmatmul.mubr.msk.f32.vlgmr.msra.gmra.mrb[150].mxu1 %vm236_vm0, %v14458_v29 }
0x6ada   :  { %18828 = vmatpush3.bf16.msra.mxu1 %v18825_v60 }
0x6adb   :  { %18830 = vmatprep.subr.bf16.mxu1 %v18829_v61 }
0x6ade   :  { %18832 = vmatpush3.bf16.msra.mxu1 %v18829_v61 }
0x6bac   :  { %v17882_v38 = vpop.f32.mrb[150].mxu1 }
0x6bad   :  { %v14550_v47 = vadd.f32 %v17882_v38, %v15746_v27  ;;  %v14544_v49 = vpop.f32.mrb[151].mxu1 }
0x6bae   :  { %v14545_v50 = vadd.f32 %v15746_v27, %v14544_v49  ;;  %v15765_v27 = vld [vmem:[%s19543_s24] ss:$0 sm:$0xff] }
0x6baf   :  { %v14554_v52 = vmul.f32 %v14550_v47, %v14550_v47 }
0x6bb0   :  { %v14553_v25 = vmul.f32 %v14545_v50, %v14545_v50 }
0x6bb1   :  { %v14556_v28 = vmul.f32 %v14554_v52, %v14550_v47 }
0x6bb2   :  { %v14555_v53 = vmul.f32 %v14553_v25, %v14545_v50 }
0x6bb3   :  { %v14558_v57 = vmul.f32 0.044715, %v14556_v28 }
0x6bb4   :  { %v14557_v46 = vmul.f32 0.044715, %v14555_v53 }
0x6bb5   :  { %v14560_v51 = vadd.f32 %v14558_v57, %v14550_v47 }
0x6bb6   :  { %v14559_v41 = vadd.f32 %v14557_v46, %v14545_v50 }
0x6bb7   :  { %v14562_v37 = vmul.f32 0.7978846, %v14560_v51 }
0x6bb8   :  { %v14561_v43 = vmul.f32 0.7978846, %v14559_v41 }
0x6bb9   :  { %19173 = vtanh.f32 %v14562_v37 }
0x6bba   :  { %19175 = vtanh.f32 %v14561_v43 }
0x6bc3   :  { %v19174_v58 = vpop.eup %19173 }
0x6bc4   :  { %v19176_v59 = vpop.eup %19175  ;;  %v14566_v56 = vadd.f32 1.0, %v19174_v58 }
0x6bc5   :  { %v14565_v62 = vadd.f32 1.0, %v19176_v59 }
0x6bc6   :  { %v14568_v3 = vmul.f32 0.5, %v14566_v56 }
0x6bc7   :  { %v14567_v4 = vmul.f32 0.5, %v14565_v62 }
0x6bc8   :  { %v14570_v10 = vmul.f32 %v14568_v3, %v14550_v47 }
0x6bc9   :  { %v14569_v48 = vmul.f32 %v14567_v4, %v14545_v50 }
0x6bcb   :  { %17899 = vmatprep.mubr.msk.f32.mxu0 %vm2629_vm4, %v14569_v48  ;;  %v14834_v48 = vld [vmem:[%s21036_s9 + $0x8] sm:$0xff] }
0x6bcc   :  { %17900 = vmatmul.mubr.msk.f32.vlgmr.msra.gmra.mrb[114].mxu0 %vm2629_vm4, %v14570_v10 }
0x6c9f   :  { %v17901_v14 = vpop.f32.mrb[114].mxu0 }
0x6ca0   :  { %v14666_v16 = vadd.f32 %v17901_v14, %v15758_v12  ;;  %v14660_v17 = vpop.f32.mrb[115].mxu0 }
0x6ca1   :  { %v14661_v54 = vadd.f32 %v15758_v12, %v14660_v17  ;;  %v14833_v12 = vld [vmem:[%s21036_s9] sm:$0xff] }
0x6ca2   :  { %v14670_v1 = vadd.f32 %v14666_v16, %v14458_v29 }
0x6ca3   :  { %v14669_v19 = vadd.f32 %v14661_v54, %v14457_v18 }
0x6ca4   :  { %v14678_v7 = vsel %vm236_vm0, %v14670_v1, 0.0 }
0x6ca5   :  { %14679 = vadd.xlane.f32.xlu1 %v14678_v7  ;;  %v14675_v9 = vsel %vm236_vm0, %v14669_v19, 0.0 }
0x6ca6   :  { %14676 = vadd.xlane.f32.xlu0 %v14675_v9 }
0x6d32   :  { %v14680_v39 = vpop.xlane.xlu1 %14679 }
0x6d33   :  { %v14682_v55 = vmul.f32 0.03125, %v14680_v39  ;;  %v14677_v20 = vpop.xlane.xlu0 %14676 }
0x6d34   :  { %v14681_v21 = vmul.f32 0.03125, %v14677_v20 }
0x6d35   :  { %v14684_v11 = vsub.f32 %v14670_v1, %v14682_v55 }
0x6d36   :  { %v14683_v6 = vsub.f32 %v14669_v19, %v14681_v21 }
0x6d37   :  { %v14686_v8 = vmul.f32 %v14684_v11, %v14684_v11 }
0x6d38   :  { %v14685_v23 = vmul.f32 %v14683_v6, %v14683_v6 }
0x6d39   :  { %v14690_v13 = vsel %vm236_vm0, %v14686_v8, 0.0 }
0x6d3a   :  { %14691 = vadd.xlane.f32.xlu1 %v14690_v13  ;;  %v14687_v24 = vsel %vm236_vm0, %v14685_v23, 0.0 }
0x6d3b   :  { %14688 = vadd.xlane.f32.xlu0 %v14687_v24 }
0x6dc7   :  { %v14692_v31 = vpop.xlane.xlu1 %14691 }
0x6dc8   :  { %v14694_v15 = vmul.f32 0.03125, %v14692_v31  ;;  %v14689_v18 = vpop.xlane.xlu0 %14688 }
0x6dc9   :  { %v14693_v29 = vmul.f32 0.03125, %v14689_v18 }
0x6dca   :  { %v14696_v32 = vadd.f32 1e-05, %v14694_v15 }
0x6dcb   :  { %v14695_v33 = vadd.f32 1e-05, %v14693_v29 }
0x6dcc   :  { %19177 = vrsqrt.f32 %v14696_v32 }
0x6dcd   :  { %19179 = vrsqrt.f32 %v14695_v33 }
0x6dd6   :  { %v19178_v34 = vpop.eup %19177 }
0x6dd7   :  { %v19180_v2 = vpop.eup %19179  ;;  %v14700_v63 = vmul.f32 %v19178_v34, %v14684_v11 }
0x6dd8   :  { %v14699_v35 = vmul.f32 %v19180_v2, %v14683_v6 }
0x6dd9   :  { %v14708_v40 = vmul.f32 %v15763_v0, %v14700_v63 }
0x6dda   :  { %v14707_v36 = vmul.f32 %v15763_v0, %v14699_v35 }
0x6ddb   :  { %v14716_v45 = vadd.f32 %v15764_v42, %v14708_v40 }
0x6ddc   :  { %v14715_v44 = vadd.f32 %v15764_v42, %v14707_v36 }
0x6dde   :  { %17910 = vmatprep.mubr.msk.f32.mxu1 %vm236_vm0, %v14715_v44 }
0x6ddf   :  { %17911 = vmatmul.mubr.msk.f32.vlgmr.msra.gmra.mrb[152].mxu1 %vm236_vm0, %v14716_v45 }
0x6eb2   :  { %v17912_v38 = vpop.f32.mrb[152].mxu1 }
0x6eb3   :  { %v14806_v47 = vadd.f32 %v17912_v38, %v15765_v27  ;;  %v14800_v49 = vpop.f32.mrb[153].mxu1 }
0x6eb4   :  { %v14801_v50 = vadd.f32 %v15765_v27, %v14800_v49 }
0x6eb5   :  { %14810 = vst [vmem:[%s19553_s29 + $0x8] sm:$0xff] %v14806_v47  ;;  %14813 = vmax.xlane.f32.xlu1 %v14806_v47 }
0x6eb6   :  { %14809 = vst [vmem:[%s19553_s29] sm:$0xff] %v14801_v50  ;;  %14811 = vmax.xlane.f32.xlu0 %v14801_v50  ;;  %s19274_s29 = smov [#allocation2]  }
0x6eb7   :  { %s14861_s19 = sshll.u32 %s19274_s29, 4  ;;  %s14862_s19 = int_to_ptr.vmem [resolvable:$true] %s14861_s19 }
0x6eb8   :  { %s19195_s24 = scalar_lea.vmem %s14862_s19, 16  ;;  %s19199_s17 = scalar_lea.vmem %s14862_s19, 32 }
0x6eb9   :  { %p19196_p0 = scmp.ne.s32.totalorder %s14862_s19, %s19195_s24  ;;  %p19200_p1 = scmp.lt.s32.totalorder %s14862_s19, %s14862_s19 }
0x6eba   :  { %p19201_p2 = scmp.lt.s32.totalorder %s19199_s17, %s19195_s24 }
0x6ebc   :  { %p19202_p3 = por %p19201_p2, %p19200_p1 }
0x6ebe   :  { %p19203_p4 = pnand %p19202_p3, %p19196_p0 }
0x6f42   :  { %v14814_v52 = vpop.xlane.xlu1 %14813 }
0x6f43   :  { %v14816_v25 = vsub.f32 %v14806_v47, %v14814_v52  ;;  %v14812_v28 = vpop.xlane.xlu0 %14811 }
0x6f44   :  { %v14815_v53 = vsub.f32 %v14801_v50, %v14812_v28 }
0x6f45   :  { %v14819_v57 = vmul.f32 1.442695, %v14816_v25 }
0x6f46   :  { %v14817_v46 = vmul.f32 1.442695, %v14815_v53 }
0x6f47   :  { %19181 = vpow2.f32 %v14819_v57 }
0x6f48   :  { %19183 = vpow2.f32 %v14817_v46 }
0x6f51   :  { %v19182_v51 = vpop.eup %19181 }
0x6f52   :  { %v19184_v41 = vpop.eup %19183  ;;  %14823 = vadd.xlane.f32.xlu1 %v19182_v51 }
0x6f53   :  { %14821 = vadd.xlane.f32.xlu0 %v19184_v41 }
0x6fdf   :  { %v14824_v37 = vpop.xlane.xlu1 %14823 }
0x6fe0   :  { %19185 = vlog2.f32 %v14824_v37  ;;  %v14822_v43 = vpop.xlane.xlu0 %14821 }
0x6fe1   :  { %19187 = vlog2.f32 %v14822_v43 }
0x6fea   :  { %v19186_v58 = vpop.eup %19185 }
0x6feb   :  { %v19188_v59 = vpop.eup %19187  ;;  %v14828_v56 = vmul.f32 0.6931472, %v19186_v58 }
0x6fec   :  { %v14826_v62 = vmul.f32 0.6931472, %v19188_v59 }
0x6fed   :  { %v14830_v3 = vadd.f32 %v14828_v56, %v14814_v52 }
0x6fee   :  { %v14829_v4 = vadd.f32 %v14826_v62, %v14812_v28 }
0x6fef   :  { %v14832_v10 = vsub.f32 %v14806_v47, %v14830_v3 }
0x6ff0   :  { %v14831_v14 = vsub.f32 %v14801_v50, %v14829_v4 }
0x6ff1   :  { %v14836_v16 = vmul.f32 %v14834_v48, %v14832_v10 }
0x6ff2   :  { %v14835_v17 = vmul.f32 %v14833_v12, %v14831_v14 }
0x6ff3   :  { %14839 = vadd.xlane.f32.xlu1 %v14836_v16 }
0x6ff4   :  { %14837 = vadd.xlane.f32.xlu0 %v14835_v17 }
0x7080   :  { %v14840_v54 = vpop.xlane.xlu1 %14839 }
0x7081   :  { %v14842_v1 = vsub.f32 0.0, %v14840_v54  ;;  %v14838_v19 = vpop.xlane.xlu0 %14837 }
0x7082   :  { %v14841_v7 = vsub.f32 0.0, %v14838_v19 }
0x7084   :  { %v14843_v9 = vadd.f32 %v14842_v1, %v14841_v7 }
0x7086   :  { %v14844_v39 = vrot.slane %v14843_v9, 4 }
0x7088   :  { %v14845_v55 = vadd.f32 %v14844_v39, %v14843_v9 }
0x708a   :  { %v14846_v20 = vrot.slane %v14845_v55, 2 }
0x708c   :  { %v14847_v21 = vadd.f32 %v14846_v20, %v14845_v55 }
0x708e   :  { %v14848_v11 = vrot.slane %v14847_v21, 1 }
0x7090   :  { %v14849_v6 = vadd.f32 %v14848_v11, %v14847_v21 }
0x7092   :  { %v14850_v8 = vmul.f32 0.0625, %v14849_v6 }
0x7094   :  { %14852 = vst.msk [vmem:[#allocation2] sm:$0x1] %vm14851_vm5, %v14850_v8 }
0x7095   :  { %19206 = shalt.err (!%p19203_p4)
}
0x7096   :  { %s21037_s3 = sld [smem:[#allocation43_spill]] }
0x709c   :  { %s19207_s8 = scalar_lea.hbm %s21037_s3, 16 }
0x709d   :  { %p19208_p5 = scmp.ne.s32.totalorder %s21037_s3, %s19207_s8  ;;  %p19211_p6 = scmp.lt.u32.totalorder %s19207_s8, %s21037_s3 }
0x709f   :  { %p19213_p7 = pnand %p19211_p6, %p19208_p5 }
0x70a1   :  { %19216 = shalt.err (!%p19213_p7)
}
0x70a2   :  { %14864 = dma.vmem_to_hbm [thread:$0]  %s14862_s19, 16, %s21037_s3, [#allocation3]  }
0x70a3   :  { %19217 = dma.done.wait [#allocation3], 16  }
0x70a4   :  { %19218 = vsyncadd [#allocation3], 4294967280 }
0x70a5   :  { %14870 = vsyncpa [#allocation3], 1 }

</bundles_post_ra>
